<compile_context>
chip_gen: v5e
topology: v5e:2x2
jax: 0.10.0
libtpu: 0.0.40
codegen_flags: <defaults>
</compile_context>

<pallas_src>
import functools
import math

import jax
import jax.numpy as jnp
from jax.experimental import pallas as pl
from jax.experimental.pallas import tpu as pltpu

# Model hyper-parameters (small, consistent with a LLaMA decoder layer stack).
H = 32            # hidden size
NH = 4            # number of attention heads
HD = H // NH      # head dim
HALF = HD // 2
INTER = 64        # MLP intermediate size
EPS = 1e-6        # RMSNorm epsilon
N_LAYERS = 8


# --------------------- Fused 8-layer decoder kernel -------------------------
def fused_eight_layer_kernel(x_ref, mask_ref, cos_ref, sin_ref,
                             ln1_ref, ln2_ref, wqkv_ref, wo_ref, wgu_ref, wd_ref,
                             h_out_ref, pk_ref, pv_ref, *, S):
    # One grid step = one batch element (block leading dim is 1).
    x = x_ref[0].astype(jnp.float32)        # [S, H]
    mask = mask_ref[0].astype(jnp.float32)  # [S, S] additive mask
    cos = cos_ref[0]                        # [S, H] (per-head cos tiled over heads)
    sin = sin_ref[0]                        # [S, H]

    def rmsnorm(v, w):                      # v: [S, H] f32, w: [1, H]
        var = jnp.mean(v * v, axis=-1, keepdims=True)
        return (v * jax.lax.rsqrt(var + EPS)) * w

    # Unrolled static loop over all 8 layers; hidden state stays in VMEM/vregs.
    for l in range(N_LAYERS):
        ln1 = ln1_ref[l]                    # [1, H]
        ln2 = ln2_ref[l]                    # [1, H]
        wqkv = wqkv_ref[l]                  # [H, 5H]  (q*s | rot(q)*s | k | rot(k) | v)
        wo = wo_ref[l]                      # [H, H]
        wgu = wgu_ref[l]                    # [H, 2*INTER]  (gate | up), 128 lanes
        wd = wd_ref[l]                      # [INTER, H]

        # ------------------- self-attention block -------------------
        residual = x
        xn = rmsnorm(x, ln1)
        qkv = jnp.dot(xn, wqkv, preferred_element_type=jnp.float32)   # [S, 5H]

        # RoPE: rotate_half + attention scale were folded into the weight
        # columns on the host, so this is pure elementwise VPU math.
        q = qkv[:, 0 * H:1 * H] * cos + qkv[:, 1 * H:2 * H] * sin      # scaled, rotated
        k = qkv[:, 2 * H:3 * H] * cos + qkv[:, 3 * H:4 * H] * sin      # rotated (unscaled)
        v = qkv[:, 4 * H:5 * H]

        # Lane-dense present-KV writeback: one [S, H] slab at lane offset l*H.
        pk_ref[0, :, l * H:(l + 1) * H] = k.astype(pk_ref.dtype)
        pv_ref[0, :, l * H:(l + 1) * H] = v.astype(pv_ref.dtype)

        # Batched multi-head attention (explicit head axis, no per-head loop).
        qh = q.reshape(S, NH, HD)
        kh = k.reshape(S, NH, HD)
        vh = v.reshape(S, NH, HD)

        s_scores = jnp.einsum("qhd,khd->hqk", qh, kh,
                              preferred_element_type=jnp.float32)      # [NH, S, S]
        s_scores = s_scores + mask[None, :, :]
        m = jnp.max(s_scores, axis=-1, keepdims=True)
        p = jnp.exp(s_scores - m)
        p = p * pl.reciprocal(jnp.sum(p, axis=-1, keepdims=True), approx=True)
        o = jnp.einsum("hqk,khd->qhd", p, vh,
                       preferred_element_type=jnp.float32)             # [S, NH, HD]

        attn = jnp.dot(o.reshape(S, H), wo, preferred_element_type=jnp.float32)
        x = residual + attn

        # -------------------------- MLP block ------------------------
        residual = x
        xn2 = rmsnorm(x, ln2)
        gu = jnp.dot(xn2, wgu, preferred_element_type=jnp.float32)     # [S, 128]
        g = gu[:, :INTER]
        u = gu[:, INTER:]
        hmlp = (g * jax.nn.sigmoid(g)) * u                             # SiLU(gate)*up
        x = residual + jnp.dot(hmlp, wd, preferred_element_type=jnp.float32)

    h_out_ref[0] = x.astype(h_out_ref.dtype)


# ---------------------------- JAX-side glue ----------------------------------
def _rot_half_cols(w_cols):
    """Permute+negate output columns so that x @ result == rotate_half(x @ w_cols)."""
    h_in = w_cols.shape[0]
    w = w_cols.reshape(h_in, NH, HD)
    w1 = w[..., :HALF]
    w2 = w[..., HALF:]
    return jnp.concatenate([-w2, w1], axis=-1).reshape(h_in, H)


def pack_params(all_params):
    """Pre-transpose / concat / stack all per-layer weights once (host side)."""
    scale = 1.0 / math.sqrt(HD)
    ln1 = jnp.stack([p["ln1"].reshape(1, H) for p in all_params])          # [L,1,H]
    ln2 = jnp.stack([p["ln2"].reshape(1, H) for p in all_params])          # [L,1,H]
    wqkv = []
    for p in all_params:
        wq_c = p["wq"].T * scale            # attention scale folded into Q columns
        wk_c = p["wk"].T
        wv_c = p["wv"].T
        wqkv.append(jnp.concatenate(
            [wq_c, _rot_half_cols(wq_c), wk_c, _rot_half_cols(wk_c), wv_c], axis=1))
    wqkv = jnp.stack(wqkv)                                                 # [L,H,5H]
    wo = jnp.stack([p["wo"].T for p in all_params])                        # [L,H,H]
    wgu = jnp.stack([jnp.concatenate([p["wg"].T, p["wu"].T], axis=1)
                     for p in all_params])                                 # [L,H,2*INTER]
    wd = jnp.stack([p["wd"].T for p in all_params])                        # [L,INTER,H]
    return ln1, ln2, wqkv, wo, wgu, wd


def rope_cos_sin(position_ids):
    inv_freq = 1.0 / (10000.0 ** (jnp.arange(0, HD, 2, dtype=jnp.float32) / HD))
    freqs = position_ids.astype(jnp.float32)[..., None] * inv_freq[None, None, :]
    emb = jnp.concatenate([freqs, freqs], axis=-1)            # [B, S, HD]
    cos = jnp.tile(jnp.cos(emb), (1, 1, NH))                  # [B, S, H] head-tiled
    sin = jnp.tile(jnp.sin(emb), (1, 1, NH))
    return cos, sin


def eight_layer_fv(hidden_states, attention_mask, position_ids, packed):
    b, s, _ = hidden_states.shape
    cos, sin = rope_cos_sin(position_ids)
    mask3 = attention_mask[:, 0, :, :]                        # [B, S, S]
    ln1, ln2, wqkv, wo, wgu, wd = packed

    kern = functools.partial(fused_eight_layer_kernel, S=s)

    def batch_spec(tail_shape):
        return pl.BlockSpec((1,) + tail_shape,
                            lambda bb: (bb,) + (0,) * len(tail_shape))

    def full_spec(arr):
        return pl.BlockSpec(arr.shape, lambda bb: (0,) * arr.ndim)

    tokens = b * s
    flops_per_layer = (
        2 * tokens * H * (5 * H)            # fused QKV(+rot) projection
        + 2 * tokens * H * H                # output projection
        + 2 * 2 * b * NH * s * s * HD       # scores + weighted value sum
        + 2 * tokens * H * (2 * INTER)      # gate/up
        + 2 * tokens * INTER * H            # down
    )
    transc_per_layer = b * NH * s * s + tokens * INTER + 2 * tokens
    bytes_accessed = (
        hidden_states.size * 4 + mask3.size * 4 + (cos.size + sin.size) * 4
        + sum(int(w.size) * 4 for w in (ln1, ln2, wqkv, wo, wgu, wd))
        + (b * s * H + 2 * b * s * N_LAYERS * H) * 4
    )
    cost = pl.CostEstimate(flops=int(N_LAYERS * flops_per_layer),
                           transcendentals=int(N_LAYERS * transc_per_layer),
                           bytes_accessed=int(bytes_accessed))

    h_out, pk, pv = pl.pallas_call(
        kern,
        grid=(b,),
        out_shape=(
            jax.ShapeDtypeStruct((b, s, H), hidden_states.dtype),
            jax.ShapeDtypeStruct((b, s, N_LAYERS * H), hidden_states.dtype),
            jax.ShapeDtypeStruct((b, s, N_LAYERS * H), hidden_states.dtype),
        ),
        in_specs=[
            batch_spec((s, H)),            # hidden states
            batch_spec((s, s)),            # additive mask
            batch_spec((s, H)),            # cos
            batch_spec((s, H)),            # sin
            full_spec(ln1), full_spec(ln2), full_spec(wqkv),
            full_spec(wo), full_spec(wgu), full_spec(wd),
        ],
        out_specs=(
            batch_spec((s, H)),
            batch_spec((s, N_LAYERS * H)),
            batch_spec((s, N_LAYERS * H)),
        ),
        compiler_params=pltpu.CompilerParams(
            dimension_semantics=("parallel",)),
        cost_estimate=cost,
    )(hidden_states, mask3, cos, sin, ln1, ln2, wqkv, wo, wgu, wd)

    # Lane-dense slabs -> HF layout: [B, S, L*H] -> [L, B, NH, S, HD].
    pk = pk.reshape(b, s, N_LAYERS, NH, HD).transpose(2, 0, 3, 1, 4)
    pv = pv.reshape(b, s, N_LAYERS, NH, HD).transpose(2, 0, 3, 1, 4)

    outs = [h_out]
    for l in range(N_LAYERS):
        outs.append(pk[l])
        outs.append(pv[l])
    return tuple(outs)


# ----------------------------------- main ------------------------------------
if __name__ == "__main__":
    B, S = 2, 8
    key = jax.random.PRNGKey(0)
    k_hidden, k_params = jax.random.split(key)

    hidden = jax.random.normal(k_hidden, (B, S, H), jnp.float32)
    position_ids = jnp.broadcast_to(jnp.arange(S, dtype=jnp.int32)[None, :], (B, S))
    causal = jnp.tril(jnp.ones((S, S), dtype=bool))
    attention_mask = jnp.broadcast_to(
        jnp.where(causal, 0.0, -1e9).astype(jnp.float32)[None, None], (B, 1, S, S)
    )

    def init_layer(k):
        ks = jax.random.split(k, 7)
        scale = 0.02
        return dict(
            ln1=jnp.ones((H,), jnp.float32),
            ln2=jnp.ones((H,), jnp.float32),
            wq=jax.random.normal(ks[0], (H, H), jnp.float32) * scale,
            wk=jax.random.normal(ks[1], (H, H), jnp.float32) * scale,
            wv=jax.random.normal(ks[2], (H, H), jnp.float32) * scale,
            wo=jax.random.normal(ks[3], (H, H), jnp.float32) * scale,
            wg=jax.random.normal(ks[4], (INTER, H), jnp.float32) * scale,
            wu=jax.random.normal(ks[5], (INTER, H), jnp.float32) * scale,
            wd=jax.random.normal(ks[6], (H, INTER), jnp.float32) * scale,
        )

    layer_keys = jax.random.split(k_params, N_LAYERS)
    all_params = [init_layer(k) for k in layer_keys]
    packed = pack_params(all_params)   # packed once, outside the jitted forward

    fwd = jax.jit(lambda h, m, pid: eight_layer_fv(h, m, pid, packed))
    outs = fwd(hidden, attention_mask, position_ids)
    jax.block_until_ready(outs)

    # sanity: 1 hidden + 16 pkv tensors, shapes as in the PyTorch module
    assert len(outs) == 17
    assert outs[0].shape == (B, S, H)
    assert all(o.shape == (B, NH, S, HD) for o in outs[1:])
    assert all(bool(jnp.all(jnp.isfinite(o))) for o in outs)
    print("KERNEL_OK")
</pallas_src>

<mosaic_0001>
module attributes {stable_mosaic.version = 11 : i64} {
  func.func @fused_eight_layer_kernel(%arg0: i32, %arg1: memref<1x8x32xf32, #tpu.memory_space<vmem>>, %arg2: memref<1x8x8xf32, #tpu.memory_space<vmem>>, %arg3: memref<1x8x32xf32, #tpu.memory_space<vmem>>, %arg4: memref<1x8x32xf32, #tpu.memory_space<vmem>>, %arg5: memref<8x1x32xf32, #tpu.memory_space<vmem>>, %arg6: memref<8x1x32xf32, #tpu.memory_space<vmem>>, %arg7: memref<8x32x160xf32, #tpu.memory_space<vmem>>, %arg8: memref<8x32x32xf32, #tpu.memory_space<vmem>>, %arg9: memref<8x32x128xf32, #tpu.memory_space<vmem>>, %arg10: memref<8x64x32xf32, #tpu.memory_space<vmem>>, %arg11: memref<1x8x32xf32, #tpu.memory_space<vmem>>, %arg12: memref<1x8x256xf32, #tpu.memory_space<vmem>>, %arg13: memref<1x8x256xf32, #tpu.memory_space<vmem>>) attributes {dimension_semantics = [#tpu.dimension_semantics<parallel>], iteration_bounds = array<i64: 2>, scalar_prefetch = 0 : i64, scratch_operands = 0 : i64, tpu.core_type = #tpu.core_type<tc>, window_params = [{transform_indices = @transform_0, window_bounds = array<i64: 1, 8, 32>}, {transform_indices = @transform_1, window_bounds = array<i64: 1, 8, 8>}, {transform_indices = @transform_2, window_bounds = array<i64: 1, 8, 32>}, {transform_indices = @transform_3, window_bounds = array<i64: 1, 8, 32>}, {pipeline_mode = #tpu.pipeline_mode<synchronous>, transform_indices = @transform_4, window_bounds = array<i64: 8, 1, 32>}, {pipeline_mode = #tpu.pipeline_mode<synchronous>, transform_indices = @transform_5, window_bounds = array<i64: 8, 1, 32>}, {pipeline_mode = #tpu.pipeline_mode<synchronous>, transform_indices = @transform_6, window_bounds = array<i64: 8, 32, 160>}, {pipeline_mode = #tpu.pipeline_mode<synchronous>, transform_indices = @transform_7, window_bounds = array<i64: 8, 32, 32>}, {pipeline_mode = #tpu.pipeline_mode<synchronous>, transform_indices = @transform_8, window_bounds = array<i64: 8, 32, 128>}, {pipeline_mode = #tpu.pipeline_mode<synchronous>, transform_indices = @transform_9, window_bounds = array<i64: 8, 64, 32>}, {transform_indices = @transform_10, window_bounds = array<i64: 1, 8, 32>}, {transform_indices = @transform_11, window_bounds = array<i64: 1, 8, 256>}, {transform_indices = @transform_12, window_bounds = array<i64: 1, 8, 256>}]} {
    %c0 = arith.constant 0 : index
    %c0_0 = arith.constant 0 : index
    %c0_1 = arith.constant 0 : index
    %0 = vector.load %arg1[%c0, %c0_0, %c0_1] : memref<1x8x32xf32, #tpu.memory_space<vmem>>, vector<1x8x32xf32>
    %1 = vector.shape_cast %0 : vector<1x8x32xf32> to vector<8x32xf32>
    %c0_2 = arith.constant 0 : index
    %c0_3 = arith.constant 0 : index
    %c0_4 = arith.constant 0 : index
    %2 = vector.load %arg2[%c0_2, %c0_3, %c0_4] : memref<1x8x8xf32, #tpu.memory_space<vmem>>, vector<1x8x8xf32>
    %3 = vector.shape_cast %2 : vector<1x8x8xf32> to vector<8x8xf32>
    %c0_5 = arith.constant 0 : index
    %c0_6 = arith.constant 0 : index
    %c0_7 = arith.constant 0 : index
    %4 = vector.load %arg3[%c0_5, %c0_6, %c0_7] : memref<1x8x32xf32, #tpu.memory_space<vmem>>, vector<1x8x32xf32>
    %5 = vector.shape_cast %4 : vector<1x8x32xf32> to vector<8x32xf32>
    %c0_8 = arith.constant 0 : index
    %c0_9 = arith.constant 0 : index
    %c0_10 = arith.constant 0 : index
    %6 = vector.load %arg4[%c0_8, %c0_9, %c0_10] : memref<1x8x32xf32, #tpu.memory_space<vmem>>, vector<1x8x32xf32>
    %7 = vector.shape_cast %6 : vector<1x8x32xf32> to vector<8x32xf32>
    %c0_11 = arith.constant 0 : index
    %c0_12 = arith.constant 0 : index
    %c0_13 = arith.constant 0 : index
    %8 = vector.load %arg5[%c0_11, %c0_12, %c0_13] : memref<8x1x32xf32, #tpu.memory_space<vmem>>, vector<1x1x32xf32>
    %9 = vector.shape_cast %8 : vector<1x1x32xf32> to vector<1x32xf32>
    %c0_14 = arith.constant 0 : index
    %c0_15 = arith.constant 0 : index
    %c0_16 = arith.constant 0 : index
    %10 = vector.load %arg6[%c0_14, %c0_15, %c0_16] : memref<8x1x32xf32, #tpu.memory_space<vmem>>, vector<1x1x32xf32>
    %11 = vector.shape_cast %10 : vector<1x1x32xf32> to vector<1x32xf32>
    %c0_17 = arith.constant 0 : index
    %c0_18 = arith.constant 0 : index
    %c0_19 = arith.constant 0 : index
    %12 = vector.load %arg7[%c0_17, %c0_18, %c0_19] : memref<8x32x160xf32, #tpu.memory_space<vmem>>, vector<1x32x160xf32>
    %13 = vector.shape_cast %12 : vector<1x32x160xf32> to vector<32x160xf32>
    %c0_20 = arith.constant 0 : index
    %c0_21 = arith.constant 0 : index
    %c0_22 = arith.constant 0 : index
    %14 = vector.load %arg8[%c0_20, %c0_21, %c0_22] : memref<8x32x32xf32, #tpu.memory_space<vmem>>, vector<1x32x32xf32>
    %15 = vector.shape_cast %14 : vector<1x32x32xf32> to vector<32x32xf32>
    %c0_23 = arith.constant 0 : index
    %c0_24 = arith.constant 0 : index
    %c0_25 = arith.constant 0 : index
    %16 = vector.load %arg9[%c0_23, %c0_24, %c0_25] : memref<8x32x128xf32, #tpu.memory_space<vmem>>, vector<1x32x128xf32>
    %17 = vector.shape_cast %16 : vector<1x32x128xf32> to vector<32x128xf32>
    %c0_26 = arith.constant 0 : index
    %c0_27 = arith.constant 0 : index
    %c0_28 = arith.constant 0 : index
    %18 = vector.load %arg10[%c0_26, %c0_27, %c0_28] : memref<8x64x32xf32, #tpu.memory_space<vmem>>, vector<1x64x32xf32>
    %19 = vector.shape_cast %18 : vector<1x64x32xf32> to vector<64x32xf32>
    %20 = arith.mulf %1, %1 : vector<8x32xf32>
    %cst = arith.constant dense<0.000000e+00> : vector<8xf32>
    %21 = vector.multi_reduction <add>, %20, %cst [1] : vector<8x32xf32> to vector<8xf32>
    %22 = vector.shape_cast %21 : vector<8xf32> to vector<8x1xf32>
    %cst_29 = arith.constant 3.200000e+01 : f32
    %23 = vector.broadcast %cst_29 : f32 to vector<8x1xf32>
    %24 = arith.divf %22, %23 : vector<8x1xf32>
    %cst_30 = arith.constant 9.99999997E-7 : f32
    %25 = vector.broadcast %cst_30 : f32 to vector<8x1xf32>
    %26 = arith.addf %24, %25 : vector<8x1xf32>
    %27 = math.rsqrt %26 : vector<8x1xf32>
    %28 = vector.broadcast %27 : vector<8x1xf32> to vector<8x32xf32>
    %29 = arith.mulf %1, %28 : vector<8x32xf32>
    %30 = vector.broadcast %9 : vector<1x32xf32> to vector<8x32xf32>
    %31 = arith.mulf %29, %30 : vector<8x32xf32>
    %cst_31 = arith.constant dense<0.000000e+00> : vector<8x160xf32>
    %32 = tpu.matmul %31, %13, %cst_31 {dimension_numbers = #tpu.dot_dimension_numbers<[1], [0], [0], [1], [0, 0, 1, 1], [], []>} : vector<8x32xf32>, vector<32x160xf32>, vector<8x160xf32> -> vector<8x160xf32>
    %33 = vector.extract_strided_slice %32 {offsets = [0, 0], sizes = [8, 32], strides = [1, 1]} : vector<8x160xf32> to vector<8x32xf32>
    %34 = arith.mulf %33, %5 : vector<8x32xf32>
    %35 = vector.extract_strided_slice %32 {offsets = [0, 32], sizes = [8, 32], strides = [1, 1]} : vector<8x160xf32> to vector<8x32xf32>
    %36 = arith.mulf %35, %7 : vector<8x32xf32>
    %37 = arith.addf %34, %36 : vector<8x32xf32>
    %38 = vector.extract_strided_slice %32 {offsets = [0, 64], sizes = [8, 32], strides = [1, 1]} : vector<8x160xf32> to vector<8x32xf32>
    %39 = arith.mulf %38, %5 : vector<8x32xf32>
    %40 = vector.extract_strided_slice %32 {offsets = [0, 96], sizes = [8, 32], strides = [1, 1]} : vector<8x160xf32> to vector<8x32xf32>
    %41 = arith.mulf %40, %7 : vector<8x32xf32>
    %42 = arith.addf %39, %41 : vector<8x32xf32>
    %43 = vector.extract_strided_slice %32 {offsets = [0, 128], sizes = [8, 32], strides = [1, 1]} : vector<8x160xf32> to vector<8x32xf32>
    %c0_32 = arith.constant 0 : index
    %c0_33 = arith.constant 0 : index
    %c0_34 = arith.constant 0 : index
    %44 = vector.load %arg12[%c0_32, %c0_33, %c0_34] : memref<1x8x256xf32, #tpu.memory_space<vmem>>, vector<1x8x32xf32>
    %45 = vector.shape_cast %44 : vector<1x8x32xf32> to vector<8x32xf32>
    %46 = vector.shape_cast %42 : vector<8x32xf32> to vector<1x8x32xf32>
    tpu.vector_store %arg12[%c0_32, %c0_33, %c0_34], %46 {strides = array<i32>} : memref<1x8x256xf32, #tpu.memory_space<vmem>>, vector<1x8x32xf32>,
    %c0_35 = arith.constant 0 : index
    %c0_36 = arith.constant 0 : index
    %c0_37 = arith.constant 0 : index
    %47 = vector.load %arg13[%c0_35, %c0_36, %c0_37] : memref<1x8x256xf32, #tpu.memory_space<vmem>>, vector<1x8x32xf32>
    %48 = vector.shape_cast %47 : vector<1x8x32xf32> to vector<8x32xf32>
    %49 = vector.shape_cast %43 : vector<8x32xf32> to vector<1x8x32xf32>
    tpu.vector_store %arg13[%c0_35, %c0_36, %c0_37], %49 {strides = array<i32>} : memref<1x8x256xf32, #tpu.memory_space<vmem>>, vector<1x8x32xf32>,
    %50 = vector.shape_cast %37 : vector<8x32xf32> to vector<8x4x8xf32>
    %51 = vector.shape_cast %42 : vector<8x32xf32> to vector<8x4x8xf32>
    %52 = vector.shape_cast %43 : vector<8x32xf32> to vector<8x4x8xf32>
    "tpu.trace_start"() <{level = 10 : i32, message = "qhd,khd->hqk"}> : () -> ()
    %cst_38 = arith.constant dense<0.000000e+00> : vector<4x8x8xf32>
    %53 = tpu.matmul %50, %51, %cst_38 {dimension_numbers = #tpu.dot_dimension_numbers<[2], [2], [0], [0], [0, 1, 0, 0, 1, 0], [1], [1]>} : vector<8x4x8xf32>, vector<8x4x8xf32>, vector<4x8x8xf32> -> vector<4x8x8xf32>
    "tpu.trace_stop"() : () -> ()
    %54 = vector.shape_cast %3 : vector<8x8xf32> to vector<1x8x8xf32>
    %55 = vector.broadcast %54 : vector<1x8x8xf32> to vector<4x8x8xf32>
    %56 = arith.addf %53, %55 : vector<4x8x8xf32>
    %cst_39 = arith.constant dense<0xFF800000> : vector<4x8xf32>
    %57 = vector.multi_reduction <maximumf>, %56, %cst_39 [2] : vector<4x8x8xf32> to vector<4x8xf32>
    %58 = vector.shape_cast %57 : vector<4x8xf32> to vector<4x8x1xf32>
    %59 = vector.broadcast %58 : vector<4x8x1xf32> to vector<4x8x8xf32>
    %60 = arith.subf %56, %59 : vector<4x8x8xf32>
    %61 = math.exp %60 : vector<4x8x8xf32>
    %cst_40 = arith.constant dense<0.000000e+00> : vector<4x8xf32>
    %62 = vector.multi_reduction <add>, %61, %cst_40 [2] : vector<4x8x8xf32> to vector<4x8xf32>
    %63 = vector.shape_cast %62 : vector<4x8xf32> to vector<4x8x1xf32>
    %64 = tpu.reciprocal %63 {approx = true} : vector<4x8x1xf32> -> vector<4x8x1xf32>
    %65 = vector.broadcast %64 : vector<4x8x1xf32> to vector<4x8x8xf32>
    %66 = arith.mulf %61, %65 : vector<4x8x8xf32>
    "tpu.trace_start"() <{level = 10 : i32, message = "hqk,khd->qhd"}> : () -> ()
    %cst_41 = arith.constant dense<0.000000e+00> : vector<4x8x8xf32>
    %67 = tpu.matmul %52, %66, %cst_41 {dimension_numbers = #tpu.dot_dimension_numbers<[0], [2], [2], [1], [0, 1, 0, 2, 1, 1], [1], [0]>} : vector<8x4x8xf32>, vector<4x8x8xf32>, vector<4x8x8xf32> -> vector<4x8x8xf32>
    %68 = tpu.transpose %67, [2, 0, 1] : vector<4x8x8xf32> -> vector<8x4x8xf32>
    "tpu.trace_stop"() : () -> ()
    %69 = vector.shape_cast %68 : vector<8x4x8xf32> to vector<8x32xf32>
    %cst_42 = arith.constant dense<0.000000e+00> : vector<8x32xf32>
    %70 = tpu.matmul %69, %15, %cst_42 {dimension_numbers = #tpu.dot_dimension_numbers<[1], [0], [0], [1], [0, 0, 1, 1], [], []>} : vector<8x32xf32>, vector<32x32xf32>, vector<8x32xf32> -> vector<8x32xf32>
    %71 = arith.addf %1, %70 : vector<8x32xf32>
    %72 = arith.mulf %71, %71 : vector<8x32xf32>
    %cst_43 = arith.constant dense<0.000000e+00> : vector<8xf32>
    %73 = vector.multi_reduction <add>, %72, %cst_43 [1] : vector<8x32xf32> to vector<8xf32>
    %74 = vector.shape_cast %73 : vector<8xf32> to vector<8x1xf32>
    %cst_44 = arith.constant 3.200000e+01 : f32
    %75 = vector.broadcast %cst_44 : f32 to vector<8x1xf32>
    %76 = arith.divf %74, %75 : vector<8x1xf32>
    %cst_45 = arith.constant 9.99999997E-7 : f32
    %77 = vector.broadcast %cst_45 : f32 to vector<8x1xf32>
    %78 = arith.addf %76, %77 : vector<8x1xf32>
    %79 = math.rsqrt %78 : vector<8x1xf32>
    %80 = vector.broadcast %79 : vector<8x1xf32> to vector<8x32xf32>
    %81 = arith.mulf %71, %80 : vector<8x32xf32>
    %82 = vector.broadcast %11 : vector<1x32xf32> to vector<8x32xf32>
    %83 = arith.mulf %81, %82 : vector<8x32xf32>
    %cst_46 = arith.constant dense<0.000000e+00> : vector<8x128xf32>
    %84 = tpu.matmul %83, %17, %cst_46 {dimension_numbers = #tpu.dot_dimension_numbers<[1], [0], [0], [1], [0, 0, 1, 1], [], []>} : vector<8x32xf32>, vector<32x128xf32>, vector<8x128xf32> -> vector<8x128xf32>
    %85 = vector.extract_strided_slice %84 {offsets = [0, 0], sizes = [8, 64], strides = [1, 1]} : vector<8x128xf32> to vector<8x64xf32>
    %86 = vector.extract_strided_slice %84 {offsets = [0, 64], sizes = [8, 64], strides = [1, 1]} : vector<8x128xf32> to vector<8x64xf32>
    %87 = arith.negf %85 : vector<8x64xf32>
    %88 = math.exp %87 : vector<8x64xf32>
    %cst_47 = arith.constant 1.000000e+00 : f32
    %89 = vector.broadcast %cst_47 : f32 to vector<8x64xf32>
    %90 = arith.addf %89, %88 : vector<8x64xf32>
    %91 = arith.divf %89, %90 : vector<8x64xf32>
    %92 = arith.mulf %85, %91 : vector<8x64xf32>
    %93 = arith.mulf %92, %86 : vector<8x64xf32>
    %cst_48 = arith.constant dense<0.000000e+00> : vector<8x32xf32>
    %94 = tpu.matmul %93, %19, %cst_48 {dimension_numbers = #tpu.dot_dimension_numbers<[1], [0], [0], [1], [0, 0, 1, 1], [], []>} : vector<8x64xf32>, vector<64x32xf32>, vector<8x32xf32> -> vector<8x32xf32>
    %95 = arith.addf %71, %94 : vector<8x32xf32>
    %c1 = arith.constant 1 : index
    %c0_49 = arith.constant 0 : index
    %c0_50 = arith.constant 0 : index
    %96 = vector.load %arg5[%c1, %c0_49, %c0_50] : memref<8x1x32xf32, #tpu.memory_space<vmem>>, vector<1x1x32xf32>
    %97 = vector.shape_cast %96 : vector<1x1x32xf32> to vector<1x32xf32>
    %c1_51 = arith.constant 1 : index
    %c0_52 = arith.constant 0 : index
    %c0_53 = arith.constant 0 : index
    %98 = vector.load %arg6[%c1_51, %c0_52, %c0_53] : memref<8x1x32xf32, #tpu.memory_space<vmem>>, vector<1x1x32xf32>
    %99 = vector.shape_cast %98 : vector<1x1x32xf32> to vector<1x32xf32>
    %c1_54 = arith.constant 1 : index
    %c0_55 = arith.constant 0 : index
    %c0_56 = arith.constant 0 : index
    %100 = vector.load %arg7[%c1_54, %c0_55, %c0_56] : memref<8x32x160xf32, #tpu.memory_space<vmem>>, vector<1x32x160xf32>
    %101 = vector.shape_cast %100 : vector<1x32x160xf32> to vector<32x160xf32>
    %c1_57 = arith.constant 1 : index
    %c0_58 = arith.constant 0 : index
    %c0_59 = arith.constant 0 : index
    %102 = vector.load %arg8[%c1_57, %c0_58, %c0_59] : memref<8x32x32xf32, #tpu.memory_space<vmem>>, vector<1x32x32xf32>
    %103 = vector.shape_cast %102 : vector<1x32x32xf32> to vector<32x32xf32>
    %c1_60 = arith.constant 1 : index
    %c0_61 = arith.constant 0 : index
    %c0_62 = arith.constant 0 : index
    %104 = vector.load %arg9[%c1_60, %c0_61, %c0_62] : memref<8x32x128xf32, #tpu.memory_space<vmem>>, vector<1x32x128xf32>
    %105 = vector.shape_cast %104 : vector<1x32x128xf32> to vector<32x128xf32>
    %c1_63 = arith.constant 1 : index
    %c0_64 = arith.constant 0 : index
    %c0_65 = arith.constant 0 : index
    %106 = vector.load %arg10[%c1_63, %c0_64, %c0_65] : memref<8x64x32xf32, #tpu.memory_space<vmem>>, vector<1x64x32xf32>
    %107 = vector.shape_cast %106 : vector<1x64x32xf32> to vector<64x32xf32>
    %108 = arith.mulf %95, %95 : vector<8x32xf32>
    %cst_66 = arith.constant dense<0.000000e+00> : vector<8xf32>
    %109 = vector.multi_reduction <add>, %108, %cst_66 [1] : vector<8x32xf32> to vector<8xf32>
    %110 = vector.shape_cast %109 : vector<8xf32> to vector<8x1xf32>
    %cst_67 = arith.constant 3.200000e+01 : f32
    %111 = vector.broadcast %cst_67 : f32 to vector<8x1xf32>
    %112 = arith.divf %110, %111 : vector<8x1xf32>
    %cst_68 = arith.constant 9.99999997E-7 : f32
    %113 = vector.broadcast %cst_68 : f32 to vector<8x1xf32>
    %114 = arith.addf %112, %113 : vector<8x1xf32>
    %115 = math.rsqrt %114 : vector<8x1xf32>
    %116 = vector.broadcast %115 : vector<8x1xf32> to vector<8x32xf32>
    %117 = arith.mulf %95, %116 : vector<8x32xf32>
    %118 = vector.broadcast %97 : vector<1x32xf32> to vector<8x32xf32>
    %119 = arith.mulf %117, %118 : vector<8x32xf32>
    %cst_69 = arith.constant dense<0.000000e+00> : vector<8x160xf32>
    %120 = tpu.matmul %119, %101, %cst_69 {dimension_numbers = #tpu.dot_dimension_numbers<[1], [0], [0], [1], [0, 0, 1, 1], [], []>} : vector<8x32xf32>, vector<32x160xf32>, vector<8x160xf32> -> vector<8x160xf32>
    %121 = vector.extract_strided_slice %120 {offsets = [0, 0], sizes = [8, 32], strides = [1, 1]} : vector<8x160xf32> to vector<8x32xf32>
    %122 = arith.mulf %121, %5 : vector<8x32xf32>
    %123 = vector.extract_strided_slice %120 {offsets = [0, 32], sizes = [8, 32], strides = [1, 1]} : vector<8x160xf32> to vector<8x32xf32>
    %124 = arith.mulf %123, %7 : vector<8x32xf32>
    %125 = arith.addf %122, %124 : vector<8x32xf32>
    %126 = vector.extract_strided_slice %120 {offsets = [0, 64], sizes = [8, 32], strides = [1, 1]} : vector<8x160xf32> to vector<8x32xf32>
    %127 = arith.mulf %126, %5 : vector<8x32xf32>
    %128 = vector.extract_strided_slice %120 {offsets = [0, 96], sizes = [8, 32], strides = [1, 1]} : vector<8x160xf32> to vector<8x32xf32>
    %129 = arith.mulf %128, %7 : vector<8x32xf32>
    %130 = arith.addf %127, %129 : vector<8x32xf32>
    %131 = vector.extract_strided_slice %120 {offsets = [0, 128], sizes = [8, 32], strides = [1, 1]} : vector<8x160xf32> to vector<8x32xf32>
    %c0_70 = arith.constant 0 : index
    %c0_71 = arith.constant 0 : index
    %c32 = arith.constant 32 : index
    %132 = vector.load %arg12[%c0_70, %c0_71, %c32] : memref<1x8x256xf32, #tpu.memory_space<vmem>>, vector<1x8x32xf32>
    %133 = vector.shape_cast %132 : vector<1x8x32xf32> to vector<8x32xf32>
    %134 = vector.shape_cast %130 : vector<8x32xf32> to vector<1x8x32xf32>
    tpu.vector_store %arg12[%c0_70, %c0_71, %c32], %134 {strides = array<i32>} : memref<1x8x256xf32, #tpu.memory_space<vmem>>, vector<1x8x32xf32>,
    %c0_72 = arith.constant 0 : index
    %c0_73 = arith.constant 0 : index
    %c32_74 = arith.constant 32 : index
    %135 = vector.load %arg13[%c0_72, %c0_73, %c32_74] : memref<1x8x256xf32, #tpu.memory_space<vmem>>, vector<1x8x32xf32>
    %136 = vector.shape_cast %135 : vector<1x8x32xf32> to vector<8x32xf32>
    %137 = vector.shape_cast %131 : vector<8x32xf32> to vector<1x8x32xf32>
    tpu.vector_store %arg13[%c0_72, %c0_73, %c32_74], %137 {strides = array<i32>} : memref<1x8x256xf32, #tpu.memory_space<vmem>>, vector<1x8x32xf32>,
    %138 = vector.shape_cast %125 : vector<8x32xf32> to vector<8x4x8xf32>
    %139 = vector.shape_cast %130 : vector<8x32xf32> to vector<8x4x8xf32>
    %140 = vector.shape_cast %131 : vector<8x32xf32> to vector<8x4x8xf32>
    "tpu.trace_start"() <{level = 10 : i32, message = "qhd,khd->hqk"}> : () -> ()
    %cst_75 = arith.constant dense<0.000000e+00> : vector<4x8x8xf32>
    %141 = tpu.matmul %138, %139, %cst_75 {dimension_numbers = #tpu.dot_dimension_numbers<[2], [2], [0], [0], [0, 1, 0, 0, 1, 0], [1], [1]>} : vector<8x4x8xf32>, vector<8x4x8xf32>, vector<4x8x8xf32> -> vector<4x8x8xf32>
    "tpu.trace_stop"() : () -> ()
    %142 = vector.shape_cast %3 : vector<8x8xf32> to vector<1x8x8xf32>
    %143 = vector.broadcast %142 : vector<1x8x8xf32> to vector<4x8x8xf32>
    %144 = arith.addf %141, %143 : vector<4x8x8xf32>
    %cst_76 = arith.constant dense<0xFF800000> : vector<4x8xf32>
    %145 = vector.multi_reduction <maximumf>, %144, %cst_76 [2] : vector<4x8x8xf32> to vector<4x8xf32>
    %146 = vector.shape_cast %145 : vector<4x8xf32> to vector<4x8x1xf32>
    %147 = vector.broadcast %146 : vector<4x8x1xf32> to vector<4x8x8xf32>
    %148 = arith.subf %144, %147 : vector<4x8x8xf32>
    %149 = math.exp %148 : vector<4x8x8xf32>
    %cst_77 = arith.constant dense<0.000000e+00> : vector<4x8xf32>
    %150 = vector.multi_reduction <add>, %149, %cst_77 [2] : vector<4x8x8xf32> to vector<4x8xf32>
    %151 = vector.shape_cast %150 : vector<4x8xf32> to vector<4x8x1xf32>
    %152 = tpu.reciprocal %151 {approx = true} : vector<4x8x1xf32> -> vector<4x8x1xf32>
    %153 = vector.broadcast %152 : vector<4x8x1xf32> to vector<4x8x8xf32>
    %154 = arith.mulf %149, %153 : vector<4x8x8xf32>
    "tpu.trace_start"() <{level = 10 : i32, message = "hqk,khd->qhd"}> : () -> ()
    %cst_78 = arith.constant dense<0.000000e+00> : vector<4x8x8xf32>
    %155 = tpu.matmul %140, %154, %cst_78 {dimension_numbers = #tpu.dot_dimension_numbers<[0], [2], [2], [1], [0, 1, 0, 2, 1, 1], [1], [0]>} : vector<8x4x8xf32>, vector<4x8x8xf32>, vector<4x8x8xf32> -> vector<4x8x8xf32>
    %156 = tpu.transpose %155, [2, 0, 1] : vector<4x8x8xf32> -> vector<8x4x8xf32>
    "tpu.trace_stop"() : () -> ()
    %157 = vector.shape_cast %156 : vector<8x4x8xf32> to vector<8x32xf32>
    %cst_79 = arith.constant dense<0.000000e+00> : vector<8x32xf32>
    %158 = tpu.matmul %157, %103, %cst_79 {dimension_numbers = #tpu.dot_dimension_numbers<[1], [0], [0], [1], [0, 0, 1, 1], [], []>} : vector<8x32xf32>, vector<32x32xf32>, vector<8x32xf32> -> vector<8x32xf32>
    %159 = arith.addf %95, %158 : vector<8x32xf32>
    %160 = arith.mulf %159, %159 : vector<8x32xf32>
    %cst_80 = arith.constant dense<0.000000e+00> : vector<8xf32>
    %161 = vector.multi_reduction <add>, %160, %cst_80 [1] : vector<8x32xf32> to vector<8xf32>
    %162 = vector.shape_cast %161 : vector<8xf32> to vector<8x1xf32>
    %cst_81 = arith.constant 3.200000e+01 : f32
    %163 = vector.broadcast %cst_81 : f32 to vector<8x1xf32>
    %164 = arith.divf %162, %163 : vector<8x1xf32>
    %cst_82 = arith.constant 9.99999997E-7 : f32
    %165 = vector.broadcast %cst_82 : f32 to vector<8x1xf32>
    %166 = arith.addf %164, %165 : vector<8x1xf32>
    %167 = math.rsqrt %166 : vector<8x1xf32>
    %168 = vector.broadcast %167 : vector<8x1xf32> to vector<8x32xf32>
    %169 = arith.mulf %159, %168 : vector<8x32xf32>
    %170 = vector.broadcast %99 : vector<1x32xf32> to vector<8x32xf32>
    %171 = arith.mulf %169, %170 : vector<8x32xf32>
    %cst_83 = arith.constant dense<0.000000e+00> : vector<8x128xf32>
    %172 = tpu.matmul %171, %105, %cst_83 {dimension_numbers = #tpu.dot_dimension_numbers<[1], [0], [0], [1], [0, 0, 1, 1], [], []>} : vector<8x32xf32>, vector<32x128xf32>, vector<8x128xf32> -> vector<8x128xf32>
    %173 = vector.extract_strided_slice %172 {offsets = [0, 0], sizes = [8, 64], strides = [1, 1]} : vector<8x128xf32> to vector<8x64xf32>
    %174 = vector.extract_strided_slice %172 {offsets = [0, 64], sizes = [8, 64], strides = [1, 1]} : vector<8x128xf32> to vector<8x64xf32>
    %175 = arith.negf %173 : vector<8x64xf32>
    %176 = math.exp %175 : vector<8x64xf32>
    %cst_84 = arith.constant 1.000000e+00 : f32
    %177 = vector.broadcast %cst_84 : f32 to vector<8x64xf32>
    %178 = arith.addf %177, %176 : vector<8x64xf32>
    %179 = arith.divf %177, %178 : vector<8x64xf32>
    %180 = arith.mulf %173, %179 : vector<8x64xf32>
    %181 = arith.mulf %180, %174 : vector<8x64xf32>
    %cst_85 = arith.constant dense<0.000000e+00> : vector<8x32xf32>
    %182 = tpu.matmul %181, %107, %cst_85 {dimension_numbers = #tpu.dot_dimension_numbers<[1], [0], [0], [1], [0, 0, 1, 1], [], []>} : vector<8x64xf32>, vector<64x32xf32>, vector<8x32xf32> -> vector<8x32xf32>
    %183 = arith.addf %159, %182 : vector<8x32xf32>
    %c2 = arith.constant 2 : index
    %c0_86 = arith.constant 0 : index
    %c0_87 = arith.constant 0 : index
    %184 = vector.load %arg5[%c2, %c0_86, %c0_87] : memref<8x1x32xf32, #tpu.memory_space<vmem>>, vector<1x1x32xf32>
    %185 = vector.shape_cast %184 : vector<1x1x32xf32> to vector<1x32xf32>
    %c2_88 = arith.constant 2 : index
    %c0_89 = arith.constant 0 : index
    %c0_90 = arith.constant 0 : index
    %186 = vector.load %arg6[%c2_88, %c0_89, %c0_90] : memref<8x1x32xf32, #tpu.memory_space<vmem>>, vector<1x1x32xf32>
    %187 = vector.shape_cast %186 : vector<1x1x32xf32> to vector<1x32xf32>
    %c2_91 = arith.constant 2 : index
    %c0_92 = arith.constant 0 : index
    %c0_93 = arith.constant 0 : index
    %188 = vector.load %arg7[%c2_91, %c0_92, %c0_93] : memref<8x32x160xf32, #tpu.memory_space<vmem>>, vector<1x32x160xf32>
    %189 = vector.shape_cast %188 : vector<1x32x160xf32> to vector<32x160xf32>
    %c2_94 = arith.constant 2 : index
    %c0_95 = arith.constant 0 : index
    %c0_96 = arith.constant 0 : index
    %190 = vector.load %arg8[%c2_94, %c0_95, %c0_96] : memref<8x32x32xf32, #tpu.memory_space<vmem>>, vector<1x32x32xf32>
    %191 = vector.shape_cast %190 : vector<1x32x32xf32> to vector<32x32xf32>
    %c2_97 = arith.constant 2 : index
    %c0_98 = arith.constant 0 : index
    %c0_99 = arith.constant 0 : index
    %192 = vector.load %arg9[%c2_97, %c0_98, %c0_99] : memref<8x32x128xf32, #tpu.memory_space<vmem>>, vector<1x32x128xf32>
    %193 = vector.shape_cast %192 : vector<1x32x128xf32> to vector<32x128xf32>
    %c2_100 = arith.constant 2 : index
    %c0_101 = arith.constant 0 : index
    %c0_102 = arith.constant 0 : index
    %194 = vector.load %arg10[%c2_100, %c0_101, %c0_102] : memref<8x64x32xf32, #tpu.memory_space<vmem>>, vector<1x64x32xf32>
    %195 = vector.shape_cast %194 : vector<1x64x32xf32> to vector<64x32xf32>
    %196 = arith.mulf %183, %183 : vector<8x32xf32>
    %cst_103 = arith.constant dense<0.000000e+00> : vector<8xf32>
    %197 = vector.multi_reduction <add>, %196, %cst_103 [1] : vector<8x32xf32> to vector<8xf32>
    %198 = vector.shape_cast %197 : vector<8xf32> to vector<8x1xf32>
    %cst_104 = arith.constant 3.200000e+01 : f32
    %199 = vector.broadcast %cst_104 : f32 to vector<8x1xf32>
    %200 = arith.divf %198, %199 : vector<8x1xf32>
    %cst_105 = arith.constant 9.99999997E-7 : f32
    %201 = vector.broadcast %cst_105 : f32 to vector<8x1xf32>
    %202 = arith.addf %200, %201 : vector<8x1xf32>
    %203 = math.rsqrt %202 : vector<8x1xf32>
    %204 = vector.broadcast %203 : vector<8x1xf32> to vector<8x32xf32>
    %205 = arith.mulf %183, %204 : vector<8x32xf32>
    %206 = vector.broadcast %185 : vector<1x32xf32> to vector<8x32xf32>
    %207 = arith.mulf %205, %206 : vector<8x32xf32>
    %cst_106 = arith.constant dense<0.000000e+00> : vector<8x160xf32>
    %208 = tpu.matmul %207, %189, %cst_106 {dimension_numbers = #tpu.dot_dimension_numbers<[1], [0], [0], [1], [0, 0, 1, 1], [], []>} : vector<8x32xf32>, vector<32x160xf32>, vector<8x160xf32> -> vector<8x160xf32>
    %209 = vector.extract_strided_slice %208 {offsets = [0, 0], sizes = [8, 32], strides = [1, 1]} : vector<8x160xf32> to vector<8x32xf32>
    %210 = arith.mulf %209, %5 : vector<8x32xf32>
    %211 = vector.extract_strided_slice %208 {offsets = [0, 32], sizes = [8, 32], strides = [1, 1]} : vector<8x160xf32> to vector<8x32xf32>
    %212 = arith.mulf %211, %7 : vector<8x32xf32>
    %213 = arith.addf %210, %212 : vector<8x32xf32>
    %214 = vector.extract_strided_slice %208 {offsets = [0, 64], sizes = [8, 32], strides = [1, 1]} : vector<8x160xf32> to vector<8x32xf32>
    %215 = arith.mulf %214, %5 : vector<8x32xf32>
    %216 = vector.extract_strided_slice %208 {offsets = [0, 96], sizes = [8, 32], strides = [1, 1]} : vector<8x160xf32> to vector<8x32xf32>
    %217 = arith.mulf %216, %7 : vector<8x32xf32>
    %218 = arith.addf %215, %217 : vector<8x32xf32>
    %219 = vector.extract_strided_slice %208 {offsets = [0, 128], sizes = [8, 32], strides = [1, 1]} : vector<8x160xf32> to vector<8x32xf32>
    %c0_107 = arith.constant 0 : index
    %c0_108 = arith.constant 0 : index
    %c64 = arith.constant 64 : index
    %220 = vector.load %arg12[%c0_107, %c0_108, %c64] : memref<1x8x256xf32, #tpu.memory_space<vmem>>, vector<1x8x32xf32>
    %221 = vector.shape_cast %220 : vector<1x8x32xf32> to vector<8x32xf32>
    %222 = vector.shape_cast %218 : vector<8x32xf32> to vector<1x8x32xf32>
    tpu.vector_store %arg12[%c0_107, %c0_108, %c64], %222 {strides = array<i32>} : memref<1x8x256xf32, #tpu.memory_space<vmem>>, vector<1x8x32xf32>,
    %c0_109 = arith.constant 0 : index
    %c0_110 = arith.constant 0 : index
    %c64_111 = arith.constant 64 : index
    %223 = vector.load %arg13[%c0_109, %c0_110, %c64_111] : memref<1x8x256xf32, #tpu.memory_space<vmem>>, vector<1x8x32xf32>
    %224 = vector.shape_cast %223 : vector<1x8x32xf32> to vector<8x32xf32>
    %225 = vector.shape_cast %219 : vector<8x32xf32> to vector<1x8x32xf32>
    tpu.vector_store %arg13[%c0_109, %c0_110, %c64_111], %225 {strides = array<i32>} : memref<1x8x256xf32, #tpu.memory_space<vmem>>, vector<1x8x32xf32>,
    %226 = vector.shape_cast %213 : vector<8x32xf32> to vector<8x4x8xf32>
    %227 = vector.shape_cast %218 : vector<8x32xf32> to vector<8x4x8xf32>
    %228 = vector.shape_cast %219 : vector<8x32xf32> to vector<8x4x8xf32>
    "tpu.trace_start"() <{level = 10 : i32, message = "qhd,khd->hqk"}> : () -> ()
    %cst_112 = arith.constant dense<0.000000e+00> : vector<4x8x8xf32>
    %229 = tpu.matmul %226, %227, %cst_112 {dimension_numbers = #tpu.dot_dimension_numbers<[2], [2], [0], [0], [0, 1, 0, 0, 1, 0], [1], [1]>} : vector<8x4x8xf32>, vector<8x4x8xf32>, vector<4x8x8xf32> -> vector<4x8x8xf32>
    "tpu.trace_stop"() : () -> ()
    %230 = vector.shape_cast %3 : vector<8x8xf32> to vector<1x8x8xf32>
    %231 = vector.broadcast %230 : vector<1x8x8xf32> to vector<4x8x8xf32>
    %232 = arith.addf %229, %231 : vector<4x8x8xf32>
    %cst_113 = arith.constant dense<0xFF800000> : vector<4x8xf32>
    %233 = vector.multi_reduction <maximumf>, %232, %cst_113 [2] : vector<4x8x8xf32> to vector<4x8xf32>
    %234 = vector.shape_cast %233 : vector<4x8xf32> to vector<4x8x1xf32>
    %235 = vector.broadcast %234 : vector<4x8x1xf32> to vector<4x8x8xf32>
    %236 = arith.subf %232, %235 : vector<4x8x8xf32>
    %237 = math.exp %236 : vector<4x8x8xf32>
    %cst_114 = arith.constant dense<0.000000e+00> : vector<4x8xf32>
    %238 = vector.multi_reduction <add>, %237, %cst_114 [2] : vector<4x8x8xf32> to vector<4x8xf32>
    %239 = vector.shape_cast %238 : vector<4x8xf32> to vector<4x8x1xf32>
    %240 = tpu.reciprocal %239 {approx = true} : vector<4x8x1xf32> -> vector<4x8x1xf32>
    %241 = vector.broadcast %240 : vector<4x8x1xf32> to vector<4x8x8xf32>
    %242 = arith.mulf %237, %241 : vector<4x8x8xf32>
    "tpu.trace_start"() <{level = 10 : i32, message = "hqk,khd->qhd"}> : () -> ()
    %cst_115 = arith.constant dense<0.000000e+00> : vector<4x8x8xf32>
    %243 = tpu.matmul %228, %242, %cst_115 {dimension_numbers = #tpu.dot_dimension_numbers<[0], [2], [2], [1], [0, 1, 0, 2, 1, 1], [1], [0]>} : vector<8x4x8xf32>, vector<4x8x8xf32>, vector<4x8x8xf32> -> vector<4x8x8xf32>
    %244 = tpu.transpose %243, [2, 0, 1] : vector<4x8x8xf32> -> vector<8x4x8xf32>
    "tpu.trace_stop"() : () -> ()
    %245 = vector.shape_cast %244 : vector<8x4x8xf32> to vector<8x32xf32>
    %cst_116 = arith.constant dense<0.000000e+00> : vector<8x32xf32>
    %246 = tpu.matmul %245, %191, %cst_116 {dimension_numbers = #tpu.dot_dimension_numbers<[1], [0], [0], [1], [0, 0, 1, 1], [], []>} : vector<8x32xf32>, vector<32x32xf32>, vector<8x32xf32> -> vector<8x32xf32>
    %247 = arith.addf %183, %246 : vector<8x32xf32>
    %248 = arith.mulf %247, %247 : vector<8x32xf32>
    %cst_117 = arith.constant dense<0.000000e+00> : vector<8xf32>
    %249 = vector.multi_reduction <add>, %248, %cst_117 [1] : vector<8x32xf32> to vector<8xf32>
    %250 = vector.shape_cast %249 : vector<8xf32> to vector<8x1xf32>
    %cst_118 = arith.constant 3.200000e+01 : f32
    %251 = vector.broadcast %cst_118 : f32 to vector<8x1xf32>
    %252 = arith.divf %250, %251 : vector<8x1xf32>
    %cst_119 = arith.constant 9.99999997E-7 : f32
    %253 = vector.broadcast %cst_119 : f32 to vector<8x1xf32>
    %254 = arith.addf %252, %253 : vector<8x1xf32>
    %255 = math.rsqrt %254 : vector<8x1xf32>
    %256 = vector.broadcast %255 : vector<8x1xf32> to vector<8x32xf32>
    %257 = arith.mulf %247, %256 : vector<8x32xf32>
    %258 = vector.broadcast %187 : vector<1x32xf32> to vector<8x32xf32>
    %259 = arith.mulf %257, %258 : vector<8x32xf32>
    %cst_120 = arith.constant dense<0.000000e+00> : vector<8x128xf32>
    %260 = tpu.matmul %259, %193, %cst_120 {dimension_numbers = #tpu.dot_dimension_numbers<[1], [0], [0], [1], [0, 0, 1, 1], [], []>} : vector<8x32xf32>, vector<32x128xf32>, vector<8x128xf32> -> vector<8x128xf32>
    %261 = vector.extract_strided_slice %260 {offsets = [0, 0], sizes = [8, 64], strides = [1, 1]} : vector<8x128xf32> to vector<8x64xf32>
    %262 = vector.extract_strided_slice %260 {offsets = [0, 64], sizes = [8, 64], strides = [1, 1]} : vector<8x128xf32> to vector<8x64xf32>
    %263 = arith.negf %261 : vector<8x64xf32>
    %264 = math.exp %263 : vector<8x64xf32>
    %cst_121 = arith.constant 1.000000e+00 : f32
    %265 = vector.broadcast %cst_121 : f32 to vector<8x64xf32>
    %266 = arith.addf %265, %264 : vector<8x64xf32>
    %267 = arith.divf %265, %266 : vector<8x64xf32>
    %268 = arith.mulf %261, %267 : vector<8x64xf32>
    %269 = arith.mulf %268, %262 : vector<8x64xf32>
    %cst_122 = arith.constant dense<0.000000e+00> : vector<8x32xf32>
    %270 = tpu.matmul %269, %195, %cst_122 {dimension_numbers = #tpu.dot_dimension_numbers<[1], [0], [0], [1], [0, 0, 1, 1], [], []>} : vector<8x64xf32>, vector<64x32xf32>, vector<8x32xf32> -> vector<8x32xf32>
    %271 = arith.addf %247, %270 : vector<8x32xf32>
    %c3 = arith.constant 3 : index
    %c0_123 = arith.constant 0 : index
    %c0_124 = arith.constant 0 : index
    %272 = vector.load %arg5[%c3, %c0_123, %c0_124] : memref<8x1x32xf32, #tpu.memory_space<vmem>>, vector<1x1x32xf32>
    %273 = vector.shape_cast %272 : vector<1x1x32xf32> to vector<1x32xf32>
    %c3_125 = arith.constant 3 : index
    %c0_126 = arith.constant 0 : index
    %c0_127 = arith.constant 0 : index
    %274 = vector.load %arg6[%c3_125, %c0_126, %c0_127] : memref<8x1x32xf32, #tpu.memory_space<vmem>>, vector<1x1x32xf32>
    %275 = vector.shape_cast %274 : vector<1x1x32xf32> to vector<1x32xf32>
    %c3_128 = arith.constant 3 : index
    %c0_129 = arith.constant 0 : index
    %c0_130 = arith.constant 0 : index
    %276 = vector.load %arg7[%c3_128, %c0_129, %c0_130] : memref<8x32x160xf32, #tpu.memory_space<vmem>>, vector<1x32x160xf32>
    %277 = vector.shape_cast %276 : vector<1x32x160xf32> to vector<32x160xf32>
    %c3_131 = arith.constant 3 : index
    %c0_132 = arith.constant 0 : index
    %c0_133 = arith.constant 0 : index
    %278 = vector.load %arg8[%c3_131, %c0_132, %c0_133] : memref<8x32x32xf32, #tpu.memory_space<vmem>>, vector<1x32x32xf32>
    %279 = vector.shape_cast %278 : vector<1x32x32xf32> to vector<32x32xf32>
    %c3_134 = arith.constant 3 : index
    %c0_135 = arith.constant 0 : index
    %c0_136 = arith.constant 0 : index
    %280 = vector.load %arg9[%c3_134, %c0_135, %c0_136] : memref<8x32x128xf32, #tpu.memory_space<vmem>>, vector<1x32x128xf32>
    %281 = vector.shape_cast %280 : vector<1x32x128xf32> to vector<32x128xf32>
    %c3_137 = arith.constant 3 : index
    %c0_138 = arith.constant 0 : index
    %c0_139 = arith.constant 0 : index
    %282 = vector.load %arg10[%c3_137, %c0_138, %c0_139] : memref<8x64x32xf32, #tpu.memory_space<vmem>>, vector<1x64x32xf32>
    %283 = vector.shape_cast %282 : vector<1x64x32xf32> to vector<64x32xf32>
    %284 = arith.mulf %271, %271 : vector<8x32xf32>
    %cst_140 = arith.constant dense<0.000000e+00> : vector<8xf32>
    %285 = vector.multi_reduction <add>, %284, %cst_140 [1] : vector<8x32xf32> to vector<8xf32>
    %286 = vector.shape_cast %285 : vector<8xf32> to vector<8x1xf32>
    %cst_141 = arith.constant 3.200000e+01 : f32
    %287 = vector.broadcast %cst_141 : f32 to vector<8x1xf32>
    %288 = arith.divf %286, %287 : vector<8x1xf32>
    %cst_142 = arith.constant 9.99999997E-7 : f32
    %289 = vector.broadcast %cst_142 : f32 to vector<8x1xf32>
    %290 = arith.addf %288, %289 : vector<8x1xf32>
    %291 = math.rsqrt %290 : vector<8x1xf32>
    %292 = vector.broadcast %291 : vector<8x1xf32> to vector<8x32xf32>
    %293 = arith.mulf %271, %292 : vector<8x32xf32>
    %294 = vector.broadcast %273 : vector<1x32xf32> to vector<8x32xf32>
    %295 = arith.mulf %293, %294 : vector<8x32xf32>
    %cst_143 = arith.constant dense<0.000000e+00> : vector<8x160xf32>
    %296 = tpu.matmul %295, %277, %cst_143 {dimension_numbers = #tpu.dot_dimension_numbers<[1], [0], [0], [1], [0, 0, 1, 1], [], []>} : vector<8x32xf32>, vector<32x160xf32>, vector<8x160xf32> -> vector<8x160xf32>
    %297 = vector.extract_strided_slice %296 {offsets = [0, 0], sizes = [8, 32], strides = [1, 1]} : vector<8x160xf32> to vector<8x32xf32>
    %298 = arith.mulf %297, %5 : vector<8x32xf32>
    %299 = vector.extract_strided_slice %296 {offsets = [0, 32], sizes = [8, 32], strides = [1, 1]} : vector<8x160xf32> to vector<8x32xf32>
    %300 = arith.mulf %299, %7 : vector<8x32xf32>
    %301 = arith.addf %298, %300 : vector<8x32xf32>
    %302 = vector.extract_strided_slice %296 {offsets = [0, 64], sizes = [8, 32], strides = [1, 1]} : vector<8x160xf32> to vector<8x32xf32>
    %303 = arith.mulf %302, %5 : vector<8x32xf32>
    %304 = vector.extract_strided_slice %296 {offsets = [0, 96], sizes = [8, 32], strides = [1, 1]} : vector<8x160xf32> to vector<8x32xf32>
    %305 = arith.mulf %304, %7 : vector<8x32xf32>
    %306 = arith.addf %303, %305 : vector<8x32xf32>
    %307 = vector.extract_strided_slice %296 {offsets = [0, 128], sizes = [8, 32], strides = [1, 1]} : vector<8x160xf32> to vector<8x32xf32>
    %c0_144 = arith.constant 0 : index
    %c0_145 = arith.constant 0 : index
    %c96 = arith.constant 96 : index
    %308 = vector.load %arg12[%c0_144, %c0_145, %c96] : memref<1x8x256xf32, #tpu.memory_space<vmem>>, vector<1x8x32xf32>
    %309 = vector.shape_cast %308 : vector<1x8x32xf32> to vector<8x32xf32>
    %310 = vector.shape_cast %306 : vector<8x32xf32> to vector<1x8x32xf32>
    tpu.vector_store %arg12[%c0_144, %c0_145, %c96], %310 {strides = array<i32>} : memref<1x8x256xf32, #tpu.memory_space<vmem>>, vector<1x8x32xf32>,
    %c0_146 = arith.constant 0 : index
    %c0_147 = arith.constant 0 : index
    %c96_148 = arith.constant 96 : index
    %311 = vector.load %arg13[%c0_146, %c0_147, %c96_148] : memref<1x8x256xf32, #tpu.memory_space<vmem>>, vector<1x8x32xf32>
    %312 = vector.shape_cast %311 : vector<1x8x32xf32> to vector<8x32xf32>
    %313 = vector.shape_cast %307 : vector<8x32xf32> to vector<1x8x32xf32>
    tpu.vector_store %arg13[%c0_146, %c0_147, %c96_148], %313 {strides = array<i32>} : memref<1x8x256xf32, #tpu.memory_space<vmem>>, vector<1x8x32xf32>,
    %314 = vector.shape_cast %301 : vector<8x32xf32> to vector<8x4x8xf32>
    %315 = vector.shape_cast %306 : vector<8x32xf32> to vector<8x4x8xf32>
    %316 = vector.shape_cast %307 : vector<8x32xf32> to vector<8x4x8xf32>
    "tpu.trace_start"() <{level = 10 : i32, message = "qhd,khd->hqk"}> : () -> ()
    %cst_149 = arith.constant dense<0.000000e+00> : vector<4x8x8xf32>
    %317 = tpu.matmul %314, %315, %cst_149 {dimension_numbers = #tpu.dot_dimension_numbers<[2], [2], [0], [0], [0, 1, 0, 0, 1, 0], [1], [1]>} : vector<8x4x8xf32>, vector<8x4x8xf32>, vector<4x8x8xf32> -> vector<4x8x8xf32>
    "tpu.trace_stop"() : () -> ()
    %318 = vector.shape_cast %3 : vector<8x8xf32> to vector<1x8x8xf32>
    %319 = vector.broadcast %318 : vector<1x8x8xf32> to vector<4x8x8xf32>
    %320 = arith.addf %317, %319 : vector<4x8x8xf32>
    %cst_150 = arith.constant dense<0xFF800000> : vector<4x8xf32>
    %321 = vector.multi_reduction <maximumf>, %320, %cst_150 [2] : vector<4x8x8xf32> to vector<4x8xf32>
    %322 = vector.shape_cast %321 : vector<4x8xf32> to vector<4x8x1xf32>
    %323 = vector.broadcast %322 : vector<4x8x1xf32> to vector<4x8x8xf32>
    %324 = arith.subf %320, %323 : vector<4x8x8xf32>
    %325 = math.exp %324 : vector<4x8x8xf32>
    %cst_151 = arith.constant dense<0.000000e+00> : vector<4x8xf32>
    %326 = vector.multi_reduction <add>, %325, %cst_151 [2] : vector<4x8x8xf32> to vector<4x8xf32>
    %327 = vector.shape_cast %326 : vector<4x8xf32> to vector<4x8x1xf32>
    %328 = tpu.reciprocal %327 {approx = true} : vector<4x8x1xf32> -> vector<4x8x1xf32>
    %329 = vector.broadcast %328 : vector<4x8x1xf32> to vector<4x8x8xf32>
    %330 = arith.mulf %325, %329 : vector<4x8x8xf32>
    "tpu.trace_start"() <{level = 10 : i32, message = "hqk,khd->qhd"}> : () -> ()
    %cst_152 = arith.constant dense<0.000000e+00> : vector<4x8x8xf32>
    %331 = tpu.matmul %316, %330, %cst_152 {dimension_numbers = #tpu.dot_dimension_numbers<[0], [2], [2], [1], [0, 1, 0, 2, 1, 1], [1], [0]>} : vector<8x4x8xf32>, vector<4x8x8xf32>, vector<4x8x8xf32> -> vector<4x8x8xf32>
    %332 = tpu.transpose %331, [2, 0, 1] : vector<4x8x8xf32> -> vector<8x4x8xf32>
    "tpu.trace_stop"() : () -> ()
    %333 = vector.shape_cast %332 : vector<8x4x8xf32> to vector<8x32xf32>
    %cst_153 = arith.constant dense<0.000000e+00> : vector<8x32xf32>
    %334 = tpu.matmul %333, %279, %cst_153 {dimension_numbers = #tpu.dot_dimension_numbers<[1], [0], [0], [1], [0, 0, 1, 1], [], []>} : vector<8x32xf32>, vector<32x32xf32>, vector<8x32xf32> -> vector<8x32xf32>
    %335 = arith.addf %271, %334 : vector<8x32xf32>
    %336 = arith.mulf %335, %335 : vector<8x32xf32>
    %cst_154 = arith.constant dense<0.000000e+00> : vector<8xf32>
    %337 = vector.multi_reduction <add>, %336, %cst_154 [1] : vector<8x32xf32> to vector<8xf32>
    %338 = vector.shape_cast %337 : vector<8xf32> to vector<8x1xf32>
    %cst_155 = arith.constant 3.200000e+01 : f32
    %339 = vector.broadcast %cst_155 : f32 to vector<8x1xf32>
    %340 = arith.divf %338, %339 : vector<8x1xf32>
    %cst_156 = arith.constant 9.99999997E-7 : f32
    %341 = vector.broadcast %cst_156 : f32 to vector<8x1xf32>
    %342 = arith.addf %340, %341 : vector<8x1xf32>
    %343 = math.rsqrt %342 : vector<8x1xf32>
    %344 = vector.broadcast %343 : vector<8x1xf32> to vector<8x32xf32>
    %345 = arith.mulf %335, %344 : vector<8x32xf32>
    %346 = vector.broadcast %275 : vector<1x32xf32> to vector<8x32xf32>
    %347 = arith.mulf %345, %346 : vector<8x32xf32>
    %cst_157 = arith.constant dense<0.000000e+00> : vector<8x128xf32>
    %348 = tpu.matmul %347, %281, %cst_157 {dimension_numbers = #tpu.dot_dimension_numbers<[1], [0], [0], [1], [0, 0, 1, 1], [], []>} : vector<8x32xf32>, vector<32x128xf32>, vector<8x128xf32> -> vector<8x128xf32>
    %349 = vector.extract_strided_slice %348 {offsets = [0, 0], sizes = [8, 64], strides = [1, 1]} : vector<8x128xf32> to vector<8x64xf32>
    %350 = vector.extract_strided_slice %348 {offsets = [0, 64], sizes = [8, 64], strides = [1, 1]} : vector<8x128xf32> to vector<8x64xf32>
    %351 = arith.negf %349 : vector<8x64xf32>
    %352 = math.exp %351 : vector<8x64xf32>
    %cst_158 = arith.constant 1.000000e+00 : f32
    %353 = vector.broadcast %cst_158 : f32 to vector<8x64xf32>
    %354 = arith.addf %353, %352 : vector<8x64xf32>
    %355 = arith.divf %353, %354 : vector<8x64xf32>
    %356 = arith.mulf %349, %355 : vector<8x64xf32>
    %357 = arith.mulf %356, %350 : vector<8x64xf32>
    %cst_159 = arith.constant dense<0.000000e+00> : vector<8x32xf32>
    %358 = tpu.matmul %357, %283, %cst_159 {dimension_numbers = #tpu.dot_dimension_numbers<[1], [0], [0], [1], [0, 0, 1, 1], [], []>} : vector<8x64xf32>, vector<64x32xf32>, vector<8x32xf32> -> vector<8x32xf32>
    %359 = arith.addf %335, %358 : vector<8x32xf32>
    %c4 = arith.constant 4 : index
    %c0_160 = arith.constant 0 : index
    %c0_161 = arith.constant 0 : index
    %360 = vector.load %arg5[%c4, %c0_160, %c0_161] : memref<8x1x32xf32, #tpu.memory_space<vmem>>, vector<1x1x32xf32>
    %361 = vector.shape_cast %360 : vector<1x1x32xf32> to vector<1x32xf32>
    %c4_162 = arith.constant 4 : index
    %c0_163 = arith.constant 0 : index
    %c0_164 = arith.constant 0 : index
    %362 = vector.load %arg6[%c4_162, %c0_163, %c0_164] : memref<8x1x32xf32, #tpu.memory_space<vmem>>, vector<1x1x32xf32>
    %363 = vector.shape_cast %362 : vector<1x1x32xf32> to vector<1x32xf32>
    %c4_165 = arith.constant 4 : index
    %c0_166 = arith.constant 0 : index
    %c0_167 = arith.constant 0 : index
    %364 = vector.load %arg7[%c4_165, %c0_166, %c0_167] : memref<8x32x160xf32, #tpu.memory_space<vmem>>, vector<1x32x160xf32>
    %365 = vector.shape_cast %364 : vector<1x32x160xf32> to vector<32x160xf32>
    %c4_168 = arith.constant 4 : index
    %c0_169 = arith.constant 0 : index
    %c0_170 = arith.constant 0 : index
    %366 = vector.load %arg8[%c4_168, %c0_169, %c0_170] : memref<8x32x32xf32, #tpu.memory_space<vmem>>, vector<1x32x32xf32>
    %367 = vector.shape_cast %366 : vector<1x32x32xf32> to vector<32x32xf32>
    %c4_171 = arith.constant 4 : index
    %c0_172 = arith.constant 0 : index
    %c0_173 = arith.constant 0 : index
    %368 = vector.load %arg9[%c4_171, %c0_172, %c0_173] : memref<8x32x128xf32, #tpu.memory_space<vmem>>, vector<1x32x128xf32>
    %369 = vector.shape_cast %368 : vector<1x32x128xf32> to vector<32x128xf32>
    %c4_174 = arith.constant 4 : index
    %c0_175 = arith.constant 0 : index
    %c0_176 = arith.constant 0 : index
    %370 = vector.load %arg10[%c4_174, %c0_175, %c0_176] : memref<8x64x32xf32, #tpu.memory_space<vmem>>, vector<1x64x32xf32>
    %371 = vector.shape_cast %370 : vector<1x64x32xf32> to vector<64x32xf32>
    %372 = arith.mulf %359, %359 : vector<8x32xf32>
    %cst_177 = arith.constant dense<0.000000e+00> : vector<8xf32>
    %373 = vector.multi_reduction <add>, %372, %cst_177 [1] : vector<8x32xf32> to vector<8xf32>
    %374 = vector.shape_cast %373 : vector<8xf32> to vector<8x1xf32>
    %cst_178 = arith.constant 3.200000e+01 : f32
    %375 = vector.broadcast %cst_178 : f32 to vector<8x1xf32>
    %376 = arith.divf %374, %375 : vector<8x1xf32>
    %cst_179 = arith.constant 9.99999997E-7 : f32
    %377 = vector.broadcast %cst_179 : f32 to vector<8x1xf32>
    %378 = arith.addf %376, %377 : vector<8x1xf32>
    %379 = math.rsqrt %378 : vector<8x1xf32>
    %380 = vector.broadcast %379 : vector<8x1xf32> to vector<8x32xf32>
    %381 = arith.mulf %359, %380 : vector<8x32xf32>
    %382 = vector.broadcast %361 : vector<1x32xf32> to vector<8x32xf32>
    %383 = arith.mulf %381, %382 : vector<8x32xf32>
    %cst_180 = arith.constant dense<0.000000e+00> : vector<8x160xf32>
    %384 = tpu.matmul %383, %365, %cst_180 {dimension_numbers = #tpu.dot_dimension_numbers<[1], [0], [0], [1], [0, 0, 1, 1], [], []>} : vector<8x32xf32>, vector<32x160xf32>, vector<8x160xf32> -> vector<8x160xf32>
    %385 = vector.extract_strided_slice %384 {offsets = [0, 0], sizes = [8, 32], strides = [1, 1]} : vector<8x160xf32> to vector<8x32xf32>
    %386 = arith.mulf %385, %5 : vector<8x32xf32>
    %387 = vector.extract_strided_slice %384 {offsets = [0, 32], sizes = [8, 32], strides = [1, 1]} : vector<8x160xf32> to vector<8x32xf32>
    %388 = arith.mulf %387, %7 : vector<8x32xf32>
    %389 = arith.addf %386, %388 : vector<8x32xf32>
    %390 = vector.extract_strided_slice %384 {offsets = [0, 64], sizes = [8, 32], strides = [1, 1]} : vector<8x160xf32> to vector<8x32xf32>
    %391 = arith.mulf %390, %5 : vector<8x32xf32>
    %392 = vector.extract_strided_slice %384 {offsets = [0, 96], sizes = [8, 32], strides = [1, 1]} : vector<8x160xf32> to vector<8x32xf32>
    %393 = arith.mulf %392, %7 : vector<8x32xf32>
    %394 = arith.addf %391, %393 : vector<8x32xf32>
    %395 = vector.extract_strided_slice %384 {offsets = [0, 128], sizes = [8, 32], strides = [1, 1]} : vector<8x160xf32> to vector<8x32xf32>
    %c0_181 = arith.constant 0 : index
    %c0_182 = arith.constant 0 : index
    %c128 = arith.constant 128 : index
    %396 = vector.load %arg12[%c0_181, %c0_182, %c128] : memref<1x8x256xf32, #tpu.memory_space<vmem>>, vector<1x8x32xf32>
    %397 = vector.shape_cast %396 : vector<1x8x32xf32> to vector<8x32xf32>
    %398 = vector.shape_cast %394 : vector<8x32xf32> to vector<1x8x32xf32>
    tpu.vector_store %arg12[%c0_181, %c0_182, %c128], %398 {strides = array<i32>} : memref<1x8x256xf32, #tpu.memory_space<vmem>>, vector<1x8x32xf32>,
    %c0_183 = arith.constant 0 : index
    %c0_184 = arith.constant 0 : index
    %c128_185 = arith.constant 128 : index
    %399 = vector.load %arg13[%c0_183, %c0_184, %c128_185] : memref<1x8x256xf32, #tpu.memory_space<vmem>>, vector<1x8x32xf32>
    %400 = vector.shape_cast %399 : vector<1x8x32xf32> to vector<8x32xf32>
    %401 = vector.shape_cast %395 : vector<8x32xf32> to vector<1x8x32xf32>
    tpu.vector_store %arg13[%c0_183, %c0_184, %c128_185], %401 {strides = array<i32>} : memref<1x8x256xf32, #tpu.memory_space<vmem>>, vector<1x8x32xf32>,
    %402 = vector.shape_cast %389 : vector<8x32xf32> to vector<8x4x8xf32>
    %403 = vector.shape_cast %394 : vector<8x32xf32> to vector<8x4x8xf32>
    %404 = vector.shape_cast %395 : vector<8x32xf32> to vector<8x4x8xf32>
    "tpu.trace_start"() <{level = 10 : i32, message = "qhd,khd->hqk"}> : () -> ()
    %cst_186 = arith.constant dense<0.000000e+00> : vector<4x8x8xf32>
    %405 = tpu.matmul %402, %403, %cst_186 {dimension_numbers = #tpu.dot_dimension_numbers<[2], [2], [0], [0], [0, 1, 0, 0, 1, 0], [1], [1]>} : vector<8x4x8xf32>, vector<8x4x8xf32>, vector<4x8x8xf32> -> vector<4x8x8xf32>
    "tpu.trace_stop"() : () -> ()
    %406 = vector.shape_cast %3 : vector<8x8xf32> to vector<1x8x8xf32>
    %407 = vector.broadcast %406 : vector<1x8x8xf32> to vector<4x8x8xf32>
    %408 = arith.addf %405, %407 : vector<4x8x8xf32>
    %cst_187 = arith.constant dense<0xFF800000> : vector<4x8xf32>
    %409 = vector.multi_reduction <maximumf>, %408, %cst_187 [2] : vector<4x8x8xf32> to vector<4x8xf32>
    %410 = vector.shape_cast %409 : vector<4x8xf32> to vector<4x8x1xf32>
    %411 = vector.broadcast %410 : vector<4x8x1xf32> to vector<4x8x8xf32>
    %412 = arith.subf %408, %411 : vector<4x8x8xf32>
    %413 = math.exp %412 : vector<4x8x8xf32>
    %cst_188 = arith.constant dense<0.000000e+00> : vector<4x8xf32>
    %414 = vector.multi_reduction <add>, %413, %cst_188 [2] : vector<4x8x8xf32> to vector<4x8xf32>
    %415 = vector.shape_cast %414 : vector<4x8xf32> to vector<4x8x1xf32>
    %416 = tpu.reciprocal %415 {approx = true} : vector<4x8x1xf32> -> vector<4x8x1xf32>
    %417 = vector.broadcast %416 : vector<4x8x1xf32> to vector<4x8x8xf32>
    %418 = arith.mulf %413, %417 : vector<4x8x8xf32>
    "tpu.trace_start"() <{level = 10 : i32, message = "hqk,khd->qhd"}> : () -> ()
    %cst_189 = arith.constant dense<0.000000e+00> : vector<4x8x8xf32>
    %419 = tpu.matmul %404, %418, %cst_189 {dimension_numbers = #tpu.dot_dimension_numbers<[0], [2], [2], [1], [0, 1, 0, 2, 1, 1], [1], [0]>} : vector<8x4x8xf32>, vector<4x8x8xf32>, vector<4x8x8xf32> -> vector<4x8x8xf32>
    %420 = tpu.transpose %419, [2, 0, 1] : vector<4x8x8xf32> -> vector<8x4x8xf32>
    "tpu.trace_stop"() : () -> ()
    %421 = vector.shape_cast %420 : vector<8x4x8xf32> to vector<8x32xf32>
    %cst_190 = arith.constant dense<0.000000e+00> : vector<8x32xf32>
    %422 = tpu.matmul %421, %367, %cst_190 {dimension_numbers = #tpu.dot_dimension_numbers<[1], [0], [0], [1], [0, 0, 1, 1], [], []>} : vector<8x32xf32>, vector<32x32xf32>, vector<8x32xf32> -> vector<8x32xf32>
    %423 = arith.addf %359, %422 : vector<8x32xf32>
    %424 = arith.mulf %423, %423 : vector<8x32xf32>
    %cst_191 = arith.constant dense<0.000000e+00> : vector<8xf32>
    %425 = vector.multi_reduction <add>, %424, %cst_191 [1] : vector<8x32xf32> to vector<8xf32>
    %426 = vector.shape_cast %425 : vector<8xf32> to vector<8x1xf32>
    %cst_192 = arith.constant 3.200000e+01 : f32
    %427 = vector.broadcast %cst_192 : f32 to vector<8x1xf32>
    %428 = arith.divf %426, %427 : vector<8x1xf32>
    %cst_193 = arith.constant 9.99999997E-7 : f32
    %429 = vector.broadcast %cst_193 : f32 to vector<8x1xf32>
    %430 = arith.addf %428, %429 : vector<8x1xf32>
    %431 = math.rsqrt %430 : vector<8x1xf32>
    %432 = vector.broadcast %431 : vector<8x1xf32> to vector<8x32xf32>
    %433 = arith.mulf %423, %432 : vector<8x32xf32>
    %434 = vector.broadcast %363 : vector<1x32xf32> to vector<8x32xf32>
    %435 = arith.mulf %433, %434 : vector<8x32xf32>
    %cst_194 = arith.constant dense<0.000000e+00> : vector<8x128xf32>
    %436 = tpu.matmul %435, %369, %cst_194 {dimension_numbers = #tpu.dot_dimension_numbers<[1], [0], [0], [1], [0, 0, 1, 1], [], []>} : vector<8x32xf32>, vector<32x128xf32>, vector<8x128xf32> -> vector<8x128xf32>
    %437 = vector.extract_strided_slice %436 {offsets = [0, 0], sizes = [8, 64], strides = [1, 1]} : vector<8x128xf32> to vector<8x64xf32>
    %438 = vector.extract_strided_slice %436 {offsets = [0, 64], sizes = [8, 64], strides = [1, 1]} : vector<8x128xf32> to vector<8x64xf32>
    %439 = arith.negf %437 : vector<8x64xf32>
    %440 = math.exp %439 : vector<8x64xf32>
    %cst_195 = arith.constant 1.000000e+00 : f32
    %441 = vector.broadcast %cst_195 : f32 to vector<8x64xf32>
    %442 = arith.addf %441, %440 : vector<8x64xf32>
    %443 = arith.divf %441, %442 : vector<8x64xf32>
    %444 = arith.mulf %437, %443 : vector<8x64xf32>
    %445 = arith.mulf %444, %438 : vector<8x64xf32>
    %cst_196 = arith.constant dense<0.000000e+00> : vector<8x32xf32>
    %446 = tpu.matmul %445, %371, %cst_196 {dimension_numbers = #tpu.dot_dimension_numbers<[1], [0], [0], [1], [0, 0, 1, 1], [], []>} : vector<8x64xf32>, vector<64x32xf32>, vector<8x32xf32> -> vector<8x32xf32>
    %447 = arith.addf %423, %446 : vector<8x32xf32>
    %c5 = arith.constant 5 : index
    %c0_197 = arith.constant 0 : index
    %c0_198 = arith.constant 0 : index
    %448 = vector.load %arg5[%c5, %c0_197, %c0_198] : memref<8x1x32xf32, #tpu.memory_space<vmem>>, vector<1x1x32xf32>
    %449 = vector.shape_cast %448 : vector<1x1x32xf32> to vector<1x32xf32>
    %c5_199 = arith.constant 5 : index
    %c0_200 = arith.constant 0 : index
    %c0_201 = arith.constant 0 : index
    %450 = vector.load %arg6[%c5_199, %c0_200, %c0_201] : memref<8x1x32xf32, #tpu.memory_space<vmem>>, vector<1x1x32xf32>
    %451 = vector.shape_cast %450 : vector<1x1x32xf32> to vector<1x32xf32>
    %c5_202 = arith.constant 5 : index
    %c0_203 = arith.constant 0 : index
    %c0_204 = arith.constant 0 : index
    %452 = vector.load %arg7[%c5_202, %c0_203, %c0_204] : memref<8x32x160xf32, #tpu.memory_space<vmem>>, vector<1x32x160xf32>
    %453 = vector.shape_cast %452 : vector<1x32x160xf32> to vector<32x160xf32>
    %c5_205 = arith.constant 5 : index
    %c0_206 = arith.constant 0 : index
    %c0_207 = arith.constant 0 : index
    %454 = vector.load %arg8[%c5_205, %c0_206, %c0_207] : memref<8x32x32xf32, #tpu.memory_space<vmem>>, vector<1x32x32xf32>
    %455 = vector.shape_cast %454 : vector<1x32x32xf32> to vector<32x32xf32>
    %c5_208 = arith.constant 5 : index
    %c0_209 = arith.constant 0 : index
    %c0_210 = arith.constant 0 : index
    %456 = vector.load %arg9[%c5_208, %c0_209, %c0_210] : memref<8x32x128xf32, #tpu.memory_space<vmem>>, vector<1x32x128xf32>
    %457 = vector.shape_cast %456 : vector<1x32x128xf32> to vector<32x128xf32>
    %c5_211 = arith.constant 5 : index
    %c0_212 = arith.constant 0 : index
    %c0_213 = arith.constant 0 : index
    %458 = vector.load %arg10[%c5_211, %c0_212, %c0_213] : memref<8x64x32xf32, #tpu.memory_space<vmem>>, vector<1x64x32xf32>
    %459 = vector.shape_cast %458 : vector<1x64x32xf32> to vector<64x32xf32>
    %460 = arith.mulf %447, %447 : vector<8x32xf32>
    %cst_214 = arith.constant dense<0.000000e+00> : vector<8xf32>
    %461 = vector.multi_reduction <add>, %460, %cst_214 [1] : vector<8x32xf32> to vector<8xf32>
    %462 = vector.shape_cast %461 : vector<8xf32> to vector<8x1xf32>
    %cst_215 = arith.constant 3.200000e+01 : f32
    %463 = vector.broadcast %cst_215 : f32 to vector<8x1xf32>
    %464 = arith.divf %462, %463 : vector<8x1xf32>
    %cst_216 = arith.constant 9.99999997E-7 : f32
    %465 = vector.broadcast %cst_216 : f32 to vector<8x1xf32>
    %466 = arith.addf %464, %465 : vector<8x1xf32>
    %467 = math.rsqrt %466 : vector<8x1xf32>
    %468 = vector.broadcast %467 : vector<8x1xf32> to vector<8x32xf32>
    %469 = arith.mulf %447, %468 : vector<8x32xf32>
    %470 = vector.broadcast %449 : vector<1x32xf32> to vector<8x32xf32>
    %471 = arith.mulf %469, %470 : vector<8x32xf32>
    %cst_217 = arith.constant dense<0.000000e+00> : vector<8x160xf32>
    %472 = tpu.matmul %471, %453, %cst_217 {dimension_numbers = #tpu.dot_dimension_numbers<[1], [0], [0], [1], [0, 0, 1, 1], [], []>} : vector<8x32xf32>, vector<32x160xf32>, vector<8x160xf32> -> vector<8x160xf32>
    %473 = vector.extract_strided_slice %472 {offsets = [0, 0], sizes = [8, 32], strides = [1, 1]} : vector<8x160xf32> to vector<8x32xf32>
    %474 = arith.mulf %473, %5 : vector<8x32xf32>
    %475 = vector.extract_strided_slice %472 {offsets = [0, 32], sizes = [8, 32], strides = [1, 1]} : vector<8x160xf32> to vector<8x32xf32>
    %476 = arith.mulf %475, %7 : vector<8x32xf32>
    %477 = arith.addf %474, %476 : vector<8x32xf32>
    %478 = vector.extract_strided_slice %472 {offsets = [0, 64], sizes = [8, 32], strides = [1, 1]} : vector<8x160xf32> to vector<8x32xf32>
    %479 = arith.mulf %478, %5 : vector<8x32xf32>
    %480 = vector.extract_strided_slice %472 {offsets = [0, 96], sizes = [8, 32], strides = [1, 1]} : vector<8x160xf32> to vector<8x32xf32>
    %481 = arith.mulf %480, %7 : vector<8x32xf32>
    %482 = arith.addf %479, %481 : vector<8x32xf32>
    %483 = vector.extract_strided_slice %472 {offsets = [0, 128], sizes = [8, 32], strides = [1, 1]} : vector<8x160xf32> to vector<8x32xf32>
    %c0_218 = arith.constant 0 : index
    %c0_219 = arith.constant 0 : index
    %c160 = arith.constant 160 : index
    %484 = vector.load %arg12[%c0_218, %c0_219, %c160] : memref<1x8x256xf32, #tpu.memory_space<vmem>>, vector<1x8x32xf32>
    %485 = vector.shape_cast %484 : vector<1x8x32xf32> to vector<8x32xf32>
    %486 = vector.shape_cast %482 : vector<8x32xf32> to vector<1x8x32xf32>
    tpu.vector_store %arg12[%c0_218, %c0_219, %c160], %486 {strides = array<i32>} : memref<1x8x256xf32, #tpu.memory_space<vmem>>, vector<1x8x32xf32>,
    %c0_220 = arith.constant 0 : index
    %c0_221 = arith.constant 0 : index
    %c160_222 = arith.constant 160 : index
    %487 = vector.load %arg13[%c0_220, %c0_221, %c160_222] : memref<1x8x256xf32, #tpu.memory_space<vmem>>, vector<1x8x32xf32>
    %488 = vector.shape_cast %487 : vector<1x8x32xf32> to vector<8x32xf32>
    %489 = vector.shape_cast %483 : vector<8x32xf32> to vector<1x8x32xf32>
    tpu.vector_store %arg13[%c0_220, %c0_221, %c160_222], %489 {strides = array<i32>} : memref<1x8x256xf32, #tpu.memory_space<vmem>>, vector<1x8x32xf32>,
    %490 = vector.shape_cast %477 : vector<8x32xf32> to vector<8x4x8xf32>
    %491 = vector.shape_cast %482 : vector<8x32xf32> to vector<8x4x8xf32>
    %492 = vector.shape_cast %483 : vector<8x32xf32> to vector<8x4x8xf32>
    "tpu.trace_start"() <{level = 10 : i32, message = "qhd,khd->hqk"}> : () -> ()
    %cst_223 = arith.constant dense<0.000000e+00> : vector<4x8x8xf32>
    %493 = tpu.matmul %490, %491, %cst_223 {dimension_numbers = #tpu.dot_dimension_numbers<[2], [2], [0], [0], [0, 1, 0, 0, 1, 0], [1], [1]>} : vector<8x4x8xf32>, vector<8x4x8xf32>, vector<4x8x8xf32> -> vector<4x8x8xf32>
    "tpu.trace_stop"() : () -> ()
    %494 = vector.shape_cast %3 : vector<8x8xf32> to vector<1x8x8xf32>
    %495 = vector.broadcast %494 : vector<1x8x8xf32> to vector<4x8x8xf32>
    %496 = arith.addf %493, %495 : vector<4x8x8xf32>
    %cst_224 = arith.constant dense<0xFF800000> : vector<4x8xf32>
    %497 = vector.multi_reduction <maximumf>, %496, %cst_224 [2] : vector<4x8x8xf32> to vector<4x8xf32>
    %498 = vector.shape_cast %497 : vector<4x8xf32> to vector<4x8x1xf32>
    %499 = vector.broadcast %498 : vector<4x8x1xf32> to vector<4x8x8xf32>
    %500 = arith.subf %496, %499 : vector<4x8x8xf32>
    %501 = math.exp %500 : vector<4x8x8xf32>
    %cst_225 = arith.constant dense<0.000000e+00> : vector<4x8xf32>
    %502 = vector.multi_reduction <add>, %501, %cst_225 [2] : vector<4x8x8xf32> to vector<4x8xf32>
    %503 = vector.shape_cast %502 : vector<4x8xf32> to vector<4x8x1xf32>
    %504 = tpu.reciprocal %503 {approx = true} : vector<4x8x1xf32> -> vector<4x8x1xf32>
    %505 = vector.broadcast %504 : vector<4x8x1xf32> to vector<4x8x8xf32>
    %506 = arith.mulf %501, %505 : vector<4x8x8xf32>
    "tpu.trace_start"() <{level = 10 : i32, message = "hqk,khd->qhd"}> : () -> ()
    %cst_226 = arith.constant dense<0.000000e+00> : vector<4x8x8xf32>
    %507 = tpu.matmul %492, %506, %cst_226 {dimension_numbers = #tpu.dot_dimension_numbers<[0], [2], [2], [1], [0, 1, 0, 2, 1, 1], [1], [0]>} : vector<8x4x8xf32>, vector<4x8x8xf32>, vector<4x8x8xf32> -> vector<4x8x8xf32>
    %508 = tpu.transpose %507, [2, 0, 1] : vector<4x8x8xf32> -> vector<8x4x8xf32>
    "tpu.trace_stop"() : () -> ()
    %509 = vector.shape_cast %508 : vector<8x4x8xf32> to vector<8x32xf32>
    %cst_227 = arith.constant dense<0.000000e+00> : vector<8x32xf32>
    %510 = tpu.matmul %509, %455, %cst_227 {dimension_numbers = #tpu.dot_dimension_numbers<[1], [0], [0], [1], [0, 0, 1, 1], [], []>} : vector<8x32xf32>, vector<32x32xf32>, vector<8x32xf32> -> vector<8x32xf32>
    %511 = arith.addf %447, %510 : vector<8x32xf32>
    %512 = arith.mulf %511, %511 : vector<8x32xf32>
    %cst_228 = arith.constant dense<0.000000e+00> : vector<8xf32>
    %513 = vector.multi_reduction <add>, %512, %cst_228 [1] : vector<8x32xf32> to vector<8xf32>
    %514 = vector.shape_cast %513 : vector<8xf32> to vector<8x1xf32>
    %cst_229 = arith.constant 3.200000e+01 : f32
    %515 = vector.broadcast %cst_229 : f32 to vector<8x1xf32>
    %516 = arith.divf %514, %515 : vector<8x1xf32>
    %cst_230 = arith.constant 9.99999997E-7 : f32
    %517 = vector.broadcast %cst_230 : f32 to vector<8x1xf32>
    %518 = arith.addf %516, %517 : vector<8x1xf32>
    %519 = math.rsqrt %518 : vector<8x1xf32>
    %520 = vector.broadcast %519 : vector<8x1xf32> to vector<8x32xf32>
    %521 = arith.mulf %511, %520 : vector<8x32xf32>
    %522 = vector.broadcast %451 : vector<1x32xf32> to vector<8x32xf32>
    %523 = arith.mulf %521, %522 : vector<8x32xf32>
    %cst_231 = arith.constant dense<0.000000e+00> : vector<8x128xf32>
    %524 = tpu.matmul %523, %457, %cst_231 {dimension_numbers = #tpu.dot_dimension_numbers<[1], [0], [0], [1], [0, 0, 1, 1], [], []>} : vector<8x32xf32>, vector<32x128xf32>, vector<8x128xf32> -> vector<8x128xf32>
    %525 = vector.extract_strided_slice %524 {offsets = [0, 0], sizes = [8, 64], strides = [1, 1]} : vector<8x128xf32> to vector<8x64xf32>
    %526 = vector.extract_strided_slice %524 {offsets = [0, 64], sizes = [8, 64], strides = [1, 1]} : vector<8x128xf32> to vector<8x64xf32>
    %527 = arith.negf %525 : vector<8x64xf32>
    %528 = math.exp %527 : vector<8x64xf32>
    %cst_232 = arith.constant 1.000000e+00 : f32
    %529 = vector.broadcast %cst_232 : f32 to vector<8x64xf32>
    %530 = arith.addf %529, %528 : vector<8x64xf32>
    %531 = arith.divf %529, %530 : vector<8x64xf32>
    %532 = arith.mulf %525, %531 : vector<8x64xf32>
    %533 = arith.mulf %532, %526 : vector<8x64xf32>
    %cst_233 = arith.constant dense<0.000000e+00> : vector<8x32xf32>
    %534 = tpu.matmul %533, %459, %cst_233 {dimension_numbers = #tpu.dot_dimension_numbers<[1], [0], [0], [1], [0, 0, 1, 1], [], []>} : vector<8x64xf32>, vector<64x32xf32>, vector<8x32xf32> -> vector<8x32xf32>
    %535 = arith.addf %511, %534 : vector<8x32xf32>
    %c6 = arith.constant 6 : index
    %c0_234 = arith.constant 0 : index
    %c0_235 = arith.constant 0 : index
    %536 = vector.load %arg5[%c6, %c0_234, %c0_235] : memref<8x1x32xf32, #tpu.memory_space<vmem>>, vector<1x1x32xf32>
    %537 = vector.shape_cast %536 : vector<1x1x32xf32> to vector<1x32xf32>
    %c6_236 = arith.constant 6 : index
    %c0_237 = arith.constant 0 : index
    %c0_238 = arith.constant 0 : index
    %538 = vector.load %arg6[%c6_236, %c0_237, %c0_238] : memref<8x1x32xf32, #tpu.memory_space<vmem>>, vector<1x1x32xf32>
    %539 = vector.shape_cast %538 : vector<1x1x32xf32> to vector<1x32xf32>
    %c6_239 = arith.constant 6 : index
    %c0_240 = arith.constant 0 : index
    %c0_241 = arith.constant 0 : index
    %540 = vector.load %arg7[%c6_239, %c0_240, %c0_241] : memref<8x32x160xf32, #tpu.memory_space<vmem>>, vector<1x32x160xf32>
    %541 = vector.shape_cast %540 : vector<1x32x160xf32> to vector<32x160xf32>
    %c6_242 = arith.constant 6 : index
    %c0_243 = arith.constant 0 : index
    %c0_244 = arith.constant 0 : index
    %542 = vector.load %arg8[%c6_242, %c0_243, %c0_244] : memref<8x32x32xf32, #tpu.memory_space<vmem>>, vector<1x32x32xf32>
    %543 = vector.shape_cast %542 : vector<1x32x32xf32> to vector<32x32xf32>
    %c6_245 = arith.constant 6 : index
    %c0_246 = arith.constant 0 : index
    %c0_247 = arith.constant 0 : index
    %544 = vector.load %arg9[%c6_245, %c0_246, %c0_247] : memref<8x32x128xf32, #tpu.memory_space<vmem>>, vector<1x32x128xf32>
    %545 = vector.shape_cast %544 : vector<1x32x128xf32> to vector<32x128xf32>
    %c6_248 = arith.constant 6 : index
    %c0_249 = arith.constant 0 : index
    %c0_250 = arith.constant 0 : index
    %546 = vector.load %arg10[%c6_248, %c0_249, %c0_250] : memref<8x64x32xf32, #tpu.memory_space<vmem>>, vector<1x64x32xf32>
    %547 = vector.shape_cast %546 : vector<1x64x32xf32> to vector<64x32xf32>
    %548 = arith.mulf %535, %535 : vector<8x32xf32>
    %cst_251 = arith.constant dense<0.000000e+00> : vector<8xf32>
    %549 = vector.multi_reduction <add>, %548, %cst_251 [1] : vector<8x32xf32> to vector<8xf32>
    %550 = vector.shape_cast %549 : vector<8xf32> to vector<8x1xf32>
    %cst_252 = arith.constant 3.200000e+01 : f32
    %551 = vector.broadcast %cst_252 : f32 to vector<8x1xf32>
    %552 = arith.divf %550, %551 : vector<8x1xf32>
    %cst_253 = arith.constant 9.99999997E-7 : f32
    %553 = vector.broadcast %cst_253 : f32 to vector<8x1xf32>
    %554 = arith.addf %552, %553 : vector<8x1xf32>
    %555 = math.rsqrt %554 : vector<8x1xf32>
    %556 = vector.broadcast %555 : vector<8x1xf32> to vector<8x32xf32>
    %557 = arith.mulf %535, %556 : vector<8x32xf32>
    %558 = vector.broadcast %537 : vector<1x32xf32> to vector<8x32xf32>
    %559 = arith.mulf %557, %558 : vector<8x32xf32>
    %cst_254 = arith.constant dense<0.000000e+00> : vector<8x160xf32>
    %560 = tpu.matmul %559, %541, %cst_254 {dimension_numbers = #tpu.dot_dimension_numbers<[1], [0], [0], [1], [0, 0, 1, 1], [], []>} : vector<8x32xf32>, vector<32x160xf32>, vector<8x160xf32> -> vector<8x160xf32>
    %561 = vector.extract_strided_slice %560 {offsets = [0, 0], sizes = [8, 32], strides = [1, 1]} : vector<8x160xf32> to vector<8x32xf32>
    %562 = arith.mulf %561, %5 : vector<8x32xf32>
    %563 = vector.extract_strided_slice %560 {offsets = [0, 32], sizes = [8, 32], strides = [1, 1]} : vector<8x160xf32> to vector<8x32xf32>
    %564 = arith.mulf %563, %7 : vector<8x32xf32>
    %565 = arith.addf %562, %564 : vector<8x32xf32>
    %566 = vector.extract_strided_slice %560 {offsets = [0, 64], sizes = [8, 32], strides = [1, 1]} : vector<8x160xf32> to vector<8x32xf32>
    %567 = arith.mulf %566, %5 : vector<8x32xf32>
    %568 = vector.extract_strided_slice %560 {offsets = [0, 96], sizes = [8, 32], strides = [1, 1]} : vector<8x160xf32> to vector<8x32xf32>
    %569 = arith.mulf %568, %7 : vector<8x32xf32>
    %570 = arith.addf %567, %569 : vector<8x32xf32>
    %571 = vector.extract_strided_slice %560 {offsets = [0, 128], sizes = [8, 32], strides = [1, 1]} : vector<8x160xf32> to vector<8x32xf32>
    %c0_255 = arith.constant 0 : index
    %c0_256 = arith.constant 0 : index
    %c192 = arith.constant 192 : index
    %572 = vector.load %arg12[%c0_255, %c0_256, %c192] : memref<1x8x256xf32, #tpu.memory_space<vmem>>, vector<1x8x32xf32>
    %573 = vector.shape_cast %572 : vector<1x8x32xf32> to vector<8x32xf32>
    %574 = vector.shape_cast %570 : vector<8x32xf32> to vector<1x8x32xf32>
    tpu.vector_store %arg12[%c0_255, %c0_256, %c192], %574 {strides = array<i32>} : memref<1x8x256xf32, #tpu.memory_space<vmem>>, vector<1x8x32xf32>,
    %c0_257 = arith.constant 0 : index
    %c0_258 = arith.constant 0 : index
    %c192_259 = arith.constant 192 : index
    %575 = vector.load %arg13[%c0_257, %c0_258, %c192_259] : memref<1x8x256xf32, #tpu.memory_space<vmem>>, vector<1x8x32xf32>
    %576 = vector.shape_cast %575 : vector<1x8x32xf32> to vector<8x32xf32>
    %577 = vector.shape_cast %571 : vector<8x32xf32> to vector<1x8x32xf32>
    tpu.vector_store %arg13[%c0_257, %c0_258, %c192_259], %577 {strides = array<i32>} : memref<1x8x256xf32, #tpu.memory_space<vmem>>, vector<1x8x32xf32>,
    %578 = vector.shape_cast %565 : vector<8x32xf32> to vector<8x4x8xf32>
    %579 = vector.shape_cast %570 : vector<8x32xf32> to vector<8x4x8xf32>
    %580 = vector.shape_cast %571 : vector<8x32xf32> to vector<8x4x8xf32>
    "tpu.trace_start"() <{level = 10 : i32, message = "qhd,khd->hqk"}> : () -> ()
    %cst_260 = arith.constant dense<0.000000e+00> : vector<4x8x8xf32>
    %581 = tpu.matmul %578, %579, %cst_260 {dimension_numbers = #tpu.dot_dimension_numbers<[2], [2], [0], [0], [0, 1, 0, 0, 1, 0], [1], [1]>} : vector<8x4x8xf32>, vector<8x4x8xf32>, vector<4x8x8xf32> -> vector<4x8x8xf32>
    "tpu.trace_stop"() : () -> ()
    %582 = vector.shape_cast %3 : vector<8x8xf32> to vector<1x8x8xf32>
    %583 = vector.broadcast %582 : vector<1x8x8xf32> to vector<4x8x8xf32>
    %584 = arith.addf %581, %583 : vector<4x8x8xf32>
    %cst_261 = arith.constant dense<0xFF800000> : vector<4x8xf32>
    %585 = vector.multi_reduction <maximumf>, %584, %cst_261 [2] : vector<4x8x8xf32> to vector<4x8xf32>
    %586 = vector.shape_cast %585 : vector<4x8xf32> to vector<4x8x1xf32>
    %587 = vector.broadcast %586 : vector<4x8x1xf32> to vector<4x8x8xf32>
    %588 = arith.subf %584, %587 : vector<4x8x8xf32>
    %589 = math.exp %588 : vector<4x8x8xf32>
    %cst_262 = arith.constant dense<0.000000e+00> : vector<4x8xf32>
    %590 = vector.multi_reduction <add>, %589, %cst_262 [2] : vector<4x8x8xf32> to vector<4x8xf32>
    %591 = vector.shape_cast %590 : vector<4x8xf32> to vector<4x8x1xf32>
    %592 = tpu.reciprocal %591 {approx = true} : vector<4x8x1xf32> -> vector<4x8x1xf32>
    %593 = vector.broadcast %592 : vector<4x8x1xf32> to vector<4x8x8xf32>
    %594 = arith.mulf %589, %593 : vector<4x8x8xf32>
    "tpu.trace_start"() <{level = 10 : i32, message = "hqk,khd->qhd"}> : () -> ()
    %cst_263 = arith.constant dense<0.000000e+00> : vector<4x8x8xf32>
    %595 = tpu.matmul %580, %594, %cst_263 {dimension_numbers = #tpu.dot_dimension_numbers<[0], [2], [2], [1], [0, 1, 0, 2, 1, 1], [1], [0]>} : vector<8x4x8xf32>, vector<4x8x8xf32>, vector<4x8x8xf32> -> vector<4x8x8xf32>
    %596 = tpu.transpose %595, [2, 0, 1] : vector<4x8x8xf32> -> vector<8x4x8xf32>
    "tpu.trace_stop"() : () -> ()
    %597 = vector.shape_cast %596 : vector<8x4x8xf32> to vector<8x32xf32>
    %cst_264 = arith.constant dense<0.000000e+00> : vector<8x32xf32>
    %598 = tpu.matmul %597, %543, %cst_264 {dimension_numbers = #tpu.dot_dimension_numbers<[1], [0], [0], [1], [0, 0, 1, 1], [], []>} : vector<8x32xf32>, vector<32x32xf32>, vector<8x32xf32> -> vector<8x32xf32>
    %599 = arith.addf %535, %598 : vector<8x32xf32>
    %600 = arith.mulf %599, %599 : vector<8x32xf32>
    %cst_265 = arith.constant dense<0.000000e+00> : vector<8xf32>
    %601 = vector.multi_reduction <add>, %600, %cst_265 [1] : vector<8x32xf32> to vector<8xf32>
    %602 = vector.shape_cast %601 : vector<8xf32> to vector<8x1xf32>
    %cst_266 = arith.constant 3.200000e+01 : f32
    %603 = vector.broadcast %cst_266 : f32 to vector<8x1xf32>
    %604 = arith.divf %602, %603 : vector<8x1xf32>
    %cst_267 = arith.constant 9.99999997E-7 : f32
    %605 = vector.broadcast %cst_267 : f32 to vector<8x1xf32>
    %606 = arith.addf %604, %605 : vector<8x1xf32>
    %607 = math.rsqrt %606 : vector<8x1xf32>
    %608 = vector.broadcast %607 : vector<8x1xf32> to vector<8x32xf32>
    %609 = arith.mulf %599, %608 : vector<8x32xf32>
    %610 = vector.broadcast %539 : vector<1x32xf32> to vector<8x32xf32>
    %611 = arith.mulf %609, %610 : vector<8x32xf32>
    %cst_268 = arith.constant dense<0.000000e+00> : vector<8x128xf32>
    %612 = tpu.matmul %611, %545, %cst_268 {dimension_numbers = #tpu.dot_dimension_numbers<[1], [0], [0], [1], [0, 0, 1, 1], [], []>} : vector<8x32xf32>, vector<32x128xf32>, vector<8x128xf32> -> vector<8x128xf32>
    %613 = vector.extract_strided_slice %612 {offsets = [0, 0], sizes = [8, 64], strides = [1, 1]} : vector<8x128xf32> to vector<8x64xf32>
    %614 = vector.extract_strided_slice %612 {offsets = [0, 64], sizes = [8, 64], strides = [1, 1]} : vector<8x128xf32> to vector<8x64xf32>
    %615 = arith.negf %613 : vector<8x64xf32>
    %616 = math.exp %615 : vector<8x64xf32>
    %cst_269 = arith.constant 1.000000e+00 : f32
    %617 = vector.broadcast %cst_269 : f32 to vector<8x64xf32>
    %618 = arith.addf %617, %616 : vector<8x64xf32>
    %619 = arith.divf %617, %618 : vector<8x64xf32>
    %620 = arith.mulf %613, %619 : vector<8x64xf32>
    %621 = arith.mulf %620, %614 : vector<8x64xf32>
    %cst_270 = arith.constant dense<0.000000e+00> : vector<8x32xf32>
    %622 = tpu.matmul %621, %547, %cst_270 {dimension_numbers = #tpu.dot_dimension_numbers<[1], [0], [0], [1], [0, 0, 1, 1], [], []>} : vector<8x64xf32>, vector<64x32xf32>, vector<8x32xf32> -> vector<8x32xf32>
    %623 = arith.addf %599, %622 : vector<8x32xf32>
    %c7 = arith.constant 7 : index
    %c0_271 = arith.constant 0 : index
    %c0_272 = arith.constant 0 : index
    %624 = vector.load %arg5[%c7, %c0_271, %c0_272] : memref<8x1x32xf32, #tpu.memory_space<vmem>>, vector<1x1x32xf32>
    %625 = vector.shape_cast %624 : vector<1x1x32xf32> to vector<1x32xf32>
    %c7_273 = arith.constant 7 : index
    %c0_274 = arith.constant 0 : index
    %c0_275 = arith.constant 0 : index
    %626 = vector.load %arg6[%c7_273, %c0_274, %c0_275] : memref<8x1x32xf32, #tpu.memory_space<vmem>>, vector<1x1x32xf32>
    %627 = vector.shape_cast %626 : vector<1x1x32xf32> to vector<1x32xf32>
    %c7_276 = arith.constant 7 : index
    %c0_277 = arith.constant 0 : index
    %c0_278 = arith.constant 0 : index
    %628 = vector.load %arg7[%c7_276, %c0_277, %c0_278] : memref<8x32x160xf32, #tpu.memory_space<vmem>>, vector<1x32x160xf32>
    %629 = vector.shape_cast %628 : vector<1x32x160xf32> to vector<32x160xf32>
    %c7_279 = arith.constant 7 : index
    %c0_280 = arith.constant 0 : index
    %c0_281 = arith.constant 0 : index
    %630 = vector.load %arg8[%c7_279, %c0_280, %c0_281] : memref<8x32x32xf32, #tpu.memory_space<vmem>>, vector<1x32x32xf32>
    %631 = vector.shape_cast %630 : vector<1x32x32xf32> to vector<32x32xf32>
    %c7_282 = arith.constant 7 : index
    %c0_283 = arith.constant 0 : index
    %c0_284 = arith.constant 0 : index
    %632 = vector.load %arg9[%c7_282, %c0_283, %c0_284] : memref<8x32x128xf32, #tpu.memory_space<vmem>>, vector<1x32x128xf32>
    %633 = vector.shape_cast %632 : vector<1x32x128xf32> to vector<32x128xf32>
    %c7_285 = arith.constant 7 : index
    %c0_286 = arith.constant 0 : index
    %c0_287 = arith.constant 0 : index
    %634 = vector.load %arg10[%c7_285, %c0_286, %c0_287] : memref<8x64x32xf32, #tpu.memory_space<vmem>>, vector<1x64x32xf32>
    %635 = vector.shape_cast %634 : vector<1x64x32xf32> to vector<64x32xf32>
    %636 = arith.mulf %623, %623 : vector<8x32xf32>
    %cst_288 = arith.constant dense<0.000000e+00> : vector<8xf32>
    %637 = vector.multi_reduction <add>, %636, %cst_288 [1] : vector<8x32xf32> to vector<8xf32>
    %638 = vector.shape_cast %637 : vector<8xf32> to vector<8x1xf32>
    %cst_289 = arith.constant 3.200000e+01 : f32
    %639 = vector.broadcast %cst_289 : f32 to vector<8x1xf32>
    %640 = arith.divf %638, %639 : vector<8x1xf32>
    %cst_290 = arith.constant 9.99999997E-7 : f32
    %641 = vector.broadcast %cst_290 : f32 to vector<8x1xf32>
    %642 = arith.addf %640, %641 : vector<8x1xf32>
    %643 = math.rsqrt %642 : vector<8x1xf32>
    %644 = vector.broadcast %643 : vector<8x1xf32> to vector<8x32xf32>
    %645 = arith.mulf %623, %644 : vector<8x32xf32>
    %646 = vector.broadcast %625 : vector<1x32xf32> to vector<8x32xf32>
    %647 = arith.mulf %645, %646 : vector<8x32xf32>
    %cst_291 = arith.constant dense<0.000000e+00> : vector<8x160xf32>
    %648 = tpu.matmul %647, %629, %cst_291 {dimension_numbers = #tpu.dot_dimension_numbers<[1], [0], [0], [1], [0, 0, 1, 1], [], []>} : vector<8x32xf32>, vector<32x160xf32>, vector<8x160xf32> -> vector<8x160xf32>
    %649 = vector.extract_strided_slice %648 {offsets = [0, 0], sizes = [8, 32], strides = [1, 1]} : vector<8x160xf32> to vector<8x32xf32>
    %650 = arith.mulf %649, %5 : vector<8x32xf32>
    %651 = vector.extract_strided_slice %648 {offsets = [0, 32], sizes = [8, 32], strides = [1, 1]} : vector<8x160xf32> to vector<8x32xf32>
    %652 = arith.mulf %651, %7 : vector<8x32xf32>
    %653 = arith.addf %650, %652 : vector<8x32xf32>
    %654 = vector.extract_strided_slice %648 {offsets = [0, 64], sizes = [8, 32], strides = [1, 1]} : vector<8x160xf32> to vector<8x32xf32>
    %655 = arith.mulf %654, %5 : vector<8x32xf32>
    %656 = vector.extract_strided_slice %648 {offsets = [0, 96], sizes = [8, 32], strides = [1, 1]} : vector<8x160xf32> to vector<8x32xf32>
    %657 = arith.mulf %656, %7 : vector<8x32xf32>
    %658 = arith.addf %655, %657 : vector<8x32xf32>
    %659 = vector.extract_strided_slice %648 {offsets = [0, 128], sizes = [8, 32], strides = [1, 1]} : vector<8x160xf32> to vector<8x32xf32>
    %c0_292 = arith.constant 0 : index
    %c0_293 = arith.constant 0 : index
    %c224 = arith.constant 224 : index
    %660 = vector.load %arg12[%c0_292, %c0_293, %c224] : memref<1x8x256xf32, #tpu.memory_space<vmem>>, vector<1x8x32xf32>
    %661 = vector.shape_cast %660 : vector<1x8x32xf32> to vector<8x32xf32>
    %662 = vector.shape_cast %658 : vector<8x32xf32> to vector<1x8x32xf32>
    tpu.vector_store %arg12[%c0_292, %c0_293, %c224], %662 {strides = array<i32>} : memref<1x8x256xf32, #tpu.memory_space<vmem>>, vector<1x8x32xf32>,
    %c0_294 = arith.constant 0 : index
    %c0_295 = arith.constant 0 : index
    %c224_296 = arith.constant 224 : index
    %663 = vector.load %arg13[%c0_294, %c0_295, %c224_296] : memref<1x8x256xf32, #tpu.memory_space<vmem>>, vector<1x8x32xf32>
    %664 = vector.shape_cast %663 : vector<1x8x32xf32> to vector<8x32xf32>
    %665 = vector.shape_cast %659 : vector<8x32xf32> to vector<1x8x32xf32>
    tpu.vector_store %arg13[%c0_294, %c0_295, %c224_296], %665 {strides = array<i32>} : memref<1x8x256xf32, #tpu.memory_space<vmem>>, vector<1x8x32xf32>,
    %666 = vector.shape_cast %653 : vector<8x32xf32> to vector<8x4x8xf32>
    %667 = vector.shape_cast %658 : vector<8x32xf32> to vector<8x4x8xf32>
    %668 = vector.shape_cast %659 : vector<8x32xf32> to vector<8x4x8xf32>
    "tpu.trace_start"() <{level = 10 : i32, message = "qhd,khd->hqk"}> : () -> ()
    %cst_297 = arith.constant dense<0.000000e+00> : vector<4x8x8xf32>
    %669 = tpu.matmul %666, %667, %cst_297 {dimension_numbers = #tpu.dot_dimension_numbers<[2], [2], [0], [0], [0, 1, 0, 0, 1, 0], [1], [1]>} : vector<8x4x8xf32>, vector<8x4x8xf32>, vector<4x8x8xf32> -> vector<4x8x8xf32>
    "tpu.trace_stop"() : () -> ()
    %670 = vector.shape_cast %3 : vector<8x8xf32> to vector<1x8x8xf32>
    %671 = vector.broadcast %670 : vector<1x8x8xf32> to vector<4x8x8xf32>
    %672 = arith.addf %669, %671 : vector<4x8x8xf32>
    %cst_298 = arith.constant dense<0xFF800000> : vector<4x8xf32>
    %673 = vector.multi_reduction <maximumf>, %672, %cst_298 [2] : vector<4x8x8xf32> to vector<4x8xf32>
    %674 = vector.shape_cast %673 : vector<4x8xf32> to vector<4x8x1xf32>
    %675 = vector.broadcast %674 : vector<4x8x1xf32> to vector<4x8x8xf32>
    %676 = arith.subf %672, %675 : vector<4x8x8xf32>
    %677 = math.exp %676 : vector<4x8x8xf32>
    %cst_299 = arith.constant dense<0.000000e+00> : vector<4x8xf32>
    %678 = vector.multi_reduction <add>, %677, %cst_299 [2] : vector<4x8x8xf32> to vector<4x8xf32>
    %679 = vector.shape_cast %678 : vector<4x8xf32> to vector<4x8x1xf32>
    %680 = tpu.reciprocal %679 {approx = true} : vector<4x8x1xf32> -> vector<4x8x1xf32>
    %681 = vector.broadcast %680 : vector<4x8x1xf32> to vector<4x8x8xf32>
    %682 = arith.mulf %677, %681 : vector<4x8x8xf32>
    "tpu.trace_start"() <{level = 10 : i32, message = "hqk,khd->qhd"}> : () -> ()
    %cst_300 = arith.constant dense<0.000000e+00> : vector<4x8x8xf32>
    %683 = tpu.matmul %668, %682, %cst_300 {dimension_numbers = #tpu.dot_dimension_numbers<[0], [2], [2], [1], [0, 1, 0, 2, 1, 1], [1], [0]>} : vector<8x4x8xf32>, vector<4x8x8xf32>, vector<4x8x8xf32> -> vector<4x8x8xf32>
    %684 = tpu.transpose %683, [2, 0, 1] : vector<4x8x8xf32> -> vector<8x4x8xf32>
    "tpu.trace_stop"() : () -> ()
    %685 = vector.shape_cast %684 : vector<8x4x8xf32> to vector<8x32xf32>
    %cst_301 = arith.constant dense<0.000000e+00> : vector<8x32xf32>
    %686 = tpu.matmul %685, %631, %cst_301 {dimension_numbers = #tpu.dot_dimension_numbers<[1], [0], [0], [1], [0, 0, 1, 1], [], []>} : vector<8x32xf32>, vector<32x32xf32>, vector<8x32xf32> -> vector<8x32xf32>
    %687 = arith.addf %623, %686 : vector<8x32xf32>
    %688 = arith.mulf %687, %687 : vector<8x32xf32>
    %cst_302 = arith.constant dense<0.000000e+00> : vector<8xf32>
    %689 = vector.multi_reduction <add>, %688, %cst_302 [1] : vector<8x32xf32> to vector<8xf32>
    %690 = vector.shape_cast %689 : vector<8xf32> to vector<8x1xf32>
    %cst_303 = arith.constant 3.200000e+01 : f32
    %691 = vector.broadcast %cst_303 : f32 to vector<8x1xf32>
    %692 = arith.divf %690, %691 : vector<8x1xf32>
    %cst_304 = arith.constant 9.99999997E-7 : f32
    %693 = vector.broadcast %cst_304 : f32 to vector<8x1xf32>
    %694 = arith.addf %692, %693 : vector<8x1xf32>
    %695 = math.rsqrt %694 : vector<8x1xf32>
    %696 = vector.broadcast %695 : vector<8x1xf32> to vector<8x32xf32>
    %697 = arith.mulf %687, %696 : vector<8x32xf32>
    %698 = vector.broadcast %627 : vector<1x32xf32> to vector<8x32xf32>
    %699 = arith.mulf %697, %698 : vector<8x32xf32>
    %cst_305 = arith.constant dense<0.000000e+00> : vector<8x128xf32>
    %700 = tpu.matmul %699, %633, %cst_305 {dimension_numbers = #tpu.dot_dimension_numbers<[1], [0], [0], [1], [0, 0, 1, 1], [], []>} : vector<8x32xf32>, vector<32x128xf32>, vector<8x128xf32> -> vector<8x128xf32>
    %701 = vector.extract_strided_slice %700 {offsets = [0, 0], sizes = [8, 64], strides = [1, 1]} : vector<8x128xf32> to vector<8x64xf32>
    %702 = vector.extract_strided_slice %700 {offsets = [0, 64], sizes = [8, 64], strides = [1, 1]} : vector<8x128xf32> to vector<8x64xf32>
    %703 = arith.negf %701 : vector<8x64xf32>
    %704 = math.exp %703 : vector<8x64xf32>
    %cst_306 = arith.constant 1.000000e+00 : f32
    %705 = vector.broadcast %cst_306 : f32 to vector<8x64xf32>
    %706 = arith.addf %705, %704 : vector<8x64xf32>
    %707 = arith.divf %705, %706 : vector<8x64xf32>
    %708 = arith.mulf %701, %707 : vector<8x64xf32>
    %709 = arith.mulf %708, %702 : vector<8x64xf32>
    %cst_307 = arith.constant dense<0.000000e+00> : vector<8x32xf32>
    %710 = tpu.matmul %709, %635, %cst_307 {dimension_numbers = #tpu.dot_dimension_numbers<[1], [0], [0], [1], [0, 0, 1, 1], [], []>} : vector<8x64xf32>, vector<64x32xf32>, vector<8x32xf32> -> vector<8x32xf32>
    %711 = arith.addf %687, %710 : vector<8x32xf32>
    %c0_308 = arith.constant 0 : index
    %c0_309 = arith.constant 0 : index
    %c0_310 = arith.constant 0 : index
    %712 = vector.load %arg11[%c0_308, %c0_309, %c0_310] : memref<1x8x32xf32, #tpu.memory_space<vmem>>, vector<1x8x32xf32>
    %713 = vector.shape_cast %712 : vector<1x8x32xf32> to vector<8x32xf32>
    %714 = vector.shape_cast %711 : vector<8x32xf32> to vector<1x8x32xf32>
    tpu.vector_store %arg11[%c0_308, %c0_309, %c0_310], %714 {strides = array<i32>} : memref<1x8x32xf32, #tpu.memory_space<vmem>>, vector<1x8x32xf32>,
    return
  }
  func.func @transform_0(%arg0: i32) -> (i32, i32, i32) {
    %c0_i32 = arith.constant 0 : i32
    %c0_i32_0 = arith.constant 0 : i32
    %c0_i32_1 = arith.constant 0 : i32
    return %arg0, %c0_i32, %c0_i32_0 : i32, i32, i32
  }
  func.func @transform_1(%arg0: i32) -> (i32, i32, i32) {
    %c0_i32 = arith.constant 0 : i32
    %c0_i32_0 = arith.constant 0 : i32
    %c0_i32_1 = arith.constant 0 : i32
    return %arg0, %c0_i32, %c0_i32_0 : i32, i32, i32
  }
  func.func @transform_2(%arg0: i32) -> (i32, i32, i32) {
    %c0_i32 = arith.constant 0 : i32
    %c0_i32_0 = arith.constant 0 : i32
    %c0_i32_1 = arith.constant 0 : i32
    return %arg0, %c0_i32, %c0_i32_0 : i32, i32, i32
  }
  func.func @transform_3(%arg0: i32) -> (i32, i32, i32) {
    %c0_i32 = arith.constant 0 : i32
    %c0_i32_0 = arith.constant 0 : i32
    %c0_i32_1 = arith.constant 0 : i32
    return %arg0, %c0_i32, %c0_i32_0 : i32, i32, i32
  }
  func.func @transform_4(%arg0: i32) -> (i32, i32, i32) {
    %c0_i32 = arith.constant 0 : i32
    %c0_i32_0 = arith.constant 0 : i32
    %c0_i32_1 = arith.constant 0 : i32
    %c0_i32_2 = arith.constant 0 : i32
    return %c0_i32, %c0_i32_0, %c0_i32_1 : i32, i32, i32
  }
  func.func @transform_5(%arg0: i32) -> (i32, i32, i32) {
    %c0_i32 = arith.constant 0 : i32
    %c0_i32_0 = arith.constant 0 : i32
    %c0_i32_1 = arith.constant 0 : i32
    %c0_i32_2 = arith.constant 0 : i32
    return %c0_i32, %c0_i32_0, %c0_i32_1 : i32, i32, i32
  }
  func.func @transform_6(%arg0: i32) -> (i32, i32, i32) {
    %c0_i32 = arith.constant 0 : i32
    %c0_i32_0 = arith.constant 0 : i32
    %c0_i32_1 = arith.constant 0 : i32
    %c0_i32_2 = arith.constant 0 : i32
    return %c0_i32, %c0_i32_0, %c0_i32_1 : i32, i32, i32
  }
  func.func @transform_7(%arg0: i32) -> (i32, i32, i32) {
    %c0_i32 = arith.constant 0 : i32
    %c0_i32_0 = arith.constant 0 : i32
    %c0_i32_1 = arith.constant 0 : i32
    %c0_i32_2 = arith.constant 0 : i32
    return %c0_i32, %c0_i32_0, %c0_i32_1 : i32, i32, i32
  }
  func.func @transform_8(%arg0: i32) -> (i32, i32, i32) {
    %c0_i32 = arith.constant 0 : i32
    %c0_i32_0 = arith.constant 0 : i32
    %c0_i32_1 = arith.constant 0 : i32
    %c0_i32_2 = arith.constant 0 : i32
    return %c0_i32, %c0_i32_0, %c0_i32_1 : i32, i32, i32
  }
  func.func @transform_9(%arg0: i32) -> (i32, i32, i32) {
    %c0_i32 = arith.constant 0 : i32
    %c0_i32_0 = arith.constant 0 : i32
    %c0_i32_1 = arith.constant 0 : i32
    %c0_i32_2 = arith.constant 0 : i32
    return %c0_i32, %c0_i32_0, %c0_i32_1 : i32, i32, i32
  }
  func.func @transform_10(%arg0: i32) -> (i32, i32, i32) {
    %c0_i32 = arith.constant 0 : i32
    %c0_i32_0 = arith.constant 0 : i32
    %c0_i32_1 = arith.constant 0 : i32
    return %arg0, %c0_i32, %c0_i32_0 : i32, i32, i32
  }
  func.func @transform_11(%arg0: i32) -> (i32, i32, i32) {
    %c0_i32 = arith.constant 0 : i32
    %c0_i32_0 = arith.constant 0 : i32
    %c0_i32_1 = arith.constant 0 : i32
    return %arg0, %c0_i32, %c0_i32_0 : i32, i32, i32
  }
  func.func @transform_12(%arg0: i32) -> (i32, i32, i32) {
    %c0_i32 = arith.constant 0 : i32
    %c0_i32_0 = arith.constant 0 : i32
    %c0_i32_1 = arith.constant 0 : i32
    return %arg0, %c0_i32, %c0_i32_0 : i32, i32, i32
  }
}

</mosaic_0001>

<bundles_post_ra>
// kernel: tile.19
= control target key start
LH: loop header
LB: loop body
LE: loop exit
PB: predicated region body
PF: predicated region fallthrough
CT: control target
= control target key end

     0   :  { %vm68_vm0 = vcmask 1047556   ;;  %s167_s9 = smov 16   ;;  %s168_s10 = smov 8   ;;  %vm70_vm1 = vcmask 64512   ;;  %vm89_vm2 = vcmask 261312   ;;  %vm110_vm3 = vcmask 195712   ;;  %s259_s0 = inlined_call_operand.vmem [shape: f32[2,8,4,8], index: 0, kind: input, shape index: {}]   ;;  %s260_s1 = inlined_call_operand.vmem [shape: f32[2,8,32], index: 1, kind: output, shape index: {}]  }
   0x1   :  { %v152_v0 = vld [vmem:[%s259_s0 + $0x1c] sm:$0xf]  ;;  %v153_v1 = vld [vmem:[%s259_s0 + $0x18] sm:$0xf]  ;;  %v154_v2 = vld [vmem:[%s259_s0 + $0x14] sm:$0xf] }
   0x2   :  { %39 = vst [vmem:[#allocation0 + $0x38] sm:$0xf] %v152_v0  ;;  %v155_v3 = vld [vmem:[%s259_s0 + $0x10] sm:$0xf]  ;;  %v156_v4 = vld [vmem:[%s259_s0 + $0xc] sm:$0xf] }
   0x3   :  { %43 = vst [vmem:[#allocation0 + $0x30] sm:$0xf] %v153_v1  ;;  %v157_v5 = vld [vmem:[%s259_s0 + $0x8] sm:$0xf]  ;;  %v158_v6 = vld [vmem:[%s259_s0 + $0x4] sm:$0xf] }
   0x4   :  { %47 = vst [vmem:[#allocation0 + $0x28] sm:$0xf] %v154_v2  ;;  %v64_v7 = vld [vmem:[%s259_s0] sm:$0xf]  ;;  %v144_v8 = vld [vmem:[%s259_s0 + $0x3c] sm:$0xf] }
   0x5   :  { %51 = vst [vmem:[#allocation0 + $0x20] sm:$0xf] %v155_v3  ;;  %v145_v9 = vld [vmem:[%s259_s0 + $0x38] sm:$0xf]  ;;  %v146_v10 = vld [vmem:[%s259_s0 + $0x34] sm:$0xf] }
   0x6   :  { %55 = vst [vmem:[#allocation0 + $0x18] sm:$0xf] %v156_v4  ;;  %v147_v11 = vld [vmem:[%s259_s0 + $0x30] sm:$0xf]  ;;  %v148_v12 = vld [vmem:[%s259_s0 + $0x2c] sm:$0xf] }
   0x7   :  { %59 = vst [vmem:[#allocation0 + $0x10] sm:$0xf] %v157_v5  ;;  %v149_v13 = vld [vmem:[%s259_s0 + $0x28] sm:$0xf]  ;;  %v150_v15 = vld [vmem:[%s259_s0 + $0x24] sm:$0xf] }
   0x8   :  { %63 = vst [vmem:[#allocation0 + $0x8] sm:$0xf] %v158_v6  ;;  %v151_v17 = vld [vmem:[%s259_s0 + $0x20] sm:$0xf]  ;;  %s166_s0 = smov 24   ;;  %vm131_vm4 = vcmask 130112  }
   0x9   :  { %65 = vst [vmem:[#allocation0] sm:$0xf] %v64_v7 }
   0xa   :  { %7 = vst [vmem:[#allocation0 + $0x78] sm:$0xf] %v144_v8 }
   0xb   :  { %11 = vst [vmem:[#allocation0 + $0x70] sm:$0xf] %v145_v9 }
   0xc   :  { %v84_v14 = vld [vmem:[#allocation0 + $0x3] ss:$8 sm:$0xf0]   ;;  %15 = vst [vmem:[#allocation0 + $0x68] sm:$0xf] %v146_v10 }
   0xd   :  { %v105_v16 = vld [vmem:[#allocation0 + $0x2] ss:$8 sm:$0xf0]   ;;  %19 = vst [vmem:[#allocation0 + $0x60] sm:$0xf] %v147_v11 }
   0xe   :  { %23 = vst [vmem:[#allocation0 + $0x58] sm:$0xf] %v148_v12  ;;  %v126_v18 = vld [vmem:[#allocation0 + $0x1] ss:$8 sm:$0xf0]  }
   0xf   :  { %27 = vst [vmem:[#allocation0 + $0x50] sm:$0xf] %v149_v13  ;;  %v67_v35 = vld [vmem:[#allocation0] ss:$8 sm:$0xf0]  }
  0x10   :  { %v82_v19 = vld [vmem:[#allocation0 + $0x3] ss:$8 sm:$0xf]   ;;  %v103_v20 = vld [vmem:[#allocation0 + $0x2] ss:$8 sm:$0xf]  }
  0x11   :  { %v86_v21 = vsel %vm68_vm0, %v84_v14, %v82_v19  ;;  %v107_v22 = vsel %vm68_vm0, %v105_v16, %v103_v20  ;;  %v124_v23 = vld [vmem:[#allocation0 + $0x1] ss:$8 sm:$0xf]   ;;  %31 = vst [vmem:[#allocation0 + $0x48] sm:$0xf] %v150_v15 }
  0x12   :  { %87 = vrot.lane.b32.xlu0 %v86_v21, %s166_s0  ;;  %108 = vrot.lane.b32.xlu1 %v107_v22, %s167_s9  ;;  %v128_v24 = vsel %vm68_vm0, %v126_v18, %v124_v23  ;;  %35 = vst [vmem:[#allocation0 + $0x40] sm:$0xf] %v151_v17  ;;  %v66_v34 = vld [vmem:[#allocation0] ss:$8 sm:$0xf]  }
  0x13   :  { %129 = vrot.lane.b32.xlu2 %v128_v24, %s168_s10  ;;  %v69_v36 = vsel %vm68_vm0, %v67_v35, %v66_v34 }
  0x14   :  { %v94_v25 = vld [vmem:[#allocation0 + $0x43] ss:$8 sm:$0xf0]   ;;  %v115_v26 = vld [vmem:[#allocation0 + $0x42] ss:$8 sm:$0xf0]  }
  0x15   :  { %v136_v27 = vld [vmem:[#allocation0 + $0x41] ss:$8 sm:$0xf0]   ;;  %71 = vst.msk [vmem:[%s260_s1] sm:$0xff] %vm70_vm1, %v69_v36  }
  0x16   :  { %v75_v38 = vld [vmem:[#allocation0 + $0x40] ss:$8 sm:$0xf0]  }
  0x19   :  { %v92_v28 = vld [vmem:[#allocation0 + $0x43] ss:$8 sm:$0xf]   ;;  %v113_v29 = vld [vmem:[#allocation0 + $0x42] ss:$8 sm:$0xf]  }
  0x1a   :  { %v96_v30 = vsel %vm68_vm0, %v94_v25, %v92_v28  ;;  %v117_v31 = vsel %vm68_vm0, %v115_v26, %v113_v29  ;;  %v134_v32 = vld [vmem:[#allocation0 + $0x41] ss:$8 sm:$0xf]   ;;  %v73_v37 = vld [vmem:[#allocation0 + $0x40] ss:$8 sm:$0xf]  }
  0x1b   :  { %97 = vrot.lane.b32.xlu0 %v96_v30, %s166_s0  ;;  %118 = vrot.lane.b32.xlu1 %v117_v31, %s167_s9  ;;  %v138_v33 = vsel %vm68_vm0, %v136_v27, %v134_v32  ;;  %v77_v40 = vsel %vm68_vm0, %v75_v38, %v73_v37 }
  0x1c   :  { %139 = vrot.lane.b32.xlu2 %v138_v33, %s168_s10  ;;  %159 = vst.msk [vmem:[%s260_s1 + $0x8] sm:$0xff] %vm70_vm1, %v77_v40  }
  0x6d   :  { %v130_v39 = vpop.permute.xlu2 %129  }
  0x76   :  { %v140_v41 = vpop.permute.xlu2 %139  }
  0x84   :  { %v88_v42 = vpop.permute.xlu0 %87   ;;  %v109_v43 = vpop.permute.xlu1 %108  }
  0x85   :  { %90 = vst.msk [vmem:[%s260_s1] sm:$0xff] %vm89_vm2, %v88_v42  }
  0x86   :  { %111 = vst.msk [vmem:[%s260_s1] sm:$0xff] %vm110_vm3, %v109_v43  }
  0x87   :  { %132 = vst.msk [vmem:[%s260_s1] sm:$0xff] %vm131_vm4, %v130_v39  }
  0x8d   :  { %v98_v44 = vpop.permute.xlu0 %97   ;;  %v119_v45 = vpop.permute.xlu1 %118  }
  0x8e   :  { %160 = vst.msk [vmem:[%s260_s1 + $0x8] sm:$0xff] %vm89_vm2, %v98_v44  }
  0x8f   :  { %161 = vst.msk [vmem:[%s260_s1 + $0x8] sm:$0xff] %vm110_vm3, %v119_v45  }
  0x90   :  { %162 = vst.msk [vmem:[%s260_s1 + $0x8] sm:$0xff] %vm131_vm4, %v140_v41  }

// kernel: _lambda_.1
= control target key start
LH: loop header
LB: loop body
LE: loop exit
PB: predicated region body
PF: predicated region fallthrough
CT: control target
= control target key end

     0   :  { %s11150_s0 = inlined_call_operand.vmem [shape: f32[2,8,32], index: 0, kind: input, shape index: {}]   ;;  %s11151_s1 = inlined_call_operand.vmem [shape: f32[2,8,8], index: 1, kind: input, shape index: {}]   ;;  %s11152_s2 = inlined_call_operand.vmem [shape: f32[2,8,32], index: 2, kind: input, shape index: {}]   ;;  %s11153_s3 = inlined_call_operand.vmem [shape: f32[2,8,32], index: 3, kind: input, shape index: {}]   ;;  %s11154_s4 = inlined_call_operand.vmem [shape: f32[8,1,32], index: 4, kind: input, shape index: {}, may-alias: {4,5}]   ;;  %s11155_s5 = inlined_call_operand.vmem [shape: f32[8,1,32], index: 5, kind: input, shape index: {}, may-alias: {4,5}]   ;;  %s11156_s6 = inlined_call_operand.hbm [shape: f32[8,32,160], index: 6, kind: input, shape index: {}]   ;;  %s11157_s7 = inlined_call_operand.hbm [shape: f32[8,32,32], index: 7, kind: input, shape index: {}]   ;;  %s11158_s8 = inlined_call_operand.vmem [shape: f32[8,32,128], index: 8, kind: input, shape index: {}]   ;;  %s11159_s9 = inlined_call_operand.hbm [shape: f32[8,64,32], index: 9, kind: input, shape index: {}]   ;;  %s11160_s10 = inlined_call_operand.hbm [shape: f32[2,8,32], index: 10, kind: output, shape index: {0}]   ;;  %s11161_s11 = inlined_call_operand.vmem [shape: f32[2,8,256], index: 11, kind: output, shape index: {1}]   ;;  %s11162_s12 = inlined_call_operand.vmem [shape: f32[2,8,256], index: 12, kind: output, shape index: {2}]  }
   0x1   :  { %11186 = sst [smem:[#allocation17_spill]] %s11150_s0 }
   0x2   :  { %11187 = sst [smem:[#allocation18_spill]] %s11151_s1 }
   0x3   :  { %11188 = sst [smem:[#allocation19_spill]] %s11152_s2 }
   0x4   :  { %11189 = sst [smem:[#allocation20_spill]] %s11153_s3 }
   0x5   :  { %11190 = sst [smem:[#allocation21_spill]] %s11156_s6 }
   0x6   :  { %11191 = sst [smem:[#allocation22_spill]] %s11157_s7 }
   0x7   :  { %18 = vsyncpa [#allocation3], 0 }
   0x8   :  { %19 = vsyncpa [#allocation6], 0 }
   0x9   :  { %20 = vsyncpa [#allocation4], 0 }
   0xa   :  { %22 = vsyncpa [#allocation4 + $0x1], 0  ;;  %s9790_s21 = smov 0   ;;  %s9792_s22 = smov 0  }
   0xb   :  { %s9794_s23 = smov 0   ;;  %s9796_s24 = smov 0  }
   0xc LB: > { %11192 = sst [smem:[#allocation12_spill]] %s9692_s21  ;;  %s9811_s25 = sadd.s32 4294967295, %s9704_s24   ;;  %s9704_s24 = sphi %s9796_s24, %s11218_s24   ;;  %s9700_s23 = sphi %s9794_s23, %s11220_s23   ;;  %s9696_s22 = sphi %s9792_s22, %s11222_s22   ;;  %s9692_s21 = sphi %s9790_s21, %s11221_s21  }
   0xd   : > { %11193 = sst [smem:[#allocation13_spill]] %s9700_s23  ;;  %s8879_s26 = sadd.s32 4294967294, %s9704_s24  }
   0xe   : > { %s9815_s27 = sadd.s32 1, %s9704_s24   ;;  %s265_s28 = sadd.s32 1, %s9700_s23 }
   0xf   : > { %11194 = sst [smem:[#allocation14_spill]] %s9815_s27  ;;  %s262_s29 = ssub.s32 %s9704_s24, %s9815_s27 }
  0x10   : > { %p275_p0 = scmp.ne.s32.totalorder %s9700_s23, %s9696_s22  ;;  %p263_p1 = scmp.eq.s32.totalorder %s262_s29, 0 }
  0x11   : > { %p276_p2 = scmp.eq.s32.totalorder %s9811_s25, 1  ;;  %p281_p3 = scmp.ne.s32.totalorder %s9696_s22, %s9692_s21 }
  0x12   : > { %p282_p4 = scmp.eq.s32.totalorder %s8879_s26, 1  ;;  %p8880_p7 = scmp.ge.s32.totalorder %s9704_s24, 1 }
  0x13   : > { %s9826_s30 = scalar_select %p263_p1, %s9700_s23, %s265_s28  }
  0x14   : > { %p9828_p5 = por %p276_p2, %p275_p0  ;;  %p9832_p6 = por %p282_p4, %p281_p3 }
  0x15   : > { %11195 = sst [smem:[#allocation15_spill]] %s9826_s30  ;;  %p341_p8 = scmp.lt.s32.totalorder %s9704_s24, 3 }
  0x16   : > { %s11197_s14 = scalar_select %p9832_p6, 1, 0 }
  0x17   : > { %p9118_p9 = scmp.eq.s32.totalorder %s9811_s25, 0  ;;  %p9839_p10 = pnand %p8880_p7, %p341_p8 }
  0x18   : > { %11198 = sst [smem:[#allocation16_spill]] %s11197_s14  ;;  %s9706_s19 = smov [#allocation5]  }
  0x19   : > { %s11200_s7 = sld [smem:[#allocation22_spill]]  ;;  %p9104_p11 = pneg %p9839_p10 }
  0x1a   : > { %s374_s20 = sshll.u32 %s9706_s19, 4  ;;  %s11202_s6 = sld [smem:[#allocation21_spill]]  ;;  %s375_s20 = int_to_ptr.vmem [resolvable:$true] %s374_s20 }
  0x1b   : > { %p9850_p12 = pnand %p9118_p9, %p9104_p11  ;;  %s9707_s16 = smov 128  }
  0x1c   : > { %s9708_s17 = smov 8   ;;  %s9710_s23 = smov 256  }
  0x1d   : > { %s9711_s27 = smov 16   ;;  %s389_s28 = sshll.u32 %s11159_s9, 4  ;;  %s390_s28 = int_to_ptr.hbm [resolvable:$true] %s389_s28 }
  0x1e   : > { %s9712_s29 = smov [#allocation7]  }
  0x1f   : > { %s372_s18 = sshll.u32 %s11200_s7, 4  ;;  %s9709_s7 = smov [#allocation2]   ;;  %s373_s18 = int_to_ptr.hbm [resolvable:$true] %s372_s18 }
  0x20   : > { %s358_s30 = sshll.u32 %s11202_s6, 4  ;;  %s360_s19 = sshll.u32 %s9709_s7, 4  ;;  %s359_s30 = int_to_ptr.hbm [resolvable:$true] %s358_s30  ;;  %s361_s19 = int_to_ptr.vmem [resolvable:$true] %s360_s19 }
  0x21   : > { %9110 = dma.hbm_to_vmem [thread:$0]  (!%p9850_p12), %s373_s18, 4096, %s375_s20, [#allocation6], %s9707_s16, %s9707_s16, %s9708_s17  }
  0x22   : > { %9107 = dma.hbm_to_vmem [thread:$0]  (!%p9850_p12), %s359_s30, 8192, %s361_s19, [#allocation3], %s9710_s23, %s9710_s23, %s9711_s27  }
  0x23   : > { %s391_s6 = sshll.u32 %s9712_s29, 4  ;;  %435 = sbr.rel (%p9839_p10) target bundleno = 19079 (0x4a87), region = 60  ;;  %s392_s6 = int_to_ptr.vmem [resolvable:$true] %s391_s6 }
  0x24   : > { %9113 = dma.hbm_to_vmem [thread:$0]  (!%p9850_p12), %s390_s28, 8192, %s392_s6, [#allocation6], %s9707_s16, %s9707_s16, %s9708_s17  }
  0x28   : > { %9679 = dma.done.wait (%p9118_p9), [#allocation3], 8192  }
  0x29   : > { %9681 = vsyncadd (%p9118_p9), [#allocation3], 4294959104 }
  0x2a   : > { %9683 = dma.done.wait (%p9118_p9), [#allocation6], 12288  }
  0x2b   : > { %9685 = vsyncadd (%p9118_p9), [#allocation6], 4294955008  ;;  %p509_p13 = scmp.lt.s32.totalorder %s9811_s25, 1  ;;  %s11203_s0 = sld [smem:[#allocation17_spill]]  ;;  %vm566_vm0 = vcmask 261120   ;;  %v9714_v4 = vmov 32.0  }
  0x2c   : > { %s11204_s2 = sld [smem:[#allocation19_spill]]  ;;  %s11184_s18 = smov 64   ;;  %9344 = vrcp.f32 %v9714_v4  ;;  %v547_v8 = vld [vmem:[#allocation2 + $0x30] sm:$0xff]  ;;  %v545_v9 = vld [vmem:[#allocation2 + $0x20] sm:$0xff]  ;;  %v548_v14 = vld [vmem:[#allocation2 + $0x38] sm:$0xff]  ;;  %vm828_vm5 = vcmask 64512  }
  0x2d   : > { %s9878_s7 = scalar_select %p509_p13, %s9811_s25, 1  ;;  %609 = vmatpush.msra.mxu1 %v547_v8  ;;  %v543_v10 = vld [vmem:[#allocation2 + $0x10] sm:$0xff]  ;;  %v541_v12 = vld [vmem:[#allocation2] sm:$0xff]  ;;  %v546_v15 = vld [vmem:[#allocation2 + $0x28] sm:$0xff]  ;;  %vm1322_vm6 = vcmask 1047556   ;;  %vm1445_vm7 = vcmask 130048  }
  0x2e   : > { %v544_v16 = vld [vmem:[#allocation2 + $0x18] sm:$0xff]  ;;  %v542_v18 = vld [vmem:[#allocation2 + $0x8] sm:$0xff]  ;;  %s11205_s3 = sld [smem:[#allocation20_spill]]  ;;  %s11182_s17 = smov 96   ;;  %v9328_v29 = vld [vmem:[%s11154_s4] ss:$0 sm:$0xff] }
  0x2f   : > { %s9881_s6 = sshll.u32 %s9878_s7, 3  ;;  %610 = vmatpush.msra.mxu1 %v545_v9  ;;  %s11168_s19 = smov 32   ;;  %vm1447_vm8 = vcmask 195584  }
  0x30   : > { %s9088_s21 = sshll.u32 %s9878_s7, 4  ;;  %s11176_s7 = smov 112  }
  0x31   : > { %s512_s27 = scalar_lea.vmem %s11203_s0, %s9881_s6  ;;  %611 = vmatpush.msra.mxu1 %v543_v10  ;;  %s9926_s30 = scalar_lea.vmem %s11162_s12, %s9088_s21 }
  0x32   : > { %v9887_v0 = vld [vmem:[%s512_s27] sm:$0xff]  ;;  %s9896_s15 = scalar_lea.vmem %s11204_s2, %s9881_s6  ;;  %v9345_v5 = vpop.eup %9344  ;;  %s11178_s14 = smov 120  }
  0x33   : > { %v565_v1 = vmul.f32 %v9887_v0, %v9887_v0  ;;  %v9899_v3 = vld [vmem:[%s9896_s15] sm:$0xff]  ;;  %v571_v6 = vmul.f32 32.0, %v9345_v5  ;;  %612 = vmatpush.msra.mxu1 %v541_v12  ;;  %vm575_vm1 = vweird.f32 %v9345_v5  ;;  %s11180_s20 = smov 104   ;;  %s9948_s28 = scalar_lea.vmem %s11161_s11, %s9088_s21 }
  0x34   : > { %649 = vrot.lane.b32.xlu1 %v9899_v3, %s11184_s18  ;;  %s524_s16 = scalar_lea.vmem %s11205_s3, %s9881_s6  ;;  %s11206_s1 = sld [smem:[#allocation18_spill]] }
  0x35   : > { %v567_v2 = vsel %vm566_vm0, %v565_v1, 0.0  ;;  %v572_v7 = vsub.f32 1.0, %v571_v6  ;;  %629 = vmatpush.msrb.mxu1 %v548_v14  ;;  %v538_v22 = vld [vmem:[%s524_s16] sm:$0xff]  ;;  %s11174_s27 = smov 16   ;;  %s11170_s26 = smov 8  }
  0x36   : > { %568 = vadd.xlane.f32.xlu0 %v567_v2  ;;  %639 = vrot.lane.b32.xlu2 %v538_v22, %s11168_s19  ;;  %s11208_s16 = smov 16   ;;  %s11209_s29 = smov 24  }
  0x37   : > { %v573_v11 = vmul.f32 %v9345_v5, %v572_v7  ;;  %630 = vmatpush.msrb.mxu1 %v546_v15  ;;  %s11210_s21 = smov 8  }
  0x39   : > { %v574_v13 = vadd.f32 %v9345_v5, %v573_v11  ;;  %631 = vmatpush.msrb.mxu1 %v544_v16 }
  0x3a   : > { %s9969_s23 = scalar_lea.vmem %s11206_s1, %s9881_s6  ;;  %s11172_s6 = smov 24  }
  0x3b   : > { %v9903_v17 = vsel %vm575_vm1, %v9345_v5, %v574_v13  ;;  %632 = vmatpush.msrb.mxu1 %v542_v18  ;;  %v9972_v63 = vld [vmem:[%s9969_s23] sm:$0xff]  ;;  %vm1542_vm1 = vcmask 523264  }
  0x4a   : > { %653 = vrot.lane.b32.xlu0 %v538_v22, %s11182_s17 }
  0x90   : > { %v9938_v41 = vpop.permute.xlu2 %639 }
  0xa6   : > { %v9933_v37 = vpop.permute.xlu1 %649 }
  0xa9   : > { %v569_v19 = vpop.xlane.xlu0 %568 }
  0xaa   : > { %v577_v20 = vmul.f32 %v9903_v17, %v569_v19 }
  0xac   : > { %v578_v21 = vadd.f32 1e-06, %v577_v20 }
  0xae   : > { %9346 = vrsqrt.f32 %v578_v21  ;;  %vm585_vm3 = vweird.f32 %v578_v21 }
  0xb4   : > { %v9347_v23 = vpop.eup %9346 }
  0xb5   : > { %v580_v24 = vmul.f32 %v9347_v23, %v578_v21  ;;  %vm586_vm2 = vweird.f32 %v9347_v23 }
  0xb6   : > { %vm587_vm4 = vmor %vm585_vm3, %vm586_vm2 }
  0xb7   : > { %v581_v25 = vmul.f32 %v9347_v23, %v580_v24 }
  0xb9   : > { %v582_v26 = vmul.f32 0.5, %v581_v25 }
  0xbb   : > { %v583_v27 = vsub.f32 1.5, %v582_v26 }
  0xbc   : > { %v9918_v33 = vpop.permute.xlu0 %653 }
  0xbd   : > { %v584_v28 = vmul.f32 %v9347_v23, %v583_v27 }
  0xbf   : > { %v588_v30 = vsel %vm587_vm4, %v9347_v23, %v584_v28 }
  0xc0   : > { %v589_v31 = vmul.f32 %v588_v30, %v9887_v0 }
  0xc2   : > { %v593_v32 = vmul.f32 %v9328_v29, %v589_v31 }
  0xc4   : > { %8898 = vmatmul.msk.f32.vlgmr.msra.gmra.mxu1 %vm566_vm0, %v593_v32 }
  0xcc   : > { %8899 = vmatmul.msk.f32.vlgmr.msrb.gmra.mxu1 %vm566_vm0, %v593_v32 }
 0x141   : > { %v614_v34 = vpop.f32.mrf.mxu1 }
 0x142   : > { %v656_v35 = vmul.f32 %v9918_v33, %v614_v34  ;;  %v652_v38 = vmul.f32 %v9933_v37, %v614_v34  ;;  %v642_v42 = vmul.f32 %v9938_v41, %v614_v34  ;;  %v637_v48 = vmul.f32 %v614_v34, %v9899_v3 }
 0x144   : > { %658 = vrot.lane.b32.xlu1 %v656_v35, %s11182_s17 }
 0x149   : > { %v9928_v36 = vpop.f32.mrf.mxu1 }
 0x14a   : > { %667 = vst.msk [vmem:[%s9926_s30] sm:$0xff] %vm566_vm0, %v9928_v36 }
 0x1b6   : > { %v659_v39 = vpop.permute.xlu1 %658 }
 0x1b7   : > { %v661_v40 = vadd.f32 %v659_v39, %v652_v38 }
 0x1b9   : > { %677 = vrot.lane.b32.xlu1 %v661_v40, %s11176_s7  ;;  %675 = vrot.lane.b32.xlu2 %v661_v40, %s11178_s14 }
 0x1c1   : > { %644 = vrot.lane.b32.xlu1 %v642_v42, %s11182_s17  ;;  %679 = vrot.lane.b32.xlu2 %v661_v40, %s11180_s20 }
 0x1c9   : > { %663 = vrot.lane.b32.xlu2 %v661_v40, %s11184_s18 }
 0x213   : > { %v676_v43 = vpop.permute.xlu2 %675 }
 0x214   : > { %691 = vrot.lane.b32.xlu0 %v676_v43, %s11184_s18 }
 0x21b   : > { %v680_v44 = vpop.permute.xlu2 %679 }
 0x223   : > { %v664_v45 = vpop.permute.xlu2 %663 }
 0x224   : > { %666 = vst.msk [vmem:[%s9948_s28] sm:$0xff] %vm566_vm0, %v664_v45 }
 0x22b   : > { %v678_v46 = vpop.permute.xlu1 %677 }
 0x22c   : > { %v9177_v47 = vpack.i.bf16 %v680_v44, %v678_v46 }
 0x22e   : > { %9178 = vrot.lane.b32.xlu1 %v9177_v47, %s11184_s18 }
 0x233   : > { %v645_v49 = vpop.permute.xlu1 %644 }
 0x234   : > { %v647_v50 = vadd.f32 %v645_v49, %v637_v48 }
 0x236   : > { %669 = vrot.lane.b32.xlu2 %v647_v50, %s11178_s14  ;;  %671 = vrot.lane.b32.xlu0 %v647_v50, %s11176_s7 }
 0x237   : > { %673 = vrot.lane.b32.xlu1 %v647_v50, %s11180_s20 }
 0x23f   : > { %685 = vrot.lane.b32.xlu1 %v9928_v36, %s11176_s7  ;;  %s11213_s7 = smov 104  }
 0x247   : > { %688 = vrot.lane.b32.xlu1 %v9928_v36, %s11180_s20 }
 0x286   : > { %v692_v51 = vpop.permute.xlu0 %691 }
 0x287   : > { %v9182_v52 = vpack.i.bf16 %v692_v51, %v664_v45 }
 0x289   : > { %9183 = vxpose.xlu2.b32.start.end [1/1] (short) (narrow) %v9182_v52, 8 }
 0x290   : > { %v670_v54 = vpop.permute.xlu2 %669 }
 0x2a0   : > { %v9179_v53 = vpop.permute.xlu1 %9178 }
 0x2a1   : > { %9190 = vxpose.xlu0.b32.start.end [1/1] (short) (narrow) %v9179_v53, 8 }
 0x2a8   : > { %v672_v58 = vpop.permute.xlu0 %671 }
 0x2a9   : > { %v674_v62 = vpop.permute.xlu1 %673 }
 0x2b1   : > { %v686_v14 = vpop.permute.xlu1 %685 }
 0x2b9   : > { %v689_v15 = vpop.permute.xlu1 %688 }
 0x322   : > { %v9184_v55 = vpop.trf.xlu2 }
 0x323   : > { %v9185_v56 = vunpack.i.l.bf16 %v9184_v55  ;;  %v9188_v57 = vunpack.i.h.bf16 %v9184_v55 }
 0x325   : > { %846 = vmatpush.msra.mxu2 %v9185_v56  ;;  %868 = vmatpush.msra.mxu3 %v9188_v57 }
 0x326   : > { %8900 = vmatmul.msk.f32.vlgmr.msra.gmra.mxu2 %vm828_vm5, %v647_v50  ;;  %8901 = vmatmul.msk.f32.vlgmr.msra.gmra.mxu3 %vm828_vm5, %v670_v54 }
 0x345   : > { %v9191_v59 = vpop.trf.xlu0 }
 0x346   : > { %v9192_v60 = vunpack.i.l.bf16 %v9191_v59  ;;  %v9195_v61 = vunpack.i.h.bf16 %v9191_v59 }
 0x348   : > { %890 = vmatpush.msrb.mxu2 %v9192_v60  ;;  %912 = vmatpush.msrb.mxu3 %v9195_v61 }
 0x349   : > { %8902 = vmatmul.msk.f32.vlgmr.msrb.gmra.mxu2 %vm828_vm5, %v672_v58  ;;  %8903 = vmatmul.msk.f32.vlgmr.msrb.gmra.mxu3 %vm828_vm5, %v674_v62  ;;  %v9720_v62 = vmov 1983009808  }
 0x3a9   : > { %v848_v1 = vpop.f32.mrf.mxu2  ;;  %v870_v5 = vpop.f32.mrf.mxu3 }
 0x3aa   : > { %v849_v2 = vadd.f32 %v848_v1, %v9972_v63  ;;  %v871_v12 = vadd.f32 %v870_v5, %v9972_v63  ;;  %v1327_v1 = vunpack.c.l.s4 %v9720_v62 }
 0x3ac   : > { %v917_v4 = vsel %vm828_vm5, %v849_v2, -inf  ;;  %v920_v13 = vsel %vm828_vm5, %v871_v12, -inf }
 0x3ad   : > { %918 = vmax.xlane.f32.xlu2 %v917_v4 }
 0x3cc   : > { %v892_v6 = vpop.f32.mrf.mxu2  ;;  %v914_v7 = vpop.f32.mrf.mxu3 }
 0x3cd   : > { %v893_v8 = vadd.f32 %v892_v6, %v9972_v63  ;;  %v915_v9 = vadd.f32 %v914_v7, %v9972_v63  ;;  %v9997_v6 = vunpack.c.0.s8 %v1327_v1 }
 0x3cf   : > { %v926_v10 = vsel %vm828_vm5, %v915_v9, -inf  ;;  %v923_v11 = vsel %vm828_vm5, %v893_v8, -inf }
 0x3d0   : > { %927 = vmax.xlane.f32.xlu0 %v926_v10  ;;  %924 = vmax.xlane.f32.xlu1 %v923_v11  ;;  %v9721_v11 = vmov 1934713408  }
 0x3d8   : > { %921 = vmax.xlane.f32.xlu1 %v920_v13 }
 0x3f1   : > { %682 = vrot.lane.b32.xlu1 %v9928_v36, %s11178_s14 }
 0x3f9   : > { %1025 = vxpose.xlu0.b32.start.end [1/1] (short) (narrow) %v686_v14, 8 }
 0x420   : > { %v919_v29 = vpop.xlane.xlu2 %918 }
 0x421   : > { %v929_v32 = vsub.f32 %v849_v2, %v919_v29 }
 0x423   : > { %v933_v35 = vmul.f32 1.442695, %v929_v32 }
 0x443   : > { %v925_v16 = vpop.xlane.xlu1 %924  ;;  %v928_v18 = vpop.xlane.xlu0 %927 }
 0x444   : > { %v931_v19 = vsub.f32 %v893_v8, %v925_v16  ;;  %v932_v21 = vsub.f32 %v915_v9, %v928_v18 }
 0x446   : > { %v937_v20 = vmul.f32 1.442695, %v931_v19  ;;  %v939_v22 = vmul.f32 1.442695, %v932_v21 }
 0x448   : > { %9348 = vpow2.f32 %v937_v20 }
 0x449   : > { %9350 = vpow2.f32 %v939_v22 }
 0x44b   : > { %v922_v23 = vpop.xlane.xlu1 %921 }
 0x44c   : > { %v930_v24 = vsub.f32 %v871_v12, %v922_v23  ;;  %v1351_v12 = vunpack.c.l.s4 %v9721_v11 }
 0x44e   : > { %v935_v25 = vmul.f32 1.442695, %v930_v24  ;;  %v9349_v26 = vpop.eup %9348  ;;  %v10003_v16 = vunpack.c.0.s8 %v1351_v12 }
 0x44f   : > { %v947_v27 = vsel %vm828_vm5, %v9349_v26, 0.0  ;;  %v9351_v28 = vpop.eup %9350 }
 0x450   : > { %9352 = vpow2.f32 %v935_v25  ;;  %948 = vadd.xlane.f32.xlu1 %v947_v27  ;;  %v950_v34 = vsel %vm828_vm5, %v9351_v28, 0.0 }
 0x451   : > { %9354 = vpow2.f32 %v933_v35 }
 0x456   : > { %v9353_v30 = vpop.eup %9352 }
 0x457   : > { %v944_v31 = vsel %vm828_vm5, %v9353_v30, 0.0  ;;  %v9355_v38 = vpop.eup %9354 }
 0x458   : > { %945 = vadd.xlane.f32.xlu2 %v944_v31  ;;  %951 = vadd.xlane.f32.xlu1 %v950_v34  ;;  %v941_v39 = vsel %vm828_vm5, %v9355_v38, 0.0 }
 0x463   : > { %v683_v40 = vpop.permute.xlu1 %682 }
 0x46a   : > { %942 = vadd.xlane.f32.xlu0 %v941_v39 }
 0x481   : > { %1057 = vxpose.xlu2.b32.start.end [1/1] (short) (narrow) %v689_v15, 8 }
 0x492   : > { %961 = vxpose.xlu1.b32.start.end [1/1] (short) (narrow) %v9928_v36, 8 }
 0x493   : > { %993 = vxpose.xlu0.b32.start.end [1/1] (short) (narrow) %v683_v40, 8 }
 0x49d   : > { %v1041_v47 = vpop.trf.xlu0 }
 0x4c3   : > { %v949_v42 = vpop.xlane.xlu1 %948 }
 0x4c4   : > { %9356 = vrcp.f32 %v949_v42 }
 0x4ca   : > { %v9357_v43 = vpop.eup %9356 }
 0x4cb   : > { %v946_v44 = vpop.xlane.xlu2 %945  ;;  %v959_v45 = vmul.f32 %v9357_v43, %v9349_v26  ;;  %v952_v46 = vpop.xlane.xlu1 %951 }
 0x4cc   : > { %9358 = vrcp.f32 %v946_v44 }
 0x4cd   : > { %9360 = vrcp.f32 %v952_v46  ;;  %8908 = vmatpush.xpose.msk.msra.mxu2 %vm828_vm5, %v959_v45 }
 0x4d0   : > { %8909 = vmatmul.msk.f32.vlgmr.msra.gmra.mxu2 %vm828_vm5, %v1041_v47 }
 0x4d2   : > { %v9359_v48 = vpop.eup %9358 }
 0x4d3   : > { %v9361_v49 = vpop.eup %9360  ;;  %v958_v50 = vmul.f32 %v9359_v48, %v9353_v30 }
 0x4d4   : > { %v960_v51 = vmul.f32 %v9361_v49, %v9351_v28 }
 0x4d5   : > { %8906 = vmatpush.xpose.msk.msra.mxu1 %vm828_vm5, %v958_v50 }
 0x4d6   : > { %8910 = vmatpush.xpose.msk.msra.mxu3 %vm828_vm5, %v960_v51 }
 0x4dd   : > { %v943_v36 = vpop.xlane.xlu0 %942 }
 0x4de   : > { %9362 = vrcp.f32 %v943_v36 }
 0x4e4   : > { %v9363_v52 = vpop.eup %9362 }
 0x4e5   : > { %v957_v53 = vmul.f32 %v9363_v52, %v9355_v38 }
 0x4e7   : > { %8904 = vmatpush.xpose.msk.msra.mxu0 %vm828_vm5, %v957_v53 }
 0x51a   : > { %v1073_v54 = vpop.trf.xlu2 }
 0x51b   : > { %8911 = vmatmul.msk.f32.vlgmr.msra.gmra.mxu3 %vm828_vm5, %v1073_v54 }
 0x536   : > { %v977_v55 = vpop.trf.xlu1 }
 0x537   : > { %v1009_v56 = vpop.trf.xlu0  ;;  %8905 = vmatmul.msk.f32.vlgmr.msra.gmra.mxu0 %vm828_vm5, %v977_v55 }
 0x538   : > { %8907 = vmatmul.msk.f32.vlgmr.msra.gmra.mxu1 %vm828_vm5, %v1009_v56 }
 0x553   : > { %v1164_v57 = vpop.f32.mrf.mxu2 }
 0x554   : > { %1257 = vxpose.xlu2.b32.start.end [1/1] (short) (narrow) %v1164_v57, 8 }
 0x59e   : > { %v1190_v58 = vpop.f32.mrf.mxu3 }
 0x59f   : > { %1289 = vxpose.xlu2.b32.start.end [1/1] (short) (narrow) %v1190_v58, 8 }
 0x5b4   : > { %v1112_v59 = vpop.f32.mrf.mxu0 }
 0x5b5   : > { %1193 = vxpose.xlu0.b32.start.end [1/1] (short) (narrow) %v1112_v59, 8  ;;  %v1138_v60 = vpop.f32.mrf.mxu1 }
 0x5bd   : > { %1225 = vxpose.xlu0.b32.start.end [1/1] (short) (narrow) %v1138_v60, 8 }
 0x5ed   : > { %v1273_v61 = vpop.trf.xlu2 }
 0x5ee   : > { %v1321_v2 = vrot.slane %v1273_v61, 4 }
 0x638   : > { %v1305_v7 = vpop.trf.xlu2 }
 0x639   : > { %v1334_v10 = vrot.slane %v1305_v7, 4 }
 0x659   : > { %v1209_v4 = vpop.trf.xlu0 }
 0x65a   : > { %v1324_v5 = vrot.slane %v1209_v4, 4  ;;  %v1323_v8 = vsel %vm1322_vm6, %v1321_v2, %v1209_v4 }
 0x65b   : > { %v1329_v13 = vperm.slane %v1323_v8, %v9997_v6 }
 0x65c   : > { %v1325_v9 = vsel %vm1322_vm6, %v1273_v61, %v1324_v5 }
 0x65d   : > { %v1333_v14 = vperm.slane %v1325_v9, %v9997_v6  ;;  %v1348_v20 = vrot.slane %v1329_v13, 4 }
 0x65f   : > { %v1360_v23 = vrot.slane %v1333_v14, 4 }
 0x661   : > { %v1241_v15 = vpop.trf.xlu0 }
 0x662   : > { %v1335_v18 = vsel %vm1322_vm6, %v1334_v10, %v1241_v15  ;;  %v1336_v19 = vrot.slane %v1241_v15, 4 }
 0x663   : > { %v1341_v21 = vperm.slane %v1335_v18, %v9997_v6  ;;  %v552_v18 = vld [vmem:[#allocation5 + $0x18] sm:$0xff] }
 0x664   : > { %v1337_v22 = vsel %vm1322_vm6, %v1305_v7, %v1336_v19  ;;  %v551_v19 = vld [vmem:[#allocation5 + $0x10] sm:$0xff]  ;;  %1464 = vmatpush.msrb.mxu0 %v552_v18 }
 0x665   : > { %v1345_v24 = vperm.slane %v1337_v22, %v9997_v6  ;;  %v1346_v25 = vrot.slane %v1341_v21, 4  ;;  %v1349_v26 = vsel %vm1322_vm6, %v1341_v21, %v1348_v20  ;;  %v550_v20 = vld [vmem:[#allocation5 + $0x8] sm:$0xff]  ;;  %v549_v21 = vld [vmem:[#allocation5] sm:$0xff] }
 0x666   : > { %v1357_v27 = vperm.slane %v1349_v26, %v10003_v16  ;;  %1465 = vmatpush.msrb.mxu0 %v551_v19 }
 0x667   : > { %v1347_v28 = vsel %vm1322_vm6, %v1346_v25, %v1329_v13  ;;  %v1358_v29 = vrot.slane %v1345_v24, 4  ;;  %v1361_v30 = vsel %vm1322_vm6, %v1345_v24, %v1360_v23 }
 0x668   : > { %v1353_v31 = vperm.slane %v1347_v28, %v10003_v16  ;;  %v1369_v32 = vperm.slane %v1361_v30, %v10003_v16  ;;  %v1372_v34 = vrot.slane %v1357_v27, 4  ;;  %1466 = vmatpush.msrb.mxu0 %v550_v20 }
 0x669   : > { %v1359_v35 = vsel %vm1322_vm6, %v1358_v29, %v1333_v14 }
 0x66a   : > { %v1365_v38 = vperm.slane %v1359_v35, %v10003_v16  ;;  %v1370_v39 = vrot.slane %v1353_v31, 4  ;;  %v1373_v40 = vsel %vm1322_vm6, 0.0, %v1372_v34  ;;  %v1376_v42 = vrot.slane %v1369_v32, 4  ;;  %1467 = vmatpush.msrb.mxu0 %v549_v21  ;;  %v556_v32 = vld [vmem:[%s11158_s8 + $0x18] sm:$0xff]  ;;  %v553_v35 = vld [vmem:[%s11158_s8] sm:$0xff] }
 0x66b   : > { %v1378_v43 = vsel %vm1322_vm6, %v1372_v34, %v1353_v31  ;;  %v1383_v44 = vrot.slane %v1373_v40, 4  ;;  %1509 = vmatpush.msrb.mxu1 %v556_v32  ;;  %v555_v34 = vld [vmem:[%s11158_s8 + $0x10] sm:$0xff] }
 0x66c   : > { %v1371_v45 = vsel %vm1322_vm6, 0.0, %v1370_v39  ;;  %v1377_v46 = vsel %vm1322_vm6, 0.0, %v1376_v42  ;;  %v1374_v47 = vrot.slane %v1365_v38, 4  ;;  %v1382_v48 = vperm.slane %v1378_v43, %v9997_v6 }
 0x66d   : > { %v1384_v49 = vsel %vm1322_vm6, %v1383_v44, %v1371_v45  ;;  %v1389_v50 = vsel %vm1322_vm6, %v1376_v42, %v1365_v38  ;;  %v1394_v51 = vrot.slane %v1377_v46, 4  ;;  %1510 = vmatpush.msrb.mxu1 %v555_v34 }
 0x66e   : > { %v1375_v36 = vsel %vm1322_vm6, 0.0, %v1374_v47  ;;  %v1388_v52 = vperm.slane %v1384_v49, %v9997_v6  ;;  %v1393_v53 = vperm.slane %v1389_v50, %v9997_v6  ;;  %v1402_v54 = vrot.slane %v1382_v48, 4 }
 0x66f   : > { %v1395_v55 = vsel %vm1322_vm6, %v1394_v51, %v1375_v36  ;;  %v564_v36 = vld [vmem:[#allocation7 + $0x38] sm:$0xff] }
 0x670   : > { %v1399_v56 = vperm.slane %v1395_v55, %v9997_v6  ;;  %v1403_v57 = vsel %vm1322_vm6, %v1388_v52, %v1402_v54  ;;  %v1414_v58 = vrot.slane %v1393_v53, 4  ;;  %v1400_v59 = vrot.slane %v1388_v52, 4  ;;  %v563_v52 = vld [vmem:[#allocation7 + $0x30] sm:$0xff]  ;;  %1554 = vmatpush.msrb.mxu2 %v564_v36  ;;  %v561_v54 = vld [vmem:[#allocation7 + $0x20] sm:$0xff]  ;;  %v560_v55 = vld [vmem:[#allocation7 + $0x18] sm:$0xff] }
 0x671   : > { %v1411_v60 = vperm.slane %v1403_v57, %v10003_v16  ;;  %v558_v57 = vld [vmem:[#allocation7 + $0x8] sm:$0xff] }
 0x672   : > { %v1415_v61 = vsel %vm1322_vm6, %v1399_v56, %v1414_v58  ;;  %v1401_v62 = vsel %vm1322_vm6, %v1400_v59, %v1382_v48  ;;  %v1412_v1 = vrot.slane %v1399_v56, 4  ;;  %v9329_v48 = vld [vmem:[%s11155_s5] ss:$0 sm:$0xff]  ;;  %1555 = vmatpush.msrb.mxu2 %v563_v52  ;;  %v559_v56 = vld [vmem:[#allocation7 + $0x10] sm:$0xff] }
 0x673   : > { %v1423_v2 = vperm.slane %v1415_v61, %v10003_v16  ;;  %v1430_v4 = vrot.slane %v1411_v60, 4  ;;  %v1407_v5 = vperm.slane %v1401_v62, %v10003_v16  ;;  %v557_v62 = vld [vmem:[#allocation7] sm:$0xff] }
 0x674   : > { %v1413_v7 = vsel %vm1322_vm6, %v1412_v1, %v1393_v53  ;;  %v562_v53 = vld [vmem:[#allocation7 + $0x28] sm:$0xff] }
 0x675   : > { %v1431_v8 = vsel %vm1322_vm6, %v1423_v2, %v1430_v4  ;;  %v1428_v9 = vrot.slane %v1423_v2, 4  ;;  %v1419_v10 = vperm.slane %v1413_v7, %v10003_v16  ;;  %v1426_v11 = vrot.slane %v1407_v5, 4  ;;  %1556 = vmatpush.msrb.mxu2 %v562_v53 }
 0x676   : > { %1441 = vrot.lane.b32.xlu0 %v1431_v8, %s11172_s6  ;;  %s11212_s6 = smov 96  }
 0x677   : > { %v1429_v12 = vsel %vm1322_vm6, %v1428_v9, %v1411_v60  ;;  %v1424_v13 = vrot.slane %v1419_v10, 4  ;;  %v1427_v14 = vsel %vm1322_vm6, %v1419_v10, %v1426_v11  ;;  %1557 = vmatpush.msrb.mxu2 %v561_v54 }
 0x678   : > { %1437 = vrot.lane.b32.xlu1 %v1429_v12, %s11174_s27  ;;  %1433 = vrot.lane.b32.xlu2 %v1427_v14, %s11170_s26  ;;  %s11207_s26 = smov 112   ;;  %s11214_s27 = smov 120  }
 0x679   : > { %v1425_v15 = vsel %vm1322_vm6, %v1424_v13, %v1407_v5  ;;  %1558 = vmatpush.msrb.mxu2 %v560_v55 }
 0x67b   : > { %1559 = vmatpush.msrb.mxu2 %v559_v56 }
 0x67d   : > { %1560 = vmatpush.msrb.mxu2 %v558_v57 }
 0x67f   : > { %1561 = vmatpush.msrb.mxu2 %v557_v62 }
 0x6d2   : > { %v1434_v22 = vpop.permute.xlu2 %1433 }
 0x6d3   : > { %v1444_v23 = vsel %vm828_vm5, %v1425_v15, %v1434_v22  ;;  %v1578_v22 = vld [vmem:[#allocation2 + $0x70] sm:$0xff] }
 0x6d4   : > { %1635 = vmatpush.msrb.mxu3 %v1578_v22 }
 0x6e8   : > { %v1442_v25 = vpop.permute.xlu0 %1441 }
 0x6ea   : > { %v1438_v24 = vpop.permute.xlu1 %1437 }
 0x6eb   : > { %v1446_v26 = vsel %vm1445_vm7, %v1444_v23, %v1438_v24  ;;  %v1579_v23 = vld [vmem:[#allocation2 + $0x78] sm:$0xff]  ;;  %v1576_v24 = vld [vmem:[#allocation2 + $0x60] sm:$0xff] }
 0x6ec   : > { %v1448_v27 = vsel %vm1447_vm8, %v1446_v26, %v1442_v25  ;;  %1655 = vmatpush.msra.mxu0 %v1579_v23  ;;  %v1577_v25 = vld [vmem:[#allocation2 + $0x68] sm:$0xff]  ;;  %1636 = vmatpush.msrb.mxu3 %v1576_v24  ;;  %v1574_v26 = vld [vmem:[#allocation2 + $0x50] sm:$0xff] }
 0x6ed   : > { %8912 = vmatmul.msk.f32.vlgmr.msrb.gmra.mxu0 %vm566_vm0, %v1448_v27  ;;  %v1575_v27 = vld [vmem:[#allocation2 + $0x58] sm:$0xff] }
 0x6ee   : > { %1656 = vmatpush.msra.mxu0 %v1577_v25  ;;  %1637 = vmatpush.msrb.mxu3 %v1574_v26 }
 0x6f0   : > { %1657 = vmatpush.msra.mxu0 %v1575_v27 }
 0x76a   : > { %v1469_v28 = vpop.f32.mrf.mxu0 }
 0x76b   : > { %v10049_v29 = vadd.f32 %v1469_v28, %v9887_v0  ;;  %v554_v0 = vld [vmem:[%s11158_s8 + $0x8] sm:$0xff]  ;;  %v1572_v28 = vld [vmem:[#allocation2 + $0x40] sm:$0xff] }
 0x76c   : > { %1511 = vmatpush.msrb.mxu1 %v554_v0  ;;  %1638 = vmatpush.msrb.mxu3 %v1572_v28 }
 0x76d   : > { %v1473_v30 = vmul.f32 %v10049_v29, %v10049_v29 }
 0x76e   : > { %1512 = vmatpush.msrb.mxu1 %v553_v35 }
 0x76f   : > { %v1474_v31 = vsel %vm566_vm0, %v1473_v30, 0.0  ;;  %v1573_v30 = vld [vmem:[#allocation2 + $0x48] sm:$0xff] }
 0x770   : > { %1475 = vadd.xlane.f32.xlu1 %v1474_v31  ;;  %1658 = vmatpush.msra.mxu0 %v1573_v30 }
 0x7e3   : > { %v1476_v38 = vpop.xlane.xlu1 %1475 }
 0x7e4   : > { %v1477_v39 = vmul.f32 %v1476_v38, %v9903_v17 }
 0x7e6   : > { %v1478_v40 = vadd.f32 1e-06, %v1477_v39 }
 0x7e8   : > { %9364 = vrsqrt.f32 %v1478_v40  ;;  %vm1485_vm10 = vweird.f32 %v1478_v40 }
 0x7ee   : > { %v9365_v42 = vpop.eup %9364 }
 0x7ef   : > { %v1480_v43 = vmul.f32 %v9365_v42, %v1478_v40  ;;  %vm1486_vm9 = vweird.f32 %v9365_v42 }
 0x7f0   : > { %vm1487_vm11 = vmor %vm1485_vm10, %vm1486_vm9 }
 0x7f1   : > { %v1481_v44 = vmul.f32 %v9365_v42, %v1480_v43 }
 0x7f3   : > { %v1482_v45 = vmul.f32 0.5, %v1481_v44 }
 0x7f5   : > { %v1483_v46 = vsub.f32 1.5, %v1482_v45 }
 0x7f7   : > { %v1484_v47 = vmul.f32 %v9365_v42, %v1483_v46 }
 0x7f9   : > { %v1488_v49 = vsel %vm1487_vm11, %v9365_v42, %v1484_v47  ;;  %v9330_v42 = vld [vmem:[%s11154_s4 + $0x1] ss:$0 sm:$0xff] }
 0x7fa   : > { %v1489_v50 = vmul.f32 %v1488_v49, %v10049_v29 }
 0x7fc   : > { %v1493_v51 = vmul.f32 %v9329_v48, %v1489_v50 }
 0x7fe   : > { %8913 = vmatmul.msk.f32.vlgmr.msrb.gmra.mxu1 %vm566_vm0, %v1493_v51 }
 0x87b   : > { %v1514_v58 = vpop.f32.mrf.mxu1 }
 0x87c   : > { %1538 = vrot.lane.b32.xlu2 %v1514_v58, %s11184_s18  ;;  %v8914_v59 = vmul.f32 -1.442695, %v1514_v58 }
 0x87e   : > { %9366 = vpow2.f32 %v8914_v59 }
 0x884   : > { %v9367_v60 = vpop.eup %9366 }
 0x885   : > { %v1520_v61 = vadd.f32 1.0, %v9367_v60 }
 0x887   : > { %9368 = vrcp.f32 %v1520_v61  ;;  %v1532_v8 = vand.u32 2147483648, %v1520_v61  ;;  %vm1526_vm13 = vweird.f32 %v1520_v61  ;;  %v1530_v9 = vand.u32 2147483647, %v1520_v61 }
 0x889   : > { %v1533_v11 = vor.u32 1.1754944e-38, %v1532_v8  ;;  %vm1531_vm15 = vcmp.eq.f32.partialorder %v1530_v9, 8.507059e+37 }
 0x88d   : > { %v9369_v1 = vpop.eup %9368 }
 0x88e   : > { %v1522_v2 = vmul.f32 %v9369_v1, %v1520_v61  ;;  %vm1527_vm12 = vweird.f32 %v9369_v1 }
 0x88f   : > { %vm1528_vm14 = vmor %vm1526_vm13, %vm1527_vm12 }
 0x890   : > { %v1523_v4 = vsub.f32 1.0, %v1522_v2 }
 0x892   : > { %v1524_v5 = vmul.f32 %v9369_v1, %v1523_v4 }
 0x894   : > { %v1525_v7 = vadd.f32 %v9369_v1, %v1524_v5 }
 0x896   : > { %v1529_v10 = vsel %vm1528_vm14, %v9369_v1, %v1525_v7 }
 0x897   : > { %v1534_v12 = vsel %vm1531_vm15, %v1533_v11, %v1529_v10 }
 0x898   : > { %v1536_v13 = vmul.f32 %v1534_v12, %v1514_v58 }
 0x8d6   : > { %v1539_v14 = vpop.permute.xlu2 %1538 }
 0x8d7   : > { %v1541_v15 = vmul.f32 %v1539_v14, %v1536_v13 }
 0x8d9   : > { %8915 = vmatmul.msk.f32.vlgmr.msrb.gmra.mxu2 %vm1542_vm1, %v1541_v15 }
 0x95c   : > { %v1563_v18 = vpop.f32.mrf.mxu2 }
 0x95d   : > { %v10075_v19 = vadd.f32 %v1563_v18, %v10049_v29 }
 0x95f   : > { %v1599_v20 = vmul.f32 %v10075_v19, %v10075_v19 }
 0x961   : > { %v1600_v21 = vsel %vm566_vm0, %v1599_v20, 0.0 }
 0x962   : > { %1601 = vadd.xlane.f32.xlu2 %v1600_v21 }
 0x9d5   : > { %v1602_v29 = vpop.xlane.xlu2 %1601 }
 0x9d6   : > { %v1603_v31 = vmul.f32 %v1602_v29, %v9903_v17 }
 0x9d8   : > { %v1604_v32 = vadd.f32 1e-06, %v1603_v31 }
 0x9da   : > { %9370 = vrsqrt.f32 %v1604_v32  ;;  %vm1611_vm3 = vweird.f32 %v1604_v32 }
 0x9e0   : > { %v9371_v34 = vpop.eup %9370 }
 0x9e1   : > { %v1606_v0 = vmul.f32 %v9371_v34, %v1604_v32  ;;  %vm1612_vm2 = vweird.f32 %v9371_v34 }
 0x9e2   : > { %vm1613_vm4 = vmor %vm1611_vm3, %vm1612_vm2 }
 0x9e3   : > { %v1607_v35 = vmul.f32 %v9371_v34, %v1606_v0 }
 0x9e5   : > { %v1608_v38 = vmul.f32 0.5, %v1607_v35 }
 0x9e7   : > { %v1609_v39 = vsub.f32 1.5, %v1608_v38 }
 0x9e9   : > { %v1610_v40 = vmul.f32 %v9371_v34, %v1609_v39 }
 0x9eb   : > { %v1614_v43 = vsel %vm1613_vm4, %v9371_v34, %v1610_v40 }
 0x9ec   : > { %v1615_v44 = vmul.f32 %v1614_v43, %v10075_v19 }
 0x9ee   : > { %v1619_v45 = vmul.f32 %v9330_v42, %v1615_v44 }
 0x9f0   : > { %8922 = vmatmul.msk.f32.vlgmr.msrb.gmra.mxu3 %vm566_vm0, %v1619_v45  ;;  %8923 = vmatmul.msk.f32.vlgmr.msra.gmra.mxu0 %vm566_vm0, %v1619_v45 }
 0xa6d   : > { %v10104_v59 = vpop.f32.mrf.mxu0 }
 0xa73   : > { %v1640_v46 = vpop.f32.mrf.mxu3 }
 0xa74   : > { %v1671_v47 = vmul.f32 %v1640_v46, %v9918_v33  ;;  %v1670_v48 = vmul.f32 %v1640_v46, %v9933_v37  ;;  %v1664_v51 = vmul.f32 %v1640_v46, %v9938_v41  ;;  %v1663_v56 = vmul.f32 %v1640_v46, %v9899_v3 }
 0xa76   : > { %1673 = vrot.lane.b32.xlu0 %v1671_v47, %s11182_s17 }
 0xae8   : > { %v1674_v49 = vpop.permute.xlu0 %1673 }
 0xae9   : > { %v10090_v50 = vadd.f32 %v1674_v49, %v1670_v48 }
 0xaeb   : > { %1699 = vrot.lane.b32.xlu1 %v10090_v50, %s11180_s20  ;;  %1695 = vrot.lane.b32.xlu0 %v10090_v50, %s11178_s14 }
 0xaf3   : > { %1697 = vrot.lane.b32.xlu0 %v10090_v50, %s11207_s26 }
 0xafb   : > { %1666 = vrot.lane.b32.xlu0 %v1664_v51, %s11182_s17 }
 0xb5d   : > { %v1696_v36 = vpop.permute.xlu0 %1695  ;;  %v1700_v53 = vpop.permute.xlu1 %1699 }
 0xb5e   : > { %v9196_v52 = vpack.i.bf16 %v10090_v50, %v1696_v36 }
 0xb60   : > { %9197 = vrot.lane.b32.xlu0 %v9196_v52, %s11184_s18 }
 0xb65   : > { %v1698_v54 = vpop.permute.xlu0 %1697 }
 0xb66   : > { %v9201_v55 = vpack.i.bf16 %v1700_v53, %v1698_v54 }
 0xb68   : > { %9202 = vrot.lane.b32.xlu2 %v9201_v55, %s11184_s18  ;;  %s11211_s18 = smov 64  }
 0xb6d   : > { %v1667_v57 = vpop.permute.xlu0 %1666 }
 0xb6e   : > { %v1669_v58 = vadd.f32 %v1667_v57, %v1663_v56 }
 0xb70   : > { %1701 = vrot.lane.b32.xlu2 %v10104_v59, %s11178_s14  ;;  %1691 = vrot.lane.b32.xlu1 %v1669_v58, %s11207_s26 }
 0xb71   : > { %1689 = vrot.lane.b32.xlu0 %v1669_v58, %s11178_s14 }
 0xb79   : > { %1693 = vrot.lane.b32.xlu0 %v1669_v58, %s11180_s20 }
 0xbc2   : > { %v9203_v60 = vpop.permute.xlu2 %9202 }
 0xbc3   : > { %9214 = vxpose.xlu0.b32.start.end [1/1] (short) (narrow) %v9203_v60, 8 }
 0xbca   : > { %v1702_v25 = vpop.permute.xlu2 %1701 }
 0xbd2   : > { %v9198_v61 = vpop.permute.xlu0 %9197 }
 0xbd3   : > { %9207 = vxpose.xlu1.b32.start.end [1/1] (short) (narrow) %v9198_v61, 8 }
 0xbe2   : > { %v1692_v4 = vpop.permute.xlu1 %1691 }
 0xbe3   : > { %v1690_v62 = vpop.permute.xlu0 %1689 }
 0xbeb   : > { %v1694_v1 = vpop.permute.xlu0 %1693 }
 0xc67   : > { %v9215_v3 = vpop.trf.xlu0 }
 0xc68   : > { %v9216_v2 = vunpack.i.l.bf16 %v9215_v3  ;;  %v9219_v7 = vunpack.i.h.bf16 %v9215_v3 }
 0xc6a   : > { %1911 = vmatpush.msrb.mxu0 %v9216_v2 }
 0xc6b   : > { %8926 = vmatmul.msk.f32.vlgmr.msrb.gmra.mxu0 %vm828_vm5, %v1692_v4 }
 0xc77   : > { %v9208_v5 = vpop.trf.xlu1 }
 0xc78   : > { %v9212_v8 = vunpack.i.h.bf16 %v9208_v5  ;;  %v9209_v9 = vunpack.i.l.bf16 %v9208_v5 }
 0xc7a   : > { %1867 = vmatpush.msra.mxu1 %v9212_v8  ;;  %1889 = vmatpush.msra.mxu3 %v9209_v9 }
 0xc7b   : > { %8924 = vmatmul.msk.f32.vlgmr.msra.gmra.mxu1 %vm828_vm5, %v1669_v58  ;;  %8925 = vmatmul.msk.f32.vlgmr.msra.gmra.mxu3 %vm828_vm5, %v1690_v62 }
 0xc7c   : > { %1933 = vmatpush.msrb.mxu1 %v9219_v7 }
 0xc83   : > { %8927 = vmatmul.msk.f32.vlgmr.msrb.gmra.mxu1 %vm828_vm5, %v1694_v1 }
 0xce8   : > { %v1913_v13 = vpop.f32.mrf.mxu0 }
 0xce9   : > { %v1914_v15 = vadd.f32 %v1913_v13, %v9972_v63 }
 0xceb   : > { %v1944_v24 = vsel %vm828_vm5, %v1914_v15, -inf }
 0xcf8   : > { %v1869_v10 = vpop.f32.mrf.mxu1 }
 0xcf9   : > { %v1870_v11 = vadd.f32 %v1869_v10, %v9972_v63 }
 0xcfb   : > { %v1938_v12 = vsel %vm828_vm5, %v1870_v11, -inf }
 0xcfc   : > { %1939 = vmax.xlane.f32.xlu2 %v1938_v12 }
 0xcfe   : > { %v1891_v14 = vpop.f32.mrf.mxu3 }
 0xcff   : > { %v1892_v18 = vadd.f32 %v1891_v14, %v9972_v63 }
 0xd00   : > { %v1935_v20 = vpop.f32.mrf.mxu1 }
 0xd01   : > { %v1936_v21 = vadd.f32 %v1935_v20, %v9972_v63  ;;  %v1941_v22 = vsel %vm828_vm5, %v1892_v18, -inf }
 0xd02   : > { %1942 = vmax.xlane.f32.xlu0 %v1941_v22 }
 0xd03   : > { %v1947_v23 = vsel %vm828_vm5, %v1936_v21, -inf }
 0xd04   : > { %1948 = vmax.xlane.f32.xlu1 %v1947_v23  ;;  %1945 = vmax.xlane.f32.xlu2 %v1944_v24 }
 0xd1c   : > { %1704 = vrot.lane.b32.xlu2 %v10104_v59, %s11207_s26 }
 0xd1d   : > { %1707 = vrot.lane.b32.xlu1 %v10104_v59, %s11180_s20  ;;  %s9085_s20 = sshll.u32 %s9811_s25, 3 }
 0xd2b   : > { %1982 = vxpose.xlu0.b32.start.end [1/1] (short) (narrow) %v10104_v59, 8 }
 0xd52   : > { %2014 = vxpose.xlu1.b32.start.end [1/1] (short) (narrow) %v1702_v25, 8 }
 0xd6f   : > { %v1940_v63 = vpop.xlane.xlu2 %1939 }
 0xd70   : > { %v1950_v26 = vsub.f32 %v1870_v11, %v1940_v63 }
 0xd72   : > { %v1954_v27 = vmul.f32 1.442695, %v1950_v26 }
 0xd74   : > { %9372 = vpow2.f32 %v1954_v27 }
 0xd75   : > { %v1943_v28 = vpop.xlane.xlu0 %1942 }
 0xd76   : > { %v1951_v30 = vsub.f32 %v1892_v18, %v1943_v28 }
 0xd77   : > { %v1946_v35 = vpop.xlane.xlu2 %1945  ;;  %v1949_v40 = vpop.xlane.xlu1 %1948 }
 0xd78   : > { %v1956_v29 = vmul.f32 1.442695, %v1951_v30  ;;  %v1952_v38 = vsub.f32 %v1914_v15, %v1946_v35  ;;  %v1953_v42 = vsub.f32 %v1936_v21, %v1949_v40 }
 0xd7a   : > { %v9373_v31 = vpop.eup %9372  ;;  %9374 = vpow2.f32 %v1956_v29  ;;  %v1958_v39 = vmul.f32 1.442695, %v1952_v38  ;;  %v1960_v43 = vmul.f32 1.442695, %v1953_v42 }
 0xd7b   : > { %v1962_v32 = vsel %vm828_vm5, %v9373_v31, 0.0 }
 0xd7c   : > { %1963 = vadd.xlane.f32.xlu2 %v1962_v32  ;;  %9376 = vpow2.f32 %v1958_v39 }
 0xd7d   : > { %9378 = vpow2.f32 %v1960_v43 }
 0xd7f   : > { %v1705_v48 = vpop.permute.xlu2 %1704 }
 0xd80   : > { %v9375_v34 = vpop.eup %9374 }
 0xd81   : > { %v1965_v0 = vsel %vm828_vm5, %v9375_v34, 0.0 }
 0xd82   : > { %v9377_v44 = vpop.eup %9376 }
 0xd83   : > { %v1968_v45 = vsel %vm828_vm5, %v9377_v44, 0.0  ;;  %v9379_v46 = vpop.eup %9378 }
 0xd84   : > { %1966 = vadd.xlane.f32.xlu2 %v1965_v0  ;;  %v1971_v47 = vsel %vm828_vm5, %v9379_v46, 0.0 }
 0xd8f   : > { %v1708_v49 = vpop.permute.xlu1 %1707 }
 0xd9c   : > { %1969 = vadd.xlane.f32.xlu0 %v1968_v45 }
 0xda4   : > { %1972 = vadd.xlane.f32.xlu0 %v1971_v47 }
 0xdad   : > { %2046 = vxpose.xlu2.b32.start.end [1/1] (short) (narrow) %v1705_v48, 8 }
 0xdcd   : > { %2078 = vxpose.xlu0.b32.start.end [1/1] (short) (narrow) %v1708_v49, 8 }
 0xdcf   : > { %v1998_v54 = vpop.trf.xlu0 }
 0xdef   : > { %v1964_v51 = vpop.xlane.xlu2 %1963 }
 0xdf0   : > { %9380 = vrcp.f32 %v1964_v51 }
 0xdf6   : > { %v9381_v36 = vpop.eup %9380  ;;  %v2030_v2 = vpop.trf.xlu1 }
 0xdf7   : > { %v1978_v52 = vmul.f32 %v9381_v36, %v9373_v31  ;;  %v1967_v53 = vpop.xlane.xlu2 %1966 }
 0xdf8   : > { %9382 = vrcp.f32 %v1967_v53 }
 0xdf9   : > { %8928 = vmatpush.xpose.msk.msra.mxu2 %vm828_vm5, %v1978_v52 }
 0xdfc   : > { %8929 = vmatmul.msk.f32.vlgmr.msra.gmra.mxu2 %vm828_vm5, %v1998_v54 }
 0xdfe   : > { %v9383_v55 = vpop.eup %9382 }
 0xdff   : > { %v1979_v56 = vmul.f32 %v9383_v55, %v9375_v34 }
 0xe01   : > { %8930 = vmatpush.xpose.msk.msrb.mxu3 %vm828_vm5, %v1979_v56 }
 0xe04   : > { %8931 = vmatmul.msk.f32.vlgmr.msrb.gmra.mxu3 %vm828_vm5, %v2030_v2 }
 0xe0f   : > { %v1970_v57 = vpop.xlane.xlu0 %1969 }
 0xe10   : > { %9384 = vrcp.f32 %v1970_v57 }
 0xe16   : > { %v9385_v58 = vpop.eup %9384 }
 0xe17   : > { %v1980_v60 = vmul.f32 %v9385_v58, %v9377_v44  ;;  %v1973_v61 = vpop.xlane.xlu0 %1972 }
 0xe18   : > { %9386 = vrcp.f32 %v1973_v61 }
 0xe19   : > { %8932 = vmatpush.xpose.msk.msra.mxu0 %vm828_vm5, %v1980_v60 }
 0xe1e   : > { %v9387_v62 = vpop.eup %9386 }
 0xe1f   : > { %v1981_v1 = vmul.f32 %v9387_v62, %v9379_v46 }
 0xe21   : > { %8934 = vmatpush.xpose.msk.msra.mxu1 %vm828_vm5, %v1981_v1 }
 0xe46   : > { %v2062_v3 = vpop.trf.xlu2 }
 0xe47   : > { %8933 = vmatmul.msk.f32.vlgmr.msra.gmra.mxu0 %vm828_vm5, %v2062_v3 }
 0xe71   : > { %v2094_v4 = vpop.trf.xlu0 }
 0xe72   : > { %8935 = vmatmul.msk.f32.vlgmr.msra.gmra.mxu1 %vm828_vm5, %v2094_v4 }
 0xe7f   : > { %v2133_v5 = vpop.f32.mrf.mxu2 }
 0xe80   : > { %2214 = vxpose.xlu0.b32.start.end [1/1] (short) (narrow) %v2133_v5, 8 }
 0xe87   : > { %v2159_v8 = vpop.f32.mrf.mxu3 }
 0xe88   : > { %2246 = vxpose.xlu2.b32.start.end [1/1] (short) (narrow) %v2159_v8, 8 }
 0xec4   : > { %v2185_v7 = vpop.f32.mrf.mxu0 }
 0xec5   : > { %2278 = vxpose.xlu0.b32.start.end [1/1] (short) (narrow) %v2185_v7, 8 }
 0xeef   : > { %v2211_v9 = vpop.f32.mrf.mxu1 }
 0xef0   : > { %2310 = vxpose.xlu1.b32.start.end [1/1] (short) (narrow) %v2211_v9, 8 }
 0xf21   : > { %v2262_v14 = vpop.trf.xlu2 }
 0xf22   : > { %v2356_v20 = vrot.slane %v2262_v14, 4 }
 0xf24   : > { %v2230_v10 = vpop.trf.xlu0 }
 0xf25   : > { %v2344_v12 = vrot.slane %v2230_v10, 4 }
 0xf69   : > { %v2294_v11 = vpop.trf.xlu0 }
 0xf6a   : > { %v2342_v13 = vrot.slane %v2294_v11, 4  ;;  %v2345_v15 = vsel %vm1322_vm6, %v2294_v11, %v2344_v12 }
 0xf6b   : > { %v2353_v21 = vperm.slane %v2345_v15, %v9997_v6 }
 0xf6c   : > { %v2343_v18 = vsel %vm1322_vm6, %v2342_v13, %v2230_v10 }
 0xf6d   : > { %v2349_v22 = vperm.slane %v2343_v18, %v9997_v6  ;;  %v2380_v63 = vrot.slane %v2353_v21, 4 }
 0xf6f   : > { %v2368_v28 = vrot.slane %v2349_v22, 4 }
 0xf94   : > { %v2326_v23 = vpop.trf.xlu1 }
 0xf95   : > { %v2354_v24 = vrot.slane %v2326_v23, 4  ;;  %v2357_v25 = vsel %vm1322_vm6, %v2326_v23, %v2356_v20 }
 0xf96   : > { %v2365_v26 = vperm.slane %v2357_v25, %v9997_v6  ;;  %v1583_v25 = vld [vmem:[#allocation5 + $0x30] sm:$0xff] }
 0xf97   : > { %v2355_v27 = vsel %vm1322_vm6, %v2354_v24, %v2262_v14  ;;  %v1584_v24 = vld [vmem:[#allocation5 + $0x38] sm:$0xff] }
 0xf98   : > { %v2361_v30 = vperm.slane %v2355_v27, %v9997_v6  ;;  %v2378_v29 = vrot.slane %v2365_v26, 4  ;;  %v2381_v31 = vsel %vm1322_vm6, %v2365_v26, %v2380_v63  ;;  %2482 = vmatpush.msrb.mxu2 %v1584_v24  ;;  %v1582_v63 = vld [vmem:[#allocation5 + $0x28] sm:$0xff]  ;;  %v1581_v26 = vld [vmem:[#allocation5 + $0x20] sm:$0xff] }
 0xf99   : > { %v2389_v32 = vperm.slane %v2381_v31, %v10003_v16 }
 0xf9a   : > { %v2366_v34 = vrot.slane %v2361_v30, 4  ;;  %v2369_v0 = vsel %vm1322_vm6, %v2361_v30, %v2368_v28  ;;  %v2379_v35 = vsel %vm1322_vm6, %v2378_v29, %v2353_v21  ;;  %2483 = vmatpush.msrb.mxu2 %v1583_v25 }
 0xf9b   : > { %v2377_v38 = vperm.slane %v2369_v0, %v10003_v16  ;;  %v2385_v39 = vperm.slane %v2379_v35, %v10003_v16  ;;  %v2396_v40 = vrot.slane %v2389_v32, 4 }
 0xf9c   : > { %v2367_v42 = vsel %vm1322_vm6, %v2366_v34, %v2349_v22  ;;  %2484 = vmatpush.msrb.mxu2 %v1582_v63 }
 0xf9d   : > { %v2373_v43 = vperm.slane %v2367_v42, %v10003_v16  ;;  %v2392_v44 = vrot.slane %v2377_v38, 4  ;;  %v2394_v45 = vrot.slane %v2385_v39, 4  ;;  %v2397_v46 = vsel %vm1322_vm6, 0.0, %v2396_v40  ;;  %v8918_v42 = vld [vmem:[%s11158_s8 + $0x20] sm:$0xff] }
 0xf9e   : > { %v2409_v47 = vsel %vm1322_vm6, %v2396_v40, %v2385_v39  ;;  %v2414_v48 = vrot.slane %v2397_v46, 4  ;;  %2485 = vmatpush.msrb.mxu2 %v1581_v26  ;;  %v8921_v39 = vld [vmem:[%s11158_s8 + $0x38] sm:$0xff]  ;;  %v8920_v40 = vld [vmem:[%s11158_s8 + $0x30] sm:$0xff] }
 0xf9f   : > { %v2393_v49 = vsel %vm1322_vm6, 0.0, %v2392_v44  ;;  %v2395_v51 = vsel %vm1322_vm6, 0.0, %v2394_v45  ;;  %v2390_v36 = vrot.slane %v2373_v43, 4  ;;  %v2398_v52 = vsel %vm1322_vm6, %v2392_v44, %v2373_v43  ;;  %2527 = vmatpush.msra.mxu3 %v8921_v39 }
 0xfa0   : > { %v2402_v53 = vperm.slane %v2398_v52, %v9997_v6  ;;  %v2403_v54 = vrot.slane %v2393_v49, 4  ;;  %v2413_v55 = vperm.slane %v2409_v47, %v9997_v6  ;;  %v2415_v56 = vsel %vm1322_vm6, %v2414_v48, %v2395_v51  ;;  %v9331_v52 = vld [vmem:[%s11155_s5 + $0x1] ss:$0 sm:$0xff] }
 0xfa1   : > { %v2391_v57 = vsel %vm1322_vm6, 0.0, %v2390_v36  ;;  %v2419_v58 = vperm.slane %v2415_v56, %v9997_v6  ;;  %2528 = vmatpush.msra.mxu3 %v8920_v40  ;;  %v1598_v56 = vld [vmem:[#allocation7 + $0x78] sm:$0xff] }
 0xfa2   : > { %v2404_v60 = vsel %vm1322_vm6, %v2403_v54, %v2391_v57  ;;  %v2422_v61 = vrot.slane %v2402_v53, 4  ;;  %v2434_v62 = vrot.slane %v2413_v55, 4  ;;  %v1597_v57 = vld [vmem:[#allocation7 + $0x70] sm:$0xff]  ;;  %2571 = vmatpush.msrb.mxu0 %v1598_v56 }
 0xfa3   : > { %v2408_v1 = vperm.slane %v2404_v60, %v9997_v6  ;;  %v2432_v3 = vrot.slane %v2419_v58, 4 }
 0xfa4   : > { %v2435_v2 = vsel %vm1322_vm6, %v2419_v58, %v2434_v62  ;;  %v1596_v58 = vld [vmem:[#allocation7 + $0x68] sm:$0xff]  ;;  %2572 = vmatpush.msrb.mxu0 %v1597_v57  ;;  %v1594_v62 = vld [vmem:[#allocation7 + $0x58] sm:$0xff]  ;;  %v10242_v57 = vld [vmem:[%s9896_s15] sm:$0xff] }
 0xfa5   : > { %v2423_v4 = vsel %vm1322_vm6, %v2408_v1, %v2422_v61  ;;  %v2443_v5 = vperm.slane %v2435_v2, %v10003_v16  ;;  %v2420_v7 = vrot.slane %v2408_v1, 4  ;;  %v2433_v8 = vsel %vm1322_vm6, %v2432_v3, %v2413_v55  ;;  %v1595_v61 = vld [vmem:[#allocation7 + $0x60] sm:$0xff]  ;;  %v1593_v1 = vld [vmem:[#allocation7 + $0x50] sm:$0xff]  ;;  %v1592_v3 = vld [vmem:[#allocation7 + $0x48] sm:$0xff] }
 0xfa6   : > { %v2431_v9 = vperm.slane %v2423_v4, %v10003_v16  ;;  %v2439_v10 = vperm.slane %v2433_v8, %v10003_v16  ;;  %2573 = vmatpush.msrb.mxu0 %v1596_v58 }
 0xfa7   : > { %v2448_v11 = vrot.slane %v2443_v5, 4  ;;  %v2421_v12 = vsel %vm1322_vm6, %v2420_v7, %v2402_v53  ;;  %v1591_v7 = vld [vmem:[#allocation7 + $0x40] sm:$0xff] }
 0xfa8   : > { %v2450_v13 = vrot.slane %v2431_v9, 4  ;;  %v2427_v14 = vperm.slane %v2421_v12, %v10003_v16  ;;  %v2444_v15 = vrot.slane %v2439_v10, 4  ;;  %2574 = vmatpush.msrb.mxu0 %v1595_v61 }
 0xfa9   : > { %v2449_v18 = vsel %vm1322_vm6, %v2448_v11, %v2431_v9 }
 0xfaa   : > { %2457 = vrot.lane.b32.xlu1 %v2449_v18, %s11208_s16  ;;  %v2451_v20 = vsel %vm1322_vm6, %v2443_v5, %v2450_v13  ;;  %v2446_v21 = vrot.slane %v2427_v14, 4  ;;  %v2445_v22 = vsel %vm1322_vm6, %v2444_v15, %v2427_v14  ;;  %2575 = vmatpush.msrb.mxu0 %v1594_v62 }
 0xfab   : > { %2461 = vrot.lane.b32.xlu2 %v2451_v20, %s11209_s29 }
 0xfac   : > { %v2447_v23 = vsel %vm1322_vm6, %v2439_v10, %v2446_v21  ;;  %2576 = vmatpush.msrb.mxu0 %v1593_v1 }
 0xfad   : > { %2453 = vrot.lane.b32.xlu0 %v2447_v23, %s11210_s21 }
 0xfae   : > { %2577 = vmatpush.msrb.mxu0 %v1592_v3 }
 0xfb0   : > { %2578 = vmatpush.msrb.mxu0 %v1591_v7 }
0x1005   : > { %v2462_v29 = vpop.permute.xlu2 %2461 }
0x101c   : > { %v2458_v28 = vpop.permute.xlu1 %2457 }
0x101f   : > { %v2454_v27 = vpop.permute.xlu0 %2453 }
0x1020   : > { %v2464_v30 = vsel %vm828_vm5, %v2445_v22, %v2454_v27  ;;  %v2595_v27 = vld [vmem:[#allocation2 + $0xb0] sm:$0xff] }
0x1021   : > { %v2465_v31 = vsel %vm1445_vm7, %v2464_v30, %v2458_v28  ;;  %v2596_v28 = vld [vmem:[#allocation2 + $0xb8] sm:$0xff]  ;;  %2652 = vmatpush.msrb.mxu1 %v2595_v27  ;;  %v2593_v30 = vld [vmem:[#allocation2 + $0xa0] sm:$0xff] }
0x1022   : > { %v2466_v32 = vsel %vm1447_vm8, %v2465_v31, %v2462_v29  ;;  %2672 = vmatpush.msra.mxu2 %v2596_v28  ;;  %v2594_v29 = vld [vmem:[#allocation2 + $0xa8] sm:$0xff]  ;;  %v2591_v31 = vld [vmem:[#allocation2 + $0x90] sm:$0xff] }
0x1023   : > { %8936 = vmatmul.msk.f32.vlgmr.msrb.gmra.mxu2 %vm566_vm0, %v2466_v32  ;;  %2653 = vmatpush.msrb.mxu1 %v2593_v30  ;;  %v2592_v32 = vld [vmem:[#allocation2 + $0x98] sm:$0xff] }
0x1024   : > { %2673 = vmatpush.msra.mxu2 %v2594_v29 }
0x1025   : > { %2654 = vmatpush.msrb.mxu1 %v2591_v31 }
0x1026   : > { %2674 = vmatpush.msra.mxu2 %v2592_v32 }
0x10a6   : > { %v2487_v34 = vpop.f32.mrf.mxu2 }
0x10a7   : > { %v10188_v0 = vadd.f32 %v2487_v34, %v10075_v19  ;;  %v8919_v19 = vld [vmem:[%s11158_s8 + $0x28] sm:$0xff]  ;;  %v2589_v34 = vld [vmem:[#allocation2 + $0x80] sm:$0xff] }
0x10a8   : > { %2529 = vmatpush.msra.mxu3 %v8919_v19  ;;  %2655 = vmatpush.msrb.mxu1 %v2589_v34 }
0x10a9   : > { %v2491_v35 = vmul.f32 %v10188_v0, %v10188_v0 }
0x10aa   : > { %2530 = vmatpush.msra.mxu3 %v8918_v42 }
0x10ab   : > { %v2492_v38 = vsel %vm566_vm0, %v2491_v35, 0.0  ;;  %v2590_v35 = vld [vmem:[#allocation2 + $0x88] sm:$0xff] }
0x10ac   : > { %2493 = vadd.xlane.f32.xlu1 %v2492_v38  ;;  %2675 = vmatpush.msra.mxu2 %v2590_v35 }
0x111f   : > { %v2494_v43 = vpop.xlane.xlu1 %2493 }
0x1120   : > { %v2495_v44 = vmul.f32 %v2494_v43, %v9903_v17 }
0x1122   : > { %v2496_v45 = vadd.f32 1e-06, %v2495_v44 }
0x1124   : > { %9388 = vrsqrt.f32 %v2496_v45  ;;  %vm2503_vm10 = vweird.f32 %v2496_v45 }
0x112a   : > { %v9389_v46 = vpop.eup %9388 }
0x112b   : > { %v2498_v47 = vmul.f32 %v9389_v46, %v2496_v45  ;;  %vm2504_vm9 = vweird.f32 %v9389_v46 }
0x112c   : > { %vm2505_vm11 = vmor %vm2503_vm10, %vm2504_vm9 }
0x112d   : > { %v2499_v48 = vmul.f32 %v9389_v46, %v2498_v47 }
0x112f   : > { %v2500_v49 = vmul.f32 0.5, %v2499_v48 }
0x1131   : > { %v2501_v51 = vsub.f32 1.5, %v2500_v49 }
0x1133   : > { %v2502_v36 = vmul.f32 %v9389_v46, %v2501_v51 }
0x1135   : > { %v2506_v53 = vsel %vm2505_vm11, %v9389_v46, %v2502_v36  ;;  %v9332_v46 = vld [vmem:[%s11154_s4 + $0x2] ss:$0 sm:$0xff] }
0x1136   : > { %v2507_v54 = vmul.f32 %v2506_v53, %v10188_v0 }
0x1138   : > { %v2511_v55 = vmul.f32 %v9331_v52, %v2507_v54 }
0x113a   : > { %8937 = vmatmul.msk.f32.vlgmr.msra.gmra.mxu3 %vm566_vm0, %v2511_v55 }
0x11bd   : > { %v2532_v60 = vpop.f32.mrf.mxu3 }
0x11be   : > { %2556 = vrot.lane.b32.xlu2 %v2532_v60, %s11211_s18  ;;  %v8938_v2 = vmul.f32 -1.442695, %v2532_v60 }
0x11c0   : > { %9390 = vpow2.f32 %v8938_v2 }
0x11c6   : > { %v9391_v4 = vpop.eup %9390 }
0x11c7   : > { %v2538_v5 = vadd.f32 1.0, %v9391_v4 }
0x11c9   : > { %9392 = vrcp.f32 %v2538_v5  ;;  %v2550_v13 = vand.u32 2147483648, %v2538_v5  ;;  %vm2544_vm13 = vweird.f32 %v2538_v5  ;;  %v2548_v14 = vand.u32 2147483647, %v2538_v5 }
0x11cb   : > { %v2551_v18 = vor.u32 1.1754944e-38, %v2550_v13  ;;  %vm2549_vm15 = vcmp.eq.f32.partialorder %v2548_v14, 8.507059e+37 }
0x11cf   : > { %v9393_v8 = vpop.eup %9392 }
0x11d0   : > { %v2540_v9 = vmul.f32 %v9393_v8, %v2538_v5  ;;  %vm2545_vm12 = vweird.f32 %v9393_v8 }
0x11d1   : > { %vm2546_vm14 = vmor %vm2544_vm13, %vm2545_vm12 }
0x11d2   : > { %v2541_v10 = vsub.f32 1.0, %v2540_v9 }
0x11d4   : > { %v2542_v11 = vmul.f32 %v9393_v8, %v2541_v10 }
0x11d6   : > { %v2543_v12 = vadd.f32 %v9393_v8, %v2542_v11 }
0x11d8   : > { %v2547_v15 = vsel %vm2546_vm14, %v9393_v8, %v2543_v12 }
0x11d9   : > { %v2552_v20 = vsel %vm2549_vm15, %v2551_v18, %v2547_v15  ;;  %v10255_v18 = vld [vmem:[%s9969_s23] sm:$0xff] }
0x11da   : > { %v2554_v21 = vmul.f32 %v2552_v20, %v2532_v60 }
0x1218   : > { %v2557_v22 = vpop.permute.xlu2 %2556 }
0x1219   : > { %v2559_v23 = vmul.f32 %v2557_v22, %v2554_v21 }
0x121b   : > { %8939 = vmatmul.msk.f32.vlgmr.msrb.gmra.mxu0 %vm1542_vm1, %v2559_v23 }
0x1298   : > { %v2580_v24 = vpop.f32.mrf.mxu0 }
0x1299   : > { %v10214_v25 = vadd.f32 %v2580_v24, %v10188_v0 }
0x129b   : > { %v2616_v63 = vmul.f32 %v10214_v25, %v10214_v25 }
0x129d   : > { %v2617_v26 = vsel %vm566_vm0, %v2616_v63, 0.0 }
0x129e   : > { %2618 = vadd.xlane.f32.xlu0 %v2617_v26 }
0x1311   : > { %v2619_v0 = vpop.xlane.xlu0 %2618 }
0x1312   : > { %v2620_v38 = vmul.f32 %v2619_v0, %v9903_v17 }
0x1314   : > { %v2621_v39 = vadd.f32 1e-06, %v2620_v38 }
0x1316   : > { %9394 = vrsqrt.f32 %v2621_v39  ;;  %vm2628_vm3 = vweird.f32 %v2621_v39 }
0x131c   : > { %v9395_v40 = vpop.eup %9394 }
0x131d   : > { %v2623_v19 = vmul.f32 %v9395_v40, %v2621_v39  ;;  %vm2629_vm2 = vweird.f32 %v9395_v40 }
0x131e   : > { %vm2630_vm4 = vmor %vm2628_vm3, %vm2629_vm2 }
0x131f   : > { %v2624_v42 = vmul.f32 %v9395_v40, %v2623_v19 }
0x1321   : > { %v2625_v43 = vmul.f32 0.5, %v2624_v42 }
0x1323   : > { %v2626_v44 = vsub.f32 1.5, %v2625_v43 }
0x1325   : > { %v2627_v45 = vmul.f32 %v9395_v40, %v2626_v44 }
0x1327   : > { %v2631_v47 = vsel %vm2630_vm4, %v9395_v40, %v2627_v45 }
0x1328   : > { %v2632_v48 = vmul.f32 %v2631_v47, %v10214_v25 }
0x132a   : > { %v2636_v49 = vmul.f32 %v9332_v46, %v2632_v48 }
0x132c   : > { %8946 = vmatmul.msk.f32.vlgmr.msrb.gmra.mxu1 %vm566_vm0, %v2636_v49  ;;  %8947 = vmatmul.msk.f32.vlgmr.msra.gmra.mxu2 %vm566_vm0, %v2636_v49 }
0x13a9   : > { %v2657_v51 = vpop.f32.mrf.mxu1 }
0x13aa   : > { %v2688_v36 = vmul.f32 %v2657_v51, %v9918_v33  ;;  %v2687_v52 = vmul.f32 %v2657_v51, %v9933_v37  ;;  %v2681_v55 = vmul.f32 %v2657_v51, %v9938_v41  ;;  %v2680_v58 = vmul.f32 %v10242_v57, %v2657_v51 }
0x13ac   : > { %2690 = vrot.lane.b32.xlu2 %v2688_v36, %s11212_s6 }
0x13af   : > { %v10259_v22 = vpop.f32.mrf.mxu2 }
0x1406   : > { %v2691_v53 = vpop.permute.xlu2 %2690 }
0x1407   : > { %v10229_v54 = vadd.f32 %v2691_v53, %v2687_v52 }
0x1409   : > { %2713 = vrot.lane.b32.xlu1 %v10229_v54, %s11213_s7  ;;  %2711 = vrot.lane.b32.xlu2 %v10229_v54, %s11207_s26 }
0x1411   : > { %2683 = vrot.lane.b32.xlu2 %v2681_v55, %s11212_s6 }
0x1419   : > { %2709 = vrot.lane.b32.xlu2 %v10229_v54, %s11214_s27 }
0x1421   : > { %2724 = vrot.lane.b32.xlu2 %v10229_v54, %s11211_s18 }
0x1463   : > { %v2712_v56 = vpop.permute.xlu2 %2711 }
0x146b   : > { %v2684_v60 = vpop.permute.xlu2 %2683 }
0x146c   : > { %v2686_v61 = vadd.f32 %v2684_v60, %v2680_v58 }
0x146e   : > { %2706 = vrot.lane.b32.xlu2 %v2686_v61, %s11213_s7  ;;  %2704 = vrot.lane.b32.xlu1 %v2686_v61, %s11207_s26 }
0x1473   : > { %v2710_v62 = vpop.permute.xlu2 %2709 }
0x1476   : > { %2726 = vrot.lane.b32.xlu2 %v2710_v62, %s11211_s18  ;;  %2702 = vrot.lane.b32.xlu1 %v2686_v61, %s11214_s27 }
0x147b   : > { %v2714_v1 = vpop.permute.xlu1 %2713  ;;  %v2725_v2 = vpop.permute.xlu2 %2724 }
0x147c   : > { %v9220_v3 = vpack.i.bf16 %v2714_v1, %v2712_v56 }
0x147e   : > { %9221 = vrot.lane.b32.xlu0 %v9220_v3, %s11211_s18 }
0x14a0   : > { %2736 = vxpose.xlu0.b32.start.end [1/1] (short) (narrow) %v2725_v2, 8 }
0x14c8   : > { %v2707_v4 = vpop.permute.xlu2 %2706 }
0x14d0   : > { %v2727_v5 = vpop.permute.xlu2 %2726 }
0x14d1   : > { %2768 = vxpose.xlu1.b32.start.end [1/1] (short) (narrow) %v2727_v5, 8 }
0x14e0   : > { %v2705_v9 = vpop.permute.xlu1 %2704 }
0x14e8   : > { %v2703_v10 = vpop.permute.xlu1 %2702 }
0x14f0   : > { %v9222_v7 = vpop.permute.xlu0 %9221 }
0x14f1   : > { %9226 = vxpose.xlu2.b32.start.end [1/1] (short) (narrow) %v9222_v7, 8 }
0x1544   : > { %v2752_v8 = vpop.trf.xlu0 }
0x1545   : > { %2881 = vmatpush.msrb.mxu3 %v2752_v8 }
0x1546   : > { %8948 = vmatmul.msk.f32.vlgmr.msrb.gmra.mxu3 %vm828_vm5, %v2686_v61 }
0x1575   : > { %v2784_v11 = vpop.trf.xlu1 }
0x1576   : > { %2903 = vmatpush.msra.mxu1 %v2784_v11 }
0x1577   : > { %8949 = vmatmul.msk.f32.vlgmr.msra.gmra.mxu1 %vm828_vm5, %v2703_v10 }
0x158a   : > { %v9227_v12 = vpop.trf.xlu2 }
0x158b   : > { %v9228_v13 = vunpack.i.l.bf16 %v9227_v12  ;;  %v9231_v14 = vunpack.i.h.bf16 %v9227_v12 }
0x158d   : > { %2925 = vmatpush.msrb.mxu2 %v9228_v13  ;;  %2947 = vmatpush.msra.mxu3 %v9231_v14 }
0x158e   : > { %8950 = vmatmul.msk.f32.vlgmr.msrb.gmra.mxu2 %vm828_vm5, %v2705_v9  ;;  %8951 = vmatmul.msk.f32.vlgmr.msra.gmra.mxu3 %vm828_vm5, %v2707_v4 }
0x15c9   : > { %v2883_v15 = vpop.f32.mrf.mxu3 }
0x15ca   : > { %v2884_v20 = vadd.f32 %v10255_v18, %v2883_v15 }
0x15cc   : > { %v2952_v21 = vsel %vm828_vm5, %v2884_v20, -inf }
0x15cd   : > { %2953 = vmax.xlane.f32.xlu1 %v2952_v21 }
0x15e6   : > { %2718 = vrot.lane.b32.xlu1 %v10259_v22, %s11207_s26 }
0x15f4   : > { %v2905_v23 = vpop.f32.mrf.mxu1 }
0x15f5   : > { %v2906_v24 = vadd.f32 %v10255_v18, %v2905_v23 }
0x15f7   : > { %v2955_v63 = vsel %vm828_vm5, %v2906_v24, -inf }
0x15f8   : > { %2956 = vmax.xlane.f32.xlu0 %v2955_v63 }
0x1611   : > { %v2927_v26 = vpop.f32.mrf.mxu2  ;;  %v2949_v27 = vpop.f32.mrf.mxu3 }
0x1612   : > { %v2928_v28 = vadd.f32 %v10255_v18, %v2927_v26  ;;  %v2950_v30 = vadd.f32 %v10255_v18, %v2949_v27 }
0x1614   : > { %v2958_v29 = vsel %vm828_vm5, %v2928_v28, -inf  ;;  %v2961_v31 = vsel %vm828_vm5, %v2950_v30, -inf }
0x1615   : > { %2959 = vmax.xlane.f32.xlu0 %v2958_v29  ;;  %2962 = vmax.xlane.f32.xlu2 %v2961_v31 }
0x1629   : > { %2715 = vrot.lane.b32.xlu0 %v10259_v22, %s11214_s27 }
0x162d   : > { %2721 = vrot.lane.b32.xlu2 %v10259_v22, %s11213_s7 }
0x1640   : > { %v2954_v32 = vpop.xlane.xlu1 %2953 }
0x1641   : > { %v2964_v34 = vsub.f32 %v2884_v20, %v2954_v32 }
0x1643   : > { %v2968_v35 = vmul.f32 1.442695, %v2964_v34 }
0x1645   : > { %9396 = vpow2.f32 %v2968_v35 }
0x164b   : > { %v9397_v0 = vpop.eup %9396 }
0x164c   : > { %v2976_v38 = vsel %vm828_vm5, %v9397_v0, 0.0 }
0x164d   : > { %2977 = vadd.xlane.f32.xlu1 %v2976_v38 }
0x1658   : > { %v2719_v56 = vpop.permute.xlu1 %2718 }
0x166b   : > { %v2957_v39 = vpop.xlane.xlu0 %2956 }
0x166c   : > { %v2965_v40 = vsub.f32 %v2906_v24, %v2957_v39 }
0x166e   : > { %v2970_v19 = vmul.f32 1.442695, %v2965_v40 }
0x1670   : > { %9398 = vpow2.f32 %v2970_v19 }
0x1676   : > { %v9399_v42 = vpop.eup %9398 }
0x1677   : > { %v2979_v43 = vsel %vm828_vm5, %v9399_v42, 0.0 }
0x1678   : > { %2980 = vadd.xlane.f32.xlu2 %v2979_v43 }
0x1687   : > { %2996 = vxpose.xlu1.b32.start.end [1/1] (short) (narrow) %v10259_v22, 8 }
0x1688   : > { %v2960_v44 = vpop.xlane.xlu0 %2959  ;;  %v2963_v45 = vpop.xlane.xlu2 %2962 }
0x1689   : > { %v2966_v46 = vsub.f32 %v2928_v28, %v2960_v44  ;;  %v2967_v48 = vsub.f32 %v2950_v30, %v2963_v45 }
0x168b   : > { %v2972_v47 = vmul.f32 1.442695, %v2966_v46  ;;  %v2974_v49 = vmul.f32 1.442695, %v2967_v48 }
0x168d   : > { %9400 = vpow2.f32 %v2972_v47 }
0x168e   : > { %9402 = vpow2.f32 %v2974_v49 }
0x1690   : > { %v2722_v53 = vpop.permute.xlu2 %2721 }
0x1693   : > { %v9401_v51 = vpop.eup %9400 }
0x1694   : > { %v2982_v36 = vsel %vm828_vm5, %v9401_v51, 0.0  ;;  %v9403_v52 = vpop.eup %9402 }
0x1695   : > { %2983 = vadd.xlane.f32.xlu0 %v2982_v36  ;;  %v2985_v55 = vsel %vm828_vm5, %v9403_v52, 0.0 }
0x169b   : > { %v2716_v62 = vpop.permute.xlu0 %2715 }
0x169d   : > { %2986 = vadd.xlane.f32.xlu0 %v2985_v55 }
0x16a1   : > { %3092 = vxpose.xlu2.b32.start.end [1/1] (short) (narrow) %v2722_v53, 8 }
0x16c0   : > { %v2978_v58 = vpop.xlane.xlu1 %2977 }
0x16c1   : > { %9404 = vrcp.f32 %v2978_v58 }
0x16c6   : > { %3060 = vxpose.xlu0.b32.start.end [1/1] (short) (narrow) %v2719_v56, 8 }
0x16c7   : > { %v9405_v60 = vpop.eup %9404 }
0x16c8   : > { %v2992_v61 = vmul.f32 %v9405_v60, %v9397_v0 }
0x16ca   : > { %8952 = vmatpush.xpose.msk.msra.mxu0 %vm828_vm5, %v2992_v61 }
0x16ce   : > { %3028 = vxpose.xlu0.b32.start.end [1/1] (short) (narrow) %v2716_v62, 8 }
0x16eb   : > { %v2981_v1 = vpop.xlane.xlu2 %2980 }
0x16ec   : > { %9406 = vrcp.f32 %v2981_v1 }
0x16f2   : > { %v9407_v3 = vpop.eup %9406 }
0x16f3   : > { %v2993_v2 = vmul.f32 %v9407_v3, %v9399_v42 }
0x16f5   : > { %8954 = vmatpush.xpose.msk.msrb.mxu1 %vm828_vm5, %v2993_v2 }
0x1708   : > { %v2984_v4 = vpop.xlane.xlu0 %2983 }
0x1709   : > { %9408 = vrcp.f32 %v2984_v4 }
0x170f   : > { %v9409_v5 = vpop.eup %9408 }
0x1710   : > { %v2994_v7 = vmul.f32 %v9409_v5, %v9401_v51  ;;  %v2987_v8 = vpop.xlane.xlu0 %2986 }
0x1711   : > { %9410 = vrcp.f32 %v2987_v8 }
0x1712   : > { %8956 = vmatpush.xpose.msk.msra.mxu2 %vm828_vm5, %v2994_v7 }
0x1717   : > { %v9411_v9 = vpop.eup %9410 }
0x1718   : > { %v2995_v10 = vmul.f32 %v9411_v9, %v9403_v52 }
0x171a   : > { %8958 = vmatpush.xpose.msk.msrb.mxu3 %vm828_vm5, %v2995_v10 }
0x172b   : > { %v3012_v11 = vpop.trf.xlu1 }
0x172c   : > { %8953 = vmatmul.msk.f32.vlgmr.msra.gmra.mxu0 %vm828_vm5, %v3012_v11 }
0x173a   : > { %v3108_v12 = vpop.trf.xlu2 }
0x173b   : > { %8959 = vmatmul.msk.f32.vlgmr.msrb.gmra.mxu3 %vm828_vm5, %v3108_v12 }
0x176a   : > { %v3076_v13 = vpop.trf.xlu0 }
0x176b   : > { %8957 = vmatmul.msk.f32.vlgmr.msra.gmra.mxu2 %vm828_vm5, %v3076_v13 }
0x1772   : > { %v3044_v14 = vpop.trf.xlu0 }
0x1773   : > { %8955 = vmatmul.msk.f32.vlgmr.msrb.gmra.mxu1 %vm828_vm5, %v3044_v14 }
0x17a9   : > { %v3147_v15 = vpop.f32.mrf.mxu0 }
0x17aa   : > { %3228 = vxpose.xlu0.b32.start.end [1/1] (short) (narrow) %v3147_v15, 8 }
0x17be   : > { %v3225_v23 = vpop.f32.mrf.mxu3 }
0x17ee   : > { %v3199_v21 = vpop.f32.mrf.mxu2 }
0x17f0   : > { %v3173_v20 = vpop.f32.mrf.mxu1 }
0x17f1   : > { %3260 = vxpose.xlu0.b32.start.end [1/1] (short) (narrow) %v3173_v20, 8 }
0x17f9   : > { %3292 = vxpose.xlu0.b32.start.end [1/1] (short) (narrow) %v3199_v21, 8 }
0x1801   : > { %3324 = vxpose.xlu0.b32.start.end [1/1] (short) (narrow) %v3225_v23, 8 }
0x184e   : > { %v3244_v24 = vpop.trf.xlu0 }
0x184f   : > { %v3358_v27 = vrot.slane %v3244_v24, 4 }
0x1895   : > { %v3276_v63 = vpop.trf.xlu0 }
0x1896   : > { %v3370_v32 = vrot.slane %v3276_v63, 4 }
0x189d   : > { %v3308_v26 = vpop.trf.xlu0 }
0x189e   : > { %v3356_v28 = vrot.slane %v3308_v26, 4  ;;  %v3359_v30 = vsel %vm1322_vm6, %v3308_v26, %v3358_v27 }
0x189f   : > { %v3367_v31 = vperm.slane %v3359_v30, %v9997_v6 }
0x18a0   : > { %v3357_v29 = vsel %vm1322_vm6, %v3356_v28, %v3244_v24 }
0x18a1   : > { %v3363_v34 = vperm.slane %v3357_v29, %v9997_v6  ;;  %v3394_v39 = vrot.slane %v3367_v31, 4 }
0x18a3   : > { %v3382_v42 = vrot.slane %v3363_v34, 4 }
0x18a5   : > { %v3340_v35 = vpop.trf.xlu0 }
0x18a6   : > { %v3368_v0 = vrot.slane %v3340_v35, 4  ;;  %v3371_v38 = vsel %vm1322_vm6, %v3340_v35, %v3370_v32 }
0x18a7   : > { %v3379_v40 = vperm.slane %v3371_v38, %v9997_v6 }
0x18a8   : > { %v3369_v19 = vsel %vm1322_vm6, %v3368_v0, %v3276_v63 }
0x18a9   : > { %v3375_v43 = vperm.slane %v3369_v19, %v9997_v6  ;;  %v3392_v44 = vrot.slane %v3379_v40, 4  ;;  %v3395_v45 = vsel %vm1322_vm6, %v3379_v40, %v3394_v39  ;;  %v2601_v19 = vld [vmem:[#allocation5 + $0x58] sm:$0xff] }
0x18aa   : > { %v3403_v46 = vperm.slane %v3395_v45, %v10003_v16  ;;  %3496 = vmatpush.msrb.mxu0 %v2601_v19 }
0x18ab   : > { %v3380_v47 = vrot.slane %v3375_v43, 4  ;;  %v3383_v48 = vsel %vm1322_vm6, %v3375_v43, %v3382_v42  ;;  %v3393_v49 = vsel %vm1322_vm6, %v3392_v44, %v3367_v31  ;;  %v2600_v42 = vld [vmem:[#allocation5 + $0x50] sm:$0xff]  ;;  %v2599_v43 = vld [vmem:[#allocation5 + $0x48] sm:$0xff]  ;;  %v2598_v44 = vld [vmem:[#allocation5 + $0x40] sm:$0xff] }
0x18ac   : > { %v3391_v51 = vperm.slane %v3383_v48, %v10003_v16  ;;  %v3399_v36 = vperm.slane %v3393_v49, %v10003_v16  ;;  %v3410_v52 = vrot.slane %v3403_v46, 4  ;;  %3497 = vmatpush.msrb.mxu0 %v2600_v42 }
0x18ad   : > { %v3381_v53 = vsel %vm1322_vm6, %v3380_v47, %v3363_v34 }
0x18ae   : > { %v3387_v55 = vperm.slane %v3381_v53, %v10003_v16  ;;  %v3406_v56 = vrot.slane %v3391_v51, 4  ;;  %v3408_v58 = vrot.slane %v3399_v36, 4  ;;  %v3411_v60 = vsel %vm1322_vm6, 0.0, %v3410_v52  ;;  %3498 = vmatpush.msrb.mxu0 %v2599_v43 }
0x18af   : > { %v3423_v61 = vsel %vm1322_vm6, %v3410_v52, %v3399_v36  ;;  %v3428_v62 = vrot.slane %v3411_v60, 4  ;;  %v8942_v60 = vld [vmem:[%s11158_s8 + $0x40] sm:$0xff] }
0x18b0   : > { %v3407_v1 = vsel %vm1322_vm6, 0.0, %v3406_v56  ;;  %v3409_v3 = vsel %vm1322_vm6, 0.0, %v3408_v58  ;;  %v3404_v2 = vrot.slane %v3387_v55, 4  ;;  %v3412_v4 = vsel %vm1322_vm6, %v3406_v56, %v3387_v55  ;;  %3499 = vmatpush.msrb.mxu0 %v2598_v44  ;;  %v8945_v56 = vld [vmem:[%s11158_s8 + $0x58] sm:$0xff]  ;;  %v8944_v58 = vld [vmem:[%s11158_s8 + $0x50] sm:$0xff] }
0x18b1   : > { %v3416_v5 = vperm.slane %v3412_v4, %v9997_v6  ;;  %v3417_v7 = vrot.slane %v3407_v1, 4  ;;  %v3427_v8 = vperm.slane %v3423_v61, %v9997_v6  ;;  %v3429_v9 = vsel %vm1322_vm6, %v3428_v62, %v3409_v3  ;;  %3541 = vmatpush.msra.mxu1 %v8945_v56  ;;  %v3606_v56 = vld [vmem:[#allocation2 + $0xd8] sm:$0xff] }
0x18b2   : > { %v3405_v10 = vsel %vm1322_vm6, 0.0, %v3404_v2  ;;  %v3433_v11 = vperm.slane %v3429_v9, %v9997_v6  ;;  %v9333_v9 = vld [vmem:[%s11155_s5 + $0x2] ss:$0 sm:$0xff] }
0x18b3   : > { %v3418_v12 = vsel %vm1322_vm6, %v3417_v7, %v3405_v10  ;;  %v3436_v13 = vrot.slane %v3416_v5, 4  ;;  %v3448_v14 = vrot.slane %v3427_v8, 4  ;;  %3542 = vmatpush.msra.mxu1 %v8944_v58  ;;  %v3603_v58 = vld [vmem:[#allocation2 + $0xc0] sm:$0xff] }
0x18b4   : > { %v3422_v15 = vperm.slane %v3418_v12, %v9997_v6  ;;  %v3446_v20 = vrot.slane %v3433_v11, 4 }
0x18b5   : > { %v3449_v21 = vsel %vm1322_vm6, %v3433_v11, %v3448_v14  ;;  %v2614_v14 = vld [vmem:[#allocation7 + $0xb0] sm:$0xff] }
0x18b6   : > { %v3437_v23 = vsel %vm1322_vm6, %v3422_v15, %v3436_v13  ;;  %v3457_v24 = vperm.slane %v3449_v21, %v10003_v16  ;;  %v3434_v63 = vrot.slane %v3422_v15, 4  ;;  %v3447_v26 = vsel %vm1322_vm6, %v3446_v20, %v3427_v8  ;;  %v2615_v13 = vld [vmem:[#allocation7 + $0xb8] sm:$0xff]  ;;  %v2613_v15 = vld [vmem:[#allocation7 + $0xa8] sm:$0xff]  ;;  %v2612_v21 = vld [vmem:[#allocation7 + $0xa0] sm:$0xff] }
0x18b7   : > { %v3445_v27 = vperm.slane %v3437_v23, %v10003_v16  ;;  %v3453_v28 = vperm.slane %v3447_v26, %v10003_v16  ;;  %3585 = vmatpush.msrb.mxu2 %v2615_v13  ;;  %v2611_v23 = vld [vmem:[#allocation7 + $0x98] sm:$0xff] }
0x18b8   : > { %v3462_v30 = vrot.slane %v3457_v24, 4  ;;  %v3435_v29 = vsel %vm1322_vm6, %v3434_v63, %v3416_v5  ;;  %v2609_v63 = vld [vmem:[#allocation7 + $0x88] sm:$0xff] }
0x18b9   : > { %v3464_v31 = vrot.slane %v3445_v27, 4  ;;  %v3441_v32 = vperm.slane %v3435_v29, %v10003_v16  ;;  %v3458_v34 = vrot.slane %v3453_v28, 4  ;;  %3586 = vmatpush.msrb.mxu2 %v2614_v14 }
0x18ba   : > { %v3463_v35 = vsel %vm1322_vm6, %v3462_v30, %v3445_v27  ;;  %v2608_v30 = vld [vmem:[#allocation7 + $0x80] sm:$0xff] }
0x18bb   : > { %3471 = vrot.lane.b32.xlu0 %v3463_v35, %s11208_s16  ;;  %v3465_v0 = vsel %vm1322_vm6, %v3457_v24, %v3464_v31  ;;  %v3460_v38 = vrot.slane %v3441_v32, 4  ;;  %v3459_v39 = vsel %vm1322_vm6, %v3458_v34, %v3441_v32  ;;  %3587 = vmatpush.msrb.mxu2 %v2613_v15  ;;  %v2610_v24 = vld [vmem:[#allocation7 + $0x90] sm:$0xff] }
0x18bc   : > { %3475 = vrot.lane.b32.xlu1 %v3465_v0, %s11209_s29 }
0x18bd   : > { %v3461_v40 = vsel %vm1322_vm6, %v3453_v28, %v3460_v38  ;;  %3588 = vmatpush.msrb.mxu2 %v2612_v21 }
0x18be   : > { %3467 = vrot.lane.b32.xlu2 %v3461_v40, %s11210_s21 }
0x18bf   : > { %3589 = vmatpush.msrb.mxu2 %v2611_v23 }
0x18c1   : > { %3590 = vmatpush.msrb.mxu2 %v2610_v24 }
0x18c3   : > { %3591 = vmatpush.msrb.mxu2 %v2609_v63 }
0x18c5   : > { %3592 = vmatpush.msrb.mxu2 %v2608_v30 }
0x1918   : > { %v3468_v45 = vpop.permute.xlu2 %3467 }
0x1919   : > { %v3478_v46 = vsel %vm828_vm5, %v3459_v39, %v3468_v45 }
0x192d   : > { %v3472_v47 = vpop.permute.xlu0 %3471 }
0x192e   : > { %v3479_v48 = vsel %vm1445_vm7, %v3478_v46, %v3472_v47  ;;  %v3476_v49 = vpop.permute.xlu1 %3475 }
0x192f   : > { %v3480_v51 = vsel %vm1447_vm8, %v3479_v48, %v3476_v49  ;;  %v3609_v49 = vld [vmem:[#allocation2 + $0xf0] sm:$0xff] }
0x1930   : > { %8960 = vmatmul.msk.f32.vlgmr.msrb.gmra.mxu0 %vm566_vm0, %v3480_v51  ;;  %v3610_v51 = vld [vmem:[#allocation2 + $0xf8] sm:$0xff]  ;;  %3666 = vmatpush.msra.mxu3 %v3609_v49 }
0x1931   : > { %3686 = vmatpush.msra.mxu0 %v3610_v51 }
0x19ad   : > { %v3501_v36 = vpop.f32.mrf.mxu0 }
0x19ae   : > { %v10334_v52 = vadd.f32 %v3501_v36, %v10214_v25  ;;  %v8943_v25 = vld [vmem:[%s11158_s8 + $0x48] sm:$0xff]  ;;  %v3607_v36 = vld [vmem:[#allocation2 + $0xe0] sm:$0xff] }
0x19af   : > { %3543 = vmatpush.msra.mxu1 %v8943_v25  ;;  %3667 = vmatpush.msra.mxu3 %v3607_v36  ;;  %v3604_v25 = vld [vmem:[#allocation2 + $0xc8] sm:$0xff] }
0x19b0   : > { %v3505_v53 = vmul.f32 %v10334_v52, %v10334_v52 }
0x19b1   : > { %3544 = vmatpush.msra.mxu1 %v8942_v60 }
0x19b2   : > { %v3506_v55 = vsel %vm566_vm0, %v3505_v53, 0.0  ;;  %v3608_v53 = vld [vmem:[#allocation2 + $0xe8] sm:$0xff] }
0x19b3   : > { %3507 = vadd.xlane.f32.xlu2 %v3506_v55  ;;  %v3605_v55 = vld [vmem:[#allocation2 + $0xd0] sm:$0xff]  ;;  %3687 = vmatpush.msra.mxu0 %v3608_v53 }
0x19b4   : > { %3668 = vmatpush.msra.mxu3 %v3605_v55 }
0x19b5   : > { %3688 = vmatpush.msra.mxu0 %v3606_v56 }
0x19b6   : > { %3669 = vmatpush.msra.mxu3 %v3603_v58 }
0x19b7   : > { %3689 = vmatpush.msra.mxu0 %v3604_v25 }
0x1a26   : > { %v3508_v61 = vpop.xlane.xlu2 %3507 }
0x1a27   : > { %v3509_v62 = vmul.f32 %v3508_v61, %v9903_v17 }
0x1a29   : > { %v3510_v1 = vadd.f32 1e-06, %v3509_v62 }
0x1a2b   : > { %9412 = vrsqrt.f32 %v3510_v1  ;;  %vm3517_vm10 = vweird.f32 %v3510_v1 }
0x1a31   : > { %v9413_v3 = vpop.eup %9412 }
0x1a32   : > { %v3512_v2 = vmul.f32 %v9413_v3, %v3510_v1  ;;  %vm3518_vm9 = vweird.f32 %v9413_v3 }
0x1a33   : > { %vm3519_vm11 = vmor %vm3517_vm10, %vm3518_vm9 }
0x1a34   : > { %v3513_v4 = vmul.f32 %v9413_v3, %v3512_v2 }
0x1a36   : > { %v3514_v5 = vmul.f32 0.5, %v3513_v4 }
0x1a38   : > { %v3515_v7 = vsub.f32 1.5, %v3514_v5 }
0x1a3a   : > { %v3516_v8 = vmul.f32 %v9413_v3, %v3515_v7  ;;  %v9334_v7 = vld [vmem:[%s11154_s4 + $0x3] ss:$0 sm:$0xff] }
0x1a3c   : > { %v3520_v10 = vsel %vm3519_vm11, %v9413_v3, %v3516_v8 }
0x1a3d   : > { %v3521_v11 = vmul.f32 %v3520_v10, %v10334_v52 }
0x1a3f   : > { %v3525_v12 = vmul.f32 %v9333_v9, %v3521_v11 }
0x1a41   : > { %8961 = vmatmul.msk.f32.vlgmr.msra.gmra.mxu1 %vm566_vm0, %v3525_v12 }
0x1abe   : > { %v3546_v20 = vpop.f32.mrf.mxu1 }
0x1abf   : > { %3570 = vrot.lane.b32.xlu1 %v3546_v20, %s11211_s18  ;;  %v8962_v26 = vmul.f32 -1.442695, %v3546_v20 }
0x1ac1   : > { %9414 = vpow2.f32 %v8962_v26 }
0x1ac7   : > { %v9415_v27 = vpop.eup %9414 }
0x1ac8   : > { %v3552_v28 = vadd.f32 1.0, %v9415_v27 }
0x1aca   : > { %9416 = vrcp.f32 %v3552_v28  ;;  %v3564_v0 = vand.u32 2147483648, %v3552_v28  ;;  %vm3558_vm13 = vweird.f32 %v3552_v28  ;;  %v3562_v38 = vand.u32 2147483647, %v3552_v28 }
0x1acc   : > { %v3565_v40 = vor.u32 1.1754944e-38, %v3564_v0  ;;  %vm3563_vm15 = vcmp.eq.f32.partialorder %v3562_v38, 8.507059e+37 }
0x1ad0   : > { %v9417_v29 = vpop.eup %9416 }
0x1ad1   : > { %v3554_v31 = vmul.f32 %v9417_v29, %v3552_v28  ;;  %vm3559_vm12 = vweird.f32 %v9417_v29 }
0x1ad2   : > { %vm3560_vm14 = vmor %vm3558_vm13, %vm3559_vm12 }
0x1ad3   : > { %v3555_v32 = vsub.f32 1.0, %v3554_v31 }
0x1ad5   : > { %v3556_v34 = vmul.f32 %v9417_v29, %v3555_v32 }
0x1ad7   : > { %v3557_v35 = vadd.f32 %v9417_v29, %v3556_v34 }
0x1ad9   : > { %v3561_v39 = vsel %vm3560_vm14, %v9417_v29, %v3557_v35 }
0x1ada   : > { %v3566_v19 = vsel %vm3563_vm15, %v3565_v40, %v3561_v39 }
0x1adb   : > { %v3568_v42 = vmul.f32 %v3566_v19, %v3546_v20 }
0x1b31   : > { %v3571_v43 = vpop.permute.xlu1 %3570 }
0x1b32   : > { %v3573_v44 = vmul.f32 %v3571_v43, %v3568_v42 }
0x1b34   : > { %8963 = vmatmul.msk.f32.vlgmr.msrb.gmra.mxu2 %vm1542_vm1, %v3573_v44 }
0x1bb7   : > { %v3594_v45 = vpop.f32.mrf.mxu2 }
0x1bb8   : > { %v10360_v46 = vadd.f32 %v3594_v45, %v10334_v52 }
0x1bba   : > { %v3630_v47 = vmul.f32 %v10360_v46, %v10360_v46 }
0x1bbc   : > { %v3631_v48 = vsel %vm566_vm0, %v3630_v47, 0.0 }
0x1bbd   : > { %3632 = vadd.xlane.f32.xlu1 %v3631_v48 }
0x1c30   : > { %v3633_v52 = vpop.xlane.xlu1 %3632 }
0x1c31   : > { %v3634_v60 = vmul.f32 %v3633_v52, %v9903_v17 }
0x1c33   : > { %v3635_v61 = vadd.f32 1e-06, %v3634_v60 }
0x1c35   : > { %9418 = vrsqrt.f32 %v3635_v61  ;;  %vm3642_vm3 = vweird.f32 %v3635_v61 }
0x1c3b   : > { %v9419_v62 = vpop.eup %9418 }
0x1c3c   : > { %v3637_v1 = vmul.f32 %v9419_v62, %v3635_v61  ;;  %vm3643_vm2 = vweird.f32 %v9419_v62 }
0x1c3d   : > { %vm3644_vm4 = vmor %vm3642_vm3, %vm3643_vm2 }
0x1c3e   : > { %v3638_v3 = vmul.f32 %v9419_v62, %v3637_v1 }
0x1c40   : > { %v3639_v2 = vmul.f32 0.5, %v3638_v3 }
0x1c42   : > { %v3640_v4 = vsub.f32 1.5, %v3639_v2 }
0x1c44   : > { %v3641_v5 = vmul.f32 %v9419_v62, %v3640_v4 }
0x1c46   : > { %v3645_v8 = vsel %vm3644_vm4, %v9419_v62, %v3641_v5 }
0x1c47   : > { %v3646_v9 = vmul.f32 %v3645_v8, %v10360_v46 }
0x1c49   : > { %v3650_v10 = vmul.f32 %v9334_v7, %v3646_v9 }
0x1c4b   : > { %8970 = vmatmul.msk.f32.vlgmr.msra.gmra.mxu3 %vm566_vm0, %v3650_v10  ;;  %8971 = vmatmul.msk.f32.vlgmr.msra.gmra.mxu0 %vm566_vm0, %v3650_v10 }
0x1cc8   : > { %v10396_v42 = vpop.f32.mrf.mxu0 }
0x1cce   : > { %v3671_v11 = vpop.f32.mrf.mxu3 }
0x1ccf   : > { %v3702_v12 = vmul.f32 %v3671_v11, %v9918_v33  ;;  %v3695_v13 = vmul.f32 %v3671_v11, %v9938_v41  ;;  %v3694_v14 = vmul.f32 %v10242_v57, %v3671_v11  ;;  %v3701_v21 = vmul.f32 %v3671_v11, %v9933_v37 }
0x1cd1   : > { %3704 = vrot.lane.b32.xlu0 %v3702_v12, %s11212_s6  ;;  %3697 = vrot.lane.b32.xlu2 %v3695_v13, %s11212_s6 }
0x1d2b   : > { %v3698_v15 = vpop.permute.xlu2 %3697 }
0x1d2c   : > { %v3700_v20 = vadd.f32 %v3698_v15, %v3694_v14 }
0x1d2e   : > { %3724 = vrot.lane.b32.xlu2 %v3700_v20, %s11213_s7  ;;  %3720 = vrot.lane.b32.xlu1 %v3700_v20, %s11214_s27 }
0x1d43   : > { %v3705_v23 = vpop.permute.xlu0 %3704 }
0x1d44   : > { %v10380_v24 = vadd.f32 %v3705_v23, %v3701_v21 }
0x1d46   : > { %3726 = vrot.lane.b32.xlu0 %v10380_v24, %s11214_s27 }
0x1d4e   : > { %3728 = vrot.lane.b32.xlu0 %v10380_v24, %s11207_s26 }
0x1d56   : > { %3730 = vrot.lane.b32.xlu0 %v10380_v24, %s11213_s7 }
0x1d5e   : > { %3722 = vrot.lane.b32.xlu0 %v3700_v20, %s11207_s26 }
0x1d88   : > { %v3725_v32 = vpop.permute.xlu2 %3724 }
0x1da0   : > { %v3721_v38 = vpop.permute.xlu1 %3720 }
0x1db8   : > { %v3727_v57 = vpop.permute.xlu0 %3726 }
0x1db9   : > { %v9232_v63 = vpack.i.bf16 %v10380_v24, %v3727_v57 }
0x1dbb   : > { %9233 = vrot.lane.b32.xlu0 %v9232_v63, %s11211_s18 }
0x1dc0   : > { %v3729_v26 = vpop.permute.xlu0 %3728 }
0x1dc8   : > { %v3731_v27 = vpop.permute.xlu0 %3730 }
0x1dc9   : > { %v9237_v28 = vpack.i.bf16 %v3731_v27, %v3729_v26 }
0x1dcb   : > { %9238 = vrot.lane.b32.xlu0 %v9237_v28, %s11211_s18 }
0x1dd0   : > { %v3723_v30 = vpop.permute.xlu0 %3722 }
0x1e2d   : > { %v9234_v29 = vpop.permute.xlu0 %9233 }
0x1e2e   : > { %9243 = vxpose.xlu0.b32.start.end [1/1] (short) (narrow) %v9234_v29, 8 }
0x1e3d   : > { %v9239_v31 = vpop.permute.xlu0 %9238 }
0x1e3e   : > { %9250 = vxpose.xlu2.b32.start.end [1/1] (short) (narrow) %v9239_v31, 8 }
0x1ed2   : > { %v9244_v34 = vpop.trf.xlu0 }
0x1ed3   : > { %v9248_v35 = vunpack.i.h.bf16 %v9244_v34  ;;  %v9245_v0 = vunpack.i.l.bf16 %v9244_v34 }
0x1ed5   : > { %3898 = vmatpush.msrb.mxu1 %v9248_v35  ;;  %3920 = vmatpush.msrb.mxu3 %v9245_v0 }
0x1ed6   : > { %8972 = vmatmul.msk.f32.vlgmr.msrb.gmra.mxu1 %vm828_vm5, %v3700_v20  ;;  %8973 = vmatmul.msk.f32.vlgmr.msrb.gmra.mxu3 %vm828_vm5, %v3721_v38 }
0x1ed7   : > { %v9251_v39 = vpop.trf.xlu2 }
0x1ed8   : > { %v9252_v40 = vunpack.i.l.bf16 %v9251_v39  ;;  %v9255_v19 = vunpack.i.h.bf16 %v9251_v39 }
0x1eda   : > { %3942 = vmatpush.msrb.mxu0 %v9252_v40  ;;  %3964 = vmatpush.msra.mxu1 %v9255_v19 }
0x1edb   : > { %8974 = vmatmul.msk.f32.vlgmr.msrb.gmra.mxu0 %vm828_vm5, %v3723_v30 }
0x1ede   : > { %8975 = vmatmul.msk.f32.vlgmr.msra.gmra.mxu1 %vm828_vm5, %v3725_v32 }
0x1f53   : > { %v3900_v43 = vpop.f32.mrf.mxu1 }
0x1f54   : > { %v3901_v44 = vadd.f32 %v10255_v18, %v3900_v43 }
0x1f56   : > { %v3969_v45 = vsel %vm828_vm5, %v3901_v44, -inf }
0x1f57   : > { %3970 = vmax.xlane.f32.xlu1 %v3969_v45 }
0x1f58   : > { %v3944_v47 = vpop.f32.mrf.mxu0 }
0x1f59   : > { %v3945_v48 = vadd.f32 %v10255_v18, %v3944_v47  ;;  %v3922_v49 = vpop.f32.mrf.mxu3 }
0x1f5a   : > { %v3923_v51 = vadd.f32 %v10255_v18, %v3922_v49 }
0x1f5b   : > { %v3975_v36 = vsel %vm828_vm5, %v3945_v48, -inf  ;;  %v3966_v55 = vpop.f32.mrf.mxu1 }
0x1f5c   : > { %3976 = vmax.xlane.f32.xlu2 %v3975_v36  ;;  %v3972_v53 = vsel %vm828_vm5, %v3923_v51, -inf  ;;  %v3967_v56 = vadd.f32 %v10255_v18, %v3966_v55 }
0x1f5d   : > { %3973 = vmax.xlane.f32.xlu0 %v3972_v53 }
0x1f5e   : > { %v3978_v58 = vsel %vm828_vm5, %v3967_v56, -inf }
0x1f70   : > { %3732 = vrot.lane.b32.xlu1 %v10396_v42, %s11214_s27 }
0x1f78   : > { %3735 = vrot.lane.b32.xlu1 %v10396_v42, %s11207_s26 }
0x1fa2   : > { %3979 = vmax.xlane.f32.xlu1 %v3978_v58 }
0x1fbb   : > { %3738 = vrot.lane.b32.xlu1 %v10396_v42, %s11213_s7 }
0x1fca   : > { %v3971_v25 = vpop.xlane.xlu1 %3970 }
0x1fcb   : > { %v3981_v52 = vsub.f32 %v3901_v44, %v3971_v25 }
0x1fcd   : > { %v3985_v60 = vmul.f32 1.442695, %v3981_v52 }
0x1fcf   : > { %9420 = vpow2.f32 %v3985_v60  ;;  %v3977_v8 = vpop.xlane.xlu2 %3976 }
0x1fd0   : > { %v3983_v9 = vsub.f32 %v3945_v48, %v3977_v8  ;;  %v3974_v11 = vpop.xlane.xlu0 %3973 }
0x1fd1   : > { %v3982_v12 = vsub.f32 %v3923_v51, %v3974_v11 }
0x1fd2   : > { %v3989_v10 = vmul.f32 1.442695, %v3983_v9 }
0x1fd3   : > { %v3987_v13 = vmul.f32 1.442695, %v3982_v12 }
0x1fd5   : > { %v9421_v61 = vpop.eup %9420 }
0x1fd6   : > { %v3993_v1 = vsel %vm828_vm5, %v9421_v61, 0.0 }
0x1fe2   : > { %v3733_v62 = vpop.permute.xlu1 %3732 }
0x1fe3   : > { %4045 = vxpose.xlu0.b32.start.end [1/1] (short) (narrow) %v3733_v62, 8 }
0x1fe5   : > { %3994 = vadd.xlane.f32.xlu1 %v3993_v1 }
0x1fea   : > { %v3736_v3 = vpop.permute.xlu1 %3735 }
0x2015   : > { %v3980_v2 = vpop.xlane.xlu1 %3979 }
0x2016   : > { %v3984_v4 = vsub.f32 %v3967_v56, %v3980_v2 }
0x2018   : > { %v3991_v18 = vmul.f32 1.442695, %v3984_v4 }
0x201a   : > { %9422 = vpow2.f32 %v3991_v18 }
0x201b   : > { %9424 = vpow2.f32 %v3989_v10 }
0x201c   : > { %9426 = vpow2.f32 %v3987_v13 }
0x201f   : > { %4013 = vxpose.xlu1.b32.start.end [1/1] (short) (narrow) %v10396_v42, 8 }
0x2020   : > { %v9423_v5 = vpop.eup %9422 }
0x2021   : > { %v4002_v7 = vsel %vm828_vm5, %v9423_v5, 0.0  ;;  %v9425_v14 = vpop.eup %9424 }
0x2022   : > { %4003 = vadd.xlane.f32.xlu2 %v4002_v7  ;;  %v3999_v20 = vsel %vm828_vm5, %v9425_v14, 0.0  ;;  %v9427_v21 = vpop.eup %9426 }
0x2023   : > { %v3996_v57 = vsel %vm828_vm5, %v9427_v21, 0.0 }
0x202d   : > { %v3739_v15 = vpop.permute.xlu1 %3738 }
0x204b   : > { %4077 = vxpose.xlu2.b32.start.end [1/1] (short) (narrow) %v3736_v3, 8 }
0x2054   : > { %4000 = vadd.xlane.f32.xlu0 %v3999_v20 }
0x2058   : > { %v3995_v23 = vpop.xlane.xlu1 %3994 }
0x2059   : > { %9428 = vrcp.f32 %v3995_v23 }
0x205c   : > { %3997 = vadd.xlane.f32.xlu0 %v3996_v57 }
0x205f   : > { %v9429_v63 = vpop.eup %9428 }
0x2060   : > { %v4009_v26 = vmul.f32 %v9429_v63, %v9421_v61 }
0x2062   : > { %8976 = vmatpush.xpose.msk.msra.mxu2 %vm828_vm5, %v4009_v26 }
0x2085   : > { %4109 = vxpose.xlu0.b32.start.end [1/1] (short) (narrow) %v3739_v15, 8 }
0x2087   : > { %v4061_v29 = vpop.trf.xlu0 }
0x2095   : > { %v4004_v27 = vpop.xlane.xlu2 %4003 }
0x2096   : > { %9430 = vrcp.f32 %v4004_v27 }
0x209c   : > { %v9431_v28 = vpop.eup %9430 }
0x209d   : > { %v4012_v30 = vmul.f32 %v9431_v28, %v9423_v5 }
0x209f   : > { %8982 = vmatpush.xpose.msk.msrb.mxu1 %vm828_vm5, %v4012_v30 }
0x20c3   : > { %v4029_v31 = vpop.trf.xlu1 }
0x20c4   : > { %8977 = vmatmul.msk.f32.vlgmr.msra.gmra.mxu2 %vm828_vm5, %v4029_v31 }
0x20c7   : > { %v4001_v32 = vpop.xlane.xlu0 %4000 }
0x20c8   : > { %9432 = vrcp.f32 %v4001_v32 }
0x20ce   : > { %v9433_v34 = vpop.eup %9432 }
0x20cf   : > { %v4011_v35 = vmul.f32 %v9433_v34, %v9425_v14  ;;  %v3998_v0 = vpop.xlane.xlu0 %3997 }
0x20d0   : > { %9434 = vrcp.f32 %v3998_v0 }
0x20d1   : > { %8980 = vmatpush.xpose.msk.msra.mxu0 %vm828_vm5, %v4011_v35 }
0x20d6   : > { %v9435_v38 = vpop.eup %9434 }
0x20d7   : > { %v4010_v39 = vmul.f32 %v9435_v38, %v9427_v21 }
0x20d9   : > { %8978 = vmatpush.xpose.msk.msra.mxu3 %vm828_vm5, %v4010_v39 }
0x20dc   : > { %8979 = vmatmul.msk.f32.vlgmr.msra.gmra.mxu3 %vm828_vm5, %v4061_v29 }
0x20e4   : > { %v4093_v40 = vpop.trf.xlu2 }
0x20e5   : > { %8981 = vmatmul.msk.f32.vlgmr.msra.gmra.mxu0 %vm828_vm5, %v4093_v40 }
0x2129   : > { %v4125_v19 = vpop.trf.xlu0 }
0x212a   : > { %8983 = vmatmul.msk.f32.vlgmr.msrb.gmra.mxu1 %vm828_vm5, %v4125_v19 }
0x2147   : > { %v4164_v43 = vpop.f32.mrf.mxu2 }
0x2148   : > { %4245 = vxpose.xlu0.b32.start.end [1/1] (short) (narrow) %v4164_v43, 8 }
0x215f   : > { %v4190_v45 = vpop.f32.mrf.mxu3 }
0x2162   : > { %v4216_v44 = vpop.f32.mrf.mxu0 }
0x2163   : > { %4309 = vxpose.xlu2.b32.start.end [1/1] (short) (narrow) %v4216_v44, 8 }
0x216b   : > { %4277 = vxpose.xlu2.b32.start.end [1/1] (short) (narrow) %v4190_v45, 8 }
0x21a7   : > { %v4242_v47 = vpop.f32.mrf.mxu1 }
0x21a8   : > { %4341 = vxpose.xlu1.b32.start.end [1/1] (short) (narrow) %v4242_v47, 8 }
0x21ec   : > { %v4261_v49 = vpop.trf.xlu0 }
0x21ed   : > { %v4375_v51 = vrot.slane %v4261_v49, 4 }
0x21fc   : > { %v4325_v48 = vpop.trf.xlu2 }
0x21fd   : > { %v4373_v36 = vrot.slane %v4325_v48, 4  ;;  %v4376_v55 = vsel %vm1322_vm6, %v4325_v48, %v4375_v51 }
0x21fe   : > { %v4384_v25 = vperm.slane %v4376_v55, %v9997_v6 }
0x21ff   : > { %v4374_v56 = vsel %vm1322_vm6, %v4373_v36, %v4261_v49 }
0x2200   : > { %v4380_v52 = vperm.slane %v4374_v56, %v9997_v6  ;;  %v4411_v1 = vrot.slane %v4384_v25, 4 }
0x2202   : > { %v4399_v4 = vrot.slane %v4380_v52, 4 }
0x2204   : > { %v4293_v53 = vpop.trf.xlu2 }
0x2205   : > { %v4387_v58 = vrot.slane %v4293_v53, 4 }
0x224c   : > { %v4357_v60 = vpop.trf.xlu1 }
0x224d   : > { %v4385_v61 = vrot.slane %v4357_v60, 4  ;;  %v4388_v62 = vsel %vm1322_vm6, %v4357_v60, %v4387_v58 }
0x224e   : > { %v4396_v3 = vperm.slane %v4388_v62, %v9997_v6 }
0x224f   : > { %v4386_v2 = vsel %vm1322_vm6, %v4385_v61, %v4293_v53 }
0x2250   : > { %v4392_v18 = vperm.slane %v4386_v2, %v9997_v6  ;;  %v4409_v5 = vrot.slane %v4396_v3, 4  ;;  %v4412_v7 = vsel %vm1322_vm6, %v4396_v3, %v4411_v1  ;;  %v3615_v2 = vld [vmem:[#allocation5 + $0x78] sm:$0xff] }
0x2251   : > { %v4420_v8 = vperm.slane %v4412_v7, %v10003_v16  ;;  %4513 = vmatpush.msrb.mxu2 %v3615_v2 }
0x2252   : > { %v4397_v9 = vrot.slane %v4392_v18, 4  ;;  %v4400_v10 = vsel %vm1322_vm6, %v4392_v18, %v4399_v4  ;;  %v4410_v11 = vsel %vm1322_vm6, %v4409_v5, %v4384_v25  ;;  %v3614_v4 = vld [vmem:[#allocation5 + $0x70] sm:$0xff]  ;;  %v3613_v18 = vld [vmem:[#allocation5 + $0x68] sm:$0xff]  ;;  %v3612_v5 = vld [vmem:[#allocation5 + $0x60] sm:$0xff] }
0x2253   : > { %v4408_v12 = vperm.slane %v4400_v10, %v10003_v16  ;;  %v4416_v13 = vperm.slane %v4410_v11, %v10003_v16  ;;  %v4427_v14 = vrot.slane %v4420_v8, 4  ;;  %4514 = vmatpush.msrb.mxu2 %v3614_v4 }
0x2254   : > { %v4398_v15 = vsel %vm1322_vm6, %v4397_v9, %v4380_v52 }
0x2255   : > { %v4404_v20 = vperm.slane %v4398_v15, %v10003_v16  ;;  %v4423_v21 = vrot.slane %v4408_v12, 4  ;;  %v4425_v23 = vrot.slane %v4416_v13, 4  ;;  %v4428_v57 = vsel %vm1322_vm6, 0.0, %v4427_v14  ;;  %4515 = vmatpush.msrb.mxu2 %v3613_v18 }
0x2256   : > { %v4440_v63 = vsel %vm1322_vm6, %v4427_v14, %v4416_v13  ;;  %v4445_v26 = vrot.slane %v4428_v57, 4  ;;  %v8966_v57 = vld [vmem:[%s11158_s8 + $0x60] sm:$0xff] }
0x2257   : > { %v4421_v27 = vrot.slane %v4404_v20, 4  ;;  %v4424_v28 = vsel %vm1322_vm6, 0.0, %v4423_v21  ;;  %v4426_v30 = vsel %vm1322_vm6, 0.0, %v4425_v23  ;;  %v4444_v29 = vperm.slane %v4440_v63, %v9997_v6  ;;  %4516 = vmatpush.msrb.mxu2 %v3612_v5  ;;  %v8968_v23 = vld [vmem:[%s11158_s8 + $0x70] sm:$0xff] }
0x2258   : > { %v4434_v31 = vrot.slane %v4424_v28, 4  ;;  %v4429_v32 = vsel %vm1322_vm6, %v4423_v21, %v4404_v20  ;;  %v4446_v34 = vsel %vm1322_vm6, %v4445_v26, %v4426_v30  ;;  %v8969_v21 = vld [vmem:[%s11158_s8 + $0x78] sm:$0xff] }
0x2259   : > { %v4422_v35 = vsel %vm1322_vm6, 0.0, %v4421_v27  ;;  %v4433_v0 = vperm.slane %v4429_v32, %v9997_v6  ;;  %v4450_v38 = vperm.slane %v4446_v34, %v9997_v6  ;;  %v4465_v39 = vrot.slane %v4444_v29, 4  ;;  %4558 = vmatpush.msrb.mxu3 %v8969_v21  ;;  %v4623_v21 = vld [vmem:[#allocation2 + $0x118] sm:$0xff] }
0x225a   : > { %v4435_v40 = vsel %vm1322_vm6, %v4434_v31, %v4422_v35  ;;  %v9335_v35 = vld [vmem:[%s11155_s5 + $0x3] ss:$0 sm:$0xff] }
0x225b   : > { %v4439_v19 = vperm.slane %v4435_v40, %v9997_v6  ;;  %v4453_v43 = vrot.slane %v4433_v0, 4  ;;  %v4466_v44 = vsel %vm1322_vm6, %v4450_v38, %v4465_v39  ;;  %v4463_v45 = vrot.slane %v4450_v38, 4  ;;  %4559 = vmatpush.msrb.mxu3 %v8968_v23  ;;  %v3629_v40 = vld [vmem:[#allocation7 + $0xf8] sm:$0xff]  ;;  %v4620_v23 = vld [vmem:[#allocation2 + $0x100] sm:$0xff] }
0x225c   : > { %v4474_v47 = vperm.slane %v4466_v44, %v10003_v16  ;;  %4602 = vmatpush.msrb.mxu0 %v3629_v40 }
0x225d   : > { %v4454_v48 = vsel %vm1322_vm6, %v4439_v19, %v4453_v43  ;;  %v4451_v49 = vrot.slane %v4439_v19, 4  ;;  %v4464_v51 = vsel %vm1322_vm6, %v4463_v45, %v4444_v29  ;;  %v3628_v19 = vld [vmem:[#allocation7 + $0xf0] sm:$0xff]  ;;  %v3627_v43 = vld [vmem:[#allocation7 + $0xe8] sm:$0xff]  ;;  %v3626_v45 = vld [vmem:[#allocation7 + $0xe0] sm:$0xff] }
0x225e   : > { %v4462_v36 = vperm.slane %v4454_v48, %v10003_v16  ;;  %v4479_v53 = vrot.slane %v4474_v47, 4  ;;  %v4470_v55 = vperm.slane %v4464_v51, %v10003_v16  ;;  %4603 = vmatpush.msrb.mxu0 %v3628_v19  ;;  %v3624_v48 = vld [vmem:[#allocation7 + $0xd0] sm:$0xff] }
0x225f   : > { %v4452_v56 = vsel %vm1322_vm6, %v4451_v49, %v4433_v0  ;;  %v3623_v49 = vld [vmem:[#allocation7 + $0xc8] sm:$0xff] }
0x2260   : > { %v4480_v58 = vsel %vm1322_vm6, %v4479_v53, %v4462_v36  ;;  %v4481_v25 = vrot.slane %v4462_v36, 4  ;;  %v4458_v52 = vperm.slane %v4452_v56, %v10003_v16  ;;  %v4475_v60 = vrot.slane %v4470_v55, 4  ;;  %4604 = vmatpush.msrb.mxu0 %v3627_v43 }
0x2261   : > { %4488 = vrot.lane.b32.xlu1 %v4480_v58, %s11208_s16 }
0x2262   : > { %v4482_v61 = vsel %vm1322_vm6, %v4474_v47, %v4481_v25  ;;  %v4477_v62 = vrot.slane %v4458_v52, 4  ;;  %v4476_v1 = vsel %vm1322_vm6, %v4475_v60, %v4458_v52  ;;  %v3625_v47 = vld [vmem:[#allocation7 + $0xd8] sm:$0xff]  ;;  %4605 = vmatpush.msrb.mxu0 %v3626_v45 }
0x2263   : > { %4492 = vrot.lane.b32.xlu2 %v4482_v61, %s11209_s29 }
0x2264   : > { %v4478_v3 = vsel %vm1322_vm6, %v4470_v55, %v4477_v62  ;;  %4606 = vmatpush.msrb.mxu0 %v3625_v47  ;;  %v3622_v55 = vld [vmem:[#allocation7 + $0xc0] sm:$0xff] }
0x2265   : > { %4484 = vrot.lane.b32.xlu0 %v4478_v3, %s11210_s21  ;;  %v10525_v47 = vld [vmem:[%s9896_s15] sm:$0xff] }
0x2266   : > { %4607 = vmatpush.msrb.mxu0 %v3624_v48 }
0x2268   : > { %4608 = vmatpush.msrb.mxu0 %v3623_v49 }
0x226a   : > { %4609 = vmatpush.msrb.mxu0 %v3622_v55 }
0x22bd   : > { %v4493_v10 = vpop.permute.xlu2 %4492 }
0x22d3   : > { %v4489_v8 = vpop.permute.xlu1 %4488 }
0x22d7   : > { %v4485_v7 = vpop.permute.xlu0 %4484 }
0x22d8   : > { %v4495_v9 = vsel %vm828_vm5, %v4476_v1, %v4485_v7 }
0x22d9   : > { %v4496_v11 = vsel %vm1445_vm7, %v4495_v9, %v4489_v8 }
0x22da   : > { %v4497_v12 = vsel %vm1447_vm8, %v4496_v11, %v4493_v10  ;;  %v4626_v11 = vld [vmem:[#allocation2 + $0x130] sm:$0xff] }
0x22db   : > { %8984 = vmatmul.msk.f32.vlgmr.msrb.gmra.mxu2 %vm566_vm0, %v4497_v12  ;;  %v4627_v12 = vld [vmem:[#allocation2 + $0x138] sm:$0xff]  ;;  %4683 = vmatpush.msra.mxu1 %v4626_v11 }
0x22dc   : > { %4703 = vmatpush.msra.mxu2 %v4627_v12 }
0x235e   : > { %v4518_v13 = vpop.f32.mrf.mxu2 }
0x235f   : > { %v10473_v14 = vadd.f32 %v4518_v13, %v10360_v46  ;;  %v8967_v46 = vld [vmem:[%s11158_s8 + $0x68] sm:$0xff]  ;;  %v4624_v13 = vld [vmem:[#allocation2 + $0x120] sm:$0xff] }
0x2360   : > { %4560 = vmatpush.msrb.mxu3 %v8967_v46  ;;  %4684 = vmatpush.msra.mxu1 %v4624_v13  ;;  %v4621_v46 = vld [vmem:[#allocation2 + $0x108] sm:$0xff] }
0x2361   : > { %v4522_v15 = vmul.f32 %v10473_v14, %v10473_v14 }
0x2362   : > { %4561 = vmatpush.msrb.mxu3 %v8966_v57 }
0x2363   : > { %v4523_v20 = vsel %vm566_vm0, %v4522_v15, 0.0  ;;  %v4625_v15 = vld [vmem:[#allocation2 + $0x128] sm:$0xff] }
0x2364   : > { %4524 = vadd.xlane.f32.xlu1 %v4523_v20  ;;  %v4622_v20 = vld [vmem:[#allocation2 + $0x110] sm:$0xff]  ;;  %4704 = vmatpush.msra.mxu2 %v4625_v15 }
0x2365   : > { %4685 = vmatpush.msra.mxu1 %v4622_v20 }
0x2366   : > { %4705 = vmatpush.msra.mxu2 %v4623_v21 }
0x2367   : > { %4686 = vmatpush.msra.mxu1 %v4620_v23 }
0x2368   : > { %4706 = vmatpush.msra.mxu2 %v4621_v46 }
0x23d7   : > { %v4525_v63 = vpop.xlane.xlu1 %4524 }
0x23d8   : > { %v4526_v26 = vmul.f32 %v4525_v63, %v9903_v17 }
0x23da   : > { %v4527_v27 = vadd.f32 1e-06, %v4526_v26 }
0x23dc   : > { %9436 = vrsqrt.f32 %v4527_v27  ;;  %vm4534_vm10 = vweird.f32 %v4527_v27 }
0x23e2   : > { %v9437_v28 = vpop.eup %9436 }
0x23e3   : > { %v4529_v30 = vmul.f32 %v9437_v28, %v4527_v27  ;;  %vm4535_vm9 = vweird.f32 %v9437_v28 }
0x23e4   : > { %vm4536_vm11 = vmor %vm4534_vm10, %vm4535_vm9 }
0x23e5   : > { %v4530_v29 = vmul.f32 %v9437_v28, %v4529_v30 }
0x23e7   : > { %v4531_v31 = vmul.f32 0.5, %v4530_v29 }
0x23e9   : > { %v4532_v32 = vsub.f32 1.5, %v4531_v31 }
0x23eb   : > { %v4533_v34 = vmul.f32 %v9437_v28, %v4532_v32  ;;  %v9336_v32 = vld [vmem:[%s11154_s4 + $0x4] ss:$0 sm:$0xff] }
0x23ed   : > { %v4537_v0 = vsel %vm4536_vm11, %v9437_v28, %v4533_v34 }
0x23ee   : > { %v4538_v38 = vmul.f32 %v4537_v0, %v10473_v14 }
0x23f0   : > { %v4542_v39 = vmul.f32 %v9335_v35, %v4538_v38 }
0x23f2   : > { %8985 = vmatmul.msk.f32.vlgmr.msrb.gmra.mxu3 %vm566_vm0, %v4542_v39 }
0x2475   : > { %v4563_v44 = vpop.f32.mrf.mxu3 }
0x2476   : > { %4587 = vrot.lane.b32.xlu2 %v4563_v44, %s11211_s18  ;;  %v8986_v51 = vmul.f32 -1.442695, %v4563_v44 }
0x2478   : > { %9438 = vpow2.f32 %v8986_v51 }
0x247e   : > { %v9439_v36 = vpop.eup %9438 }
0x247f   : > { %v4569_v53 = vadd.f32 1.0, %v9439_v36 }
0x2481   : > { %9440 = vrcp.f32 %v4569_v53  ;;  %v4581_v61 = vand.u32 2147483648, %v4569_v53  ;;  %vm4575_vm13 = vweird.f32 %v4569_v53  ;;  %v4579_v62 = vand.u32 2147483647, %v4569_v53 }
0x2483   : > { %v4582_v3 = vor.u32 1.1754944e-38, %v4581_v61  ;;  %vm4580_vm15 = vcmp.eq.f32.partialorder %v4579_v62, 8.507059e+37 }
0x2487   : > { %v9441_v56 = vpop.eup %9440 }
0x2488   : > { %v4571_v58 = vmul.f32 %v9441_v56, %v4569_v53  ;;  %vm4576_vm12 = vweird.f32 %v9441_v56 }
0x2489   : > { %vm4577_vm14 = vmor %vm4575_vm13, %vm4576_vm12 }
0x248a   : > { %v4572_v25 = vsub.f32 1.0, %v4571_v58 }
0x248c   : > { %v4573_v52 = vmul.f32 %v9441_v56, %v4572_v25 }
0x248e   : > { %v4574_v60 = vadd.f32 %v9441_v56, %v4573_v52 }
0x2490   : > { %v4578_v1 = vsel %vm4577_vm14, %v9441_v56, %v4574_v60 }
0x2491   : > { %v4583_v2 = vsel %vm4580_vm15, %v4582_v3, %v4578_v1 }
0x2492   : > { %v4585_v4 = vmul.f32 %v4583_v2, %v4563_v44 }
0x24d0   : > { %v4588_v18 = vpop.permute.xlu2 %4587 }
0x24d1   : > { %v4590_v5 = vmul.f32 %v4588_v18, %v4585_v4 }
0x24d3   : > { %8987 = vmatmul.msk.f32.vlgmr.msrb.gmra.mxu0 %vm1542_vm1, %v4590_v5 }
0x2550   : > { %v4611_v7 = vpop.f32.mrf.mxu0 }
0x2551   : > { %v10499_v8 = vadd.f32 %v4611_v7, %v10473_v14  ;;  %v10541_v7 = vld [vmem:[%s9969_s23] sm:$0xff] }
0x2553   : > { %v4647_v9 = vmul.f32 %v10499_v8, %v10499_v8 }
0x2555   : > { %v4648_v10 = vsel %vm566_vm0, %v4647_v9, 0.0 }
0x2556   : > { %4649 = vadd.xlane.f32.xlu0 %v4648_v10 }
0x25c9   : > { %v4650_v14 = vpop.xlane.xlu0 %4649 }
0x25ca   : > { %v4651_v57 = vmul.f32 %v4650_v14, %v9903_v17 }
0x25cc   : > { %v4652_v63 = vadd.f32 1e-06, %v4651_v57 }
0x25ce   : > { %9442 = vrsqrt.f32 %v4652_v63  ;;  %vm4659_vm3 = vweird.f32 %v4652_v63 }
0x25d4   : > { %v9443_v26 = vpop.eup %9442 }
0x25d5   : > { %v4654_v27 = vmul.f32 %v9443_v26, %v4652_v63  ;;  %vm4660_vm2 = vweird.f32 %v9443_v26 }
0x25d6   : > { %vm4661_vm4 = vmor %vm4659_vm3, %vm4660_vm2 }
0x25d7   : > { %v4655_v28 = vmul.f32 %v9443_v26, %v4654_v27 }
0x25d9   : > { %v4656_v30 = vmul.f32 0.5, %v4655_v28 }
0x25db   : > { %v4657_v29 = vsub.f32 1.5, %v4656_v30 }
0x25dd   : > { %v4658_v31 = vmul.f32 %v9443_v26, %v4657_v29 }
0x25df   : > { %v4662_v34 = vsel %vm4661_vm4, %v9443_v26, %v4658_v31 }
0x25e0   : > { %v4663_v35 = vmul.f32 %v4662_v34, %v10499_v8 }
0x25e2   : > { %v4667_v0 = vmul.f32 %v9336_v32, %v4663_v35 }
0x25e4   : > { %8994 = vmatmul.msk.f32.vlgmr.msra.gmra.mxu1 %vm566_vm0, %v4667_v0  ;;  %8995 = vmatmul.msk.f32.vlgmr.msra.gmra.mxu2 %vm566_vm0, %v4667_v0 }
0x2661   : > { %v4688_v38 = vpop.f32.mrf.mxu1 }
0x2662   : > { %v4719_v39 = vmul.f32 %v4688_v38, %v9918_v33  ;;  %v4712_v40 = vmul.f32 %v4688_v38, %v9938_v41  ;;  %v4718_v43 = vmul.f32 %v4688_v38, %v9933_v37  ;;  %v4711_v48 = vmul.f32 %v10525_v47, %v4688_v38 }
0x2664   : > { %4721 = vrot.lane.b32.xlu2 %v4719_v39, %s11212_s6  ;;  %4714 = vrot.lane.b32.xlu1 %v4712_v40, %s11212_s6 }
0x2667   : > { %v10515_v19 = vpop.f32.mrf.mxu2 }
0x2668   : > { %4730 = vst.msk [vmem:[%s9926_s30 + $0x8] sm:$0xff] %vm566_vm0, %v10515_v19 }
0x26be   : > { %v4722_v44 = vpop.permute.xlu2 %4721 }
0x26bf   : > { %v4724_v45 = vadd.f32 %v4722_v44, %v4718_v43 }
0x26c1   : > { %4740 = vrot.lane.b32.xlu2 %v4724_v45, %s11207_s26 }
0x26c9   : > { %4742 = vrot.lane.b32.xlu2 %v4724_v45, %s11213_s7 }
0x26d1   : > { %4738 = vrot.lane.b32.xlu2 %v4724_v45, %s11214_s27 }
0x26d6   : > { %v4715_v49 = vpop.permute.xlu1 %4714 }
0x26d7   : > { %v4717_v51 = vadd.f32 %v4715_v49, %v4711_v48 }
0x26d9   : > { %4726 = vrot.lane.b32.xlu2 %v4724_v45, %s11211_s18  ;;  %4734 = vrot.lane.b32.xlu1 %v4717_v51, %s11207_s26 }
0x26e1   : > { %4736 = vrot.lane.b32.xlu2 %v4717_v51, %s11213_s7  ;;  %4732 = vrot.lane.b32.xlu1 %v4717_v51, %s11214_s27 }
0x271b   : > { %v4741_v36 = vpop.permute.xlu2 %4740 }
0x2723   : > { %v4743_v53 = vpop.permute.xlu2 %4742 }
0x2724   : > { %v9256_v55 = vpack.i.bf16 %v4743_v53, %v4741_v36 }
0x2726   : > { %9257 = vrot.lane.b32.xlu0 %v9256_v55, %s11211_s18 }
0x272b   : > { %v4739_v56 = vpop.permute.xlu2 %4738 }
0x272c   : > { %4754 = vrot.lane.b32.xlu2 %v4739_v56, %s11211_s18 }
0x2733   : > { %v4727_v58 = vpop.permute.xlu2 %4726 }
0x2734   : > { %4729 = vst.msk [vmem:[%s9948_s28 + $0x8] sm:$0xff] %vm566_vm0, %v4727_v58 }
0x273b   : > { %v4737_v25 = vpop.permute.xlu2 %4736 }
0x274b   : > { %v4735_v62 = vpop.permute.xlu1 %4734 }
0x2752   : > { %4763 = vxpose.xlu2.b32.start.end [1/1] (short) (narrow) %v4727_v58, 8 }
0x2753   : > { %v4733_v1 = vpop.permute.xlu1 %4732 }
0x2786   : > { %v4755_v52 = vpop.permute.xlu2 %4754 }
0x2787   : > { %4795 = vxpose.xlu1.b32.start.end [1/1] (short) (narrow) %v4755_v52, 8 }
0x2798   : > { %v9258_v60 = vpop.permute.xlu0 %9257 }
0x2799   : > { %9262 = vxpose.xlu0.b32.start.end [1/1] (short) (narrow) %v9258_v60, 8 }
0x27eb   : > { %v4779_v61 = vpop.trf.xlu2 }
0x27ec   : > { %4908 = vmatpush.msra.mxu3 %v4779_v61 }
0x27ed   : > { %8996 = vmatmul.msk.f32.vlgmr.msra.gmra.mxu3 %vm828_vm5, %v4717_v51 }
0x282b   : > { %v4811_v3 = vpop.trf.xlu1 }
0x282c   : > { %4930 = vmatpush.msrb.mxu1 %v4811_v3 }
0x282d   : > { %8997 = vmatmul.msk.f32.vlgmr.msrb.gmra.mxu1 %vm828_vm5, %v4733_v1 }
0x283d   : > { %v9263_v2 = vpop.trf.xlu0 }
0x283e   : > { %v9264_v4 = vunpack.i.l.bf16 %v9263_v2  ;;  %v9267_v18 = vunpack.i.h.bf16 %v9263_v2 }
0x2840   : > { %4952 = vmatpush.msrb.mxu2 %v9264_v4  ;;  %4974 = vmatpush.msrb.mxu3 %v9267_v18 }
0x2841   : > { %8998 = vmatmul.msk.f32.vlgmr.msrb.gmra.mxu2 %vm828_vm5, %v4735_v62  ;;  %8999 = vmatmul.msk.f32.vlgmr.msrb.gmra.mxu3 %vm828_vm5, %v4737_v25 }
0x2870   : > { %v4910_v5 = vpop.f32.mrf.mxu3 }
0x2871   : > { %v4911_v9 = vadd.f32 %v10541_v7, %v4910_v5 }
0x2873   : > { %v4979_v10 = vsel %vm828_vm5, %v4911_v9, -inf }
0x2874   : > { %4980 = vmax.xlane.f32.xlu1 %v4979_v10 }
0x288d   : > { %4751 = vrot.lane.b32.xlu1 %v10515_v19, %s11213_s7 }
0x28aa   : > { %v4932_v11 = vpop.f32.mrf.mxu1 }
0x28ab   : > { %v4933_v12 = vadd.f32 %v10541_v7, %v4932_v11 }
0x28ad   : > { %v4982_v13 = vsel %vm828_vm5, %v4933_v12, -inf }
0x28ae   : > { %4983 = vmax.xlane.f32.xlu0 %v4982_v13 }
0x28c4   : > { %v4954_v15 = vpop.f32.mrf.mxu2  ;;  %v4976_v20 = vpop.f32.mrf.mxu3 }
0x28c5   : > { %v4955_v21 = vadd.f32 %v10541_v7, %v4954_v15  ;;  %v4977_v23 = vadd.f32 %v10541_v7, %v4976_v20 }
0x28c7   : > { %v4988_v46 = vsel %vm828_vm5, %v4977_v23, -inf  ;;  %v4985_v14 = vsel %vm828_vm5, %v4955_v21, -inf }
0x28c8   : > { %4989 = vmax.xlane.f32.xlu2 %v4988_v46  ;;  %4986 = vmax.xlane.f32.xlu0 %v4985_v14 }
0x28dc   : > { %4745 = vrot.lane.b32.xlu0 %v10515_v19, %s11214_s27 }
0x28e0   : > { %4748 = vrot.lane.b32.xlu2 %v10515_v19, %s11207_s26 }
0x28e7   : > { %v4981_v57 = vpop.xlane.xlu1 %4980 }
0x28e8   : > { %v4991_v63 = vsub.f32 %v4911_v9, %v4981_v57 }
0x28ea   : > { %v4995_v26 = vmul.f32 1.442695, %v4991_v63 }
0x28ec   : > { %9444 = vpow2.f32 %v4995_v26 }
0x28f2   : > { %v9445_v27 = vpop.eup %9444 }
0x28f3   : > { %v5003_v28 = vsel %vm828_vm5, %v9445_v27, 0.0 }
0x28ff   : > { %v4752_v35 = vpop.permute.xlu1 %4751 }
0x2909   : > { %5004 = vadd.xlane.f32.xlu2 %v5003_v28 }
0x2921   : > { %v4984_v30 = vpop.xlane.xlu0 %4983 }
0x2922   : > { %v4992_v29 = vsub.f32 %v4933_v12, %v4984_v30 }
0x2924   : > { %v4997_v31 = vmul.f32 1.442695, %v4992_v29 }
0x2926   : > { %9446 = vpow2.f32 %v4997_v31 }
0x292c   : > { %v9447_v32 = vpop.eup %9446 }
0x292d   : > { %v5006_v34 = vsel %vm828_vm5, %v9447_v32, 0.0 }
0x292e   : > { %5007 = vadd.xlane.f32.xlu1 %v5006_v34 }
0x2932   : > { %5119 = vxpose.xlu2.b32.start.end [1/1] (short) (narrow) %v4752_v35, 8 }
0x293b   : > { %v4987_v0 = vpop.xlane.xlu0 %4986  ;;  %v4990_v38 = vpop.xlane.xlu2 %4989 }
0x293c   : > { %v4993_v39 = vsub.f32 %v4955_v21, %v4987_v0  ;;  %v4994_v43 = vsub.f32 %v4977_v23, %v4990_v38 }
0x293e   : > { %v4999_v40 = vmul.f32 1.442695, %v4993_v39  ;;  %v5001_v44 = vmul.f32 1.442695, %v4994_v43 }
0x2940   : > { %9448 = vpow2.f32 %v4999_v40 }
0x2941   : > { %9450 = vpow2.f32 %v5001_v44 }
0x2943   : > { %v4749_v36 = vpop.permute.xlu2 %4748 }
0x2946   : > { %v9449_v45 = vpop.eup %9448 }
0x2947   : > { %v5009_v48 = vsel %vm828_vm5, %v9449_v45, 0.0  ;;  %v9451_v49 = vpop.eup %9450 }
0x2948   : > { %5010 = vadd.xlane.f32.xlu0 %v5009_v48  ;;  %v5012_v51 = vsel %vm828_vm5, %v9451_v49, 0.0 }
0x294e   : > { %v4746_v55 = vpop.permute.xlu0 %4745 }
0x2950   : > { %5013 = vadd.xlane.f32.xlu0 %v5012_v51 }
0x2968   : > { %5023 = vxpose.xlu1.b32.start.end [1/1] (short) (narrow) %v10515_v19, 8 }
0x2979   : > { %5087 = vxpose.xlu0.b32.start.end [1/1] (short) (narrow) %v4749_v36, 8 }
0x297c   : > { %v5005_v53 = vpop.xlane.xlu2 %5004 }
0x297d   : > { %9452 = vrcp.f32 %v5005_v53 }
0x2981   : > { %5055 = vxpose.xlu0.b32.start.end [1/1] (short) (narrow) %v4746_v55, 8 }
0x2983   : > { %v9453_v56 = vpop.eup %9452 }
0x2984   : > { %v5019_v58 = vmul.f32 %v9453_v56, %v9445_v27 }
0x2986   : > { %9000 = vmatpush.xpose.msk.msra.mxu0 %vm828_vm5, %v5019_v58 }
0x29a1   : > { %v5008_v25 = vpop.xlane.xlu1 %5007 }
0x29a2   : > { %9454 = vrcp.f32 %v5008_v25 }
0x29a8   : > { %v9455_v52 = vpop.eup %9454 }
0x29a9   : > { %v5020_v60 = vmul.f32 %v9455_v52, %v9447_v32 }
0x29ab   : > { %9002 = vmatpush.xpose.msk.msra.mxu1 %vm828_vm5, %v5020_v60 }
0x29bb   : > { %v5011_v61 = vpop.xlane.xlu0 %5010 }
0x29bc   : > { %9456 = vrcp.f32 %v5011_v61 }
0x29c2   : > { %v9457_v62 = vpop.eup %9456 }
0x29c3   : > { %v5021_v19 = vmul.f32 %v9457_v62, %v9449_v45  ;;  %v5014_v1 = vpop.xlane.xlu0 %5013 }
0x29c4   : > { %9458 = vrcp.f32 %v5014_v1 }
0x29c5   : > { %9004 = vmatpush.xpose.msk.msra.mxu2 %vm828_vm5, %v5021_v19 }
0x29ca   : > { %v9459_v3 = vpop.eup %9458 }
0x29cb   : > { %v5022_v2 = vmul.f32 %v9459_v3, %v9451_v49  ;;  %v5135_v4 = vpop.trf.xlu2 }
0x29cd   : > { %9006 = vmatpush.xpose.msk.msra.mxu3 %vm828_vm5, %v5022_v2 }
0x29d0   : > { %9007 = vmatmul.msk.f32.vlgmr.msra.gmra.mxu3 %vm828_vm5, %v5135_v4 }
0x2a0c   : > { %v5039_v18 = vpop.trf.xlu1 }
0x2a0d   : > { %9001 = vmatmul.msk.f32.vlgmr.msra.gmra.mxu0 %vm828_vm5, %v5039_v18 }
0x2a1d   : > { %v5103_v5 = vpop.trf.xlu0 }
0x2a1e   : > { %9005 = vmatmul.msk.f32.vlgmr.msra.gmra.mxu2 %vm828_vm5, %v5103_v5 }
0x2a25   : > { %v5071_v9 = vpop.trf.xlu0 }
0x2a26   : > { %9003 = vmatmul.msk.f32.vlgmr.msra.gmra.mxu1 %vm828_vm5, %v5071_v9 }
0x2a53   : > { %v5252_v13 = vpop.f32.mrf.mxu3 }
0x2a8a   : > { %v5174_v10 = vpop.f32.mrf.mxu0 }
0x2a8b   : > { %5255 = vxpose.xlu0.b32.start.end [1/1] (short) (narrow) %v5174_v10, 8 }
0x2aa1   : > { %v5226_v11 = vpop.f32.mrf.mxu2 }
0x2aa2   : > { %5319 = vxpose.xlu0.b32.start.end [1/1] (short) (narrow) %v5226_v11, 8 }
0x2aa3   : > { %v5200_v12 = vpop.f32.mrf.mxu1 }
0x2aa4   : > { %5287 = vxpose.xlu2.b32.start.end [1/1] (short) (narrow) %v5200_v12, 8 }
0x2aaa   : > { %5351 = vxpose.xlu0.b32.start.end [1/1] (short) (narrow) %v5252_v13, 8 }
0x2b2f   : > { %v5271_v15 = vpop.trf.xlu0 }
0x2b30   : > { %v5385_v21 = vrot.slane %v5271_v15, 4 }
0x2b3d   : > { %v5303_v46 = vpop.trf.xlu2 }
0x2b3e   : > { %v5397_v63 = vrot.slane %v5303_v46, 4 }
0x2b46   : > { %v5335_v20 = vpop.trf.xlu0 }
0x2b47   : > { %v5383_v23 = vrot.slane %v5335_v20, 4  ;;  %v5386_v14 = vsel %vm1322_vm6, %v5335_v20, %v5385_v21 }
0x2b48   : > { %v5394_v26 = vperm.slane %v5386_v14, %v9997_v6 }
0x2b49   : > { %v5384_v57 = vsel %vm1322_vm6, %v5383_v23, %v5271_v15 }
0x2b4a   : > { %v5390_v27 = vperm.slane %v5384_v57, %v9997_v6  ;;  %v5421_v31 = vrot.slane %v5394_v26, 4 }
0x2b4c   : > { %v5409_v35 = vrot.slane %v5390_v27, 4 }
0x2b4e   : > { %v5367_v28 = vpop.trf.xlu0 }
0x2b4f   : > { %v5395_v30 = vrot.slane %v5367_v28, 4  ;;  %v5398_v29 = vsel %vm1322_vm6, %v5367_v28, %v5397_v63 }
0x2b50   : > { %v5406_v32 = vperm.slane %v5398_v29, %v9997_v6 }
0x2b51   : > { %v5396_v34 = vsel %vm1322_vm6, %v5395_v30, %v5303_v46 }
0x2b52   : > { %v5402_v0 = vperm.slane %v5396_v34, %v9997_v6  ;;  %v5419_v38 = vrot.slane %v5406_v32, 4  ;;  %v5422_v39 = vsel %vm1322_vm6, %v5406_v32, %v5421_v31 }
0x2b53   : > { %v5430_v40 = vperm.slane %v5422_v39, %v10003_v16  ;;  %v4630_v39 = vld [vmem:[#allocation5 + $0x88] sm:$0xff] }
0x2b54   : > { %v5407_v43 = vrot.slane %v5402_v0, 4  ;;  %v5410_v44 = vsel %vm1322_vm6, %v5402_v0, %v5409_v35  ;;  %v5420_v45 = vsel %vm1322_vm6, %v5419_v38, %v5394_v26  ;;  %v4632_v0 = vld [vmem:[#allocation5 + $0x98] sm:$0xff]  ;;  %v4631_v38 = vld [vmem:[#allocation5 + $0x90] sm:$0xff] }
0x2b55   : > { %v5418_v48 = vperm.slane %v5410_v44, %v10003_v16  ;;  %v5426_v49 = vperm.slane %v5420_v45, %v10003_v16  ;;  %v5437_v51 = vrot.slane %v5430_v40, 4  ;;  %5523 = vmatpush.msrb.mxu0 %v4632_v0  ;;  %v4629_v40 = vld [vmem:[#allocation5 + $0x80] sm:$0xff] }
0x2b56   : > { %v5408_v36 = vsel %vm1322_vm6, %v5407_v43, %v5390_v27 }
0x2b57   : > { %v5414_v53 = vperm.slane %v5408_v36, %v10003_v16  ;;  %v5433_v55 = vrot.slane %v5418_v48, 4  ;;  %v5435_v56 = vrot.slane %v5426_v49, 4  ;;  %v5438_v58 = vsel %vm1322_vm6, 0.0, %v5437_v51  ;;  %5524 = vmatpush.msrb.mxu0 %v4631_v38 }
0x2b58   : > { %v5450_v25 = vsel %vm1322_vm6, %v5437_v51, %v5426_v49  ;;  %v5455_v52 = vrot.slane %v5438_v58, 4  ;;  %v8993_v58 = vld [vmem:[%s11158_s8 + $0x98] sm:$0xff] }
0x2b59   : > { %v5431_v60 = vrot.slane %v5414_v53, 4  ;;  %v5434_v61 = vsel %vm1322_vm6, 0.0, %v5433_v55  ;;  %v5436_v62 = vsel %vm1322_vm6, 0.0, %v5435_v56  ;;  %v5454_v19 = vperm.slane %v5450_v25, %v9997_v6  ;;  %5525 = vmatpush.msrb.mxu0 %v4630_v39  ;;  %5568 = vmatpush.msrb.mxu1 %v8993_v58  ;;  %v8992_v25 = vld [vmem:[%s11158_s8 + $0x90] sm:$0xff]  ;;  %v5635_v58 = vld [vmem:[#allocation2 + $0x168] sm:$0xff] }
0x2b5a   : > { %v5444_v1 = vrot.slane %v5434_v61, 4  ;;  %v5439_v3 = vsel %vm1322_vm6, %v5433_v55, %v5414_v53  ;;  %v5456_v2 = vsel %vm1322_vm6, %v5455_v52, %v5436_v62  ;;  %v8990_v52 = vld [vmem:[%s11158_s8 + $0x80] sm:$0xff] }
0x2b5b   : > { %v5432_v4 = vsel %vm1322_vm6, 0.0, %v5431_v60  ;;  %v5443_v18 = vperm.slane %v5439_v3, %v9997_v6  ;;  %v5460_v5 = vperm.slane %v5456_v2, %v9997_v6  ;;  %v5475_v9 = vrot.slane %v5454_v19, 4  ;;  %5526 = vmatpush.msrb.mxu0 %v4629_v40  ;;  %5569 = vmatpush.msrb.mxu1 %v8992_v25  ;;  %v5632_v25 = vld [vmem:[#allocation2 + $0x150] sm:$0xff] }
0x2b5c   : > { %v5445_v10 = vsel %vm1322_vm6, %v5444_v1, %v5432_v4 }
0x2b5d   : > { %v5449_v11 = vperm.slane %v5445_v10, %v9997_v6  ;;  %v5463_v12 = vrot.slane %v5443_v18, 4  ;;  %v5476_v13 = vsel %vm1322_vm6, %v5460_v5, %v5475_v9  ;;  %v5473_v15 = vrot.slane %v5460_v5, 4  ;;  %v9337_v5 = vld [vmem:[%s11155_s5 + $0x4] ss:$0 sm:$0xff] }
0x2b5e   : > { %v5484_v20 = vperm.slane %v5476_v13, %v10003_v16  ;;  %v4645_v13 = vld [vmem:[#allocation7 + $0x130] sm:$0xff] }
0x2b5f   : > { %v5464_v21 = vsel %vm1322_vm6, %v5449_v11, %v5463_v12  ;;  %v5461_v23 = vrot.slane %v5449_v11, 4  ;;  %v5474_v46 = vsel %vm1322_vm6, %v5473_v15, %v5454_v19  ;;  %v4646_v12 = vld [vmem:[#allocation7 + $0x138] sm:$0xff]  ;;  %v4644_v15 = vld [vmem:[#allocation7 + $0x128] sm:$0xff] }
0x2b60   : > { %v5472_v14 = vperm.slane %v5464_v21, %v10003_v16  ;;  %v5489_v57 = vrot.slane %v5484_v20, 4  ;;  %v5480_v63 = vperm.slane %v5474_v46, %v10003_v16  ;;  %5612 = vmatpush.msrb.mxu2 %v4646_v12  ;;  %v4642_v21 = vld [vmem:[#allocation7 + $0x118] sm:$0xff]  ;;  %v4640_v46 = vld [vmem:[#allocation7 + $0x108] sm:$0xff] }
0x2b61   : > { %v5462_v26 = vsel %vm1322_vm6, %v5461_v23, %v5443_v18  ;;  %v4641_v23 = vld [vmem:[#allocation7 + $0x110] sm:$0xff] }
0x2b62   : > { %v5490_v27 = vsel %vm1322_vm6, %v5489_v57, %v5472_v14  ;;  %v5491_v28 = vrot.slane %v5472_v14, 4  ;;  %v5468_v30 = vperm.slane %v5462_v26, %v10003_v16  ;;  %v5485_v29 = vrot.slane %v5480_v63, 4  ;;  %5613 = vmatpush.msrb.mxu2 %v4645_v13 }
0x2b63   : > { %5498 = vrot.lane.b32.xlu2 %v5490_v27, %s11208_s16  ;;  %v4639_v27 = vld [vmem:[#allocation7 + $0x100] sm:$0xff] }
0x2b64   : > { %v5492_v31 = vsel %vm1322_vm6, %v5484_v20, %v5491_v28  ;;  %v5487_v32 = vrot.slane %v5468_v30, 4  ;;  %v5486_v34 = vsel %vm1322_vm6, %v5485_v29, %v5468_v30  ;;  %v4643_v20 = vld [vmem:[#allocation7 + $0x120] sm:$0xff]  ;;  %5614 = vmatpush.msrb.mxu2 %v4644_v15 }
0x2b65   : > { %5502 = vrot.lane.b32.xlu1 %v5492_v31, %s11209_s29 }
0x2b66   : > { %v5488_v35 = vsel %vm1322_vm6, %v5480_v63, %v5487_v32  ;;  %5615 = vmatpush.msrb.mxu2 %v4643_v20 }
0x2b67   : > { %5494 = vrot.lane.b32.xlu0 %v5488_v35, %s11210_s21 }
0x2b68   : > { %5616 = vmatpush.msrb.mxu2 %v4642_v21 }
0x2b6a   : > { %5617 = vmatpush.msrb.mxu2 %v4641_v23 }
0x2b6c   : > { %5618 = vmatpush.msrb.mxu2 %v4640_v46 }
0x2b6e   : > { %5619 = vmatpush.msrb.mxu2 %v4639_v27 }
0x2bbd   : > { %v5499_v44 = vpop.permute.xlu2 %5498 }
0x2bd7   : > { %v5503_v48 = vpop.permute.xlu1 %5502 }
0x2bd9   : > { %v5495_v43 = vpop.permute.xlu0 %5494 }
0x2bda   : > { %v5505_v45 = vsel %vm828_vm5, %v5486_v34, %v5495_v43 }
0x2bdb   : > { %v5506_v49 = vsel %vm1445_vm7, %v5505_v45, %v5499_v44 }
0x2bdc   : > { %v5507_v51 = vsel %vm1447_vm8, %v5506_v49, %v5503_v48 }
0x2bdd   : > { %9008 = vmatmul.msk.f32.vlgmr.msrb.gmra.mxu0 %vm566_vm0, %v5507_v51 }
0x2c5a   : > { %v5528_v36 = vpop.f32.mrf.mxu0 }
0x2c5b   : > { %v10618_v53 = vadd.f32 %v5528_v36, %v10499_v8  ;;  %v8991_v8 = vld [vmem:[%s11158_s8 + $0x88] sm:$0xff]  ;;  %v5636_v36 = vld [vmem:[#allocation2 + $0x170] sm:$0xff] }
0x2c5c   : > { %5570 = vmatpush.msrb.mxu1 %v8991_v8  ;;  %5693 = vmatpush.msrb.mxu3 %v5636_v36  ;;  %v5633_v8 = vld [vmem:[#allocation2 + $0x158] sm:$0xff] }
0x2c5d   : > { %v5532_v55 = vmul.f32 %v10618_v53, %v10618_v53 }
0x2c5e   : > { %5571 = vmatpush.msrb.mxu1 %v8990_v52  ;;  %v5631_v52 = vld [vmem:[#allocation2 + $0x148] sm:$0xff] }
0x2c5f   : > { %v5533_v56 = vsel %vm566_vm0, %v5532_v55, 0.0  ;;  %v5637_v55 = vld [vmem:[#allocation2 + $0x178] sm:$0xff] }
0x2c60   : > { %5534 = vadd.xlane.f32.xlu1 %v5533_v56  ;;  %5713 = vmatpush.msra.mxu0 %v5637_v55  ;;  %v5634_v56 = vld [vmem:[#allocation2 + $0x160] sm:$0xff] }
0x2c61   : > { %5694 = vmatpush.msrb.mxu3 %v5634_v56 }
0x2c62   : > { %5714 = vmatpush.msra.mxu0 %v5635_v58 }
0x2c63   : > { %5695 = vmatpush.msrb.mxu3 %v5632_v25 }
0x2c64   : > { %5715 = vmatpush.msra.mxu0 %v5633_v8 }
0x2c66   : > { %5716 = vmatpush.msra.mxu0 %v5631_v52 }
0x2cd3   : > { %v5535_v60 = vpop.xlane.xlu1 %5534 }
0x2cd4   : > { %v5536_v61 = vmul.f32 %v5535_v60, %v9903_v17 }
0x2cd6   : > { %v5537_v62 = vadd.f32 1e-06, %v5536_v61 }
0x2cd8   : > { %9460 = vrsqrt.f32 %v5537_v62  ;;  %vm5544_vm10 = vweird.f32 %v5537_v62 }
0x2cde   : > { %v9461_v19 = vpop.eup %9460 }
0x2cdf   : > { %v5539_v1 = vmul.f32 %v9461_v19, %v5537_v62  ;;  %vm5545_vm9 = vweird.f32 %v9461_v19 }
0x2ce0   : > { %vm5546_vm11 = vmor %vm5544_vm10, %vm5545_vm9 }
0x2ce1   : > { %v5540_v3 = vmul.f32 %v9461_v19, %v5539_v1 }
0x2ce3   : > { %v5541_v2 = vmul.f32 0.5, %v5540_v3 }
0x2ce5   : > { %v5542_v4 = vsub.f32 1.5, %v5541_v2 }
0x2ce7   : > { %v5543_v18 = vmul.f32 %v9461_v19, %v5542_v4 }
0x2ce9   : > { %v5547_v9 = vsel %vm5546_vm11, %v9461_v19, %v5543_v18 }
0x2cea   : > { %v5548_v10 = vmul.f32 %v5547_v9, %v10618_v53 }
0x2cec   : > { %v5552_v11 = vmul.f32 %v9337_v5, %v5548_v10  ;;  %v9338_v5 = vld [vmem:[%s11154_s4 + $0x5] ss:$0 sm:$0xff] }
0x2cee   : > { %9009 = vmatmul.msk.f32.vlgmr.msrb.gmra.mxu1 %vm566_vm0, %v5552_v11 }
0x2d6b   : > { %v5573_v14 = vpop.f32.mrf.mxu1 }
0x2d6c   : > { %5597 = vrot.lane.b32.xlu0 %v5573_v14, %s11211_s18  ;;  %v9010_v57 = vmul.f32 -1.442695, %v5573_v14 }
0x2d6e   : > { %9462 = vpow2.f32 %v9010_v57 }
0x2d74   : > { %v9463_v63 = vpop.eup %9462 }
0x2d75   : > { %v5579_v26 = vadd.f32 1.0, %v9463_v63 }
0x2d77   : > { %9464 = vrcp.f32 %v5579_v26  ;;  %v5591_v34 = vand.u32 2147483648, %v5579_v26  ;;  %vm5585_vm13 = vweird.f32 %v5579_v26  ;;  %v5589_v35 = vand.u32 2147483647, %v5579_v26 }
0x2d79   : > { %v5592_v38 = vor.u32 1.1754944e-38, %v5591_v34  ;;  %vm5590_vm15 = vcmp.eq.f32.partialorder %v5589_v35, 8.507059e+37 }
0x2d7d   : > { %v9465_v28 = vpop.eup %9464 }
0x2d7e   : > { %v5581_v30 = vmul.f32 %v9465_v28, %v5579_v26  ;;  %vm5586_vm12 = vweird.f32 %v9465_v28 }
0x2d7f   : > { %vm5587_vm14 = vmor %vm5585_vm13, %vm5586_vm12 }
0x2d80   : > { %v5582_v29 = vsub.f32 1.0, %v5581_v30 }
0x2d82   : > { %v5583_v31 = vmul.f32 %v9465_v28, %v5582_v29 }
0x2d84   : > { %v5584_v32 = vadd.f32 %v9465_v28, %v5583_v31 }
0x2d86   : > { %v5588_v0 = vsel %vm5587_vm14, %v9465_v28, %v5584_v32 }
0x2d87   : > { %v5593_v39 = vsel %vm5590_vm15, %v5592_v38, %v5588_v0 }
0x2d88   : > { %v5595_v40 = vmul.f32 %v5593_v39, %v5573_v14 }
0x2dde   : > { %v5598_v43 = vpop.permute.xlu0 %5597 }
0x2ddf   : > { %v5600_v44 = vmul.f32 %v5598_v43, %v5595_v40 }
0x2de1   : > { %9011 = vmatmul.msk.f32.vlgmr.msrb.gmra.mxu2 %vm1542_vm1, %v5600_v44 }
0x2e64   : > { %v5621_v45 = vpop.f32.mrf.mxu2 }
0x2e65   : > { %v10644_v48 = vadd.f32 %v5621_v45, %v10618_v53  ;;  %v5630_v53 = vld [vmem:[#allocation2 + $0x140] sm:$0xff] }
0x2e66   : > { %5696 = vmatpush.msrb.mxu3 %v5630_v53 }
0x2e67   : > { %v5657_v49 = vmul.f32 %v10644_v48, %v10644_v48 }
0x2e69   : > { %v5658_v51 = vsel %vm566_vm0, %v5657_v49, 0.0 }
0x2e6a   : > { %5659 = vadd.xlane.f32.xlu2 %v5658_v51 }
0x2edd   : > { %v5660_v60 = vpop.xlane.xlu2 %5659 }
0x2ede   : > { %v5661_v61 = vmul.f32 %v5660_v60, %v9903_v17 }
0x2ee0   : > { %v5662_v62 = vadd.f32 1e-06, %v5661_v61 }
0x2ee2   : > { %9466 = vrsqrt.f32 %v5662_v62  ;;  %vm5669_vm3 = vweird.f32 %v5662_v62 }
0x2ee8   : > { %v9467_v19 = vpop.eup %9466 }
0x2ee9   : > { %v5664_v1 = vmul.f32 %v9467_v19, %v5662_v62  ;;  %vm5670_vm2 = vweird.f32 %v9467_v19 }
0x2eea   : > { %vm5671_vm4 = vmor %vm5669_vm3, %vm5670_vm2 }
0x2eeb   : > { %v5665_v3 = vmul.f32 %v9467_v19, %v5664_v1 }
0x2eed   : > { %v5666_v2 = vmul.f32 0.5, %v5665_v3 }
0x2eef   : > { %v5667_v4 = vsub.f32 1.5, %v5666_v2 }
0x2ef1   : > { %v5668_v18 = vmul.f32 %v9467_v19, %v5667_v4 }
0x2ef3   : > { %v5672_v9 = vsel %vm5671_vm4, %v9467_v19, %v5668_v18 }
0x2ef4   : > { %v5673_v10 = vmul.f32 %v5672_v9, %v10644_v48 }
0x2ef6   : > { %v5677_v11 = vmul.f32 %v9338_v5, %v5673_v10 }
0x2ef8   : > { %9018 = vmatmul.msk.f32.vlgmr.msrb.gmra.mxu3 %vm566_vm0, %v5677_v11  ;;  %9019 = vmatmul.msk.f32.vlgmr.msra.gmra.mxu0 %vm566_vm0, %v5677_v11 }
0x2f75   : > { %v10676_v29 = vpop.f32.mrf.mxu0 }
0x2f7b   : > { %v5698_v12 = vpop.f32.mrf.mxu3 }
0x2f7c   : > { %v5729_v13 = vmul.f32 %v5698_v12, %v9918_v33  ;;  %v5728_v15 = vmul.f32 %v5698_v12, %v9933_v37  ;;  %v5722_v23 = vmul.f32 %v5698_v12, %v9938_v41  ;;  %v5721_v27 = vmul.f32 %v10525_v47, %v5698_v12 }
0x2f7e   : > { %5731 = vrot.lane.b32.xlu0 %v5729_v13, %s11212_s6 }
0x2ff0   : > { %v5732_v20 = vpop.permute.xlu0 %5731 }
0x2ff1   : > { %v10659_v21 = vadd.f32 %v5732_v20, %v5728_v15 }
0x2ff3   : > { %5752 = vrot.lane.b32.xlu0 %v10659_v21, %s11214_s27 }
0x2ffb   : > { %5754 = vrot.lane.b32.xlu0 %v10659_v21, %s11207_s26 }
0x3003   : > { %5756 = vrot.lane.b32.xlu0 %v10659_v21, %s11213_s7 }
0x300b   : > { %5724 = vrot.lane.b32.xlu0 %v5722_v23, %s11212_s6 }
0x3065   : > { %v5753_v46 = vpop.permute.xlu0 %5752 }
0x3066   : > { %v9268_v14 = vpack.i.bf16 %v10659_v21, %v5753_v46 }
0x3068   : > { %9269 = vrot.lane.b32.xlu1 %v9268_v14, %s11211_s18 }
0x306d   : > { %v5755_v57 = vpop.permute.xlu0 %5754 }
0x3075   : > { %v5757_v63 = vpop.permute.xlu0 %5756 }
0x3076   : > { %v9273_v26 = vpack.i.bf16 %v5757_v63, %v5755_v57 }
0x3078   : > { %9274 = vrot.lane.b32.xlu2 %v9273_v26, %s11211_s18 }
0x307d   : > { %v5725_v28 = vpop.permute.xlu0 %5724 }
0x307e   : > { %v5727_v30 = vadd.f32 %v5725_v28, %v5721_v27 }
0x3080   : > { %5746 = vrot.lane.b32.xlu0 %v5727_v30, %s11214_s27 }
0x3088   : > { %5748 = vrot.lane.b32.xlu0 %v5727_v30, %s11207_s26 }
0x3090   : > { %5750 = vrot.lane.b32.xlu0 %v5727_v30, %s11213_s7 }
0x3098   : > { %5758 = vrot.lane.b32.xlu0 %v10676_v29, %s11214_s27 }
0x30d2   : > { %v9275_v31 = vpop.permute.xlu2 %9274 }
0x30d3   : > { %9286 = vxpose.xlu2.b32.start.end [1/1] (short) (narrow) %v9275_v31, 8 }
0x30da   : > { %v9270_v32 = vpop.permute.xlu1 %9269 }
0x30db   : > { %9279 = vxpose.xlu1.b32.start.end [1/1] (short) (narrow) %v9270_v32, 8 }
0x30f2   : > { %v5747_v34 = vpop.permute.xlu0 %5746 }
0x30fa   : > { %v5749_v0 = vpop.permute.xlu0 %5748 }
0x3102   : > { %v5751_v44 = vpop.permute.xlu0 %5750 }
0x310a   : > { %v5759_v61 = vpop.permute.xlu0 %5758 }
0x316c   : > { %v9287_v35 = vpop.trf.xlu2 }
0x316d   : > { %v9288_v47 = vunpack.i.l.bf16 %v9287_v35  ;;  %v9291_v38 = vunpack.i.h.bf16 %v9287_v35 }
0x316f   : > { %5968 = vmatpush.msrb.mxu0 %v9288_v47 }
0x3170   : > { %9022 = vmatmul.msk.f32.vlgmr.msrb.gmra.mxu0 %vm828_vm5, %v5749_v0 }
0x317f   : > { %v9280_v39 = vpop.trf.xlu1 }
0x3180   : > { %v9284_v40 = vunpack.i.h.bf16 %v9280_v39  ;;  %v9281_v43 = vunpack.i.l.bf16 %v9280_v39 }
0x3182   : > { %5924 = vmatpush.msra.mxu1 %v9284_v40  ;;  %5946 = vmatpush.msra.mxu3 %v9281_v43 }
0x3183   : > { %9020 = vmatmul.msk.f32.vlgmr.msra.gmra.mxu1 %vm828_vm5, %v5727_v30  ;;  %9021 = vmatmul.msk.f32.vlgmr.msra.gmra.mxu3 %vm828_vm5, %v5747_v34 }
0x3184   : > { %5990 = vmatpush.msrb.mxu1 %v9291_v38 }
0x318b   : > { %9023 = vmatmul.msk.f32.vlgmr.msrb.gmra.mxu1 %vm828_vm5, %v5751_v44 }
0x31ed   : > { %v5970_v36 = vpop.f32.mrf.mxu0 }
0x31ee   : > { %v5971_v56 = vadd.f32 %v10541_v7, %v5970_v36 }
0x31f0   : > { %v6001_v60 = vsel %vm828_vm5, %v5971_v56, -inf }
0x3200   : > { %v5926_v45 = vpop.f32.mrf.mxu1 }
0x3201   : > { %v5927_v49 = vadd.f32 %v10541_v7, %v5926_v45 }
0x3203   : > { %v5995_v51 = vsel %vm828_vm5, %v5927_v49, -inf }
0x3204   : > { %5996 = vmax.xlane.f32.xlu0 %v5995_v51 }
0x3206   : > { %v5948_v55 = vpop.f32.mrf.mxu3 }
0x3207   : > { %v5949_v58 = vadd.f32 %v10541_v7, %v5948_v55 }
0x3208   : > { %v5992_v25 = vpop.f32.mrf.mxu1 }
0x3209   : > { %v5993_v8 = vadd.f32 %v10541_v7, %v5992_v25  ;;  %v5998_v53 = vsel %vm828_vm5, %v5949_v58, -inf }
0x320a   : > { %5999 = vmax.xlane.f32.xlu2 %v5998_v53 }
0x320b   : > { %v6004_v52 = vsel %vm828_vm5, %v5993_v8, -inf }
0x320c   : > { %6005 = vmax.xlane.f32.xlu1 %v6004_v52  ;;  %6002 = vmax.xlane.f32.xlu0 %v6001_v60 }
0x3220   : > { %5761 = vrot.lane.b32.xlu0 %v10676_v29, %s11207_s26 }
0x3225   : > { %5764 = vrot.lane.b32.xlu1 %v10676_v29, %s11213_s7 }
0x3233   : > { %6039 = vxpose.xlu2.b32.start.end [1/1] (short) (narrow) %v10676_v29, 8 }
0x325a   : > { %6071 = vxpose.xlu1.b32.start.end [1/1] (short) (narrow) %v5759_v61, 8 }
0x3277   : > { %v5997_v7 = vpop.xlane.xlu0 %5996 }
0x3278   : > { %v6007_v62 = vsub.f32 %v5927_v49, %v5997_v7 }
0x327a   : > { %v6011_v19 = vmul.f32 1.442695, %v6007_v62 }
0x327c   : > { %9468 = vpow2.f32 %v6011_v19 }
0x327d   : > { %v6000_v1 = vpop.xlane.xlu2 %5999 }
0x327e   : > { %v6008_v3 = vsub.f32 %v5949_v58, %v6000_v1 }
0x327f   : > { %v6003_v10 = vpop.xlane.xlu0 %6002  ;;  %v6006_v13 = vpop.xlane.xlu1 %6005 }
0x3280   : > { %v6013_v2 = vmul.f32 1.442695, %v6008_v3  ;;  %v6009_v11 = vsub.f32 %v5971_v56, %v6003_v10  ;;  %v6010_v15 = vsub.f32 %v5993_v8, %v6006_v13 }
0x3282   : > { %v9469_v4 = vpop.eup %9468  ;;  %9470 = vpow2.f32 %v6013_v2  ;;  %v6015_v12 = vmul.f32 1.442695, %v6009_v11  ;;  %v6017_v20 = vmul.f32 1.442695, %v6010_v15 }
0x3283   : > { %v6019_v18 = vsel %vm828_vm5, %v9469_v4, 0.0 }
0x3284   : > { %6020 = vadd.xlane.f32.xlu0 %v6019_v18  ;;  %9472 = vpow2.f32 %v6015_v12 }
0x3285   : > { %9474 = vpow2.f32 %v6017_v20 }
0x3288   : > { %v9471_v5 = vpop.eup %9470 }
0x3289   : > { %v6022_v9 = vsel %vm828_vm5, %v9471_v5, 0.0 }
0x328a   : > { %v9473_v23 = vpop.eup %9472 }
0x328b   : > { %v6025_v46 = vsel %vm828_vm5, %v9473_v23, 0.0  ;;  %v9475_v14 = vpop.eup %9474 }
0x328c   : > { %6023 = vadd.xlane.f32.xlu0 %v6022_v9  ;;  %v6028_v57 = vsel %vm828_vm5, %v9475_v14, 0.0 }
0x3292   : > { %v5762_v63 = vpop.permute.xlu0 %5761 }
0x3297   : > { %v5765_v26 = vpop.permute.xlu1 %5764 }
0x32a4   : > { %6026 = vadd.xlane.f32.xlu2 %v6025_v46 }
0x32ac   : > { %6029 = vadd.xlane.f32.xlu2 %v6028_v57 }
0x32b5   : > { %6103 = vxpose.xlu0.b32.start.end [1/1] (short) (narrow) %v5762_v63, 8 }
0x32cc   : > { %v6055_v32 = vpop.trf.xlu2 }
0x32d5   : > { %6135 = vxpose.xlu2.b32.start.end [1/1] (short) (narrow) %v5765_v26, 8 }
0x32f7   : > { %v6021_v27 = vpop.xlane.xlu0 %6020 }
0x32f8   : > { %9476 = vrcp.f32 %v6021_v27 }
0x32fe   : > { %v9477_v28 = vpop.eup %9476  ;;  %v6087_v47 = vpop.trf.xlu1 }
0x32ff   : > { %v6035_v30 = vmul.f32 %v9477_v28, %v9469_v4  ;;  %v6024_v31 = vpop.xlane.xlu0 %6023 }
0x3300   : > { %9478 = vrcp.f32 %v6024_v31 }
0x3301   : > { %9024 = vmatpush.xpose.msk.msra.mxu2 %vm828_vm5, %v6035_v30 }
0x3304   : > { %9025 = vmatmul.msk.f32.vlgmr.msra.gmra.mxu2 %vm828_vm5, %v6055_v32 }
0x3306   : > { %v9479_v34 = vpop.eup %9478 }
0x3307   : > { %v6036_v35 = vmul.f32 %v9479_v34, %v9471_v5 }
0x3309   : > { %9026 = vmatpush.xpose.msk.msrb.mxu3 %vm828_vm5, %v6036_v35 }
0x330c   : > { %9027 = vmatmul.msk.f32.vlgmr.msrb.gmra.mxu3 %vm828_vm5, %v6087_v47 }
0x3317   : > { %v6027_v0 = vpop.xlane.xlu2 %6026 }
0x3318   : > { %9480 = vrcp.f32 %v6027_v0 }
0x331e   : > { %v9481_v38 = vpop.eup %9480 }
0x331f   : > { %v6037_v39 = vmul.f32 %v9481_v38, %v9473_v23  ;;  %v6030_v40 = vpop.xlane.xlu2 %6029 }
0x3320   : > { %9482 = vrcp.f32 %v6030_v40 }
0x3321   : > { %9028 = vmatpush.xpose.msk.msra.mxu0 %vm828_vm5, %v6037_v39 }
0x3326   : > { %v9483_v43 = vpop.eup %9482 }
0x3327   : > { %v6038_v44 = vmul.f32 %v9483_v43, %v9475_v14 }
0x3329   : > { %9030 = vmatpush.xpose.msk.msra.mxu1 %vm828_vm5, %v6038_v44 }
0x3359   : > { %v6119_v45 = vpop.trf.xlu0 }
0x335a   : > { %9029 = vmatmul.msk.f32.vlgmr.msra.gmra.mxu0 %vm828_vm5, %v6119_v45 }
0x336e   : > { %v6151_v49 = vpop.trf.xlu2 }
0x336f   : > { %9031 = vmatmul.msk.f32.vlgmr.msra.gmra.mxu1 %vm828_vm5, %v6151_v49 }
0x3387   : > { %v6190_v51 = vpop.f32.mrf.mxu2 }
0x3388   : > { %6271 = vxpose.xlu0.b32.start.end [1/1] (short) (narrow) %v6190_v51, 8 }
0x338f   : > { %v6216_v36 = vpop.f32.mrf.mxu3 }
0x3390   : > { %6303 = vxpose.xlu1.b32.start.end [1/1] (short) (narrow) %v6216_v36, 8 }
0x33d7   : > { %v6242_v55 = vpop.f32.mrf.mxu0 }
0x33d8   : > { %6335 = vxpose.xlu2.b32.start.end [1/1] (short) (narrow) %v6242_v55, 8 }
0x33ec   : > { %v6268_v56 = vpop.f32.mrf.mxu1 }
0x33ed   : > { %6367 = vxpose.xlu2.b32.start.end [1/1] (short) (narrow) %v6268_v56, 8 }
0x342c   : > { %v6287_v58 = vpop.trf.xlu0 }
0x342d   : > { %v6401_v8 = vrot.slane %v6287_v58, 4 }
0x3434   : > { %v6319_v52 = vpop.trf.xlu1 }
0x3435   : > { %v6413_v7 = vrot.slane %v6319_v52, 4 }
0x3471   : > { %v6351_v25 = vpop.trf.xlu2 }
0x3472   : > { %v6399_v53 = vrot.slane %v6351_v25, 4  ;;  %v6402_v60 = vsel %vm1322_vm6, %v6351_v25, %v6401_v8 }
0x3473   : > { %v6410_v62 = vperm.slane %v6402_v60, %v9997_v6 }
0x3474   : > { %v6400_v61 = vsel %vm1322_vm6, %v6399_v53, %v6287_v58 }
0x3475   : > { %v6406_v19 = vperm.slane %v6400_v61, %v9997_v6  ;;  %v6437_v4 = vrot.slane %v6410_v62, 4 }
0x3477   : > { %v6425_v9 = vrot.slane %v6406_v19, 4 }
0x3486   : > { %v6383_v1 = vpop.trf.xlu2 }
0x3487   : > { %v6411_v3 = vrot.slane %v6383_v1, 4  ;;  %v6414_v2 = vsel %vm1322_vm6, %v6383_v1, %v6413_v7 }
0x3488   : > { %v6422_v18 = vperm.slane %v6414_v2, %v9997_v6 }
0x3489   : > { %v6412_v5 = vsel %vm1322_vm6, %v6411_v3, %v6319_v52 }
0x348a   : > { %v6418_v10 = vperm.slane %v6412_v5, %v9997_v6  ;;  %v6435_v11 = vrot.slane %v6422_v18, 4  ;;  %v6438_v12 = vsel %vm1322_vm6, %v6422_v18, %v6437_v4 }
0x348b   : > { %v6446_v13 = vperm.slane %v6438_v12, %v10003_v16  ;;  %v5640_v12 = vld [vmem:[#allocation5 + $0xa8] sm:$0xff] }
0x348c   : > { %v6423_v15 = vrot.slane %v6418_v10, 4  ;;  %v6426_v20 = vsel %vm1322_vm6, %v6418_v10, %v6425_v9  ;;  %v6436_v23 = vsel %vm1322_vm6, %v6435_v11, %v6410_v62  ;;  %v5642_v10 = vld [vmem:[#allocation5 + $0xb8] sm:$0xff]  ;;  %v5641_v11 = vld [vmem:[#allocation5 + $0xb0] sm:$0xff] }
0x348d   : > { %v6434_v46 = vperm.slane %v6426_v20, %v10003_v16  ;;  %v6442_v14 = vperm.slane %v6436_v23, %v10003_v16  ;;  %v6453_v57 = vrot.slane %v6446_v13, 4  ;;  %6539 = vmatpush.msrb.mxu2 %v5642_v10  ;;  %v5639_v13 = vld [vmem:[#allocation5 + $0xa0] sm:$0xff] }
0x348e   : > { %v6424_v63 = vsel %vm1322_vm6, %v6423_v15, %v6406_v19 }
0x348f   : > { %v6430_v26 = vperm.slane %v6424_v63, %v10003_v16  ;;  %v6449_v27 = vrot.slane %v6434_v46, 4  ;;  %v6451_v28 = vrot.slane %v6442_v14, 4  ;;  %v6454_v30 = vsel %vm1322_vm6, 0.0, %v6453_v57  ;;  %6540 = vmatpush.msrb.mxu2 %v5641_v11 }
0x3490   : > { %v6466_v31 = vsel %vm1322_vm6, %v6453_v57, %v6442_v14  ;;  %v6471_v32 = vrot.slane %v6454_v30, 4  ;;  %v9017_v30 = vld [vmem:[%s11158_s8 + $0xb8] sm:$0xff] }
0x3491   : > { %v6447_v34 = vrot.slane %v6430_v26, 4  ;;  %v6450_v35 = vsel %vm1322_vm6, 0.0, %v6449_v27  ;;  %v6452_v47 = vsel %vm1322_vm6, 0.0, %v6451_v28  ;;  %v6470_v0 = vperm.slane %v6466_v31, %v9997_v6  ;;  %6541 = vmatpush.msrb.mxu2 %v5640_v12  ;;  %6584 = vmatpush.msra.mxu3 %v9017_v30  ;;  %v9016_v31 = vld [vmem:[%s11158_s8 + $0xb0] sm:$0xff]  ;;  %v6651_v30 = vld [vmem:[#allocation2 + $0x1a8] sm:$0xff] }
0x3492   : > { %v6460_v38 = vrot.slane %v6450_v35, 4  ;;  %v6472_v39 = vsel %vm1322_vm6, %v6471_v32, %v6452_v47  ;;  %v6455_v40 = vsel %vm1322_vm6, %v6449_v27, %v6430_v26  ;;  %v9014_v32 = vld [vmem:[%s11158_s8 + $0xa0] sm:$0xff] }
0x3493   : > { %v6448_v43 = vsel %vm1322_vm6, 0.0, %v6447_v34  ;;  %v6459_v44 = vperm.slane %v6455_v40, %v9997_v6  ;;  %v6476_v45 = vperm.slane %v6472_v39, %v9997_v6  ;;  %v6491_v49 = vrot.slane %v6470_v0, 4  ;;  %6542 = vmatpush.msrb.mxu2 %v5639_v13  ;;  %6585 = vmatpush.msra.mxu3 %v9016_v31  ;;  %v6648_v31 = vld [vmem:[#allocation2 + $0x190] sm:$0xff] }
0x3494   : > { %v6461_v51 = vsel %vm1322_vm6, %v6460_v38, %v6448_v43 }
0x3495   : > { %v6465_v36 = vperm.slane %v6461_v51, %v9997_v6  ;;  %v6479_v55 = vrot.slane %v6459_v44, 4  ;;  %v6492_v56 = vsel %vm1322_vm6, %v6476_v45, %v6491_v49  ;;  %v6489_v58 = vrot.slane %v6476_v45, 4  ;;  %v9339_v45 = vld [vmem:[%s11155_s5 + $0x5] ss:$0 sm:$0xff] }
0x3496   : > { %v6500_v25 = vperm.slane %v6492_v56, %v10003_v16  ;;  %v5655_v56 = vld [vmem:[#allocation7 + $0x170] sm:$0xff] }
0x3497   : > { %v6480_v8 = vsel %vm1322_vm6, %v6465_v36, %v6479_v55  ;;  %v6477_v53 = vrot.slane %v6465_v36, 4  ;;  %v6490_v52 = vsel %vm1322_vm6, %v6489_v58, %v6470_v0  ;;  %v5656_v55 = vld [vmem:[#allocation7 + $0x178] sm:$0xff]  ;;  %v5654_v58 = vld [vmem:[#allocation7 + $0x168] sm:$0xff] }
0x3498   : > { %v6488_v60 = vperm.slane %v6480_v8, %v10003_v16  ;;  %v6505_v61 = vrot.slane %v6500_v25, 4  ;;  %v6496_v7 = vperm.slane %v6490_v52, %v10003_v16  ;;  %6628 = vmatpush.msrb.mxu0 %v5656_v55  ;;  %v5652_v8 = vld [vmem:[#allocation7 + $0x158] sm:$0xff]  ;;  %v5650_v52 = vld [vmem:[#allocation7 + $0x148] sm:$0xff] }
0x3499   : > { %v6478_v62 = vsel %vm1322_vm6, %v6477_v53, %v6459_v44  ;;  %v5651_v53 = vld [vmem:[#allocation7 + $0x150] sm:$0xff] }
0x349a   : > { %v6506_v19 = vsel %vm1322_vm6, %v6505_v61, %v6488_v60  ;;  %v6507_v1 = vrot.slane %v6488_v60, 4  ;;  %v6484_v3 = vperm.slane %v6478_v62, %v10003_v16  ;;  %v6501_v2 = vrot.slane %v6496_v7, 4  ;;  %6629 = vmatpush.msrb.mxu0 %v5655_v56 }
0x349b   : > { %6514 = vrot.lane.b32.xlu2 %v6506_v19, %s11208_s16  ;;  %v5649_v19 = vld [vmem:[#allocation7 + $0x140] sm:$0xff] }
0x349c   : > { %v6508_v4 = vsel %vm1322_vm6, %v6500_v25, %v6507_v1  ;;  %v6503_v18 = vrot.slane %v6484_v3, 4  ;;  %v6502_v5 = vsel %vm1322_vm6, %v6501_v2, %v6484_v3  ;;  %v5653_v25 = vld [vmem:[#allocation7 + $0x160] sm:$0xff]  ;;  %6630 = vmatpush.msrb.mxu0 %v5654_v58 }
0x349d   : > { %6518 = vrot.lane.b32.xlu1 %v6508_v4, %s11209_s29 }
0x349e   : > { %v6504_v9 = vsel %vm1322_vm6, %v6496_v7, %v6503_v18  ;;  %6631 = vmatpush.msrb.mxu0 %v5653_v25 }
0x349f   : > { %6510 = vrot.lane.b32.xlu0 %v6504_v9, %s11210_s21 }
0x34a0   : > { %6632 = vmatpush.msrb.mxu0 %v5652_v8 }
0x34a2   : > { %6633 = vmatpush.msrb.mxu0 %v5651_v53 }
0x34a4   : > { %6634 = vmatpush.msrb.mxu0 %v5650_v52  ;;  %v10809_v52 = vld [vmem:[%s9896_s15] sm:$0xff]  ;;  %s8692_s15 = scalar_lea.hbm %s11160_s10, %s9085_s20 }
0x34a6   : > { %6635 = vmatpush.msrb.mxu0 %v5649_v19 }
0x34f5   : > { %v6515_v20 = vpop.permute.xlu2 %6514 }
0x350f   : > { %v6519_v46 = vpop.permute.xlu1 %6518 }
0x3511   : > { %v6511_v15 = vpop.permute.xlu0 %6510 }
0x3512   : > { %v6521_v23 = vsel %vm828_vm5, %v6502_v5, %v6511_v15 }
0x3513   : > { %v6522_v14 = vsel %vm1445_vm7, %v6521_v23, %v6515_v20 }
0x3514   : > { %v6523_v57 = vsel %vm1447_vm8, %v6522_v14, %v6519_v46 }
0x3515   : > { %9032 = vmatmul.msk.f32.vlgmr.msrb.gmra.mxu2 %vm566_vm0, %v6523_v57 }
0x3598   : > { %v6544_v63 = vpop.f32.mrf.mxu2 }
0x3599   : > { %v10757_v26 = vadd.f32 %v6544_v63, %v10644_v48  ;;  %v9015_v48 = vld [vmem:[%s11158_s8 + $0xa8] sm:$0xff]  ;;  %v6652_v63 = vld [vmem:[#allocation2 + $0x1b0] sm:$0xff] }
0x359a   : > { %6586 = vmatpush.msra.mxu3 %v9015_v48  ;;  %6709 = vmatpush.msrb.mxu1 %v6652_v63  ;;  %v6649_v48 = vld [vmem:[#allocation2 + $0x198] sm:$0xff] }
0x359b   : > { %v6548_v27 = vmul.f32 %v10757_v26, %v10757_v26 }
0x359c   : > { %6587 = vmatpush.msra.mxu3 %v9014_v32  ;;  %v6647_v32 = vld [vmem:[#allocation2 + $0x188] sm:$0xff] }
0x359d   : > { %v6549_v28 = vsel %vm566_vm0, %v6548_v27, 0.0  ;;  %v6653_v27 = vld [vmem:[#allocation2 + $0x1b8] sm:$0xff] }
0x359e   : > { %6550 = vadd.xlane.f32.xlu1 %v6549_v28  ;;  %6729 = vmatpush.msra.mxu2 %v6653_v27  ;;  %v6650_v28 = vld [vmem:[#allocation2 + $0x1a0] sm:$0xff] }
0x359f   : > { %6710 = vmatpush.msrb.mxu1 %v6650_v28 }
0x35a0   : > { %6730 = vmatpush.msra.mxu2 %v6651_v30 }
0x35a1   : > { %6711 = vmatpush.msrb.mxu1 %v6648_v31 }
0x35a2   : > { %6731 = vmatpush.msra.mxu2 %v6649_v48 }
0x35a4   : > { %6732 = vmatpush.msra.mxu2 %v6647_v32 }
0x3611   : > { %v6551_v34 = vpop.xlane.xlu1 %6550 }
0x3612   : > { %v6552_v35 = vmul.f32 %v6551_v34, %v9903_v17 }
0x3614   : > { %v6553_v47 = vadd.f32 1e-06, %v6552_v35 }
0x3616   : > { %9484 = vrsqrt.f32 %v6553_v47  ;;  %vm6560_vm10 = vweird.f32 %v6553_v47 }
0x361c   : > { %v9485_v0 = vpop.eup %9484 }
0x361d   : > { %v6555_v38 = vmul.f32 %v9485_v0, %v6553_v47  ;;  %vm6561_vm9 = vweird.f32 %v9485_v0 }
0x361e   : > { %vm6562_vm11 = vmor %vm6560_vm10, %vm6561_vm9 }
0x361f   : > { %v6556_v39 = vmul.f32 %v9485_v0, %v6555_v38 }
0x3621   : > { %v6557_v40 = vmul.f32 0.5, %v6556_v39 }
0x3623   : > { %v6558_v43 = vsub.f32 1.5, %v6557_v40 }
0x3625   : > { %v6559_v44 = vmul.f32 %v9485_v0, %v6558_v43 }
0x3627   : > { %v6563_v49 = vsel %vm6562_vm11, %v9485_v0, %v6559_v44 }
0x3628   : > { %v6564_v51 = vmul.f32 %v6563_v49, %v10757_v26 }
0x362a   : > { %v6568_v36 = vmul.f32 %v9339_v45, %v6564_v51  ;;  %v9340_v45 = vld [vmem:[%s11154_s4 + $0x6] ss:$0 sm:$0xff] }
0x362c   : > { %9033 = vmatmul.msk.f32.vlgmr.msra.gmra.mxu3 %vm566_vm0, %v6568_v36 }
0x36af   : > { %v6589_v60 = vpop.f32.mrf.mxu3 }
0x36b0   : > { %6613 = vrot.lane.b32.xlu2 %v6589_v60, %s11211_s18  ;;  %v9034_v61 = vmul.f32 -1.442695, %v6589_v60 }
0x36b2   : > { %9486 = vpow2.f32 %v9034_v61 }
0x36b8   : > { %v9487_v7 = vpop.eup %9486 }
0x36b9   : > { %v6595_v62 = vadd.f32 1.0, %v9487_v7 }
0x36bb   : > { %9488 = vrcp.f32 %v6595_v62  ;;  %v6607_v5 = vand.u32 2147483648, %v6595_v62  ;;  %vm6601_vm13 = vweird.f32 %v6595_v62  ;;  %v6605_v9 = vand.u32 2147483647, %v6595_v62 }
0x36bd   : > { %v6608_v11 = vor.u32 1.1754944e-38, %v6607_v5  ;;  %vm6606_vm15 = vcmp.eq.f32.partialorder %v6605_v9, 8.507059e+37 }
0x36c1   : > { %v9489_v1 = vpop.eup %9488 }
0x36c2   : > { %v6597_v3 = vmul.f32 %v9489_v1, %v6595_v62  ;;  %vm6602_vm12 = vweird.f32 %v9489_v1 }
0x36c3   : > { %vm6603_vm14 = vmor %vm6601_vm13, %vm6602_vm12 }
0x36c4   : > { %v6598_v2 = vsub.f32 1.0, %v6597_v3 }
0x36c6   : > { %v6599_v4 = vmul.f32 %v9489_v1, %v6598_v2 }
0x36c8   : > { %v6600_v18 = vadd.f32 %v9489_v1, %v6599_v4 }
0x36ca   : > { %v6604_v10 = vsel %vm6603_vm14, %v9489_v1, %v6600_v18 }
0x36cb   : > { %v6609_v12 = vsel %vm6606_vm15, %v6608_v11, %v6604_v10 }
0x36cc   : > { %v6611_v13 = vmul.f32 %v6609_v12, %v6589_v60 }
0x370a   : > { %v6614_v15 = vpop.permute.xlu2 %6613 }
0x370b   : > { %v6616_v20 = vmul.f32 %v6614_v15, %v6611_v13 }
0x370d   : > { %9035 = vmatmul.msk.f32.vlgmr.msrb.gmra.mxu0 %vm1542_vm1, %v6616_v20 }
0x378a   : > { %v6637_v23 = vpop.f32.mrf.mxu0 }
0x378b   : > { %v10783_v46 = vadd.f32 %v6637_v23, %v10757_v26  ;;  %v6646_v26 = vld [vmem:[#allocation2 + $0x180] sm:$0xff] }
0x378c   : > { %6712 = vmatpush.msrb.mxu1 %v6646_v26 }
0x378d   : > { %v6673_v14 = vmul.f32 %v10783_v46, %v10783_v46 }
0x378f   : > { %v6674_v57 = vsel %vm566_vm0, %v6673_v14, 0.0  ;;  %v10824_v14 = vld [vmem:[%s9969_s23] sm:$0xff] }
0x3790   : > { %6675 = vadd.xlane.f32.xlu0 %v6674_v57 }
0x3803   : > { %v6676_v34 = vpop.xlane.xlu0 %6675 }
0x3804   : > { %v6677_v35 = vmul.f32 %v6676_v34, %v9903_v17 }
0x3806   : > { %v6678_v47 = vadd.f32 1e-06, %v6677_v35 }
0x3808   : > { %9490 = vrsqrt.f32 %v6678_v47  ;;  %vm6685_vm3 = vweird.f32 %v6678_v47 }
0x380e   : > { %v9491_v0 = vpop.eup %9490 }
0x380f   : > { %v6680_v38 = vmul.f32 %v9491_v0, %v6678_v47  ;;  %vm6686_vm2 = vweird.f32 %v9491_v0 }
0x3810   : > { %vm6687_vm4 = vmor %vm6685_vm3, %vm6686_vm2 }
0x3811   : > { %v6681_v39 = vmul.f32 %v9491_v0, %v6680_v38 }
0x3813   : > { %v6682_v40 = vmul.f32 0.5, %v6681_v39 }
0x3815   : > { %v6683_v43 = vsub.f32 1.5, %v6682_v40 }
0x3817   : > { %v6684_v44 = vmul.f32 %v9491_v0, %v6683_v43 }
0x3819   : > { %v6688_v49 = vsel %vm6687_vm4, %v9491_v0, %v6684_v44 }
0x381a   : > { %v6689_v51 = vmul.f32 %v6688_v49, %v10783_v46 }
0x381c   : > { %v6693_v36 = vmul.f32 %v9340_v45, %v6689_v51 }
0x381e   : > { %9042 = vmatmul.msk.f32.vlgmr.msrb.gmra.mxu1 %vm566_vm0, %v6693_v36  ;;  %9043 = vmatmul.msk.f32.vlgmr.msra.gmra.mxu2 %vm566_vm0, %v6693_v36 }
0x389b   : > { %v6714_v55 = vpop.f32.mrf.mxu1 }
0x389c   : > { %v6738_v56 = vmul.f32 %v6714_v55, %v9938_v41  ;;  %v6745_v58 = vmul.f32 %v6714_v55, %v9918_v33  ;;  %v6744_v25 = vmul.f32 %v6714_v55, %v9933_v37  ;;  %v6737_v60 = vmul.f32 %v10809_v52, %v6714_v55 }
0x389e   : > { %6747 = vrot.lane.b32.xlu2 %v6745_v58, %s11212_s6  ;;  %6740 = vrot.lane.b32.xlu1 %v6738_v56, %s11212_s6 }
0x38a1   : > { %v10828_v27 = vpop.f32.mrf.mxu2 }
0x38f8   : > { %v6748_v8 = vpop.permute.xlu2 %6747 }
0x38f9   : > { %v10800_v53 = vadd.f32 %v6748_v8, %v6744_v25 }
0x38fb   : > { %6767 = vrot.lane.b32.xlu2 %v10800_v53, %s11207_s26 }
0x3903   : > { %6769 = vrot.lane.b32.xlu2 %v10800_v53, %s11213_s7 }
0x390b   : > { %6765 = vrot.lane.b32.xlu2 %v10800_v53, %s11214_s27 }
0x3910   : > { %v6741_v61 = vpop.permute.xlu1 %6740 }
0x3911   : > { %v6743_v7 = vadd.f32 %v6741_v61, %v6737_v60 }
0x3913   : > { %6780 = vrot.lane.b32.xlu2 %v10800_v53, %s11211_s18  ;;  %6760 = vrot.lane.b32.xlu1 %v6743_v7, %s11207_s26 }
0x391b   : > { %6762 = vrot.lane.b32.xlu2 %v6743_v7, %s11213_s7  ;;  %6758 = vrot.lane.b32.xlu1 %v6743_v7, %s11214_s27 }
0x3955   : > { %v6768_v62 = vpop.permute.xlu2 %6767 }
0x395d   : > { %v6770_v19 = vpop.permute.xlu2 %6769 }
0x395e   : > { %v9292_v1 = vpack.i.bf16 %v6770_v19, %v6768_v62 }
0x3960   : > { %9293 = vrot.lane.b32.xlu0 %v9292_v1, %s11211_s18 }
0x3965   : > { %v6766_v3 = vpop.permute.xlu2 %6765 }
0x3966   : > { %6782 = vrot.lane.b32.xlu2 %v6766_v3, %s11211_s18 }
0x396d   : > { %v6781_v2 = vpop.permute.xlu2 %6780 }
0x3975   : > { %v6763_v4 = vpop.permute.xlu2 %6762 }
0x3982   : > { %6792 = vxpose.xlu0.b32.start.end [1/1] (short) (narrow) %v6781_v2, 8 }
0x3985   : > { %v6761_v10 = vpop.permute.xlu1 %6760 }
0x398d   : > { %v6759_v11 = vpop.permute.xlu1 %6758 }
0x39c0   : > { %v6783_v18 = vpop.permute.xlu2 %6782 }
0x39c1   : > { %6824 = vxpose.xlu1.b32.start.end [1/1] (short) (narrow) %v6783_v18, 8 }
0x39d2   : > { %v9294_v5 = vpop.permute.xlu0 %9293 }
0x39d3   : > { %9298 = vxpose.xlu2.b32.start.end [1/1] (short) (narrow) %v9294_v5, 8 }
0x3a26   : > { %v6808_v9 = vpop.trf.xlu0 }
0x3a27   : > { %6937 = vmatpush.msrb.mxu3 %v6808_v9 }
0x3a28   : > { %9044 = vmatmul.msk.f32.vlgmr.msrb.gmra.mxu3 %vm828_vm5, %v6743_v7 }
0x3a65   : > { %v6840_v12 = vpop.trf.xlu1 }
0x3a66   : > { %6959 = vmatpush.msra.mxu1 %v6840_v12 }
0x3a67   : > { %9045 = vmatmul.msk.f32.vlgmr.msra.gmra.mxu1 %vm828_vm5, %v6759_v11 }
0x3a6c   : > { %v9299_v13 = vpop.trf.xlu2 }
0x3a6d   : > { %v9303_v15 = vunpack.i.h.bf16 %v9299_v13  ;;  %v9300_v20 = vunpack.i.l.bf16 %v9299_v13 }
0x3a6f   : > { %6981 = vmatpush.msrb.mxu2 %v9300_v20  ;;  %7003 = vmatpush.msra.mxu3 %v9303_v15 }
0x3a70   : > { %9046 = vmatmul.msk.f32.vlgmr.msrb.gmra.mxu2 %vm828_vm5, %v6761_v10  ;;  %9047 = vmatmul.msk.f32.vlgmr.msra.gmra.mxu3 %vm828_vm5, %v6763_v4 }
0x3aab   : > { %v6939_v28 = vpop.f32.mrf.mxu3 }
0x3aac   : > { %v6940_v49 = vadd.f32 %v10824_v14, %v6939_v28 }
0x3aae   : > { %v7008_v51 = vsel %vm828_vm5, %v6940_v49, -inf }
0x3ae4   : > { %v6961_v23 = vpop.f32.mrf.mxu1 }
0x3ae5   : > { %v6962_v57 = vadd.f32 %v10824_v14, %v6961_v23 }
0x3ae7   : > { %v7011_v63 = vsel %vm828_vm5, %v6962_v57, -inf }
0x3ae8   : > { %7012 = vmax.xlane.f32.xlu0 %v7011_v63 }
0x3af3   : > { %v6983_v30 = vpop.f32.mrf.mxu2  ;;  %v7005_v31 = vpop.f32.mrf.mxu3 }
0x3af4   : > { %v6984_v48 = vadd.f32 %v10824_v14, %v6983_v30  ;;  %v7006_v26 = vadd.f32 %v10824_v14, %v7005_v31 }
0x3af6   : > { %v7014_v32 = vsel %vm828_vm5, %v6984_v48, -inf  ;;  %v7017_v34 = vsel %vm828_vm5, %v7006_v26, -inf }
0x3af7   : > { %7015 = vmax.xlane.f32.xlu0 %v7014_v32  ;;  %7018 = vmax.xlane.f32.xlu2 %v7017_v34 }
0x3b0b   : > { %6777 = vrot.lane.b32.xlu0 %v10828_v27, %s11213_s7 }
0x3b0f   : > { %6774 = vrot.lane.b32.xlu2 %v10828_v27, %s11207_s26 }
0x3b5b   : > { %v7013_v35 = vpop.xlane.xlu0 %7012 }
0x3b5c   : > { %v7021_v47 = vsub.f32 %v6962_v57, %v7013_v35 }
0x3b5e   : > { %v7026_v0 = vmul.f32 1.442695, %v7021_v47 }
0x3b60   : > { %9492 = vpow2.f32 %v7026_v0 }
0x3b66   : > { %v9493_v38 = vpop.eup %9492 }
0x3b67   : > { %v7035_v39 = vsel %vm828_vm5, %v9493_v38, 0.0 }
0x3b68   : > { %7036 = vadd.xlane.f32.xlu2 %v7035_v39 }
0x3b6a   : > { %v7019_v40 = vpop.xlane.xlu2 %7018  ;;  %v7016_v44 = vpop.xlane.xlu0 %7015 }
0x3b6b   : > { %v7022_v58 = vsub.f32 %v6984_v48, %v7016_v44  ;;  %v7023_v8 = vsub.f32 %v7006_v26, %v7019_v40 }
0x3b6d   : > { %v7028_v25 = vmul.f32 1.442695, %v7022_v58  ;;  %v7030_v60 = vmul.f32 1.442695, %v7023_v8 }
0x3b72   : > { %v6775_v43 = vpop.permute.xlu2 %6774 }
0x3b73   : > { %7116 = vxpose.xlu1.b32.start.end [1/1] (short) (narrow) %v6775_v43, 8 }
0x3b7d   : > { %v6778_v45 = vpop.permute.xlu0 %6777 }
0x3b91   : > { %7148 = vxpose.xlu2.b32.start.end [1/1] (short) (narrow) %v6778_v45, 8 }
0x3bd3   : > { %7009 = vmax.xlane.f32.xlu1 %v7008_v51 }
0x3bdb   : > { %v7037_v36 = vpop.xlane.xlu2 %7036 }
0x3bdc   : > { %9494 = vrcp.f32 %v7037_v36 }
0x3bdd   : > { %9496 = vpow2.f32 %v7028_v25 }
0x3bde   : > { %9498 = vpow2.f32 %v7030_v60 }
0x3be2   : > { %v9495_v55 = vpop.eup %9494 }
0x3be3   : > { %v7049_v56 = vmul.f32 %v9495_v55, %v9493_v38  ;;  %v9497_v61 = vpop.eup %9496 }
0x3be4   : > { %v7038_v7 = vsel %vm828_vm5, %v9497_v61, 0.0  ;;  %v9499_v62 = vpop.eup %9498 }
0x3be5   : > { %9050 = vmatpush.xpose.msk.msrb.mxu1 %vm828_vm5, %v7049_v56  ;;  %v7041_v19 = vsel %vm828_vm5, %v9499_v62, 0.0 }
0x3bec   : > { %6771 = vrot.lane.b32.xlu1 %v10828_v27, %s11214_s27 }
0x3c16   : > { %7039 = vadd.xlane.f32.xlu1 %v7038_v7 }
0x3c17   : > { %v7132_v1 = vpop.trf.xlu1 }
0x3c1e   : > { %7042 = vadd.xlane.f32.xlu1 %v7041_v19 }
0x3c2a   : > { %v7164_v28 = vpop.trf.xlu2 }
0x3c46   : > { %v7010_v3 = vpop.xlane.xlu1 %7009 }
0x3c47   : > { %v7020_v2 = vsub.f32 %v6940_v49, %v7010_v3 }
0x3c49   : > { %v7024_v4 = vmul.f32 1.442695, %v7020_v2 }
0x3c4b   : > { %9500 = vpow2.f32 %v7024_v4 }
0x3c51   : > { %v9501_v18 = vpop.eup %9500 }
0x3c52   : > { %v7032_v5 = vsel %vm828_vm5, %v9501_v18, 0.0 }
0x3c53   : > { %7033 = vadd.xlane.f32.xlu0 %v7032_v5 }
0x3c5e   : > { %v6772_v9 = vpop.permute.xlu1 %6771 }
0x3c5f   : > { %7084 = vxpose.xlu1.b32.start.end [1/1] (short) (narrow) %v6772_v9, 8 }
0x3c7c   : > { %7052 = vxpose.xlu0.b32.start.end [1/1] (short) (narrow) %v10828_v27, 8 }
0x3c89   : > { %v7040_v10 = vpop.xlane.xlu1 %7039 }
0x3c8a   : > { %9502 = vrcp.f32 %v7040_v10 }
0x3c90   : > { %v9503_v11 = vpop.eup %9502 }
0x3c91   : > { %v7050_v12 = vmul.f32 %v9503_v11, %v9497_v61  ;;  %v7043_v13 = vpop.xlane.xlu1 %7042 }
0x3c92   : > { %9504 = vrcp.f32 %v7043_v13 }
0x3c93   : > { %9052 = vmatpush.xpose.msk.msra.mxu2 %vm828_vm5, %v7050_v12 }
0x3c96   : > { %9053 = vmatmul.msk.f32.vlgmr.msra.gmra.mxu2 %vm828_vm5, %v7132_v1 }
0x3c98   : > { %v9505_v15 = vpop.eup %9504 }
0x3c99   : > { %v7051_v20 = vmul.f32 %v9505_v15, %v9499_v62 }
0x3c9b   : > { %9054 = vmatpush.xpose.msk.msrb.mxu3 %vm828_vm5, %v7051_v20 }
0x3c9e   : > { %9055 = vmatmul.msk.f32.vlgmr.msrb.gmra.mxu3 %vm828_vm5, %v7164_v28 }
0x3cc6   : > { %v7034_v23 = vpop.xlane.xlu0 %7033 }
0x3cc7   : > { %9506 = vrcp.f32 %v7034_v23 }
0x3ccd   : > { %v9507_v57 = vpop.eup %9506 }
0x3cce   : > { %v7048_v63 = vmul.f32 %v9507_v57, %v9501_v18 }
0x3cd0   : > { %9048 = vmatpush.xpose.msk.msra.mxu0 %vm828_vm5, %v7048_v63 }
0x3d03   : > { %v7100_v30 = vpop.trf.xlu1 }
0x3d04   : > { %9051 = vmatmul.msk.f32.vlgmr.msrb.gmra.mxu1 %vm828_vm5, %v7100_v30 }
0x3d19   : > { %v7255_v32 = vpop.f32.mrf.mxu2 }
0x3d20   : > { %v7068_v31 = vpop.trf.xlu0 }
0x3d21   : > { %9049 = vmatmul.msk.f32.vlgmr.msra.gmra.mxu0 %vm828_vm5, %v7068_v31  ;;  %v7281_v48 = vpop.f32.mrf.mxu3 }
0x3d22   : > { %7380 = vxpose.xlu1.b32.start.end [1/1] (short) (narrow) %v7281_v48, 8 }
0x3d81   : > { %v7229_v26 = vpop.f32.mrf.mxu1 }
0x3d82   : > { %7316 = vxpose.xlu2.b32.start.end [1/1] (short) (narrow) %v7229_v26, 8 }
0x3d8a   : > { %7348 = vxpose.xlu2.b32.start.end [1/1] (short) (narrow) %v7255_v32, 8 }
0x3d9e   : > { %v7203_v34 = vpop.f32.mrf.mxu0 }
0x3d9f   : > { %7284 = vxpose.xlu0.b32.start.end [1/1] (short) (narrow) %v7203_v34, 8 }
0x3dc6   : > { %v7396_v47 = vpop.trf.xlu1 }
0x3dc7   : > { %v7424_v0 = vrot.slane %v7396_v47, 4 }
0x3e1b   : > { %v7332_v35 = vpop.trf.xlu2 }
0x3e1c   : > { %v7426_v38 = vrot.slane %v7332_v35, 4  ;;  %v7425_v40 = vsel %vm1322_vm6, %v7424_v0, %v7332_v35 }
0x3e1d   : > { %v7431_v45 = vperm.slane %v7425_v40, %v9997_v6 }
0x3e1e   : > { %v7427_v43 = vsel %vm1322_vm6, %v7396_v47, %v7426_v38 }
0x3e1f   : > { %v7435_v49 = vperm.slane %v7427_v43, %v9997_v6  ;;  %v7436_v56 = vrot.slane %v7431_v45, 4 }
0x3e21   : > { %v7448_v8 = vrot.slane %v7435_v49, 4 }
0x3e23   : > { %v7364_v39 = vpop.trf.xlu2 }
0x3e24   : > { %v7412_v44 = vrot.slane %v7364_v39, 4 }
0x3e43   : > { %v7300_v51 = vpop.trf.xlu0 }
0x3e44   : > { %v7413_v36 = vsel %vm1322_vm6, %v7412_v44, %v7300_v51  ;;  %v7414_v55 = vrot.slane %v7300_v51, 4 }
0x3e45   : > { %v7419_v58 = vperm.slane %v7413_v36, %v9997_v6 }
0x3e46   : > { %v7415_v25 = vsel %vm1322_vm6, %v7364_v39, %v7414_v55 }
0x3e47   : > { %v7423_v60 = vperm.slane %v7415_v25, %v9997_v6  ;;  %v7437_v61 = vsel %vm1322_vm6, %v7436_v56, %v7419_v58  ;;  %v7438_v7 = vrot.slane %v7419_v58, 4 }
0x3e48   : > { %v7443_v62 = vperm.slane %v7437_v61, %v10003_v16 }
0x3e49   : > { %v7439_v19 = vsel %vm1322_vm6, %v7431_v45, %v7438_v7  ;;  %v7449_v1 = vsel %vm1322_vm6, %v7448_v8, %v7423_v60  ;;  %v7450_v3 = vrot.slane %v7423_v60, 4 }
0x3e4a   : > { %v7447_v2 = vperm.slane %v7439_v19, %v10003_v16  ;;  %v7455_v4 = vperm.slane %v7449_v1, %v10003_v16  ;;  %v7460_v9 = vrot.slane %v7443_v62, 4  ;;  %v6658_v19 = vld [vmem:[#allocation5 + $0xd8] sm:$0xff]  ;;  %v6657_v1 = vld [vmem:[#allocation5 + $0xd0] sm:$0xff] }
0x3e4b   : > { %v7451_v18 = vsel %vm1322_vm6, %v7435_v49, %v7450_v3  ;;  %7552 = vmatpush.msrb.mxu0 %v6658_v19  ;;  %v6656_v3 = vld [vmem:[#allocation5 + $0xc8] sm:$0xff] }
0x3e4c   : > { %v7459_v5 = vperm.slane %v7451_v18, %v10003_v16  ;;  %v7462_v10 = vrot.slane %v7447_v2, 4  ;;  %v7464_v12 = vrot.slane %v7455_v4, 4  ;;  %v7461_v57 = vsel %vm1322_vm6, 0.0, %v7460_v9  ;;  %v6655_v2 = vld [vmem:[#allocation5 + $0xc0] sm:$0xff] }
0x3e4d   : > { %7553 = vmatpush.msrb.mxu0 %v6657_v1 }
0x3e4e   : > { %v7463_v11 = vsel %vm1322_vm6, 0.0, %v7462_v10  ;;  %v7466_v13 = vrot.slane %v7459_v5, 4  ;;  %v7468_v15 = vsel %vm1322_vm6, %v7462_v10, %v7443_v62  ;;  %v7465_v32 = vsel %vm1322_vm6, 0.0, %v7464_v12 }
0x3e4f   : > { %v7472_v20 = vperm.slane %v7468_v15, %v9997_v6  ;;  %v7473_v23 = vrot.slane %v7463_v11, 4  ;;  %7554 = vmatpush.msrb.mxu0 %v6656_v3 }
0x3e50   : > { %v7467_v63 = vsel %vm1322_vm6, 0.0, %v7466_v13  ;;  %v7479_v28 = vsel %vm1322_vm6, %v7466_v13, %v7455_v4 }
0x3e51   : > { %v7474_v30 = vsel %vm1322_vm6, %v7473_v23, %v7461_v57  ;;  %v7484_v31 = vrot.slane %v7467_v63, 4  ;;  %v7483_v48 = vperm.slane %v7479_v28, %v9997_v6  ;;  %v7492_v26 = vrot.slane %v7472_v20, 4  ;;  %7555 = vmatpush.msrb.mxu0 %v6655_v2  ;;  %v9041_v23 = vld [vmem:[%s11158_s8 + $0xd8] sm:$0xff]  ;;  %v9040_v57 = vld [vmem:[%s11158_s8 + $0xd0] sm:$0xff]  ;;  %v9038_v63 = vld [vmem:[%s11158_s8 + $0xc0] sm:$0xff] }
0x3e52   : > { %v7478_v34 = vperm.slane %v7474_v30, %v9997_v6  ;;  %7597 = vmatpush.msra.mxu1 %v9041_v23 }
0x3e53   : > { %v7485_v35 = vsel %vm1322_vm6, %v7484_v31, %v7465_v32  ;;  %v7504_v47 = vrot.slane %v7483_v48, 4 }
0x3e54   : > { %v7489_v0 = vperm.slane %v7485_v35, %v9997_v6  ;;  %v7493_v38 = vsel %vm1322_vm6, %v7478_v34, %v7492_v26  ;;  %v7490_v39 = vrot.slane %v7478_v34, 4  ;;  %7598 = vmatpush.msra.mxu1 %v9040_v57  ;;  %v7665_v57 = vld [vmem:[#allocation2 + $0x1f0] sm:$0xff] }
0x3e55   : > { %v7501_v40 = vperm.slane %v7493_v38, %v10003_v16  ;;  %7722 = vmatpush.msra.mxu3 %v7665_v57 }
0x3e56   : > { %v7505_v43 = vsel %vm1322_vm6, %v7489_v0, %v7504_v47  ;;  %v7491_v44 = vsel %vm1322_vm6, %v7490_v39, %v7472_v20  ;;  %v7502_v45 = vrot.slane %v7489_v0, 4  ;;  %v9341_v0 = vld [vmem:[%s11155_s5 + $0x6] ss:$0 sm:$0xff] }
0x3e57   : > { %v7513_v49 = vperm.slane %v7505_v43, %v10003_v16  ;;  %v7520_v51 = vrot.slane %v7501_v40, 4  ;;  %v7497_v36 = vperm.slane %v7491_v44, %v10003_v16  ;;  %v6672_v43 = vld [vmem:[#allocation7 + $0x1b8] sm:$0xff]  ;;  %v6671_v44 = vld [vmem:[#allocation7 + $0x1b0] sm:$0xff] }
0x3e58   : > { %v7503_v55 = vsel %vm1322_vm6, %v7502_v45, %v7483_v48  ;;  %7641 = vmatpush.msrb.mxu2 %v6672_v43  ;;  %v6670_v45 = vld [vmem:[#allocation7 + $0x1a8] sm:$0xff]  ;;  %v9342_v43 = vld [vmem:[%s11154_s4 + $0x7] ss:$0 sm:$0xff] }
0x3e59   : > { %v7521_v56 = vsel %vm1322_vm6, %v7513_v49, %v7520_v51  ;;  %v7518_v58 = vrot.slane %v7513_v49, 4  ;;  %v7509_v25 = vperm.slane %v7503_v55, %v10003_v16  ;;  %v7516_v8 = vrot.slane %v7497_v36, 4  ;;  %v6669_v49 = vld [vmem:[#allocation7 + $0x1a0] sm:$0xff]  ;;  %v6668_v51 = vld [vmem:[#allocation7 + $0x198] sm:$0xff]  ;;  %v6666_v55 = vld [vmem:[#allocation7 + $0x188] sm:$0xff] }
0x3e5a   : > { %7531 = vrot.lane.b32.xlu2 %v7521_v56, %s11209_s29  ;;  %7642 = vmatpush.msrb.mxu2 %v6671_v44 }
0x3e5b   : > { %v7519_v60 = vsel %vm1322_vm6, %v7518_v58, %v7501_v40  ;;  %v7517_v61 = vsel %vm1322_vm6, %v7509_v25, %v7516_v8  ;;  %v7514_v7 = vrot.slane %v7509_v25, 4 }
0x3e5c   : > { %7527 = vrot.lane.b32.xlu1 %v7519_v60, %s11208_s16  ;;  %7523 = vrot.lane.b32.xlu0 %v7517_v61, %s11210_s21  ;;  %v6665_v60 = vld [vmem:[#allocation7 + $0x180] sm:$0xff] }
0x3e5d   : > { %v7515_v62 = vsel %vm1322_vm6, %v7514_v7, %v7497_v36  ;;  %7643 = vmatpush.msrb.mxu2 %v6670_v45  ;;  %v6667_v36 = vld [vmem:[#allocation7 + $0x190] sm:$0xff] }
0x3e5f   : > { %7644 = vmatpush.msrb.mxu2 %v6669_v49 }
0x3e61   : > { %7645 = vmatpush.msrb.mxu2 %v6668_v51 }
0x3e63   : > { %7646 = vmatpush.msrb.mxu2 %v6667_v36 }
0x3e65   : > { %7647 = vmatpush.msrb.mxu2 %v6666_v55 }
0x3e67   : > { %7648 = vmatpush.msrb.mxu2 %v6665_v60 }
0x3eb4   : > { %v7532_v9 = vpop.permute.xlu2 %7531 }
0x3ece   : > { %v7528_v4 = vpop.permute.xlu1 %7527  ;;  %v7524_v18 = vpop.permute.xlu0 %7523 }
0x3ecf   : > { %v7534_v5 = vsel %vm828_vm5, %v7515_v62, %v7524_v18 }
0x3ed0   : > { %v7535_v10 = vsel %vm1445_vm7, %v7534_v5, %v7528_v4 }
0x3ed1   : > { %v7536_v11 = vsel %vm1447_vm8, %v7535_v10, %v7532_v9 }
0x3ed2   : > { %9056 = vmatmul.msk.f32.vlgmr.msrb.gmra.mxu0 %vm566_vm0, %v7536_v11 }
0x3f4f   : > { %v7557_v12 = vpop.f32.mrf.mxu0 }
0x3f50   : > { %v10903_v13 = vadd.f32 %v7557_v12, %v10783_v46  ;;  %v9039_v46 = vld [vmem:[%s11158_s8 + $0xc8] sm:$0xff] }
0x3f51   : > { %7599 = vmatpush.msra.mxu1 %v9039_v46  ;;  %v7666_v46 = vld [vmem:[#allocation2 + $0x1f8] sm:$0xff] }
0x3f52   : > { %v7561_v15 = vmul.f32 %v10903_v13, %v10903_v13  ;;  %7742 = vmatpush.msra.mxu0 %v7666_v46 }
0x3f53   : > { %7600 = vmatpush.msra.mxu1 %v9038_v63  ;;  %v7663_v63 = vld [vmem:[#allocation2 + $0x1e0] sm:$0xff] }
0x3f54   : > { %v7562_v20 = vsel %vm566_vm0, %v7561_v15, 0.0  ;;  %7723 = vmatpush.msra.mxu3 %v7663_v63 }
0x3f55   : > { %7563 = vadd.xlane.f32.xlu1 %v7562_v20 }
0x3fc8   : > { %v7564_v28 = vpop.xlane.xlu1 %7563 }
0x3fc9   : > { %v7565_v30 = vmul.f32 %v7564_v28, %v9903_v17  ;;  %v7664_v28 = vld [vmem:[#allocation2 + $0x1e8] sm:$0xff] }
0x3fca   : > { %7743 = vmatpush.msra.mxu0 %v7664_v28 }
0x3fcb   : > { %v7566_v31 = vadd.f32 1e-06, %v7565_v30  ;;  %v7661_v30 = vld [vmem:[#allocation2 + $0x1d0] sm:$0xff] }
0x3fcc   : > { %7724 = vmatpush.msra.mxu3 %v7661_v30 }
0x3fcd   : > { %9508 = vrsqrt.f32 %v7566_v31  ;;  %vm7573_vm10 = vweird.f32 %v7566_v31 }
0x3fd3   : > { %v9509_v48 = vpop.eup %9508 }
0x3fd4   : > { %v7568_v26 = vmul.f32 %v9509_v48, %v7566_v31  ;;  %vm7574_vm9 = vweird.f32 %v9509_v48  ;;  %v7662_v31 = vld [vmem:[#allocation2 + $0x1d8] sm:$0xff] }
0x3fd5   : > { %vm7575_vm11 = vmor %vm7573_vm10, %vm7574_vm9  ;;  %7744 = vmatpush.msra.mxu0 %v7662_v31  ;;  %vm2694_vm9 = vcmask 785920  }
0x3fd6   : > { %v7569_v32 = vmul.f32 %v9509_v48, %v7568_v26 }
0x3fd8   : > { %v7570_v34 = vmul.f32 0.5, %v7569_v32 }
0x3fda   : > { %v7571_v35 = vsub.f32 1.5, %v7570_v34 }
0x3fdc   : > { %v7572_v47 = vmul.f32 %v9509_v48, %v7571_v35 }
0x3fde   : > { %v7576_v38 = vsel %vm7575_vm11, %v9509_v48, %v7572_v47  ;;  %v7660_v48 = vld [vmem:[#allocation2 + $0x1c8] sm:$0xff] }
0x3fdf   : > { %v7577_v39 = vmul.f32 %v7576_v38, %v10903_v13  ;;  %7745 = vmatpush.msra.mxu0 %v7660_v48 }
0x3fe1   : > { %v7581_v40 = vmul.f32 %v9341_v0, %v7577_v39 }
0x3fe3   : > { %9057 = vmatmul.msk.f32.vlgmr.msra.gmra.mxu1 %vm566_vm0, %v7581_v40 }
0x4060   : > { %v7602_v56 = vpop.f32.mrf.mxu1 }
0x4061   : > { %7626 = vrot.lane.b32.xlu0 %v7602_v56, %s11211_s18  ;;  %v9058_v58 = vmul.f32 -1.442695, %v7602_v56 }
0x4063   : > { %9510 = vpow2.f32 %v9058_v58 }
0x4069   : > { %v9511_v25 = vpop.eup %9510 }
0x406a   : > { %v7608_v8 = vadd.f32 1.0, %v9511_v25 }
0x406c   : > { %9512 = vrcp.f32 %v7608_v8  ;;  %v7620_v3 = vand.u32 2147483648, %v7608_v8  ;;  %vm7614_vm13 = vweird.f32 %v7608_v8  ;;  %v7618_v2 = vand.u32 2147483647, %v7608_v8 }
0x406e   : > { %v7621_v18 = vor.u32 1.1754944e-38, %v7620_v3  ;;  %vm7619_vm15 = vcmp.eq.f32.partialorder %v7618_v2, 8.507059e+37 }
0x4072   : > { %v9513_v61 = vpop.eup %9512 }
0x4073   : > { %v7610_v7 = vmul.f32 %v9513_v61, %v7608_v8  ;;  %vm7615_vm12 = vweird.f32 %v9513_v61 }
0x4074   : > { %vm7616_vm14 = vmor %vm7614_vm13, %vm7615_vm12 }
0x4075   : > { %v7611_v62 = vsub.f32 1.0, %v7610_v7 }
0x4077   : > { %v7612_v19 = vmul.f32 %v9513_v61, %v7611_v62 }
0x4079   : > { %v7613_v1 = vadd.f32 %v9513_v61, %v7612_v19 }
0x407b   : > { %v7617_v4 = vsel %vm7616_vm14, %v9513_v61, %v7613_v1 }
0x407c   : > { %v7622_v5 = vsel %vm7619_vm15, %v7621_v18, %v7617_v4 }
0x407d   : > { %v7624_v9 = vmul.f32 %v7622_v5, %v7602_v56 }
0x40d3   : > { %v7627_v10 = vpop.permute.xlu0 %7626 }
0x40d4   : > { %v7629_v11 = vmul.f32 %v7627_v10, %v7624_v9 }
0x40d6   : > { %9059 = vmatmul.msk.f32.vlgmr.msrb.gmra.mxu2 %vm1542_vm1, %v7629_v11 }
0x4159   : > { %v7650_v12 = vpop.f32.mrf.mxu2 }
0x415a   : > { %v10929_v15 = vadd.f32 %v7650_v12, %v10903_v13  ;;  %v7659_v13 = vld [vmem:[#allocation2 + $0x1c0] sm:$0xff] }
0x415b   : > { %7725 = vmatpush.msra.mxu3 %v7659_v13 }
0x415c   : > { %v7686_v20 = vmul.f32 %v10929_v15, %v10929_v15 }
0x415e   : > { %v7687_v23 = vsel %vm566_vm0, %v7686_v20, 0.0 }
0x415f   : > { %7688 = vadd.xlane.f32.xlu2 %v7687_v23 }
0x41d2   : > { %v7689_v26 = vpop.xlane.xlu2 %7688 }
0x41d3   : > { %v7690_v32 = vmul.f32 %v7689_v26, %v9903_v17 }
0x41d5   : > { %v7691_v34 = vadd.f32 1e-06, %v7690_v32 }
0x41d7   : > { %9514 = vrsqrt.f32 %v7691_v34  ;;  %vm7698_vm3 = vweird.f32 %v7691_v34 }
0x41dd   : > { %v9515_v35 = vpop.eup %9514 }
0x41de   : > { %v7693_v47 = vmul.f32 %v9515_v35, %v7691_v34  ;;  %vm7699_vm2 = vweird.f32 %v9515_v35 }
0x41df   : > { %vm7700_vm4 = vmor %vm7698_vm3, %vm7699_vm2 }
0x41e0   : > { %v7694_v0 = vmul.f32 %v9515_v35, %v7693_v47 }
0x41e2   : > { %v7695_v38 = vmul.f32 0.5, %v7694_v0 }
0x41e4   : > { %v7696_v39 = vsub.f32 1.5, %v7695_v38 }
0x41e6   : > { %v7697_v40 = vmul.f32 %v9515_v35, %v7696_v39 }
0x41e8   : > { %v7701_v44 = vsel %vm7700_vm4, %v9515_v35, %v7697_v40 }
0x41e9   : > { %v7702_v45 = vmul.f32 %v7701_v44, %v10929_v15 }
0x41eb   : > { %v7706_v49 = vmul.f32 %v9342_v43, %v7702_v45 }
0x41ed   : > { %9066 = vmatmul.msk.f32.vlgmr.msra.gmra.mxu3 %vm566_vm0, %v7706_v49  ;;  %9067 = vmatmul.msk.f32.vlgmr.msra.gmra.mxu0 %vm566_vm0, %v7706_v49 }
0x426a   : > { %v10965_v12 = vpop.f32.mrf.mxu0 }
0x4270   : > { %v7727_v51 = vpop.f32.mrf.mxu3 }
0x4271   : > { %v7758_v36 = vmul.f32 %v7727_v51, %v9918_v33  ;;  %v7757_v55 = vmul.f32 %v7727_v51, %v9933_v37  ;;  %v7751_v25 = vmul.f32 %v7727_v51, %v9938_v41  ;;  %v7750_v7 = vmul.f32 %v10809_v52, %v7727_v51 }
0x4273   : > { %7760 = vrot.lane.b32.xlu0 %v7758_v36, %s11212_s6 }
0x42e5   : > { %v7761_v56 = vpop.permute.xlu0 %7760 }
0x42e6   : > { %v10944_v58 = vadd.f32 %v7761_v56, %v7757_v55 }
0x42e8   : > { %7783 = vrot.lane.b32.xlu1 %v10944_v58, %s11207_s26  ;;  %7781 = vrot.lane.b32.xlu0 %v10944_v58, %s11214_s27 }
0x42f0   : > { %7785 = vrot.lane.b32.xlu0 %v10944_v58, %s11213_s7 }
0x42f8   : > { %7753 = vrot.lane.b32.xlu0 %v7751_v25, %s11212_s6 }
0x435a   : > { %v7782_v33 = vpop.permute.xlu0 %7781  ;;  %v7784_v37 = vpop.permute.xlu1 %7783 }
0x435b   : > { %v9304_v8 = vpack.i.bf16 %v10944_v58, %v7782_v33 }
0x435d   : > { %9305 = vrot.lane.b32.xlu0 %v9304_v8, %s11211_s18 }
0x4362   : > { %v7786_v60 = vpop.permute.xlu0 %7785 }
0x4363   : > { %v9309_v61 = vpack.i.bf16 %v7786_v60, %v7784_v37 }
0x4365   : > { %9310 = vrot.lane.b32.xlu2 %v9309_v61, %s11211_s18 }
0x436a   : > { %v7754_v62 = vpop.permute.xlu0 %7753 }
0x436b   : > { %v7756_v19 = vadd.f32 %v7754_v62, %v7750_v7 }
0x436d   : > { %7777 = vrot.lane.b32.xlu0 %v7756_v19, %s11207_s26  ;;  %7775 = vrot.lane.b32.xlu1 %v7756_v19, %s11214_s27 }
0x4375   : > { %7779 = vrot.lane.b32.xlu1 %v7756_v19, %s11213_s7 }
0x43bf   : > { %v9311_v41 = vpop.permute.xlu2 %9310 }
0x43c0   : > { %9322 = vxpose.xlu1.b32.start.end [1/1] (short) (narrow) %v9311_v41, 8 }
0x43cf   : > { %v9306_v1 = vpop.permute.xlu0 %9305 }
0x43d0   : > { %9315 = vxpose.xlu0.b32.start.end [1/1] (short) (narrow) %v9306_v1, 8 }
0x43df   : > { %v7776_v3 = vpop.permute.xlu1 %7775  ;;  %v7778_v5 = vpop.permute.xlu0 %7777 }
0x43e7   : > { %v7780_v2 = vpop.permute.xlu1 %7779 }
0x4464   : > { %v9323_v4 = vpop.trf.xlu1 }
0x4465   : > { %v9324_v18 = vunpack.i.l.bf16 %v9323_v4  ;;  %v9327_v52 = vunpack.i.h.bf16 %v9323_v4 }
0x4467   : > { %7997 = vmatpush.msrb.mxu0 %v9324_v18 }
0x4468   : > { %9070 = vmatmul.msk.f32.vlgmr.msrb.gmra.mxu0 %vm828_vm5, %v7778_v5 }
0x4474   : > { %v9316_v9 = vpop.trf.xlu0 }
0x4475   : > { %v9320_v10 = vunpack.i.h.bf16 %v9316_v9  ;;  %v9317_v11 = vunpack.i.l.bf16 %v9316_v9 }
0x4477   : > { %7953 = vmatpush.msrb.mxu1 %v9320_v10  ;;  %7975 = vmatpush.msrb.mxu3 %v9317_v11 }
0x4478   : > { %9068 = vmatmul.msk.f32.vlgmr.msrb.gmra.mxu1 %vm828_vm5, %v7756_v19  ;;  %9069 = vmatmul.msk.f32.vlgmr.msrb.gmra.mxu3 %vm828_vm5, %v7776_v3 }
0x4479   : > { %8019 = vmatpush.msra.mxu1 %v9327_v52 }
0x4480   : > { %9071 = vmatmul.msk.f32.vlgmr.msra.gmra.mxu1 %vm828_vm5, %v7780_v2 }
0x44e5   : > { %v7999_v46 = vpop.f32.mrf.mxu0 }
0x44e6   : > { %v8000_v28 = vadd.f32 %v10824_v14, %v7999_v46 }
0x44e8   : > { %v8030_v32 = vsel %vm828_vm5, %v8000_v28, -inf }
0x44f5   : > { %v7955_v20 = vpop.f32.mrf.mxu1 }
0x44f6   : > { %v7956_v23 = vadd.f32 %v10824_v14, %v7955_v20 }
0x44f8   : > { %v8024_v57 = vsel %vm828_vm5, %v7956_v23, -inf }
0x44f9   : > { %8025 = vmax.xlane.f32.xlu2 %v8024_v57 }
0x44fb   : > { %v7977_v63 = vpop.f32.mrf.mxu3 }
0x44fc   : > { %v7978_v30 = vadd.f32 %v10824_v14, %v7977_v63 }
0x44fd   : > { %v8021_v31 = vpop.f32.mrf.mxu1 }
0x44fe   : > { %v8022_v13 = vadd.f32 %v10824_v14, %v8021_v31  ;;  %v8027_v48 = vsel %vm828_vm5, %v7978_v30, -inf }
0x44ff   : > { %8028 = vmax.xlane.f32.xlu0 %v8027_v48 }
0x4500   : > { %v8033_v26 = vsel %vm828_vm5, %v8022_v13, -inf }
0x4501   : > { %8034 = vmax.xlane.f32.xlu1 %v8033_v26  ;;  %8031 = vmax.xlane.f32.xlu2 %v8030_v32 }
0x4519   : > { %7787 = vrot.lane.b32.xlu2 %v10965_v12, %s11214_s27 }
0x4521   : > { %7790 = vrot.lane.b32.xlu2 %v10965_v12, %s11207_s26  ;;  %s11215_s26 = smov 32  }
0x4529   : > { %7793 = vrot.lane.b32.xlu2 %v10965_v12, %s11213_s7  ;;  %s9654_s7 = scalar_lea.hbm %s11160_s10, 16 }
0x456c   : > { %v8026_v34 = vpop.xlane.xlu2 %8025 }
0x456d   : > { %v8036_v14 = vsub.f32 %v7956_v23, %v8026_v34 }
0x456f   : > { %v8040_v35 = vmul.f32 1.442695, %v8036_v14 }
0x4571   : > { %9516 = vpow2.f32 %v8040_v35 }
0x4572   : > { %v8029_v38 = vpop.xlane.xlu0 %8028 }
0x4573   : > { %v8037_v49 = vsub.f32 %v7978_v30, %v8029_v38 }
0x4574   : > { %v8035_v47 = vpop.xlane.xlu1 %8034  ;;  %v8032_v0 = vpop.xlane.xlu2 %8031 }
0x4575   : > { %v8039_v39 = vsub.f32 %v8022_v13, %v8035_v47  ;;  %v8038_v40 = vsub.f32 %v8000_v28, %v8032_v0  ;;  %v8042_v36 = vmul.f32 1.442695, %v8037_v49 }
0x4577   : > { %v9517_v43 = vpop.eup %9516  ;;  %v8046_v44 = vmul.f32 1.442695, %v8039_v39  ;;  %v8044_v45 = vmul.f32 1.442695, %v8038_v40 }
0x4578   : > { %v8048_v51 = vsel %vm828_vm5, %v9517_v43, 0.0 }
0x4579   : > { %9518 = vpow2.f32 %v8046_v44  ;;  %8049 = vadd.xlane.f32.xlu2 %v8048_v51 }
0x457a   : > { %9520 = vpow2.f32 %v8044_v45 }
0x457b   : > { %9522 = vpow2.f32 %v8042_v36 }
0x457c   : > { %v7788_v60 = vpop.permute.xlu2 %7787 }
0x457f   : > { %v9519_v55 = vpop.eup %9518 }
0x4580   : > { %v9521_v56 = vpop.eup %9520  ;;  %v8057_v25 = vsel %vm828_vm5, %v9519_v55, 0.0 }
0x4581   : > { %8058 = vadd.xlane.f32.xlu1 %v8057_v25  ;;  %v8054_v33 = vsel %vm828_vm5, %v9521_v56, 0.0  ;;  %v9523_v8 = vpop.eup %9522 }
0x4582   : > { %8055 = vadd.xlane.f32.xlu0 %v8054_v33  ;;  %v8051_v37 = vsel %vm828_vm5, %v9523_v8, 0.0 }
0x4584   : > { %v7791_v61 = vpop.permute.xlu2 %7790 }
0x458a   : > { %8052 = vadd.xlane.f32.xlu0 %v8051_v37 }
0x458c   : > { %v7794_v7 = vpop.permute.xlu2 %7793 }
0x45a2   : > { %8068 = vxpose.xlu2.b32.start.end [1/1] (short) (narrow) %v10965_v12, 8 }
0x45aa   : > { %8164 = vxpose.xlu2.b32.start.end [1/1] (short) (narrow) %v7794_v7, 8 }
0x45b3   : > { %8100 = vxpose.xlu0.b32.start.end [1/1] (short) (narrow) %v7788_v60, 8 }
0x45bb   : > { %8132 = vxpose.xlu1.b32.start.end [1/1] (short) (narrow) %v7791_v61, 8 }
0x45ec   : > { %v8050_v62 = vpop.xlane.xlu2 %8049 }
0x45ed   : > { %9524 = vrcp.f32 %v8050_v62 }
0x45f3   : > { %v9525_v19 = vpop.eup %9524 }
0x45f4   : > { %v8064_v41 = vmul.f32 %v9525_v19, %v9517_v43  ;;  %v8059_v1 = vpop.xlane.xlu1 %8058 }
0x45f5   : > { %9526 = vrcp.f32 %v8059_v1  ;;  %v8056_v3 = vpop.xlane.xlu0 %8055 }
0x45f6   : > { %9528 = vrcp.f32 %v8056_v3  ;;  %9072 = vmatpush.xpose.msk.msra.mxu2 %vm828_vm5, %v8064_v41 }
0x45fb   : > { %v9527_v2 = vpop.eup %9526 }
0x45fc   : > { %v9529_v4 = vpop.eup %9528  ;;  %v8067_v18 = vmul.f32 %v9527_v2, %v9519_v55 }
0x45fd   : > { %v8066_v5 = vmul.f32 %v9529_v4, %v9521_v56  ;;  %v8053_v52 = vpop.xlane.xlu0 %8052 }
0x45fe   : > { %9530 = vrcp.f32 %v8053_v52  ;;  %9078 = vmatpush.xpose.msk.msrb.mxu1 %vm828_vm5, %v8067_v18 }
0x45ff   : > { %9076 = vmatpush.xpose.msk.msra.mxu0 %vm828_vm5, %v8066_v5 }
0x4604   : > { %v9531_v9 = vpop.eup %9530 }
0x4605   : > { %v8065_v10 = vmul.f32 %v9531_v9, %v9523_v8 }
0x4607   : > { %9074 = vmatpush.xpose.msk.msra.mxu3 %vm828_vm5, %v8065_v10 }
0x463b   : > { %v8084_v11 = vpop.trf.xlu2 }
0x463c   : > { %9073 = vmatmul.msk.f32.vlgmr.msra.gmra.mxu2 %vm828_vm5, %v8084_v11 }
0x4643   : > { %v8180_v20 = vpop.trf.xlu2 }
0x4644   : > { %9079 = vmatmul.msk.f32.vlgmr.msrb.gmra.mxu1 %vm828_vm5, %v8180_v20 }
0x4657   : > { %v8116_v23 = vpop.trf.xlu0 }
0x4658   : > { %9075 = vmatmul.msk.f32.vlgmr.msra.gmra.mxu3 %vm828_vm5, %v8116_v23 }
0x465f   : > { %v8148_v57 = vpop.trf.xlu1 }
0x4660   : > { %9077 = vmatmul.msk.f32.vlgmr.msra.gmra.mxu0 %vm828_vm5, %v8148_v57 }
0x46bf   : > { %v8219_v46 = vpop.f32.mrf.mxu2 }
0x46c0   : > { %8300 = vxpose.xlu0.b32.start.end [1/1] (short) (narrow) %v8219_v46, 8 }
0x46c1   : > { %v8297_v30 = vpop.f32.mrf.mxu1 }
0x46db   : > { %v8245_v63 = vpop.f32.mrf.mxu3 }
0x46dc   : > { %8332 = vxpose.xlu0.b32.start.end [1/1] (short) (narrow) %v8245_v63, 8 }
0x46dd   : > { %v8271_v28 = vpop.f32.mrf.mxu0 }
0x46de   : > { %8364 = vxpose.xlu2.b32.start.end [1/1] (short) (narrow) %v8271_v28, 8 }
0x46e6   : > { %8396 = vxpose.xlu2.b32.start.end [1/1] (short) (narrow) %v8297_v30, 8 }
0x4764   : > { %v8316_v31 = vpop.trf.xlu0 }
0x4765   : > { %v8430_v26 = vrot.slane %v8316_v31, 4 }
0x4777   : > { %v8380_v13 = vpop.trf.xlu2 }
0x4778   : > { %v8428_v48 = vrot.slane %v8380_v13, 4  ;;  %v8431_v34 = vsel %vm1322_vm6, %v8380_v13, %v8430_v26 }
0x4779   : > { %v8439_v47 = vperm.slane %v8431_v34, %v9997_v6 }
0x477a   : > { %v8429_v32 = vsel %vm1322_vm6, %v8428_v48, %v8316_v31 }
0x477b   : > { %v8435_v14 = vperm.slane %v8429_v32, %v9997_v6  ;;  %v8466_v49 = vrot.slane %v8439_v47, 4 }
0x477d   : > { %v8454_v43 = vrot.slane %v8435_v14, 4 }
0x477f   : > { %v8412_v35 = vpop.trf.xlu2 }
0x4780   : > { %v8348_v0 = vpop.trf.xlu0  ;;  %v8440_v38 = vrot.slane %v8412_v35, 4 }
0x4781   : > { %v8442_v39 = vrot.slane %v8348_v0, 4 }
0x4782   : > { %v8441_v40 = vsel %vm1322_vm6, %v8440_v38, %v8348_v0 }
0x4783   : > { %v8443_v44 = vsel %vm1322_vm6, %v8412_v35, %v8442_v39  ;;  %v8447_v45 = vperm.slane %v8441_v40, %v9997_v6 }
0x4784   : > { %v8451_v51 = vperm.slane %v8443_v44, %v9997_v6 }
0x4785   : > { %v8452_v36 = vrot.slane %v8447_v45, 4  ;;  %v8455_v55 = vsel %vm1322_vm6, %v8447_v45, %v8454_v43 }
0x4786   : > { %v8463_v56 = vperm.slane %v8455_v55, %v10003_v16  ;;  %v8464_v25 = vrot.slane %v8451_v51, 4  ;;  %v8467_v33 = vsel %vm1322_vm6, %v8451_v51, %v8466_v49  ;;  %v7670_v51 = vld [vmem:[#allocation5 + $0xf0] sm:$0xff] }
0x4787   : > { %v8453_v8 = vsel %vm1322_vm6, %v8452_v36, %v8435_v14  ;;  %v8475_v37 = vperm.slane %v8467_v33, %v10003_v16  ;;  %v7669_v36 = vld [vmem:[#allocation5 + $0xe8] sm:$0xff] }
0x4788   : > { %v8459_v60 = vperm.slane %v8453_v8, %v10003_v16  ;;  %v8465_v61 = vsel %vm1322_vm6, %v8464_v25, %v8439_v47  ;;  %v8478_v7 = vrot.slane %v8463_v56, 4 }
0x4789   : > { %v8471_v62 = vperm.slane %v8465_v61, %v10003_v16  ;;  %v8482_v19 = vrot.slane %v8475_v37, 4 }
0x478a   : > { %v8476_v41 = vrot.slane %v8459_v60, 4  ;;  %v8479_v1 = vsel %vm1322_vm6, 0.0, %v8478_v7  ;;  %v8484_v3 = vsel %vm1322_vm6, %v8478_v7, %v8459_v60 }
0x478b   : > { %v8480_v2 = vrot.slane %v8471_v62, 4  ;;  %v8483_v4 = vsel %vm1322_vm6, 0.0, %v8482_v19  ;;  %v8489_v18 = vrot.slane %v8479_v1, 4  ;;  %v8495_v5 = vsel %vm1322_vm6, %v8482_v19, %v8471_v62  ;;  %v9064_v62 = vld [vmem:[%s11158_s8 + $0xf0] sm:$0xff]  ;;  %v9062_v19 = vld [vmem:[%s11158_s8 + $0xe0] sm:$0xff] }
0x478c   : > { %v8499_v52 = vperm.slane %v8495_v5, %v9997_v6  ;;  %v8500_v9 = vrot.slane %v8483_v4, 4  ;;  %v8477_v10 = vsel %vm1322_vm6, 0.0, %v8476_v41  ;;  %v8488_v11 = vperm.slane %v8484_v3, %v9997_v6 }
0x478d   : > { %v8481_v20 = vsel %vm1322_vm6, 0.0, %v8480_v2  ;;  %v8490_v23 = vsel %vm1322_vm6, %v8489_v18, %v8477_v10 }
0x478e   : > { %v8494_v57 = vperm.slane %v8490_v23, %v9997_v6  ;;  %v8501_v46 = vsel %vm1322_vm6, %v8500_v9, %v8481_v20  ;;  %v8508_v63 = vrot.slane %v8488_v11, 4  ;;  %v8520_v28 = vrot.slane %v8499_v52, 4  ;;  %v9343_v9 = vld [vmem:[%s11155_s5 + $0x7] ss:$0 sm:$0xff]  ;;  %v7685_v23 = vld [vmem:[#allocation7 + $0x1f8] sm:$0xff] }
0x478f   : > { %v8505_v30 = vperm.slane %v8501_v46, %v9997_v6  ;;  %8657 = vmatpush.msrb.mxu0 %v7685_v23  ;;  %v7683_v46 = vld [vmem:[#allocation7 + $0x1e8] sm:$0xff] }
0x4790   : > { %v8509_v31 = vsel %vm1322_vm6, %v8494_v57, %v8508_v63  ;;  %v8506_v13 = vrot.slane %v8494_v57, 4  ;;  %v7684_v57 = vld [vmem:[#allocation7 + $0x1f0] sm:$0xff]  ;;  %v7682_v63 = vld [vmem:[#allocation7 + $0x1e0] sm:$0xff] }
0x4791   : > { %v8517_v48 = vperm.slane %v8509_v31, %v10003_v16  ;;  %v8521_v26 = vsel %vm1322_vm6, %v8505_v30, %v8520_v28  ;;  %v8518_v32 = vrot.slane %v8505_v30, 4  ;;  %8658 = vmatpush.msrb.mxu0 %v7684_v57  ;;  %v7681_v28 = vld [vmem:[#allocation7 + $0x1d8] sm:$0xff]  ;;  %v7680_v30 = vld [vmem:[#allocation7 + $0x1d0] sm:$0xff]  ;;  %v7679_v31 = vld [vmem:[#allocation7 + $0x1c8] sm:$0xff] }
0x4792   : > { %v8529_v34 = vperm.slane %v8521_v26, %v10003_v16  ;;  %v8507_v14 = vsel %vm1322_vm6, %v8506_v13, %v8488_v11 }
0x4793   : > { %v8536_v35 = vrot.slane %v8517_v48, 4  ;;  %v8513_v47 = vperm.slane %v8507_v14, %v10003_v16  ;;  %v8519_v0 = vsel %vm1322_vm6, %v8518_v32, %v8499_v52  ;;  %8659 = vmatpush.msrb.mxu0 %v7683_v46 }
0x4794   : > { %v8534_v38 = vrot.slane %v8529_v34, 4  ;;  %v8525_v6 = vperm.slane %v8519_v0, %v10003_v16  ;;  %v7671_v16 = vld [vmem:[#allocation5 + $0xf8] sm:$0xff] }
0x4795   : > { %v8537_v39 = vsel %vm1322_vm6, %v8529_v34, %v8536_v35  ;;  %v8532_v40 = vrot.slane %v8513_v47, 4  ;;  %8568 = vmatpush.msrb.mxu2 %v7671_v16  ;;  %8660 = vmatpush.msrb.mxu0 %v7682_v63 }
0x4796   : > { %8547 = vrot.lane.b32.xlu1 %v8537_v39, %s11209_s29  ;;  %v8535_v43 = vsel %vm1322_vm6, %v8534_v38, %v8517_v48  ;;  %v8530_v44 = vrot.slane %v8525_v6, 4 }
0x4797   : > { %8543 = vrot.lane.b32.xlu0 %v8535_v43, %s11208_s16  ;;  %v8533_v45 = vsel %vm1322_vm6, %v8525_v6, %v8532_v40  ;;  %8569 = vmatpush.msrb.mxu2 %v7670_v51  ;;  %s8696_s16 = sshll.u32 %s8692_s15, 4  ;;  %s8697_s16 = int_to_ptr.hbm [resolvable:$true] %s8696_s16 }
0x4798   : > { %8539 = vrot.lane.b32.xlu2 %v8533_v45, %s11210_s21  ;;  %v8531_v49 = vsel %vm1322_vm6, %v8530_v44, %v8513_v47  ;;  %vm1681_vm6 = vcmask 523520   ;;  %8661 = vmatpush.msrb.mxu0 %v7681_v28 }
0x4799   : > { %8570 = vmatpush.msrb.mxu2 %v7669_v36 }
0x479a   : > { %8662 = vmatpush.msrb.mxu0 %v7680_v30 }
0x479c   : > { %8663 = vmatpush.msrb.mxu0 %v7679_v31 }
0x479f   : > { %1678 = vrot.lane.b32.xlu0 %v10090_v50, %s11212_s6  ;;  %v7668_v50 = vld [vmem:[#allocation5 + $0xe0] sm:$0xff] }
0x47a0   : > { %8571 = vmatpush.msrb.mxu2 %v7668_v50 }
0x47a7   : > { %5736 = vrot.lane.b32.xlu0 %v10659_v21, %s11212_s6 }
0x47af   : > { %2697 = vrot.lane.b32.xlu0 %v10259_v22, %s11211_s18 }
0x47b7   : > { %3709 = vrot.lane.b32.xlu0 %v10380_v24, %s11215_s26 }
0x47bf   : > { %7770 = vrot.lane.b32.xlu0 %v10965_v12, %s11212_s6 }
0x47f2   : > { %v8540_v21 = vpop.permute.xlu2 %8539 }
0x47f3   : > { %v8550_v55 = vsel %vm828_vm5, %v8531_v49, %v8540_v21  ;;  %vm3712_vm5 = vcmask 1048320  }
0x4808   : > { %v8548_v22 = vpop.permute.xlu1 %8547 }
0x4809   : > { %v8544_v24 = vpop.permute.xlu0 %8543 }
0x480a   : > { %v8551_v12 = vsel %vm1445_vm7, %v8550_v55, %v8544_v24 }
0x480b   : > { %v8552_v56 = vsel %vm1447_vm8, %v8551_v12, %v8548_v22 }
0x480c   : > { %9080 = vmatmul.msk.f32.vlgmr.msrb.gmra.mxu2 %vm566_vm0, %v8552_v56 }
0x4811   : > { %v1679_v25 = vpop.permute.xlu0 %1678 }
0x4812   : > { %1682 = vst.msk [vmem:[%s9948_s28] sm:$0xff] %vm1681_vm6, %v1679_v25 }
0x4813   : > { %2695 = vst.msk [vmem:[%s9948_s28] sm:$0xff] %vm2694_vm9, %v10229_v54 }
0x4819   : > { %v5737_v33 = vpop.permute.xlu0 %5736 }
0x481a   : > { %5739 = vst.msk [vmem:[%s9948_s28 + $0x8] sm:$0xff] %vm1681_vm6, %v5737_v33 }
0x481b   : > { %6751 = vst.msk [vmem:[%s9948_s28 + $0x8] sm:$0xff] %vm2694_vm9, %v10800_v53  ;;  %v9065_v53 = vld [vmem:[%s11158_s8 + $0xf8] sm:$0xff] }
0x481c   : > { %8613 = vmatpush.msrb.mxu3 %v9065_v53 }
0x481e   : > { %8614 = vmatpush.msrb.mxu3 %v9064_v62 }
0x4821   : > { %v11061_v8 = vpop.permute.xlu0 %2697 }
0x4829   : > { %v3710_v37 = vpop.permute.xlu0 %3709 }
0x482a   : > { %3713 = vst.msk [vmem:[%s9948_s28] sm:$0xff] %vm3712_vm5, %v3710_v37 }
0x4831   : > { %v7771_v16 = vpop.permute.xlu0 %7770 }
0x488f   : > { %v8573_v60 = vpop.f32.mrf.mxu2 }
0x4890   : > { %v11066_v61 = vadd.f32 %v8573_v60, %v10929_v15  ;;  %v9063_v15 = vld [vmem:[%s11158_s8 + $0xe8] sm:$0xff] }
0x4891   : > { %8615 = vmatpush.msrb.mxu3 %v9063_v15 }
0x4892   : > { %v8577_v7 = vmul.f32 %v11066_v61, %v11066_v61 }
0x4893   : > { %8616 = vmatpush.msrb.mxu3 %v9062_v19 }
0x4894   : > { %v8578_v54 = vsel %vm566_vm0, %v8577_v7, 0.0 }
0x4895   : > { %8579 = vadd.xlane.f32.xlu1 %v8578_v54 }
0x48ae   : > { %3715 = vrot.lane.b32.xlu1 %v10396_v42, %s11212_s6 }
0x4908   : > { %v8580_v42 = vpop.xlane.xlu1 %8579 }
0x4909   : > { %v8581_v41 = vmul.f32 %v8580_v42, %v9903_v17 }
0x490b   : > { %v8582_v1 = vadd.f32 1e-06, %v8581_v41 }
0x490d   : > { %9532 = vrsqrt.f32 %v8582_v1  ;;  %vm8589_vm8 = vweird.f32 %v8582_v1 }
0x4913   : > { %v9533_v3 = vpop.eup %9532 }
0x4914   : > { %v8584_v2 = vmul.f32 %v9533_v3, %v8582_v1  ;;  %vm8590_vm7 = vweird.f32 %v9533_v3 }
0x4915   : > { %vm8591_vm10 = vmor %vm8589_vm8, %vm8590_vm7 }
0x4916   : > { %v8585_v4 = vmul.f32 %v9533_v3, %v8584_v2 }
0x4918   : > { %v8586_v18 = vmul.f32 0.5, %v8585_v4 }
0x491a   : > { %v8587_v5 = vsub.f32 1.5, %v8586_v18 }
0x491c   : > { %v8588_v52 = vmul.f32 %v9533_v3, %v8587_v5 }
0x491e   : > { %v8592_v10 = vsel %vm8591_vm10, %v9533_v3, %v8588_v52 }
0x491f   : > { %v8593_v11 = vmul.f32 %v8592_v10, %v11066_v61 }
0x4920   : > { %v3716_v44 = vpop.permute.xlu1 %3715 }
0x4921   : > { %v8597_v20 = vmul.f32 %v9343_v9, %v8593_v11 }
0x4923   : > { %9081 = vmatmul.msk.f32.vlgmr.msrb.gmra.mxu3 %vm566_vm0, %v8597_v20 }
0x49a6   : > { %v8618_v17 = vpop.f32.mrf.mxu3 }
0x49a7   : > { %8642 = vrot.lane.b32.xlu2 %v8618_v17, %s11211_s18  ;;  %v9082_v13 = vmul.f32 -1.442695, %v8618_v17 }
0x49a9   : > { %9534 = vpow2.f32 %v9082_v13 }
0x49af   : > { %1684 = vrot.lane.b32.xlu2 %v10104_v59, %s11215_s26  ;;  %v9535_v48 = vpop.eup %9534  ;;  %v7678_v59 = vld [vmem:[#allocation7 + $0x1c0] sm:$0xff] }
0x49b0   : > { %v8624_v26 = vadd.f32 1.0, %v9535_v48  ;;  %8664 = vmatpush.msrb.mxu0 %v7678_v59 }
0x49b2   : > { %9536 = vrcp.f32 %v8624_v26  ;;  %vm8630_vm12 = vweird.f32 %v8624_v26 }
0x49b7   : > { %5741 = vrot.lane.b32.xlu2 %v10676_v29, %s11215_s26  ;;  %v8636_v29 = vand.u32 2147483648, %v8624_v26 }
0x49b8   : > { %v9537_v32 = vpop.eup %9536 }
0x49b9   : > { %v8626_v34 = vmul.f32 %v9537_v32, %v8624_v26  ;;  %vm8631_vm11 = vweird.f32 %v9537_v32  ;;  %v8637_v0 = vor.u32 1.1754944e-38, %v8636_v29 }
0x49ba   : > { %vm8632_vm13 = vmor %vm8630_vm12, %vm8631_vm11 }
0x49bb   : > { %v8627_v14 = vsub.f32 1.0, %v8626_v34 }
0x49bd   : > { %v8628_v35 = vmul.f32 %v9537_v32, %v8627_v14 }
0x49bf   : > { %6753 = vrot.lane.b32.xlu2 %v10828_v27, %s11211_s18  ;;  %v8629_v47 = vadd.f32 %v9537_v32, %v8628_v35  ;;  %v8634_v27 = vand.u32 2147483647, %v8624_v26  ;;  %s492_s18 = sand.u32 1, %s9696_s22  }
0x49c0   : > { %s8889_s14 = sshll.u32 %s492_s18, 3 }
0x49c1   : > { %vm8635_vm14 = vcmp.eq.f32.partialorder %v8634_v27, 8.507059e+37  ;;  %s494_s23 = scalar_lea.vmem [#allocation8], %s8889_s14 }
0x49c7   : > { %7765 = vrot.lane.b32.xlu2 %v10944_v58, %s11215_s26  ;;  %v8633_v58 = vsel %vm8632_vm13, %v9537_v32, %v8629_v47  ;;  %s8694_s26 = sshll.u32 %s494_s23, 4  ;;  %s8695_s26 = int_to_ptr.vmem [resolvable:$true] %s8694_s26 }
0x49c8   : > { %v8638_v38 = vsel %vm8635_vm14, %v8637_v0, %v8633_v58 }
0x49c9   : > { %v8640_v6 = vmul.f32 %v8638_v38, %v8618_v17 }
0x4a01   : > { %v8643_v39 = vpop.permute.xlu2 %8642 }
0x4a02   : > { %v8645_v40 = vmul.f32 %v8643_v39, %v8640_v6 }
0x4a04   : > { %9083 = vmatmul.msk.f32.vlgmr.msrb.gmra.mxu0 %vm1542_vm1, %v8645_v40 }
0x4a09   : > { %v1685_v43 = vpop.permute.xlu2 %1684 }
0x4a0a   : > { %1687 = vst.msk [vmem:[%s9926_s30] sm:$0xff] %vm1681_vm6, %v1685_v43 }
0x4a0b   : > { %2700 = vst.msk [vmem:[%s9926_s30] sm:$0xff] %vm2694_vm9, %v11061_v8 }
0x4a0c   : > { %3718 = vst.msk [vmem:[%s9926_s30] sm:$0xff] %vm3712_vm5, %v3716_v44 }
0x4a11   : > { %v5742_v45 = vpop.permute.xlu2 %5741 }
0x4a12   : > { %5744 = vst.msk [vmem:[%s9926_s30 + $0x8] sm:$0xff] %vm1681_vm6, %v5742_v45 }
0x4a19   : > { %v6754_v49 = vpop.permute.xlu2 %6753 }
0x4a1a   : > { %6756 = vst.msk [vmem:[%s9926_s30 + $0x8] sm:$0xff] %vm2694_vm9, %v6754_v49 }
0x4a1b   : > { %7773 = vst.msk [vmem:[%s9926_s30 + $0x8] sm:$0xff] %vm3712_vm5, %v7771_v16  ;;  %s8672_s30 = scalar_lea.sflag [#allocation4], %s492_s18 }
0x4a21   : > { %v7766_v51 = vpop.permute.xlu2 %7765 }
0x4a22   : > { %7768 = vst.msk [vmem:[%s9948_s28 + $0x8] sm:$0xff] %vm3712_vm5, %v7766_v51  ;;  %s9648_s28 = sshra.s32 %s8697_s16, 4  ;;  %s9649_s28 = int_to_ptr.hbm [resolvable:$true] %s9648_s28 }
0x4a23   : > { %s9650_s29 = scalar_lea.hbm %s9649_s28, 8  ;;  %p9655_p3 = scmp.lt.s32.totalorder %s9649_s28, %s11160_s10 }
0x4a24   : > { %p9651_p0 = scmp.ne.s32.totalorder %s9649_s28, %s9650_s29  ;;  %p9656_p4 = scmp.lt.s32.totalorder %s9654_s7, %s9650_s29 }
0x4a26   : > { %p9652_p1 = pnand %p9651_p0, %p9828_p5  ;;  %p9657_p7 = por %p9656_p4, %p9655_p3 }
0x4a28   : > { %p9653_p2 = pneg %p9652_p1 }
0x4a2a   : > { %p9658_p8 = pnand %p9657_p7, %p9653_p2 }
0x4a81   : > { %v8666_v36 = vpop.f32.mrf.mxu0 }
0x4a82   : > { %v8669_v50 = vadd.f32 %v8666_v36, %v11066_v61 }
0x4a84   : > { %8670 = vst.msk [vmem:[%s494_s23] sm:$0xff] %vm566_vm0, %v8669_v50 }
0x4a85   : > { %9661 = shalt.err (!%p9658_p8)
}
0x4a86   : > { %9102 = dma.vmem_to_hbm [thread:$0]  (%p9828_p5), %s8695_s26, 128, %s8697_s16, %s8672_s30  }
0x4a87 PF: > { %s11216_s1 = sld [smem:[#allocation12_spill]]  ;;  %p9124_p9 = scmp.ge.s32.totalorder %s9704_s24, 2 }
0x4a89   : > { %p9115_p10 = pnand %p9124_p9, %p9832_p6 }
0x4a8b   : > { %p9116_p11 = pneg %p9115_p10 }
0x4a8d   : > { %s8714_s6 = sand.u32 1, %s11216_s1  }
0x4a8e   : > { %s8715_s3 = scalar_lea.sflag [#allocation4], %s8714_s6 }
0x4a8f   : > { %9687 = dma.done.wait (%p9116_p11), %s8715_s3, 128  }
0x4a90   : > { %9689 = vsyncadd (%p9116_p11), %s8715_s3, 4294967168  ;;  %s11218_s24 = sld [smem:[#allocation14_spill]]  ;;  %s11221_s21 = smov %s9696_s22 }
0x4a91   : > { %s11219_s18 = sld [smem:[#allocation13_spill]] }
0x4a92   : > { %s11220_s23 = sld [smem:[#allocation15_spill]] }
0x4a96   : > { %p25_p12 = scmp.ge.s32.totalorder %s11218_s24, 4  }
0x4a97   : > { %s11222_s22 = smov %s11219_s18 }
0x4a98   :  { %27 = sbr.rel (!%p25_p12) target bundleno = 12 (0xc), region = 183 }
0x4a9d   :  { %8737 = vsyncpa [#allocation3], 1 }
0x4a9e   :  { %8739 = vsyncpa [#allocation3 + $0x1], 1 }
0x4a9f   :  { %8740 = vsyncpa [#allocation6], 1 }
0x4aa0   :  { %8741 = vsyncpa [#allocation4], 1 }
0x4aa1   :  { %8743 = vsyncpa [#allocation4 + $0x1], 1 }

</bundles_post_ra>
